<compile_context>
chip_gen: v5e
topology: v5e:2x2
jax: 0.10.0
libtpu: 0.0.40
codegen_flags: <defaults>
</compile_context>

<pallas_src>
import jax
import jax.numpy as jnp
from jax.experimental import pallas as pl
from jax.experimental.pallas import tpu as pltpu


def _round_up(x, m):
    return ((x + m - 1) // m) * m


def make_qcnn(state_size, action_size):
    C, D, H, W = state_size
    K = 5
    Co1, Co2 = 10, 32
    A = action_size

    D1, H1 = D - K + 1, H - K + 1            # conv1 output spatial (26, 26)
    assert D % 2 == 0 and D1 % 2 == 0, "even D required for the even/odd row split"
    D1p, H1p = D1 // 2, H1 // 2              # after MaxPool3d((2,2,1)) -> (13, 13)
    D2, H2 = D1p - K + 1, H1p - K + 1        # conv2 output spatial (9, 9)
    assert D2 % 3 == 0 and H2 % 3 == 0
    D2p, H2p = D2 // 3, H2 // 3              # after MaxPool3d((3,3,1)) -> (3, 3)
    assert Co2 * D2p * H2p * W == 864, "module hard-codes Linear(864, action_size)"

    HCp = _round_up(H * C, 128)              # padded input row width (H*C -> 128)
    G1 = _round_up(H1p * Co1, 128)           # conv1 output column-group width (256)
    G2 = _round_up(H2p * Co2, 128)           # conv2 output column-group width (128)
    Ap = _round_up(A, 128)                   # padded action dim (128)
    Dh = D // 2

    # ------------------------------------------------------------------ kernel ----
    def kernel(x_ref, w1_ref, w2_ref, wl_ref, b1_ref, b2_ref, bl_ref, o_ref):
        bias1 = b1_ref[...]                  # (1, 2*G1) f32
        bias2 = b2_ref[...]                  # (1, 3*G2) f32
        acc = bl_ref[...]                    # (1, Ap)   f32, linear bias pre-loaded
        for wi in range(W):
            # ---- Conv1 + ReLU: 2*K shifted matmuls (even / odd output D-rows) ----
            ye = jnp.zeros((D1p, 2 * G1), jnp.float32)
            yo = jnp.zeros((D1p, 2 * G1), jnp.float32)
            for ki in range(K):
                wk = w1_ref[ki]                                       # (HCp, 2*G1) bf16
                xe = x_ref[0, wi, ki % 2, ki // 2: ki // 2 + D1p, :]
                xo = x_ref[0, wi, (ki + 1) % 2,
                           (ki + 1) // 2: (ki + 1) // 2 + D1p, :]
                ye = ye + jnp.dot(xe.astype(jnp.bfloat16), wk,
                                  preferred_element_type=jnp.float32)
                yo = yo + jnp.dot(xo.astype(jnp.bfloat16), wk,
                                  preferred_element_type=jnp.float32)
            ye = jnp.maximum(ye + bias1, 0.0)
            yo = jnp.maximum(yo + bias1, 0.0)
            # ---- MaxPool3d((2,2,1)): rows = even/odd max, cols = 128-aligned group max
            p1r = jnp.maximum(ye, yo)                                 # (D1p, 2*G1)
            p1 = jnp.maximum(p1r[:, :G1], p1r[:, G1:])                # (D1p, G1)
            # ---- Conv2 + ReLU: K shifted matmuls --------------------------------
            y2 = jnp.zeros((D2, 3 * G2), jnp.float32)
            for ki in range(K):
                y2 = y2 + jnp.dot(p1[ki:ki + D2, :].astype(jnp.bfloat16), w2_ref[ki],
                                  preferred_element_type=jnp.float32)
            y2 = jnp.maximum(y2 + bias2, 0.0)                         # (D2, 3*G2)
            # ---- MaxPool3d((3,3,1)) + Linear accumulation -----------------------
            for d in range(D2p):
                rmax = jnp.max(y2[3 * d:3 * d + 3, :], axis=0, keepdims=True)
                cmax = jnp.maximum(jnp.maximum(rmax[:, :G2], rmax[:, G2:2 * G2]),
                                   rmax[:, 2 * G2:])                  # (1, G2)
                acc = acc + jnp.dot(cmax.astype(jnp.bfloat16), wl_ref[wi, d],
                                    preferred_element_type=jnp.float32)
        o_ref[0] = acc

    # ------------------------------------------ one-time weight preprocessing ----
    def _banded(wmat, n_pos, stride, group_w, in_stride, in_width):
        # wmat: (C_out, C_in, K, K) indexed [o, c, ki, kh].
        # Builds B[ki] with B[ki][hh*in_stride + c, g*group_w + j*C_out + o]
        #   = wmat[o, c, ki, hh - (stride*j + g)] (0 if out of the 5-wide band),
        # so  conv_out(row, H=stride*j+g, o) = sum_ki act[row+ki, :] @ B[ki].
        c_out, c_in = wmat.shape[0], wmat.shape[1]
        j = jnp.arange(n_pos)
        ci = jnp.arange(c_in)
        co = jnp.arange(c_out)
        B = jnp.zeros((K, in_width, stride * group_w), jnp.float32)
        for ki in range(K):
            for g in range(stride):
                for kh in range(K):
                    hh = stride * j + g + kh
                    rows = hh[:, None] * in_stride + ci[None, :]          # (n_pos, c_in)
                    cols = g * group_w + j[:, None] * c_out + co[None, :]  # (n_pos, c_out)
                    blk = jnp.broadcast_to(wmat[:, :, ki, kh].T[None],
                                           (n_pos, c_in, c_out))
                    B = B.at[ki, rows[:, :, None], cols[:, None, :]].set(blk)
        return B.astype(jnp.bfloat16)

    def prepare(params):
        w1 = params["w1"][..., 0].astype(jnp.float32)      # (Co1, C, 5, 5)
        w2 = params["w2"][..., 0].astype(jnp.float32)      # (Co2, Co1, 5, 5)
        lin_w = params["lin_w"].astype(jnp.float32)        # (A, 864)
        W1b = _banded(w1, H1p, 2, G1, C, HCp)              # (K, HCp, 2*G1)
        W2b = _banded(w2, H2p, 3, G2, Co1, G1)             # (K, G1, 3*G2)
        # Linear weight permuted to the kernel's (w, pooled-D, pooled-H*channel) order
        # (PyTorch flatten order is (c, d, h, w)).
        lw = lin_w.reshape(A, Co2, D2p, H2p, W)            # [a, c, d, h, w]
        WL = jnp.zeros((W, D2p, G2, Ap), jnp.float32)
        rows = jnp.arange(H2p)[:, None] * Co2 + jnp.arange(Co2)[None, :]
        a_idx = jnp.arange(A)
        for wi in range(W):
            for d in range(D2p):
                blk = jnp.transpose(lw[:, :, d, :, wi], (2, 1, 0))   # (H2p, Co2, A)
                WL = WL.at[wi, d, rows[:, :, None], a_idx[None, None, :]].set(blk)
        WL = WL.astype(jnp.bfloat16)
        # Biases tiled to the grouped column layouts (unused columns stay 0).
        g1 = jnp.pad(jnp.tile(params["b1"].astype(jnp.float32), H1p),
                     (0, G1 - H1p * Co1))
        g2 = jnp.pad(jnp.tile(params["b2"].astype(jnp.float32), H2p),
                     (0, G2 - H2p * Co2))
        bias1 = jnp.tile(g1, 2).reshape(1, 2 * G1)
        bias2 = jnp.tile(g2, 3).reshape(1, 3 * G2)
        biasl = jnp.zeros((1, Ap), jnp.float32).at[0, :A].set(
            params["lin_b"].astype(jnp.float32))
        return {"w1": W1b, "w2": W2b, "wl": WL, "b1": bias1, "b2": bias2, "bl": biasl}

    # ------------------------------------------------------------------ forward ----
    def forward(x, prep):
        n = x.shape[0]
        # NCDHW -> per (n, w): rows = D, cols = H*C (channels-last), lane-padded to 128
        # and split by D-row parity so the row pool never needs strided access.
        x2 = jnp.transpose(x, (0, 4, 2, 3, 1)).astype(jnp.float32)   # (n, W, D, H, C)
        x2 = x2.reshape(n, W, D, H * C)
        x2 = jnp.pad(x2, ((0, 0), (0, 0), (0, 0), (0, HCp - H * C)))
        x2 = x2.reshape(n, W, Dh, 2, HCp).transpose(0, 1, 3, 2, 4)   # (n, W, 2, Dh, HCp)

        out = pl.pallas_call(
            kernel,
            out_shape=jax.ShapeDtypeStruct((n, 1, Ap), jnp.float32),
            grid=(n,),
            in_specs=[
                pl.BlockSpec((1, W, 2, Dh, HCp), lambda i: (i, 0, 0, 0, 0)),
                pl.BlockSpec((K, HCp, 2 * G1), lambda i: (0, 0, 0)),
                pl.BlockSpec((K, G1, 3 * G2), lambda i: (0, 0, 0)),
                pl.BlockSpec((W, D2p, G2, Ap), lambda i: (0, 0, 0, 0)),
                pl.BlockSpec((1, 2 * G1), lambda i: (0, 0)),
                pl.BlockSpec((1, 3 * G2), lambda i: (0, 0)),
                pl.BlockSpec((1, Ap), lambda i: (0, 0)),
            ],
            out_specs=pl.BlockSpec((1, 1, Ap), lambda i: (i, 0, 0)),
            compiler_params=pltpu.CompilerParams(
                dimension_semantics=("parallel",),
                vmem_limit_bytes=32 * 1024 * 1024,
            ),
        )(x2, prep["w1"], prep["w2"], prep["wl"], prep["b1"], prep["b2"], prep["bl"])
        return out[:, 0, :A]

    return prepare, forward


# ---------------------------------------------------------------------------------
# Pure-JAX reference (direct port of the PyTorch module) for validation.
# ---------------------------------------------------------------------------------
def qcnn_reference(x, params):
    hp = jax.lax.Precision.HIGHEST
    n, c, d, h, w = x.shape
    w1 = params["w1"][..., 0]
    d1, h1 = d - 4, h - 4
    p1 = jnp.stack([x[:, :, i:i + d1, j:j + h1, :]
                    for i in range(5) for j in range(5)], axis=2)
    y1 = jnp.einsum("nckdhw,ock->nodhw", p1, w1.reshape(10, c, 25), precision=hp)
    y1 = jax.nn.relu(y1 + params["b1"][None, :, None, None, None])
    y1 = y1.reshape(n, 10, d1 // 2, 2, h1 // 2, 2, w).max(axis=(3, 5))
    w2 = params["w2"][..., 0]
    d1p, h1p = d1 // 2, h1 // 2
    d2, h2 = d1p - 4, h1p - 4
    p2 = jnp.stack([y1[:, :, i:i + d2, j:j + h2, :]
                    for i in range(5) for j in range(5)], axis=2)
    y2 = jnp.einsum("nckdhw,ock->nodhw", p2, w2.reshape(32, 10, 25), precision=hp)
    y2 = jax.nn.relu(y2 + params["b2"][None, :, None, None, None])
    y2 = y2.reshape(n, 32, d2 // 3, 3, h2 // 3, 3, w).max(axis=(3, 5))
    flat = y2.reshape(n, -1)
    return jnp.dot(flat, params["lin_w"].T, precision=hp) + params["lin_b"]


# ---------------------------------------------------------------------------------
# Deterministic parameter init (same shapes as the PyTorch module)
# ---------------------------------------------------------------------------------
def init_params(key, state_size, action_size):
    c_in = state_size[0]
    k1, k2, k3, k4, k5, k6 = jax.random.split(key, 6)

    def u(k, shape, fan_in):
        bound = 1.0 / float(fan_in) ** 0.5
        return jax.random.uniform(k, shape, jnp.float32, -bound, bound)

    fan1 = c_in * 5 * 5 * 1
    fan2 = 10 * 5 * 5 * 1
    return {
        "w1": u(k1, (10, c_in, 5, 5, 1), fan1),
        "b1": u(k2, (10,), fan1),
        "w2": u(k3, (32, 10, 5, 5, 1), fan2),
        "b2": u(k4, (32,), fan2),
        "lin_w": u(k5, (action_size, 864), 864),
        "lin_b": u(k6, (action_size,), 864),
    }


if __name__ == "__main__":
    # state_size = (C, D, H, W).  D=H=30, W=3 is what the hard-coded Linear(864, A)
    # implies: ((30-4)//2 - 4)//3 = 3 and 32*3*3*3 = 864.
    state_size = (4, 30, 30, 3)
    action_size = 6
    batch = 2

    key = jax.random.PRNGKey(0)
    pkey, xkey = jax.random.split(key)
    params = init_params(pkey, state_size, action_size)
    x = jax.random.normal(xkey, (batch,) + state_size, jnp.float32)  # (N, C, D, H, W)

    prepare, forward = make_qcnn(state_size, action_size)
    prep = prepare(params)                      # one-time weight preprocessing
    fwd = jax.jit(forward)
    out = jax.block_until_ready(fwd(x, prep))

    ref = qcnn_reference(x, params)
    assert out.shape == (batch, action_size), out.shape
    assert bool(jnp.all(jnp.isfinite(out)))
    assert bool(jnp.allclose(out, ref, rtol=5e-2, atol=5e-2)), (
        float(jnp.max(jnp.abs(out - ref))))
    print("KERNEL_OK")
</pallas_src>

<mosaic_0001>
module attributes {stable_mosaic.version = 11 : i64} {
  func.func @kernel(%arg0: i32, %arg1: memref<1x3x2x15x128xf32, #tpu.memory_space<vmem>>, %arg2: memref<5x128x512xbf16, #tpu.memory_space<vmem>>, %arg3: memref<5x256x384xbf16, #tpu.memory_space<vmem>>, %arg4: memref<3x3x128x128xbf16, #tpu.memory_space<vmem>>, %arg5: memref<1x512xf32, #tpu.memory_space<vmem>>, %arg6: memref<1x384xf32, #tpu.memory_space<vmem>>, %arg7: memref<1x128xf32, #tpu.memory_space<vmem>>, %arg8: memref<1x1x128xf32, #tpu.memory_space<vmem>>) attributes {dimension_semantics = [#tpu.dimension_semantics<parallel>], iteration_bounds = array<i64: 2>, scalar_prefetch = 0 : i64, scratch_operands = 0 : i64, tpu.core_type = #tpu.core_type<tc>, window_params = [{transform_indices = @transform_0, window_bounds = array<i64: 1, 3, 2, 15, 128>}, {pipeline_mode = #tpu.pipeline_mode<synchronous>, transform_indices = @transform_1, window_bounds = array<i64: 5, 128, 512>}, {pipeline_mode = #tpu.pipeline_mode<synchronous>, transform_indices = @transform_2, window_bounds = array<i64: 5, 256, 384>}, {pipeline_mode = #tpu.pipeline_mode<synchronous>, transform_indices = @transform_3, window_bounds = array<i64: 3, 3, 128, 128>}, {pipeline_mode = #tpu.pipeline_mode<synchronous>, transform_indices = @transform_4, window_bounds = array<i64: 1, 512>}, {pipeline_mode = #tpu.pipeline_mode<synchronous>, transform_indices = @transform_5, window_bounds = array<i64: 1, 384>}, {pipeline_mode = #tpu.pipeline_mode<synchronous>, transform_indices = @transform_6, window_bounds = array<i64: 1, 128>}, {transform_indices = @transform_7, window_bounds = array<i64: 1, 1, 128>}]} {
    %c0 = arith.constant 0 : index
    %c0_0 = arith.constant 0 : index
    %0 = vector.load %arg5[%c0, %c0_0] : memref<1x512xf32, #tpu.memory_space<vmem>>, vector<1x512xf32>
    %c0_1 = arith.constant 0 : index
    %c0_2 = arith.constant 0 : index
    %1 = vector.load %arg6[%c0_1, %c0_2] : memref<1x384xf32, #tpu.memory_space<vmem>>, vector<1x384xf32>
    %c0_3 = arith.constant 0 : index
    %c0_4 = arith.constant 0 : index
    %2 = vector.load %arg7[%c0_3, %c0_4] : memref<1x128xf32, #tpu.memory_space<vmem>>, vector<1x128xf32>
    %cst = arith.constant 0.000000e+00 : f32
    %3 = vector.broadcast %cst : f32 to vector<13x512xf32>
    %cst_5 = arith.constant 0.000000e+00 : f32
    %4 = vector.broadcast %cst_5 : f32 to vector<13x512xf32>
    %c0_6 = arith.constant 0 : index
    %c0_7 = arith.constant 0 : index
    %c0_8 = arith.constant 0 : index
    %5 = vector.load %arg2[%c0_6, %c0_7, %c0_8] : memref<5x128x512xbf16, #tpu.memory_space<vmem>>, vector<1x128x512xbf16>
    %6 = vector.shape_cast %5 : vector<1x128x512xbf16> to vector<128x512xbf16>
    %c0_9 = arith.constant 0 : index
    %c0_10 = arith.constant 0 : index
    %c0_11 = arith.constant 0 : index
    %c0_12 = arith.constant 0 : index
    %c0_13 = arith.constant 0 : index
    %7 = vector.load %arg1[%c0_9, %c0_10, %c0_11, %c0_12, %c0_13] : memref<1x3x2x15x128xf32, #tpu.memory_space<vmem>>, vector<1x1x1x13x128xf32>
    %8 = vector.shape_cast %7 : vector<1x1x1x13x128xf32> to vector<13x128xf32>
    %c0_14 = arith.constant 0 : index
    %c0_15 = arith.constant 0 : index
    %c1 = arith.constant 1 : index
    %c0_16 = arith.constant 0 : index
    %c0_17 = arith.constant 0 : index
    %9 = vector.load %arg1[%c0_14, %c0_15, %c1, %c0_16, %c0_17] : memref<1x3x2x15x128xf32, #tpu.memory_space<vmem>>, vector<1x1x1x13x128xf32>
    %10 = vector.shape_cast %9 : vector<1x1x1x13x128xf32> to vector<13x128xf32>
    %11 = arith.truncf %8 : vector<13x128xf32> to vector<13x128xbf16>
    %cst_18 = arith.constant dense<0.000000e+00> : vector<13x512xf32>
    %12 = tpu.matmul %11, %6, %cst_18 {dimension_numbers = #tpu.dot_dimension_numbers<[1], [0], [0], [1], [0, 0, 1, 1], [], []>} : vector<13x128xbf16>, vector<128x512xbf16>, vector<13x512xf32> -> vector<13x512xf32>
    %13 = arith.addf %3, %12 : vector<13x512xf32>
    %14 = arith.truncf %10 : vector<13x128xf32> to vector<13x128xbf16>
    %cst_19 = arith.constant dense<0.000000e+00> : vector<13x512xf32>
    %15 = tpu.matmul %14, %6, %cst_19 {dimension_numbers = #tpu.dot_dimension_numbers<[1], [0], [0], [1], [0, 0, 1, 1], [], []>} : vector<13x128xbf16>, vector<128x512xbf16>, vector<13x512xf32> -> vector<13x512xf32>
    %16 = arith.addf %4, %15 : vector<13x512xf32>
    %c1_20 = arith.constant 1 : index
    %c0_21 = arith.constant 0 : index
    %c0_22 = arith.constant 0 : index
    %17 = vector.load %arg2[%c1_20, %c0_21, %c0_22] : memref<5x128x512xbf16, #tpu.memory_space<vmem>>, vector<1x128x512xbf16>
    %18 = vector.shape_cast %17 : vector<1x128x512xbf16> to vector<128x512xbf16>
    %c0_23 = arith.constant 0 : index
    %c0_24 = arith.constant 0 : index
    %c1_25 = arith.constant 1 : index
    %c0_26 = arith.constant 0 : index
    %c0_27 = arith.constant 0 : index
    %19 = vector.load %arg1[%c0_23, %c0_24, %c1_25, %c0_26, %c0_27] : memref<1x3x2x15x128xf32, #tpu.memory_space<vmem>>, vector<1x1x1x13x128xf32>
    %20 = vector.shape_cast %19 : vector<1x1x1x13x128xf32> to vector<13x128xf32>
    %c0_28 = arith.constant 0 : index
    %c0_29 = arith.constant 0 : index
    %c0_30 = arith.constant 0 : index
    %c1_31 = arith.constant 1 : index
    %c0_32 = arith.constant 0 : index
    %21 = vector.load %arg1[%c0_28, %c0_29, %c0_30, %c1_31, %c0_32] : memref<1x3x2x15x128xf32, #tpu.memory_space<vmem>>, vector<1x1x1x13x128xf32>
    %22 = vector.shape_cast %21 : vector<1x1x1x13x128xf32> to vector<13x128xf32>
    %23 = arith.truncf %20 : vector<13x128xf32> to vector<13x128xbf16>
    %cst_33 = arith.constant dense<0.000000e+00> : vector<13x512xf32>
    %24 = tpu.matmul %23, %18, %cst_33 {dimension_numbers = #tpu.dot_dimension_numbers<[1], [0], [0], [1], [0, 0, 1, 1], [], []>} : vector<13x128xbf16>, vector<128x512xbf16>, vector<13x512xf32> -> vector<13x512xf32>
    %25 = arith.addf %13, %24 : vector<13x512xf32>
    %26 = arith.truncf %22 : vector<13x128xf32> to vector<13x128xbf16>
    %cst_34 = arith.constant dense<0.000000e+00> : vector<13x512xf32>
    %27 = tpu.matmul %26, %18, %cst_34 {dimension_numbers = #tpu.dot_dimension_numbers<[1], [0], [0], [1], [0, 0, 1, 1], [], []>} : vector<13x128xbf16>, vector<128x512xbf16>, vector<13x512xf32> -> vector<13x512xf32>
    %28 = arith.addf %16, %27 : vector<13x512xf32>
    %c2 = arith.constant 2 : index
    %c0_35 = arith.constant 0 : index
    %c0_36 = arith.constant 0 : index
    %29 = vector.load %arg2[%c2, %c0_35, %c0_36] : memref<5x128x512xbf16, #tpu.memory_space<vmem>>, vector<1x128x512xbf16>
    %30 = vector.shape_cast %29 : vector<1x128x512xbf16> to vector<128x512xbf16>
    %c0_37 = arith.constant 0 : index
    %c0_38 = arith.constant 0 : index
    %c0_39 = arith.constant 0 : index
    %c1_40 = arith.constant 1 : index
    %c0_41 = arith.constant 0 : index
    %31 = vector.load %arg1[%c0_37, %c0_38, %c0_39, %c1_40, %c0_41] : memref<1x3x2x15x128xf32, #tpu.memory_space<vmem>>, vector<1x1x1x13x128xf32>
    %32 = vector.shape_cast %31 : vector<1x1x1x13x128xf32> to vector<13x128xf32>
    %c0_42 = arith.constant 0 : index
    %c0_43 = arith.constant 0 : index
    %c1_44 = arith.constant 1 : index
    %c1_45 = arith.constant 1 : index
    %c0_46 = arith.constant 0 : index
    %33 = vector.load %arg1[%c0_42, %c0_43, %c1_44, %c1_45, %c0_46] : memref<1x3x2x15x128xf32, #tpu.memory_space<vmem>>, vector<1x1x1x13x128xf32>
    %34 = vector.shape_cast %33 : vector<1x1x1x13x128xf32> to vector<13x128xf32>
    %35 = arith.truncf %32 : vector<13x128xf32> to vector<13x128xbf16>
    %cst_47 = arith.constant dense<0.000000e+00> : vector<13x512xf32>
    %36 = tpu.matmul %35, %30, %cst_47 {dimension_numbers = #tpu.dot_dimension_numbers<[1], [0], [0], [1], [0, 0, 1, 1], [], []>} : vector<13x128xbf16>, vector<128x512xbf16>, vector<13x512xf32> -> vector<13x512xf32>
    %37 = arith.addf %25, %36 : vector<13x512xf32>
    %38 = arith.truncf %34 : vector<13x128xf32> to vector<13x128xbf16>
    %cst_48 = arith.constant dense<0.000000e+00> : vector<13x512xf32>
    %39 = tpu.matmul %38, %30, %cst_48 {dimension_numbers = #tpu.dot_dimension_numbers<[1], [0], [0], [1], [0, 0, 1, 1], [], []>} : vector<13x128xbf16>, vector<128x512xbf16>, vector<13x512xf32> -> vector<13x512xf32>
    %40 = arith.addf %28, %39 : vector<13x512xf32>
    %c3 = arith.constant 3 : index
    %c0_49 = arith.constant 0 : index
    %c0_50 = arith.constant 0 : index
    %41 = vector.load %arg2[%c3, %c0_49, %c0_50] : memref<5x128x512xbf16, #tpu.memory_space<vmem>>, vector<1x128x512xbf16>
    %42 = vector.shape_cast %41 : vector<1x128x512xbf16> to vector<128x512xbf16>
    %c0_51 = arith.constant 0 : index
    %c0_52 = arith.constant 0 : index
    %c1_53 = arith.constant 1 : index
    %c1_54 = arith.constant 1 : index
    %c0_55 = arith.constant 0 : index
    %43 = vector.load %arg1[%c0_51, %c0_52, %c1_53, %c1_54, %c0_55] : memref<1x3x2x15x128xf32, #tpu.memory_space<vmem>>, vector<1x1x1x13x128xf32>
    %44 = vector.shape_cast %43 : vector<1x1x1x13x128xf32> to vector<13x128xf32>
    %c0_56 = arith.constant 0 : index
    %c0_57 = arith.constant 0 : index
    %c0_58 = arith.constant 0 : index
    %c2_59 = arith.constant 2 : index
    %c0_60 = arith.constant 0 : index
    %45 = vector.load %arg1[%c0_56, %c0_57, %c0_58, %c2_59, %c0_60] : memref<1x3x2x15x128xf32, #tpu.memory_space<vmem>>, vector<1x1x1x13x128xf32>
    %46 = vector.shape_cast %45 : vector<1x1x1x13x128xf32> to vector<13x128xf32>
    %47 = arith.truncf %44 : vector<13x128xf32> to vector<13x128xbf16>
    %cst_61 = arith.constant dense<0.000000e+00> : vector<13x512xf32>
    %48 = tpu.matmul %47, %42, %cst_61 {dimension_numbers = #tpu.dot_dimension_numbers<[1], [0], [0], [1], [0, 0, 1, 1], [], []>} : vector<13x128xbf16>, vector<128x512xbf16>, vector<13x512xf32> -> vector<13x512xf32>
    %49 = arith.addf %37, %48 : vector<13x512xf32>
    %50 = arith.truncf %46 : vector<13x128xf32> to vector<13x128xbf16>
    %cst_62 = arith.constant dense<0.000000e+00> : vector<13x512xf32>
    %51 = tpu.matmul %50, %42, %cst_62 {dimension_numbers = #tpu.dot_dimension_numbers<[1], [0], [0], [1], [0, 0, 1, 1], [], []>} : vector<13x128xbf16>, vector<128x512xbf16>, vector<13x512xf32> -> vector<13x512xf32>
    %52 = arith.addf %40, %51 : vector<13x512xf32>
    %c4 = arith.constant 4 : index
    %c0_63 = arith.constant 0 : index
    %c0_64 = arith.constant 0 : index
    %53 = vector.load %arg2[%c4, %c0_63, %c0_64] : memref<5x128x512xbf16, #tpu.memory_space<vmem>>, vector<1x128x512xbf16>
    %54 = vector.shape_cast %53 : vector<1x128x512xbf16> to vector<128x512xbf16>
    %c0_65 = arith.constant 0 : index
    %c0_66 = arith.constant 0 : index
    %c0_67 = arith.constant 0 : index
    %c2_68 = arith.constant 2 : index
    %c0_69 = arith.constant 0 : index
    %55 = vector.load %arg1[%c0_65, %c0_66, %c0_67, %c2_68, %c0_69] : memref<1x3x2x15x128xf32, #tpu.memory_space<vmem>>, vector<1x1x1x13x128xf32>
    %56 = vector.shape_cast %55 : vector<1x1x1x13x128xf32> to vector<13x128xf32>
    %c0_70 = arith.constant 0 : index
    %c0_71 = arith.constant 0 : index
    %c1_72 = arith.constant 1 : index
    %c2_73 = arith.constant 2 : index
    %c0_74 = arith.constant 0 : index
    %57 = vector.load %arg1[%c0_70, %c0_71, %c1_72, %c2_73, %c0_74] : memref<1x3x2x15x128xf32, #tpu.memory_space<vmem>>, vector<1x1x1x13x128xf32>
    %58 = vector.shape_cast %57 : vector<1x1x1x13x128xf32> to vector<13x128xf32>
    %59 = arith.truncf %56 : vector<13x128xf32> to vector<13x128xbf16>
    %cst_75 = arith.constant dense<0.000000e+00> : vector<13x512xf32>
    %60 = tpu.matmul %59, %54, %cst_75 {dimension_numbers = #tpu.dot_dimension_numbers<[1], [0], [0], [1], [0, 0, 1, 1], [], []>} : vector<13x128xbf16>, vector<128x512xbf16>, vector<13x512xf32> -> vector<13x512xf32>
    %61 = arith.addf %49, %60 : vector<13x512xf32>
    %62 = arith.truncf %58 : vector<13x128xf32> to vector<13x128xbf16>
    %cst_76 = arith.constant dense<0.000000e+00> : vector<13x512xf32>
    %63 = tpu.matmul %62, %54, %cst_76 {dimension_numbers = #tpu.dot_dimension_numbers<[1], [0], [0], [1], [0, 0, 1, 1], [], []>} : vector<13x128xbf16>, vector<128x512xbf16>, vector<13x512xf32> -> vector<13x512xf32>
    %64 = arith.addf %52, %63 : vector<13x512xf32>
    %65 = vector.broadcast %0 : vector<1x512xf32> to vector<13x512xf32>
    %66 = arith.addf %61, %65 : vector<13x512xf32>
    %cst_77 = arith.constant 0.000000e+00 : f32
    %67 = vector.broadcast %cst_77 : f32 to vector<13x512xf32>
    %68 = arith.maximumf %66, %67 : vector<13x512xf32>
    %69 = vector.broadcast %0 : vector<1x512xf32> to vector<13x512xf32>
    %70 = arith.addf %64, %69 : vector<13x512xf32>
    %cst_78 = arith.constant 0.000000e+00 : f32
    %71 = vector.broadcast %cst_78 : f32 to vector<13x512xf32>
    %72 = arith.maximumf %70, %71 : vector<13x512xf32>
    %73 = arith.maximumf %68, %72 : vector<13x512xf32>
    %74 = vector.extract_strided_slice %73 {offsets = [0, 0], sizes = [13, 256], strides = [1, 1]} : vector<13x512xf32> to vector<13x256xf32>
    %75 = vector.extract_strided_slice %73 {offsets = [0, 256], sizes = [13, 256], strides = [1, 1]} : vector<13x512xf32> to vector<13x256xf32>
    %76 = arith.maximumf %74, %75 : vector<13x256xf32>
    %cst_79 = arith.constant 0.000000e+00 : f32
    %77 = vector.broadcast %cst_79 : f32 to vector<9x384xf32>
    %78 = vector.extract_strided_slice %76 {offsets = [0, 0], sizes = [9, 256], strides = [1, 1]} : vector<13x256xf32> to vector<9x256xf32>
    %79 = arith.truncf %78 : vector<9x256xf32> to vector<9x256xbf16>
    %c0_80 = arith.constant 0 : index
    %c0_81 = arith.constant 0 : index
    %c0_82 = arith.constant 0 : index
    %80 = vector.load %arg3[%c0_80, %c0_81, %c0_82] : memref<5x256x384xbf16, #tpu.memory_space<vmem>>, vector<1x256x384xbf16>
    %81 = vector.shape_cast %80 : vector<1x256x384xbf16> to vector<256x384xbf16>
    %cst_83 = arith.constant dense<0.000000e+00> : vector<9x384xf32>
    %82 = tpu.matmul %79, %81, %cst_83 {dimension_numbers = #tpu.dot_dimension_numbers<[1], [0], [0], [1], [0, 0, 1, 1], [], []>} : vector<9x256xbf16>, vector<256x384xbf16>, vector<9x384xf32> -> vector<9x384xf32>
    %83 = arith.addf %77, %82 : vector<9x384xf32>
    %84 = vector.extract_strided_slice %76 {offsets = [1, 0], sizes = [9, 256], strides = [1, 1]} : vector<13x256xf32> to vector<9x256xf32>
    %85 = arith.truncf %84 : vector<9x256xf32> to vector<9x256xbf16>
    %c1_84 = arith.constant 1 : index
    %c0_85 = arith.constant 0 : index
    %c0_86 = arith.constant 0 : index
    %86 = vector.load %arg3[%c1_84, %c0_85, %c0_86] : memref<5x256x384xbf16, #tpu.memory_space<vmem>>, vector<1x256x384xbf16>
    %87 = vector.shape_cast %86 : vector<1x256x384xbf16> to vector<256x384xbf16>
    %cst_87 = arith.constant dense<0.000000e+00> : vector<9x384xf32>
    %88 = tpu.matmul %85, %87, %cst_87 {dimension_numbers = #tpu.dot_dimension_numbers<[1], [0], [0], [1], [0, 0, 1, 1], [], []>} : vector<9x256xbf16>, vector<256x384xbf16>, vector<9x384xf32> -> vector<9x384xf32>
    %89 = arith.addf %83, %88 : vector<9x384xf32>
    %90 = vector.extract_strided_slice %76 {offsets = [2, 0], sizes = [9, 256], strides = [1, 1]} : vector<13x256xf32> to vector<9x256xf32>
    %91 = arith.truncf %90 : vector<9x256xf32> to vector<9x256xbf16>
    %c2_88 = arith.constant 2 : index
    %c0_89 = arith.constant 0 : index
    %c0_90 = arith.constant 0 : index
    %92 = vector.load %arg3[%c2_88, %c0_89, %c0_90] : memref<5x256x384xbf16, #tpu.memory_space<vmem>>, vector<1x256x384xbf16>
    %93 = vector.shape_cast %92 : vector<1x256x384xbf16> to vector<256x384xbf16>
    %cst_91 = arith.constant dense<0.000000e+00> : vector<9x384xf32>
    %94 = tpu.matmul %91, %93, %cst_91 {dimension_numbers = #tpu.dot_dimension_numbers<[1], [0], [0], [1], [0, 0, 1, 1], [], []>} : vector<9x256xbf16>, vector<256x384xbf16>, vector<9x384xf32> -> vector<9x384xf32>
    %95 = arith.addf %89, %94 : vector<9x384xf32>
    %96 = vector.extract_strided_slice %76 {offsets = [3, 0], sizes = [9, 256], strides = [1, 1]} : vector<13x256xf32> to vector<9x256xf32>
    %97 = arith.truncf %96 : vector<9x256xf32> to vector<9x256xbf16>
    %c3_92 = arith.constant 3 : index
    %c0_93 = arith.constant 0 : index
    %c0_94 = arith.constant 0 : index
    %98 = vector.load %arg3[%c3_92, %c0_93, %c0_94] : memref<5x256x384xbf16, #tpu.memory_space<vmem>>, vector<1x256x384xbf16>
    %99 = vector.shape_cast %98 : vector<1x256x384xbf16> to vector<256x384xbf16>
    %cst_95 = arith.constant dense<0.000000e+00> : vector<9x384xf32>
    %100 = tpu.matmul %97, %99, %cst_95 {dimension_numbers = #tpu.dot_dimension_numbers<[1], [0], [0], [1], [0, 0, 1, 1], [], []>} : vector<9x256xbf16>, vector<256x384xbf16>, vector<9x384xf32> -> vector<9x384xf32>
    %101 = arith.addf %95, %100 : vector<9x384xf32>
    %102 = vector.extract_strided_slice %76 {offsets = [4, 0], sizes = [9, 256], strides = [1, 1]} : vector<13x256xf32> to vector<9x256xf32>
    %103 = arith.truncf %102 : vector<9x256xf32> to vector<9x256xbf16>
    %c4_96 = arith.constant 4 : index
    %c0_97 = arith.constant 0 : index
    %c0_98 = arith.constant 0 : index
    %104 = vector.load %arg3[%c4_96, %c0_97, %c0_98] : memref<5x256x384xbf16, #tpu.memory_space<vmem>>, vector<1x256x384xbf16>
    %105 = vector.shape_cast %104 : vector<1x256x384xbf16> to vector<256x384xbf16>
    %cst_99 = arith.constant dense<0.000000e+00> : vector<9x384xf32>
    %106 = tpu.matmul %103, %105, %cst_99 {dimension_numbers = #tpu.dot_dimension_numbers<[1], [0], [0], [1], [0, 0, 1, 1], [], []>} : vector<9x256xbf16>, vector<256x384xbf16>, vector<9x384xf32> -> vector<9x384xf32>
    %107 = arith.addf %101, %106 : vector<9x384xf32>
    %108 = vector.broadcast %1 : vector<1x384xf32> to vector<9x384xf32>
    %109 = arith.addf %107, %108 : vector<9x384xf32>
    %cst_100 = arith.constant 0.000000e+00 : f32
    %110 = vector.broadcast %cst_100 : f32 to vector<9x384xf32>
    %111 = arith.maximumf %109, %110 : vector<9x384xf32>
    %112 = vector.extract_strided_slice %111 {offsets = [0, 0], sizes = [3, 384], strides = [1, 1]} : vector<9x384xf32> to vector<3x384xf32>
    %cst_101 = arith.constant dense<0xFF800000> : vector<384xf32>
    %113 = vector.multi_reduction <maximumf>, %112, %cst_101 [0] : vector<3x384xf32> to vector<384xf32>
    %114 = vector.shape_cast %113 : vector<384xf32> to vector<1x384xf32>
    %115 = vector.extract_strided_slice %114 {offsets = [0, 0], sizes = [1, 128], strides = [1, 1]} : vector<1x384xf32> to vector<1x128xf32>
    %116 = vector.extract_strided_slice %114 {offsets = [0, 128], sizes = [1, 128], strides = [1, 1]} : vector<1x384xf32> to vector<1x128xf32>
    %117 = arith.maximumf %115, %116 : vector<1x128xf32>
    %118 = vector.extract_strided_slice %114 {offsets = [0, 256], sizes = [1, 128], strides = [1, 1]} : vector<1x384xf32> to vector<1x128xf32>
    %119 = arith.maximumf %117, %118 : vector<1x128xf32>
    %120 = arith.truncf %119 : vector<1x128xf32> to vector<1x128xbf16>
    %c0_102 = arith.constant 0 : index
    %c0_103 = arith.constant 0 : index
    %c0_104 = arith.constant 0 : index
    %c0_105 = arith.constant 0 : index
    %121 = vector.load %arg4[%c0_102, %c0_103, %c0_104, %c0_105] : memref<3x3x128x128xbf16, #tpu.memory_space<vmem>>, vector<1x1x128x128xbf16>
    %122 = vector.shape_cast %121 : vector<1x1x128x128xbf16> to vector<128x128xbf16>
    %cst_106 = arith.constant dense<0.000000e+00> : vector<1x128xf32>
    %123 = tpu.matmul %120, %122, %cst_106 {dimension_numbers = #tpu.dot_dimension_numbers<[1], [0], [0], [1], [0, 0, 1, 1], [], []>} : vector<1x128xbf16>, vector<128x128xbf16>, vector<1x128xf32> -> vector<1x128xf32>
    %124 = arith.addf %2, %123 : vector<1x128xf32>
    %125 = vector.extract_strided_slice %111 {offsets = [3, 0], sizes = [3, 384], strides = [1, 1]} : vector<9x384xf32> to vector<3x384xf32>
    %cst_107 = arith.constant dense<0xFF800000> : vector<384xf32>
    %126 = vector.multi_reduction <maximumf>, %125, %cst_107 [0] : vector<3x384xf32> to vector<384xf32>
    %127 = vector.shape_cast %126 : vector<384xf32> to vector<1x384xf32>
    %128 = vector.extract_strided_slice %127 {offsets = [0, 0], sizes = [1, 128], strides = [1, 1]} : vector<1x384xf32> to vector<1x128xf32>
    %129 = vector.extract_strided_slice %127 {offsets = [0, 128], sizes = [1, 128], strides = [1, 1]} : vector<1x384xf32> to vector<1x128xf32>
    %130 = arith.maximumf %128, %129 : vector<1x128xf32>
    %131 = vector.extract_strided_slice %127 {offsets = [0, 256], sizes = [1, 128], strides = [1, 1]} : vector<1x384xf32> to vector<1x128xf32>
    %132 = arith.maximumf %130, %131 : vector<1x128xf32>
    %133 = arith.truncf %132 : vector<1x128xf32> to vector<1x128xbf16>
    %c0_108 = arith.constant 0 : index
    %c1_109 = arith.constant 1 : index
    %c0_110 = arith.constant 0 : index
    %c0_111 = arith.constant 0 : index
    %134 = vector.load %arg4[%c0_108, %c1_109, %c0_110, %c0_111] : memref<3x3x128x128xbf16, #tpu.memory_space<vmem>>, vector<1x1x128x128xbf16>
    %135 = vector.shape_cast %134 : vector<1x1x128x128xbf16> to vector<128x128xbf16>
    %cst_112 = arith.constant dense<0.000000e+00> : vector<1x128xf32>
    %136 = tpu.matmul %133, %135, %cst_112 {dimension_numbers = #tpu.dot_dimension_numbers<[1], [0], [0], [1], [0, 0, 1, 1], [], []>} : vector<1x128xbf16>, vector<128x128xbf16>, vector<1x128xf32> -> vector<1x128xf32>
    %137 = arith.addf %124, %136 : vector<1x128xf32>
    %138 = vector.extract_strided_slice %111 {offsets = [6, 0], sizes = [3, 384], strides = [1, 1]} : vector<9x384xf32> to vector<3x384xf32>
    %cst_113 = arith.constant dense<0xFF800000> : vector<384xf32>
    %139 = vector.multi_reduction <maximumf>, %138, %cst_113 [0] : vector<3x384xf32> to vector<384xf32>
    %140 = vector.shape_cast %139 : vector<384xf32> to vector<1x384xf32>
    %141 = vector.extract_strided_slice %140 {offsets = [0, 0], sizes = [1, 128], strides = [1, 1]} : vector<1x384xf32> to vector<1x128xf32>
    %142 = vector.extract_strided_slice %140 {offsets = [0, 128], sizes = [1, 128], strides = [1, 1]} : vector<1x384xf32> to vector<1x128xf32>
    %143 = arith.maximumf %141, %142 : vector<1x128xf32>
    %144 = vector.extract_strided_slice %140 {offsets = [0, 256], sizes = [1, 128], strides = [1, 1]} : vector<1x384xf32> to vector<1x128xf32>
    %145 = arith.maximumf %143, %144 : vector<1x128xf32>
    %146 = arith.truncf %145 : vector<1x128xf32> to vector<1x128xbf16>
    %c0_114 = arith.constant 0 : index
    %c2_115 = arith.constant 2 : index
    %c0_116 = arith.constant 0 : index
    %c0_117 = arith.constant 0 : index
    %147 = vector.load %arg4[%c0_114, %c2_115, %c0_116, %c0_117] : memref<3x3x128x128xbf16, #tpu.memory_space<vmem>>, vector<1x1x128x128xbf16>
    %148 = vector.shape_cast %147 : vector<1x1x128x128xbf16> to vector<128x128xbf16>
    %cst_118 = arith.constant dense<0.000000e+00> : vector<1x128xf32>
    %149 = tpu.matmul %146, %148, %cst_118 {dimension_numbers = #tpu.dot_dimension_numbers<[1], [0], [0], [1], [0, 0, 1, 1], [], []>} : vector<1x128xbf16>, vector<128x128xbf16>, vector<1x128xf32> -> vector<1x128xf32>
    %150 = arith.addf %137, %149 : vector<1x128xf32>
    %cst_119 = arith.constant 0.000000e+00 : f32
    %151 = vector.broadcast %cst_119 : f32 to vector<13x512xf32>
    %cst_120 = arith.constant 0.000000e+00 : f32
    %152 = vector.broadcast %cst_120 : f32 to vector<13x512xf32>
    %c0_121 = arith.constant 0 : index
    %c0_122 = arith.constant 0 : index
    %c0_123 = arith.constant 0 : index
    %153 = vector.load %arg2[%c0_121, %c0_122, %c0_123] : memref<5x128x512xbf16, #tpu.memory_space<vmem>>, vector<1x128x512xbf16>
    %154 = vector.shape_cast %153 : vector<1x128x512xbf16> to vector<128x512xbf16>
    %c0_124 = arith.constant 0 : index
    %c1_125 = arith.constant 1 : index
    %c0_126 = arith.constant 0 : index
    %c0_127 = arith.constant 0 : index
    %c0_128 = arith.constant 0 : index
    %155 = vector.load %arg1[%c0_124, %c1_125, %c0_126, %c0_127, %c0_128] : memref<1x3x2x15x128xf32, #tpu.memory_space<vmem>>, vector<1x1x1x13x128xf32>
    %156 = vector.shape_cast %155 : vector<1x1x1x13x128xf32> to vector<13x128xf32>
    %c0_129 = arith.constant 0 : index
    %c1_130 = arith.constant 1 : index
    %c1_131 = arith.constant 1 : index
    %c0_132 = arith.constant 0 : index
    %c0_133 = arith.constant 0 : index
    %157 = vector.load %arg1[%c0_129, %c1_130, %c1_131, %c0_132, %c0_133] : memref<1x3x2x15x128xf32, #tpu.memory_space<vmem>>, vector<1x1x1x13x128xf32>
    %158 = vector.shape_cast %157 : vector<1x1x1x13x128xf32> to vector<13x128xf32>
    %159 = arith.truncf %156 : vector<13x128xf32> to vector<13x128xbf16>
    %cst_134 = arith.constant dense<0.000000e+00> : vector<13x512xf32>
    %160 = tpu.matmul %159, %154, %cst_134 {dimension_numbers = #tpu.dot_dimension_numbers<[1], [0], [0], [1], [0, 0, 1, 1], [], []>} : vector<13x128xbf16>, vector<128x512xbf16>, vector<13x512xf32> -> vector<13x512xf32>
    %161 = arith.addf %151, %160 : vector<13x512xf32>
    %162 = arith.truncf %158 : vector<13x128xf32> to vector<13x128xbf16>
    %cst_135 = arith.constant dense<0.000000e+00> : vector<13x512xf32>
    %163 = tpu.matmul %162, %154, %cst_135 {dimension_numbers = #tpu.dot_dimension_numbers<[1], [0], [0], [1], [0, 0, 1, 1], [], []>} : vector<13x128xbf16>, vector<128x512xbf16>, vector<13x512xf32> -> vector<13x512xf32>
    %164 = arith.addf %152, %163 : vector<13x512xf32>
    %c1_136 = arith.constant 1 : index
    %c0_137 = arith.constant 0 : index
    %c0_138 = arith.constant 0 : index
    %165 = vector.load %arg2[%c1_136, %c0_137, %c0_138] : memref<5x128x512xbf16, #tpu.memory_space<vmem>>, vector<1x128x512xbf16>
    %166 = vector.shape_cast %165 : vector<1x128x512xbf16> to vector<128x512xbf16>
    %c0_139 = arith.constant 0 : index
    %c1_140 = arith.constant 1 : index
    %c1_141 = arith.constant 1 : index
    %c0_142 = arith.constant 0 : index
    %c0_143 = arith.constant 0 : index
    %167 = vector.load %arg1[%c0_139, %c1_140, %c1_141, %c0_142, %c0_143] : memref<1x3x2x15x128xf32, #tpu.memory_space<vmem>>, vector<1x1x1x13x128xf32>
    %168 = vector.shape_cast %167 : vector<1x1x1x13x128xf32> to vector<13x128xf32>
    %c0_144 = arith.constant 0 : index
    %c1_145 = arith.constant 1 : index
    %c0_146 = arith.constant 0 : index
    %c1_147 = arith.constant 1 : index
    %c0_148 = arith.constant 0 : index
    %169 = vector.load %arg1[%c0_144, %c1_145, %c0_146, %c1_147, %c0_148] : memref<1x3x2x15x128xf32, #tpu.memory_space<vmem>>, vector<1x1x1x13x128xf32>
    %170 = vector.shape_cast %169 : vector<1x1x1x13x128xf32> to vector<13x128xf32>
    %171 = arith.truncf %168 : vector<13x128xf32> to vector<13x128xbf16>
    %cst_149 = arith.constant dense<0.000000e+00> : vector<13x512xf32>
    %172 = tpu.matmul %171, %166, %cst_149 {dimension_numbers = #tpu.dot_dimension_numbers<[1], [0], [0], [1], [0, 0, 1, 1], [], []>} : vector<13x128xbf16>, vector<128x512xbf16>, vector<13x512xf32> -> vector<13x512xf32>
    %173 = arith.addf %161, %172 : vector<13x512xf32>
    %174 = arith.truncf %170 : vector<13x128xf32> to vector<13x128xbf16>
    %cst_150 = arith.constant dense<0.000000e+00> : vector<13x512xf32>
    %175 = tpu.matmul %174, %166, %cst_150 {dimension_numbers = #tpu.dot_dimension_numbers<[1], [0], [0], [1], [0, 0, 1, 1], [], []>} : vector<13x128xbf16>, vector<128x512xbf16>, vector<13x512xf32> -> vector<13x512xf32>
    %176 = arith.addf %164, %175 : vector<13x512xf32>
    %c2_151 = arith.constant 2 : index
    %c0_152 = arith.constant 0 : index
    %c0_153 = arith.constant 0 : index
    %177 = vector.load %arg2[%c2_151, %c0_152, %c0_153] : memref<5x128x512xbf16, #tpu.memory_space<vmem>>, vector<1x128x512xbf16>
    %178 = vector.shape_cast %177 : vector<1x128x512xbf16> to vector<128x512xbf16>
    %c0_154 = arith.constant 0 : index
    %c1_155 = arith.constant 1 : index
    %c0_156 = arith.constant 0 : index
    %c1_157 = arith.constant 1 : index
    %c0_158 = arith.constant 0 : index
    %179 = vector.load %arg1[%c0_154, %c1_155, %c0_156, %c1_157, %c0_158] : memref<1x3x2x15x128xf32, #tpu.memory_space<vmem>>, vector<1x1x1x13x128xf32>
    %180 = vector.shape_cast %179 : vector<1x1x1x13x128xf32> to vector<13x128xf32>
    %c0_159 = arith.constant 0 : index
    %c1_160 = arith.constant 1 : index
    %c1_161 = arith.constant 1 : index
    %c1_162 = arith.constant 1 : index
    %c0_163 = arith.constant 0 : index
    %181 = vector.load %arg1[%c0_159, %c1_160, %c1_161, %c1_162, %c0_163] : memref<1x3x2x15x128xf32, #tpu.memory_space<vmem>>, vector<1x1x1x13x128xf32>
    %182 = vector.shape_cast %181 : vector<1x1x1x13x128xf32> to vector<13x128xf32>
    %183 = arith.truncf %180 : vector<13x128xf32> to vector<13x128xbf16>
    %cst_164 = arith.constant dense<0.000000e+00> : vector<13x512xf32>
    %184 = tpu.matmul %183, %178, %cst_164 {dimension_numbers = #tpu.dot_dimension_numbers<[1], [0], [0], [1], [0, 0, 1, 1], [], []>} : vector<13x128xbf16>, vector<128x512xbf16>, vector<13x512xf32> -> vector<13x512xf32>
    %185 = arith.addf %173, %184 : vector<13x512xf32>
    %186 = arith.truncf %182 : vector<13x128xf32> to vector<13x128xbf16>
    %cst_165 = arith.constant dense<0.000000e+00> : vector<13x512xf32>
    %187 = tpu.matmul %186, %178, %cst_165 {dimension_numbers = #tpu.dot_dimension_numbers<[1], [0], [0], [1], [0, 0, 1, 1], [], []>} : vector<13x128xbf16>, vector<128x512xbf16>, vector<13x512xf32> -> vector<13x512xf32>
    %188 = arith.addf %176, %187 : vector<13x512xf32>
    %c3_166 = arith.constant 3 : index
    %c0_167 = arith.constant 0 : index
    %c0_168 = arith.constant 0 : index
    %189 = vector.load %arg2[%c3_166, %c0_167, %c0_168] : memref<5x128x512xbf16, #tpu.memory_space<vmem>>, vector<1x128x512xbf16>
    %190 = vector.shape_cast %189 : vector<1x128x512xbf16> to vector<128x512xbf16>
    %c0_169 = arith.constant 0 : index
    %c1_170 = arith.constant 1 : index
    %c1_171 = arith.constant 1 : index
    %c1_172 = arith.constant 1 : index
    %c0_173 = arith.constant 0 : index
    %191 = vector.load %arg1[%c0_169, %c1_170, %c1_171, %c1_172, %c0_173] : memref<1x3x2x15x128xf32, #tpu.memory_space<vmem>>, vector<1x1x1x13x128xf32>
    %192 = vector.shape_cast %191 : vector<1x1x1x13x128xf32> to vector<13x128xf32>
    %c0_174 = arith.constant 0 : index
    %c1_175 = arith.constant 1 : index
    %c0_176 = arith.constant 0 : index
    %c2_177 = arith.constant 2 : index
    %c0_178 = arith.constant 0 : index
    %193 = vector.load %arg1[%c0_174, %c1_175, %c0_176, %c2_177, %c0_178] : memref<1x3x2x15x128xf32, #tpu.memory_space<vmem>>, vector<1x1x1x13x128xf32>
    %194 = vector.shape_cast %193 : vector<1x1x1x13x128xf32> to vector<13x128xf32>
    %195 = arith.truncf %192 : vector<13x128xf32> to vector<13x128xbf16>
    %cst_179 = arith.constant dense<0.000000e+00> : vector<13x512xf32>
    %196 = tpu.matmul %195, %190, %cst_179 {dimension_numbers = #tpu.dot_dimension_numbers<[1], [0], [0], [1], [0, 0, 1, 1], [], []>} : vector<13x128xbf16>, vector<128x512xbf16>, vector<13x512xf32> -> vector<13x512xf32>
    %197 = arith.addf %185, %196 : vector<13x512xf32>
    %198 = arith.truncf %194 : vector<13x128xf32> to vector<13x128xbf16>
    %cst_180 = arith.constant dense<0.000000e+00> : vector<13x512xf32>
    %199 = tpu.matmul %198, %190, %cst_180 {dimension_numbers = #tpu.dot_dimension_numbers<[1], [0], [0], [1], [0, 0, 1, 1], [], []>} : vector<13x128xbf16>, vector<128x512xbf16>, vector<13x512xf32> -> vector<13x512xf32>
    %200 = arith.addf %188, %199 : vector<13x512xf32>
    %c4_181 = arith.constant 4 : index
    %c0_182 = arith.constant 0 : index
    %c0_183 = arith.constant 0 : index
    %201 = vector.load %arg2[%c4_181, %c0_182, %c0_183] : memref<5x128x512xbf16, #tpu.memory_space<vmem>>, vector<1x128x512xbf16>
    %202 = vector.shape_cast %201 : vector<1x128x512xbf16> to vector<128x512xbf16>
    %c0_184 = arith.constant 0 : index
    %c1_185 = arith.constant 1 : index
    %c0_186 = arith.constant 0 : index
    %c2_187 = arith.constant 2 : index
    %c0_188 = arith.constant 0 : index
    %203 = vector.load %arg1[%c0_184, %c1_185, %c0_186, %c2_187, %c0_188] : memref<1x3x2x15x128xf32, #tpu.memory_space<vmem>>, vector<1x1x1x13x128xf32>
    %204 = vector.shape_cast %203 : vector<1x1x1x13x128xf32> to vector<13x128xf32>
    %c0_189 = arith.constant 0 : index
    %c1_190 = arith.constant 1 : index
    %c1_191 = arith.constant 1 : index
    %c2_192 = arith.constant 2 : index
    %c0_193 = arith.constant 0 : index
    %205 = vector.load %arg1[%c0_189, %c1_190, %c1_191, %c2_192, %c0_193] : memref<1x3x2x15x128xf32, #tpu.memory_space<vmem>>, vector<1x1x1x13x128xf32>
    %206 = vector.shape_cast %205 : vector<1x1x1x13x128xf32> to vector<13x128xf32>
    %207 = arith.truncf %204 : vector<13x128xf32> to vector<13x128xbf16>
    %cst_194 = arith.constant dense<0.000000e+00> : vector<13x512xf32>
    %208 = tpu.matmul %207, %202, %cst_194 {dimension_numbers = #tpu.dot_dimension_numbers<[1], [0], [0], [1], [0, 0, 1, 1], [], []>} : vector<13x128xbf16>, vector<128x512xbf16>, vector<13x512xf32> -> vector<13x512xf32>
    %209 = arith.addf %197, %208 : vector<13x512xf32>
    %210 = arith.truncf %206 : vector<13x128xf32> to vector<13x128xbf16>
    %cst_195 = arith.constant dense<0.000000e+00> : vector<13x512xf32>
    %211 = tpu.matmul %210, %202, %cst_195 {dimension_numbers = #tpu.dot_dimension_numbers<[1], [0], [0], [1], [0, 0, 1, 1], [], []>} : vector<13x128xbf16>, vector<128x512xbf16>, vector<13x512xf32> -> vector<13x512xf32>
    %212 = arith.addf %200, %211 : vector<13x512xf32>
    %213 = vector.broadcast %0 : vector<1x512xf32> to vector<13x512xf32>
    %214 = arith.addf %209, %213 : vector<13x512xf32>
    %cst_196 = arith.constant 0.000000e+00 : f32
    %215 = vector.broadcast %cst_196 : f32 to vector<13x512xf32>
    %216 = arith.maximumf %214, %215 : vector<13x512xf32>
    %217 = vector.broadcast %0 : vector<1x512xf32> to vector<13x512xf32>
    %218 = arith.addf %212, %217 : vector<13x512xf32>
    %cst_197 = arith.constant 0.000000e+00 : f32
    %219 = vector.broadcast %cst_197 : f32 to vector<13x512xf32>
    %220 = arith.maximumf %218, %219 : vector<13x512xf32>
    %221 = arith.maximumf %216, %220 : vector<13x512xf32>
    %222 = vector.extract_strided_slice %221 {offsets = [0, 0], sizes = [13, 256], strides = [1, 1]} : vector<13x512xf32> to vector<13x256xf32>
    %223 = vector.extract_strided_slice %221 {offsets = [0, 256], sizes = [13, 256], strides = [1, 1]} : vector<13x512xf32> to vector<13x256xf32>
    %224 = arith.maximumf %222, %223 : vector<13x256xf32>
    %cst_198 = arith.constant 0.000000e+00 : f32
    %225 = vector.broadcast %cst_198 : f32 to vector<9x384xf32>
    %226 = vector.extract_strided_slice %224 {offsets = [0, 0], sizes = [9, 256], strides = [1, 1]} : vector<13x256xf32> to vector<9x256xf32>
    %227 = arith.truncf %226 : vector<9x256xf32> to vector<9x256xbf16>
    %c0_199 = arith.constant 0 : index
    %c0_200 = arith.constant 0 : index
    %c0_201 = arith.constant 0 : index
    %228 = vector.load %arg3[%c0_199, %c0_200, %c0_201] : memref<5x256x384xbf16, #tpu.memory_space<vmem>>, vector<1x256x384xbf16>
    %229 = vector.shape_cast %228 : vector<1x256x384xbf16> to vector<256x384xbf16>
    %cst_202 = arith.constant dense<0.000000e+00> : vector<9x384xf32>
    %230 = tpu.matmul %227, %229, %cst_202 {dimension_numbers = #tpu.dot_dimension_numbers<[1], [0], [0], [1], [0, 0, 1, 1], [], []>} : vector<9x256xbf16>, vector<256x384xbf16>, vector<9x384xf32> -> vector<9x384xf32>
    %231 = arith.addf %225, %230 : vector<9x384xf32>
    %232 = vector.extract_strided_slice %224 {offsets = [1, 0], sizes = [9, 256], strides = [1, 1]} : vector<13x256xf32> to vector<9x256xf32>
    %233 = arith.truncf %232 : vector<9x256xf32> to vector<9x256xbf16>
    %c1_203 = arith.constant 1 : index
    %c0_204 = arith.constant 0 : index
    %c0_205 = arith.constant 0 : index
    %234 = vector.load %arg3[%c1_203, %c0_204, %c0_205] : memref<5x256x384xbf16, #tpu.memory_space<vmem>>, vector<1x256x384xbf16>
    %235 = vector.shape_cast %234 : vector<1x256x384xbf16> to vector<256x384xbf16>
    %cst_206 = arith.constant dense<0.000000e+00> : vector<9x384xf32>
    %236 = tpu.matmul %233, %235, %cst_206 {dimension_numbers = #tpu.dot_dimension_numbers<[1], [0], [0], [1], [0, 0, 1, 1], [], []>} : vector<9x256xbf16>, vector<256x384xbf16>, vector<9x384xf32> -> vector<9x384xf32>
    %237 = arith.addf %231, %236 : vector<9x384xf32>
    %238 = vector.extract_strided_slice %224 {offsets = [2, 0], sizes = [9, 256], strides = [1, 1]} : vector<13x256xf32> to vector<9x256xf32>
    %239 = arith.truncf %238 : vector<9x256xf32> to vector<9x256xbf16>
    %c2_207 = arith.constant 2 : index
    %c0_208 = arith.constant 0 : index
    %c0_209 = arith.constant 0 : index
    %240 = vector.load %arg3[%c2_207, %c0_208, %c0_209] : memref<5x256x384xbf16, #tpu.memory_space<vmem>>, vector<1x256x384xbf16>
    %241 = vector.shape_cast %240 : vector<1x256x384xbf16> to vector<256x384xbf16>
    %cst_210 = arith.constant dense<0.000000e+00> : vector<9x384xf32>
    %242 = tpu.matmul %239, %241, %cst_210 {dimension_numbers = #tpu.dot_dimension_numbers<[1], [0], [0], [1], [0, 0, 1, 1], [], []>} : vector<9x256xbf16>, vector<256x384xbf16>, vector<9x384xf32> -> vector<9x384xf32>
    %243 = arith.addf %237, %242 : vector<9x384xf32>
    %244 = vector.extract_strided_slice %224 {offsets = [3, 0], sizes = [9, 256], strides = [1, 1]} : vector<13x256xf32> to vector<9x256xf32>
    %245 = arith.truncf %244 : vector<9x256xf32> to vector<9x256xbf16>
    %c3_211 = arith.constant 3 : index
    %c0_212 = arith.constant 0 : index
    %c0_213 = arith.constant 0 : index
    %246 = vector.load %arg3[%c3_211, %c0_212, %c0_213] : memref<5x256x384xbf16, #tpu.memory_space<vmem>>, vector<1x256x384xbf16>
    %247 = vector.shape_cast %246 : vector<1x256x384xbf16> to vector<256x384xbf16>
    %cst_214 = arith.constant dense<0.000000e+00> : vector<9x384xf32>
    %248 = tpu.matmul %245, %247, %cst_214 {dimension_numbers = #tpu.dot_dimension_numbers<[1], [0], [0], [1], [0, 0, 1, 1], [], []>} : vector<9x256xbf16>, vector<256x384xbf16>, vector<9x384xf32> -> vector<9x384xf32>
    %249 = arith.addf %243, %248 : vector<9x384xf32>
    %250 = vector.extract_strided_slice %224 {offsets = [4, 0], sizes = [9, 256], strides = [1, 1]} : vector<13x256xf32> to vector<9x256xf32>
    %251 = arith.truncf %250 : vector<9x256xf32> to vector<9x256xbf16>
    %c4_215 = arith.constant 4 : index
    %c0_216 = arith.constant 0 : index
    %c0_217 = arith.constant 0 : index
    %252 = vector.load %arg3[%c4_215, %c0_216, %c0_217] : memref<5x256x384xbf16, #tpu.memory_space<vmem>>, vector<1x256x384xbf16>
    %253 = vector.shape_cast %252 : vector<1x256x384xbf16> to vector<256x384xbf16>
    %cst_218 = arith.constant dense<0.000000e+00> : vector<9x384xf32>
    %254 = tpu.matmul %251, %253, %cst_218 {dimension_numbers = #tpu.dot_dimension_numbers<[1], [0], [0], [1], [0, 0, 1, 1], [], []>} : vector<9x256xbf16>, vector<256x384xbf16>, vector<9x384xf32> -> vector<9x384xf32>
    %255 = arith.addf %249, %254 : vector<9x384xf32>
    %256 = vector.broadcast %1 : vector<1x384xf32> to vector<9x384xf32>
    %257 = arith.addf %255, %256 : vector<9x384xf32>
    %cst_219 = arith.constant 0.000000e+00 : f32
    %258 = vector.broadcast %cst_219 : f32 to vector<9x384xf32>
    %259 = arith.maximumf %257, %258 : vector<9x384xf32>
    %260 = vector.extract_strided_slice %259 {offsets = [0, 0], sizes = [3, 384], strides = [1, 1]} : vector<9x384xf32> to vector<3x384xf32>
    %cst_220 = arith.constant dense<0xFF800000> : vector<384xf32>
    %261 = vector.multi_reduction <maximumf>, %260, %cst_220 [0] : vector<3x384xf32> to vector<384xf32>
    %262 = vector.shape_cast %261 : vector<384xf32> to vector<1x384xf32>
    %263 = vector.extract_strided_slice %262 {offsets = [0, 0], sizes = [1, 128], strides = [1, 1]} : vector<1x384xf32> to vector<1x128xf32>
    %264 = vector.extract_strided_slice %262 {offsets = [0, 128], sizes = [1, 128], strides = [1, 1]} : vector<1x384xf32> to vector<1x128xf32>
    %265 = arith.maximumf %263, %264 : vector<1x128xf32>
    %266 = vector.extract_strided_slice %262 {offsets = [0, 256], sizes = [1, 128], strides = [1, 1]} : vector<1x384xf32> to vector<1x128xf32>
    %267 = arith.maximumf %265, %266 : vector<1x128xf32>
    %268 = arith.truncf %267 : vector<1x128xf32> to vector<1x128xbf16>
    %c1_221 = arith.constant 1 : index
    %c0_222 = arith.constant 0 : index
    %c0_223 = arith.constant 0 : index
    %c0_224 = arith.constant 0 : index
    %269 = vector.load %arg4[%c1_221, %c0_222, %c0_223, %c0_224] : memref<3x3x128x128xbf16, #tpu.memory_space<vmem>>, vector<1x1x128x128xbf16>
    %270 = vector.shape_cast %269 : vector<1x1x128x128xbf16> to vector<128x128xbf16>
    %cst_225 = arith.constant dense<0.000000e+00> : vector<1x128xf32>
    %271 = tpu.matmul %268, %270, %cst_225 {dimension_numbers = #tpu.dot_dimension_numbers<[1], [0], [0], [1], [0, 0, 1, 1], [], []>} : vector<1x128xbf16>, vector<128x128xbf16>, vector<1x128xf32> -> vector<1x128xf32>
    %272 = arith.addf %150, %271 : vector<1x128xf32>
    %273 = vector.extract_strided_slice %259 {offsets = [3, 0], sizes = [3, 384], strides = [1, 1]} : vector<9x384xf32> to vector<3x384xf32>
    %cst_226 = arith.constant dense<0xFF800000> : vector<384xf32>
    %274 = vector.multi_reduction <maximumf>, %273, %cst_226 [0] : vector<3x384xf32> to vector<384xf32>
    %275 = vector.shape_cast %274 : vector<384xf32> to vector<1x384xf32>
    %276 = vector.extract_strided_slice %275 {offsets = [0, 0], sizes = [1, 128], strides = [1, 1]} : vector<1x384xf32> to vector<1x128xf32>
    %277 = vector.extract_strided_slice %275 {offsets = [0, 128], sizes = [1, 128], strides = [1, 1]} : vector<1x384xf32> to vector<1x128xf32>
    %278 = arith.maximumf %276, %277 : vector<1x128xf32>
    %279 = vector.extract_strided_slice %275 {offsets = [0, 256], sizes = [1, 128], strides = [1, 1]} : vector<1x384xf32> to vector<1x128xf32>
    %280 = arith.maximumf %278, %279 : vector<1x128xf32>
    %281 = arith.truncf %280 : vector<1x128xf32> to vector<1x128xbf16>
    %c1_227 = arith.constant 1 : index
    %c1_228 = arith.constant 1 : index
    %c0_229 = arith.constant 0 : index
    %c0_230 = arith.constant 0 : index
    %282 = vector.load %arg4[%c1_227, %c1_228, %c0_229, %c0_230] : memref<3x3x128x128xbf16, #tpu.memory_space<vmem>>, vector<1x1x128x128xbf16>
    %283 = vector.shape_cast %282 : vector<1x1x128x128xbf16> to vector<128x128xbf16>
    %cst_231 = arith.constant dense<0.000000e+00> : vector<1x128xf32>
    %284 = tpu.matmul %281, %283, %cst_231 {dimension_numbers = #tpu.dot_dimension_numbers<[1], [0], [0], [1], [0, 0, 1, 1], [], []>} : vector<1x128xbf16>, vector<128x128xbf16>, vector<1x128xf32> -> vector<1x128xf32>
    %285 = arith.addf %272, %284 : vector<1x128xf32>
    %286 = vector.extract_strided_slice %259 {offsets = [6, 0], sizes = [3, 384], strides = [1, 1]} : vector<9x384xf32> to vector<3x384xf32>
    %cst_232 = arith.constant dense<0xFF800000> : vector<384xf32>
    %287 = vector.multi_reduction <maximumf>, %286, %cst_232 [0] : vector<3x384xf32> to vector<384xf32>
    %288 = vector.shape_cast %287 : vector<384xf32> to vector<1x384xf32>
    %289 = vector.extract_strided_slice %288 {offsets = [0, 0], sizes = [1, 128], strides = [1, 1]} : vector<1x384xf32> to vector<1x128xf32>
    %290 = vector.extract_strided_slice %288 {offsets = [0, 128], sizes = [1, 128], strides = [1, 1]} : vector<1x384xf32> to vector<1x128xf32>
    %291 = arith.maximumf %289, %290 : vector<1x128xf32>
    %292 = vector.extract_strided_slice %288 {offsets = [0, 256], sizes = [1, 128], strides = [1, 1]} : vector<1x384xf32> to vector<1x128xf32>
    %293 = arith.maximumf %291, %292 : vector<1x128xf32>
    %294 = arith.truncf %293 : vector<1x128xf32> to vector<1x128xbf16>
    %c1_233 = arith.constant 1 : index
    %c2_234 = arith.constant 2 : index
    %c0_235 = arith.constant 0 : index
    %c0_236 = arith.constant 0 : index
    %295 = vector.load %arg4[%c1_233, %c2_234, %c0_235, %c0_236] : memref<3x3x128x128xbf16, #tpu.memory_space<vmem>>, vector<1x1x128x128xbf16>
    %296 = vector.shape_cast %295 : vector<1x1x128x128xbf16> to vector<128x128xbf16>
    %cst_237 = arith.constant dense<0.000000e+00> : vector<1x128xf32>
    %297 = tpu.matmul %294, %296, %cst_237 {dimension_numbers = #tpu.dot_dimension_numbers<[1], [0], [0], [1], [0, 0, 1, 1], [], []>} : vector<1x128xbf16>, vector<128x128xbf16>, vector<1x128xf32> -> vector<1x128xf32>
    %298 = arith.addf %285, %297 : vector<1x128xf32>
    %cst_238 = arith.constant 0.000000e+00 : f32
    %299 = vector.broadcast %cst_238 : f32 to vector<13x512xf32>
    %cst_239 = arith.constant 0.000000e+00 : f32
    %300 = vector.broadcast %cst_239 : f32 to vector<13x512xf32>
    %c0_240 = arith.constant 0 : index
    %c0_241 = arith.constant 0 : index
    %c0_242 = arith.constant 0 : index
    %301 = vector.load %arg2[%c0_240, %c0_241, %c0_242] : memref<5x128x512xbf16, #tpu.memory_space<vmem>>, vector<1x128x512xbf16>
    %302 = vector.shape_cast %301 : vector<1x128x512xbf16> to vector<128x512xbf16>
    %c0_243 = arith.constant 0 : index
    %c2_244 = arith.constant 2 : index
    %c0_245 = arith.constant 0 : index
    %c0_246 = arith.constant 0 : index
    %c0_247 = arith.constant 0 : index
    %303 = vector.load %arg1[%c0_243, %c2_244, %c0_245, %c0_246, %c0_247] : memref<1x3x2x15x128xf32, #tpu.memory_space<vmem>>, vector<1x1x1x13x128xf32>
    %304 = vector.shape_cast %303 : vector<1x1x1x13x128xf32> to vector<13x128xf32>
    %c0_248 = arith.constant 0 : index
    %c2_249 = arith.constant 2 : index
    %c1_250 = arith.constant 1 : index
    %c0_251 = arith.constant 0 : index
    %c0_252 = arith.constant 0 : index
    %305 = vector.load %arg1[%c0_248, %c2_249, %c1_250, %c0_251, %c0_252] : memref<1x3x2x15x128xf32, #tpu.memory_space<vmem>>, vector<1x1x1x13x128xf32>
    %306 = vector.shape_cast %305 : vector<1x1x1x13x128xf32> to vector<13x128xf32>
    %307 = arith.truncf %304 : vector<13x128xf32> to vector<13x128xbf16>
    %cst_253 = arith.constant dense<0.000000e+00> : vector<13x512xf32>
    %308 = tpu.matmul %307, %302, %cst_253 {dimension_numbers = #tpu.dot_dimension_numbers<[1], [0], [0], [1], [0, 0, 1, 1], [], []>} : vector<13x128xbf16>, vector<128x512xbf16>, vector<13x512xf32> -> vector<13x512xf32>
    %309 = arith.addf %299, %308 : vector<13x512xf32>
    %310 = arith.truncf %306 : vector<13x128xf32> to vector<13x128xbf16>
    %cst_254 = arith.constant dense<0.000000e+00> : vector<13x512xf32>
    %311 = tpu.matmul %310, %302, %cst_254 {dimension_numbers = #tpu.dot_dimension_numbers<[1], [0], [0], [1], [0, 0, 1, 1], [], []>} : vector<13x128xbf16>, vector<128x512xbf16>, vector<13x512xf32> -> vector<13x512xf32>
    %312 = arith.addf %300, %311 : vector<13x512xf32>
    %c1_255 = arith.constant 1 : index
    %c0_256 = arith.constant 0 : index
    %c0_257 = arith.constant 0 : index
    %313 = vector.load %arg2[%c1_255, %c0_256, %c0_257] : memref<5x128x512xbf16, #tpu.memory_space<vmem>>, vector<1x128x512xbf16>
    %314 = vector.shape_cast %313 : vector<1x128x512xbf16> to vector<128x512xbf16>
    %c0_258 = arith.constant 0 : index
    %c2_259 = arith.constant 2 : index
    %c1_260 = arith.constant 1 : index
    %c0_261 = arith.constant 0 : index
    %c0_262 = arith.constant 0 : index
    %315 = vector.load %arg1[%c0_258, %c2_259, %c1_260, %c0_261, %c0_262] : memref<1x3x2x15x128xf32, #tpu.memory_space<vmem>>, vector<1x1x1x13x128xf32>
    %316 = vector.shape_cast %315 : vector<1x1x1x13x128xf32> to vector<13x128xf32>
    %c0_263 = arith.constant 0 : index
    %c2_264 = arith.constant 2 : index
    %c0_265 = arith.constant 0 : index
    %c1_266 = arith.constant 1 : index
    %c0_267 = arith.constant 0 : index
    %317 = vector.load %arg1[%c0_263, %c2_264, %c0_265, %c1_266, %c0_267] : memref<1x3x2x15x128xf32, #tpu.memory_space<vmem>>, vector<1x1x1x13x128xf32>
    %318 = vector.shape_cast %317 : vector<1x1x1x13x128xf32> to vector<13x128xf32>
    %319 = arith.truncf %316 : vector<13x128xf32> to vector<13x128xbf16>
    %cst_268 = arith.constant dense<0.000000e+00> : vector<13x512xf32>
    %320 = tpu.matmul %319, %314, %cst_268 {dimension_numbers = #tpu.dot_dimension_numbers<[1], [0], [0], [1], [0, 0, 1, 1], [], []>} : vector<13x128xbf16>, vector<128x512xbf16>, vector<13x512xf32> -> vector<13x512xf32>
    %321 = arith.addf %309, %320 : vector<13x512xf32>
    %322 = arith.truncf %318 : vector<13x128xf32> to vector<13x128xbf16>
    %cst_269 = arith.constant dense<0.000000e+00> : vector<13x512xf32>
    %323 = tpu.matmul %322, %314, %cst_269 {dimension_numbers = #tpu.dot_dimension_numbers<[1], [0], [0], [1], [0, 0, 1, 1], [], []>} : vector<13x128xbf16>, vector<128x512xbf16>, vector<13x512xf32> -> vector<13x512xf32>
    %324 = arith.addf %312, %323 : vector<13x512xf32>
    %c2_270 = arith.constant 2 : index
    %c0_271 = arith.constant 0 : index
    %c0_272 = arith.constant 0 : index
    %325 = vector.load %arg2[%c2_270, %c0_271, %c0_272] : memref<5x128x512xbf16, #tpu.memory_space<vmem>>, vector<1x128x512xbf16>
    %326 = vector.shape_cast %325 : vector<1x128x512xbf16> to vector<128x512xbf16>
    %c0_273 = arith.constant 0 : index
    %c2_274 = arith.constant 2 : index
    %c0_275 = arith.constant 0 : index
    %c1_276 = arith.constant 1 : index
    %c0_277 = arith.constant 0 : index
    %327 = vector.load %arg1[%c0_273, %c2_274, %c0_275, %c1_276, %c0_277] : memref<1x3x2x15x128xf32, #tpu.memory_space<vmem>>, vector<1x1x1x13x128xf32>
    %328 = vector.shape_cast %327 : vector<1x1x1x13x128xf32> to vector<13x128xf32>
    %c0_278 = arith.constant 0 : index
    %c2_279 = arith.constant 2 : index
    %c1_280 = arith.constant 1 : index
    %c1_281 = arith.constant 1 : index
    %c0_282 = arith.constant 0 : index
    %329 = vector.load %arg1[%c0_278, %c2_279, %c1_280, %c1_281, %c0_282] : memref<1x3x2x15x128xf32, #tpu.memory_space<vmem>>, vector<1x1x1x13x128xf32>
    %330 = vector.shape_cast %329 : vector<1x1x1x13x128xf32> to vector<13x128xf32>
    %331 = arith.truncf %328 : vector<13x128xf32> to vector<13x128xbf16>
    %cst_283 = arith.constant dense<0.000000e+00> : vector<13x512xf32>
    %332 = tpu.matmul %331, %326, %cst_283 {dimension_numbers = #tpu.dot_dimension_numbers<[1], [0], [0], [1], [0, 0, 1, 1], [], []>} : vector<13x128xbf16>, vector<128x512xbf16>, vector<13x512xf32> -> vector<13x512xf32>
    %333 = arith.addf %321, %332 : vector<13x512xf32>
    %334 = arith.truncf %330 : vector<13x128xf32> to vector<13x128xbf16>
    %cst_284 = arith.constant dense<0.000000e+00> : vector<13x512xf32>
    %335 = tpu.matmul %334, %326, %cst_284 {dimension_numbers = #tpu.dot_dimension_numbers<[1], [0], [0], [1], [0, 0, 1, 1], [], []>} : vector<13x128xbf16>, vector<128x512xbf16>, vector<13x512xf32> -> vector<13x512xf32>
    %336 = arith.addf %324, %335 : vector<13x512xf32>
    %c3_285 = arith.constant 3 : index
    %c0_286 = arith.constant 0 : index
    %c0_287 = arith.constant 0 : index
    %337 = vector.load %arg2[%c3_285, %c0_286, %c0_287] : memref<5x128x512xbf16, #tpu.memory_space<vmem>>, vector<1x128x512xbf16>
    %338 = vector.shape_cast %337 : vector<1x128x512xbf16> to vector<128x512xbf16>
    %c0_288 = arith.constant 0 : index
    %c2_289 = arith.constant 2 : index
    %c1_290 = arith.constant 1 : index
    %c1_291 = arith.constant 1 : index
    %c0_292 = arith.constant 0 : index
    %339 = vector.load %arg1[%c0_288, %c2_289, %c1_290, %c1_291, %c0_292] : memref<1x3x2x15x128xf32, #tpu.memory_space<vmem>>, vector<1x1x1x13x128xf32>
    %340 = vector.shape_cast %339 : vector<1x1x1x13x128xf32> to vector<13x128xf32>
    %c0_293 = arith.constant 0 : index
    %c2_294 = arith.constant 2 : index
    %c0_295 = arith.constant 0 : index
    %c2_296 = arith.constant 2 : index
    %c0_297 = arith.constant 0 : index
    %341 = vector.load %arg1[%c0_293, %c2_294, %c0_295, %c2_296, %c0_297] : memref<1x3x2x15x128xf32, #tpu.memory_space<vmem>>, vector<1x1x1x13x128xf32>
    %342 = vector.shape_cast %341 : vector<1x1x1x13x128xf32> to vector<13x128xf32>
    %343 = arith.truncf %340 : vector<13x128xf32> to vector<13x128xbf16>
    %cst_298 = arith.constant dense<0.000000e+00> : vector<13x512xf32>
    %344 = tpu.matmul %343, %338, %cst_298 {dimension_numbers = #tpu.dot_dimension_numbers<[1], [0], [0], [1], [0, 0, 1, 1], [], []>} : vector<13x128xbf16>, vector<128x512xbf16>, vector<13x512xf32> -> vector<13x512xf32>
    %345 = arith.addf %333, %344 : vector<13x512xf32>
    %346 = arith.truncf %342 : vector<13x128xf32> to vector<13x128xbf16>
    %cst_299 = arith.constant dense<0.000000e+00> : vector<13x512xf32>
    %347 = tpu.matmul %346, %338, %cst_299 {dimension_numbers = #tpu.dot_dimension_numbers<[1], [0], [0], [1], [0, 0, 1, 1], [], []>} : vector<13x128xbf16>, vector<128x512xbf16>, vector<13x512xf32> -> vector<13x512xf32>
    %348 = arith.addf %336, %347 : vector<13x512xf32>
    %c4_300 = arith.constant 4 : index
    %c0_301 = arith.constant 0 : index
    %c0_302 = arith.constant 0 : index
    %349 = vector.load %arg2[%c4_300, %c0_301, %c0_302] : memref<5x128x512xbf16, #tpu.memory_space<vmem>>, vector<1x128x512xbf16>
    %350 = vector.shape_cast %349 : vector<1x128x512xbf16> to vector<128x512xbf16>
    %c0_303 = arith.constant 0 : index
    %c2_304 = arith.constant 2 : index
    %c0_305 = arith.constant 0 : index
    %c2_306 = arith.constant 2 : index
    %c0_307 = arith.constant 0 : index
    %351 = vector.load %arg1[%c0_303, %c2_304, %c0_305, %c2_306, %c0_307] : memref<1x3x2x15x128xf32, #tpu.memory_space<vmem>>, vector<1x1x1x13x128xf32>
    %352 = vector.shape_cast %351 : vector<1x1x1x13x128xf32> to vector<13x128xf32>
    %c0_308 = arith.constant 0 : index
    %c2_309 = arith.constant 2 : index
    %c1_310 = arith.constant 1 : index
    %c2_311 = arith.constant 2 : index
    %c0_312 = arith.constant 0 : index
    %353 = vector.load %arg1[%c0_308, %c2_309, %c1_310, %c2_311, %c0_312] : memref<1x3x2x15x128xf32, #tpu.memory_space<vmem>>, vector<1x1x1x13x128xf32>
    %354 = vector.shape_cast %353 : vector<1x1x1x13x128xf32> to vector<13x128xf32>
    %355 = arith.truncf %352 : vector<13x128xf32> to vector<13x128xbf16>
    %cst_313 = arith.constant dense<0.000000e+00> : vector<13x512xf32>
    %356 = tpu.matmul %355, %350, %cst_313 {dimension_numbers = #tpu.dot_dimension_numbers<[1], [0], [0], [1], [0, 0, 1, 1], [], []>} : vector<13x128xbf16>, vector<128x512xbf16>, vector<13x512xf32> -> vector<13x512xf32>
    %357 = arith.addf %345, %356 : vector<13x512xf32>
    %358 = arith.truncf %354 : vector<13x128xf32> to vector<13x128xbf16>
    %cst_314 = arith.constant dense<0.000000e+00> : vector<13x512xf32>
    %359 = tpu.matmul %358, %350, %cst_314 {dimension_numbers = #tpu.dot_dimension_numbers<[1], [0], [0], [1], [0, 0, 1, 1], [], []>} : vector<13x128xbf16>, vector<128x512xbf16>, vector<13x512xf32> -> vector<13x512xf32>
    %360 = arith.addf %348, %359 : vector<13x512xf32>
    %361 = vector.broadcast %0 : vector<1x512xf32> to vector<13x512xf32>
    %362 = arith.addf %357, %361 : vector<13x512xf32>
    %cst_315 = arith.constant 0.000000e+00 : f32
    %363 = vector.broadcast %cst_315 : f32 to vector<13x512xf32>
    %364 = arith.maximumf %362, %363 : vector<13x512xf32>
    %365 = vector.broadcast %0 : vector<1x512xf32> to vector<13x512xf32>
    %366 = arith.addf %360, %365 : vector<13x512xf32>
    %cst_316 = arith.constant 0.000000e+00 : f32
    %367 = vector.broadcast %cst_316 : f32 to vector<13x512xf32>
    %368 = arith.maximumf %366, %367 : vector<13x512xf32>
    %369 = arith.maximumf %364, %368 : vector<13x512xf32>
    %370 = vector.extract_strided_slice %369 {offsets = [0, 0], sizes = [13, 256], strides = [1, 1]} : vector<13x512xf32> to vector<13x256xf32>
    %371 = vector.extract_strided_slice %369 {offsets = [0, 256], sizes = [13, 256], strides = [1, 1]} : vector<13x512xf32> to vector<13x256xf32>
    %372 = arith.maximumf %370, %371 : vector<13x256xf32>
    %cst_317 = arith.constant 0.000000e+00 : f32
    %373 = vector.broadcast %cst_317 : f32 to vector<9x384xf32>
    %374 = vector.extract_strided_slice %372 {offsets = [0, 0], sizes = [9, 256], strides = [1, 1]} : vector<13x256xf32> to vector<9x256xf32>
    %375 = arith.truncf %374 : vector<9x256xf32> to vector<9x256xbf16>
    %c0_318 = arith.constant 0 : index
    %c0_319 = arith.constant 0 : index
    %c0_320 = arith.constant 0 : index
    %376 = vector.load %arg3[%c0_318, %c0_319, %c0_320] : memref<5x256x384xbf16, #tpu.memory_space<vmem>>, vector<1x256x384xbf16>
    %377 = vector.shape_cast %376 : vector<1x256x384xbf16> to vector<256x384xbf16>
    %cst_321 = arith.constant dense<0.000000e+00> : vector<9x384xf32>
    %378 = tpu.matmul %375, %377, %cst_321 {dimension_numbers = #tpu.dot_dimension_numbers<[1], [0], [0], [1], [0, 0, 1, 1], [], []>} : vector<9x256xbf16>, vector<256x384xbf16>, vector<9x384xf32> -> vector<9x384xf32>
    %379 = arith.addf %373, %378 : vector<9x384xf32>
    %380 = vector.extract_strided_slice %372 {offsets = [1, 0], sizes = [9, 256], strides = [1, 1]} : vector<13x256xf32> to vector<9x256xf32>
    %381 = arith.truncf %380 : vector<9x256xf32> to vector<9x256xbf16>
    %c1_322 = arith.constant 1 : index
    %c0_323 = arith.constant 0 : index
    %c0_324 = arith.constant 0 : index
    %382 = vector.load %arg3[%c1_322, %c0_323, %c0_324] : memref<5x256x384xbf16, #tpu.memory_space<vmem>>, vector<1x256x384xbf16>
    %383 = vector.shape_cast %382 : vector<1x256x384xbf16> to vector<256x384xbf16>
    %cst_325 = arith.constant dense<0.000000e+00> : vector<9x384xf32>
    %384 = tpu.matmul %381, %383, %cst_325 {dimension_numbers = #tpu.dot_dimension_numbers<[1], [0], [0], [1], [0, 0, 1, 1], [], []>} : vector<9x256xbf16>, vector<256x384xbf16>, vector<9x384xf32> -> vector<9x384xf32>
    %385 = arith.addf %379, %384 : vector<9x384xf32>
    %386 = vector.extract_strided_slice %372 {offsets = [2, 0], sizes = [9, 256], strides = [1, 1]} : vector<13x256xf32> to vector<9x256xf32>
    %387 = arith.truncf %386 : vector<9x256xf32> to vector<9x256xbf16>
    %c2_326 = arith.constant 2 : index
    %c0_327 = arith.constant 0 : index
    %c0_328 = arith.constant 0 : index
    %388 = vector.load %arg3[%c2_326, %c0_327, %c0_328] : memref<5x256x384xbf16, #tpu.memory_space<vmem>>, vector<1x256x384xbf16>
    %389 = vector.shape_cast %388 : vector<1x256x384xbf16> to vector<256x384xbf16>
    %cst_329 = arith.constant dense<0.000000e+00> : vector<9x384xf32>
    %390 = tpu.matmul %387, %389, %cst_329 {dimension_numbers = #tpu.dot_dimension_numbers<[1], [0], [0], [1], [0, 0, 1, 1], [], []>} : vector<9x256xbf16>, vector<256x384xbf16>, vector<9x384xf32> -> vector<9x384xf32>
    %391 = arith.addf %385, %390 : vector<9x384xf32>
    %392 = vector.extract_strided_slice %372 {offsets = [3, 0], sizes = [9, 256], strides = [1, 1]} : vector<13x256xf32> to vector<9x256xf32>
    %393 = arith.truncf %392 : vector<9x256xf32> to vector<9x256xbf16>
    %c3_330 = arith.constant 3 : index
    %c0_331 = arith.constant 0 : index
    %c0_332 = arith.constant 0 : index
    %394 = vector.load %arg3[%c3_330, %c0_331, %c0_332] : memref<5x256x384xbf16, #tpu.memory_space<vmem>>, vector<1x256x384xbf16>
    %395 = vector.shape_cast %394 : vector<1x256x384xbf16> to vector<256x384xbf16>
    %cst_333 = arith.constant dense<0.000000e+00> : vector<9x384xf32>
    %396 = tpu.matmul %393, %395, %cst_333 {dimension_numbers = #tpu.dot_dimension_numbers<[1], [0], [0], [1], [0, 0, 1, 1], [], []>} : vector<9x256xbf16>, vector<256x384xbf16>, vector<9x384xf32> -> vector<9x384xf32>
    %397 = arith.addf %391, %396 : vector<9x384xf32>
    %398 = vector.extract_strided_slice %372 {offsets = [4, 0], sizes = [9, 256], strides = [1, 1]} : vector<13x256xf32> to vector<9x256xf32>
    %399 = arith.truncf %398 : vector<9x256xf32> to vector<9x256xbf16>
    %c4_334 = arith.constant 4 : index
    %c0_335 = arith.constant 0 : index
    %c0_336 = arith.constant 0 : index
    %400 = vector.load %arg3[%c4_334, %c0_335, %c0_336] : memref<5x256x384xbf16, #tpu.memory_space<vmem>>, vector<1x256x384xbf16>
    %401 = vector.shape_cast %400 : vector<1x256x384xbf16> to vector<256x384xbf16>
    %cst_337 = arith.constant dense<0.000000e+00> : vector<9x384xf32>
    %402 = tpu.matmul %399, %401, %cst_337 {dimension_numbers = #tpu.dot_dimension_numbers<[1], [0], [0], [1], [0, 0, 1, 1], [], []>} : vector<9x256xbf16>, vector<256x384xbf16>, vector<9x384xf32> -> vector<9x384xf32>
    %403 = arith.addf %397, %402 : vector<9x384xf32>
    %404 = vector.broadcast %1 : vector<1x384xf32> to vector<9x384xf32>
    %405 = arith.addf %403, %404 : vector<9x384xf32>
    %cst_338 = arith.constant 0.000000e+00 : f32
    %406 = vector.broadcast %cst_338 : f32 to vector<9x384xf32>
    %407 = arith.maximumf %405, %406 : vector<9x384xf32>
    %408 = vector.extract_strided_slice %407 {offsets = [0, 0], sizes = [3, 384], strides = [1, 1]} : vector<9x384xf32> to vector<3x384xf32>
    %cst_339 = arith.constant dense<0xFF800000> : vector<384xf32>
    %409 = vector.multi_reduction <maximumf>, %408, %cst_339 [0] : vector<3x384xf32> to vector<384xf32>
    %410 = vector.shape_cast %409 : vector<384xf32> to vector<1x384xf32>
    %411 = vector.extract_strided_slice %410 {offsets = [0, 0], sizes = [1, 128], strides = [1, 1]} : vector<1x384xf32> to vector<1x128xf32>
    %412 = vector.extract_strided_slice %410 {offsets = [0, 128], sizes = [1, 128], strides = [1, 1]} : vector<1x384xf32> to vector<1x128xf32>
    %413 = arith.maximumf %411, %412 : vector<1x128xf32>
    %414 = vector.extract_strided_slice %410 {offsets = [0, 256], sizes = [1, 128], strides = [1, 1]} : vector<1x384xf32> to vector<1x128xf32>
    %415 = arith.maximumf %413, %414 : vector<1x128xf32>
    %416 = arith.truncf %415 : vector<1x128xf32> to vector<1x128xbf16>
    %c2_340 = arith.constant 2 : index
    %c0_341 = arith.constant 0 : index
    %c0_342 = arith.constant 0 : index
    %c0_343 = arith.constant 0 : index
    %417 = vector.load %arg4[%c2_340, %c0_341, %c0_342, %c0_343] : memref<3x3x128x128xbf16, #tpu.memory_space<vmem>>, vector<1x1x128x128xbf16>
    %418 = vector.shape_cast %417 : vector<1x1x128x128xbf16> to vector<128x128xbf16>
    %cst_344 = arith.constant dense<0.000000e+00> : vector<1x128xf32>
    %419 = tpu.matmul %416, %418, %cst_344 {dimension_numbers = #tpu.dot_dimension_numbers<[1], [0], [0], [1], [0, 0, 1, 1], [], []>} : vector<1x128xbf16>, vector<128x128xbf16>, vector<1x128xf32> -> vector<1x128xf32>
    %420 = arith.addf %298, %419 : vector<1x128xf32>
    %421 = vector.extract_strided_slice %407 {offsets = [3, 0], sizes = [3, 384], strides = [1, 1]} : vector<9x384xf32> to vector<3x384xf32>
    %cst_345 = arith.constant dense<0xFF800000> : vector<384xf32>
    %422 = vector.multi_reduction <maximumf>, %421, %cst_345 [0] : vector<3x384xf32> to vector<384xf32>
    %423 = vector.shape_cast %422 : vector<384xf32> to vector<1x384xf32>
    %424 = vector.extract_strided_slice %423 {offsets = [0, 0], sizes = [1, 128], strides = [1, 1]} : vector<1x384xf32> to vector<1x128xf32>
    %425 = vector.extract_strided_slice %423 {offsets = [0, 128], sizes = [1, 128], strides = [1, 1]} : vector<1x384xf32> to vector<1x128xf32>
    %426 = arith.maximumf %424, %425 : vector<1x128xf32>
    %427 = vector.extract_strided_slice %423 {offsets = [0, 256], sizes = [1, 128], strides = [1, 1]} : vector<1x384xf32> to vector<1x128xf32>
    %428 = arith.maximumf %426, %427 : vector<1x128xf32>
    %429 = arith.truncf %428 : vector<1x128xf32> to vector<1x128xbf16>
    %c2_346 = arith.constant 2 : index
    %c1_347 = arith.constant 1 : index
    %c0_348 = arith.constant 0 : index
    %c0_349 = arith.constant 0 : index
    %430 = vector.load %arg4[%c2_346, %c1_347, %c0_348, %c0_349] : memref<3x3x128x128xbf16, #tpu.memory_space<vmem>>, vector<1x1x128x128xbf16>
    %431 = vector.shape_cast %430 : vector<1x1x128x128xbf16> to vector<128x128xbf16>
    %cst_350 = arith.constant dense<0.000000e+00> : vector<1x128xf32>
    %432 = tpu.matmul %429, %431, %cst_350 {dimension_numbers = #tpu.dot_dimension_numbers<[1], [0], [0], [1], [0, 0, 1, 1], [], []>} : vector<1x128xbf16>, vector<128x128xbf16>, vector<1x128xf32> -> vector<1x128xf32>
    %433 = arith.addf %420, %432 : vector<1x128xf32>
    %434 = vector.extract_strided_slice %407 {offsets = [6, 0], sizes = [3, 384], strides = [1, 1]} : vector<9x384xf32> to vector<3x384xf32>
    %cst_351 = arith.constant dense<0xFF800000> : vector<384xf32>
    %435 = vector.multi_reduction <maximumf>, %434, %cst_351 [0] : vector<3x384xf32> to vector<384xf32>
    %436 = vector.shape_cast %435 : vector<384xf32> to vector<1x384xf32>
    %437 = vector.extract_strided_slice %436 {offsets = [0, 0], sizes = [1, 128], strides = [1, 1]} : vector<1x384xf32> to vector<1x128xf32>
    %438 = vector.extract_strided_slice %436 {offsets = [0, 128], sizes = [1, 128], strides = [1, 1]} : vector<1x384xf32> to vector<1x128xf32>
    %439 = arith.maximumf %437, %438 : vector<1x128xf32>
    %440 = vector.extract_strided_slice %436 {offsets = [0, 256], sizes = [1, 128], strides = [1, 1]} : vector<1x384xf32> to vector<1x128xf32>
    %441 = arith.maximumf %439, %440 : vector<1x128xf32>
    %442 = arith.truncf %441 : vector<1x128xf32> to vector<1x128xbf16>
    %c2_352 = arith.constant 2 : index
    %c2_353 = arith.constant 2 : index
    %c0_354 = arith.constant 0 : index
    %c0_355 = arith.constant 0 : index
    %443 = vector.load %arg4[%c2_352, %c2_353, %c0_354, %c0_355] : memref<3x3x128x128xbf16, #tpu.memory_space<vmem>>, vector<1x1x128x128xbf16>
    %444 = vector.shape_cast %443 : vector<1x1x128x128xbf16> to vector<128x128xbf16>
    %cst_356 = arith.constant dense<0.000000e+00> : vector<1x128xf32>
    %445 = tpu.matmul %442, %444, %cst_356 {dimension_numbers = #tpu.dot_dimension_numbers<[1], [0], [0], [1], [0, 0, 1, 1], [], []>} : vector<1x128xbf16>, vector<128x128xbf16>, vector<1x128xf32> -> vector<1x128xf32>
    %446 = arith.addf %433, %445 : vector<1x128xf32>
    %c0_357 = arith.constant 0 : index
    %c0_358 = arith.constant 0 : index
    %c0_359 = arith.constant 0 : index
    %447 = vector.load %arg8[%c0_357, %c0_358, %c0_359] : memref<1x1x128xf32, #tpu.memory_space<vmem>>, vector<1x1x128xf32>
    %448 = vector.shape_cast %447 : vector<1x1x128xf32> to vector<1x128xf32>
    %449 = vector.shape_cast %446 : vector<1x128xf32> to vector<1x1x128xf32>
    tpu.vector_store %arg8[%c0_357, %c0_358, %c0_359], %449 {strides = array<i32>} : memref<1x1x128xf32, #tpu.memory_space<vmem>>, vector<1x1x128xf32>,
    return
  }
  func.func @transform_0(%arg0: i32) -> (i32, i32, i32, i32, i32) {
    %c0_i32 = arith.constant 0 : i32
    %c0_i32_0 = arith.constant 0 : i32
    %c0_i32_1 = arith.constant 0 : i32
    %c0_i32_2 = arith.constant 0 : i32
    %c0_i32_3 = arith.constant 0 : i32
    return %arg0, %c0_i32, %c0_i32_0, %c0_i32_1, %c0_i32_2 : i32, i32, i32, i32, i32
  }
  func.func @transform_1(%arg0: i32) -> (i32, i32, i32) {
    %c0_i32 = arith.constant 0 : i32
    %c0_i32_0 = arith.constant 0 : i32
    %c0_i32_1 = arith.constant 0 : i32
    %c0_i32_2 = arith.constant 0 : i32
    return %c0_i32, %c0_i32_0, %c0_i32_1 : i32, i32, i32
  }
  func.func @transform_2(%arg0: i32) -> (i32, i32, i32) {
    %c0_i32 = arith.constant 0 : i32
    %c0_i32_0 = arith.constant 0 : i32
    %c0_i32_1 = arith.constant 0 : i32
    %c0_i32_2 = arith.constant 0 : i32
    return %c0_i32, %c0_i32_0, %c0_i32_1 : i32, i32, i32
  }
  func.func @transform_3(%arg0: i32) -> (i32, i32, i32, i32) {
    %c0_i32 = arith.constant 0 : i32
    %c0_i32_0 = arith.constant 0 : i32
    %c0_i32_1 = arith.constant 0 : i32
    %c0_i32_2 = arith.constant 0 : i32
    %c0_i32_3 = arith.constant 0 : i32
    return %c0_i32, %c0_i32_0, %c0_i32_1, %c0_i32_2 : i32, i32, i32, i32
  }
  func.func @transform_4(%arg0: i32) -> (i32, i32) {
    %c0_i32 = arith.constant 0 : i32
    %c0_i32_0 = arith.constant 0 : i32
    %c0_i32_1 = arith.constant 0 : i32
    return %c0_i32, %c0_i32_0 : i32, i32
  }
  func.func @transform_5(%arg0: i32) -> (i32, i32) {
    %c0_i32 = arith.constant 0 : i32
    %c0_i32_0 = arith.constant 0 : i32
    %c0_i32_1 = arith.constant 0 : i32
    return %c0_i32, %c0_i32_0 : i32, i32
  }
  func.func @transform_6(%arg0: i32) -> (i32, i32) {
    %c0_i32 = arith.constant 0 : i32
    %c0_i32_0 = arith.constant 0 : i32
    %c0_i32_1 = arith.constant 0 : i32
    return %c0_i32, %c0_i32_0 : i32, i32
  }
  func.func @transform_7(%arg0: i32) -> (i32, i32, i32) {
    %c0_i32 = arith.constant 0 : i32
    %c0_i32_0 = arith.constant 0 : i32
    %c0_i32_1 = arith.constant 0 : i32
    return %arg0, %c0_i32, %c0_i32_0 : i32, i32, i32
  }
}

</mosaic_0001>

<bundles_post_ra>
// kernel: forward.1
= control target key start
LH: loop header
LB: loop body
LE: loop exit
PB: predicated region body
PF: predicated region fallthrough
CT: control target
= control target key end

     0   :  { %12 = vsyncpa [#allocation3], 0  ;;  %s15869_s0 = inlined_call_operand.vmem [shape: f32[2,3,2,15,128], index: 0, kind: input, shape index: {}]   ;;  %s15870_s1 = inlined_call_operand.hbm [shape: bf16[5,128,512], index: 1, kind: input, shape index: {}]   ;;  %s15871_s2 = inlined_call_operand.vmem [shape: bf16[5,256,384], index: 2, kind: input, shape index: {}]   ;;  %s15872_s3 = inlined_call_operand.vmem [shape: bf16[3,3,128,128], index: 3, kind: input, shape index: {}]   ;;  %s15873_s4 = inlined_call_operand.vmem [shape: f32[1,512], index: 4, kind: input, shape index: {}]   ;;  %s15874_s5 = inlined_call_operand.vmem [shape: f32[1,384], index: 5, kind: input, shape index: {}]   ;;  %s15875_s6 = inlined_call_operand.vmem [shape: f32[1,128], index: 6, kind: input, shape index: {}]   ;;  %s15876_s7 = inlined_call_operand.hbm [shape: f32[2,1,128], index: 7, kind: output, shape index: {}]  }
   0x1   :  { %13 = vsyncpa [#allocation4], 0 }
   0x2   :  { %15 = vsyncpa [#allocation4 + $0x1], 0  ;;  %s10359_s24 = smov 0   ;;  %s10361_s25 = smov 0  }
   0x3   :  { %s10363_s26 = smov 0   ;;  %s10365_s27 = smov 0  }
   0x4 LB: > { %s10380_s28 = sadd.s32 4294967295, %s10314_s27   ;;  %s7382_s29 = sadd.s32 4294967294, %s10314_s27   ;;  %s10314_s27 = sphi %s10365_s27, %s18097_s27   ;;  %s10310_s26 = sphi %s10363_s26, %s18096_s26   ;;  %s10306_s25 = sphi %s10361_s25, %s18095_s25   ;;  %s10302_s24 = sphi %s10359_s24, %s18094_s24  }
   0x5   : > { %s10384_s30 = sadd.s32 1, %s10314_s27   ;;  %s180_s8 = sadd.s32 1, %s10310_s26 }
   0x6   : > { %s177_s9 = ssub.s32 %s10314_s27, %s10384_s30  ;;  %p190_p0 = scmp.ne.s32.totalorder %s10310_s26, %s10306_s25 }
   0x7   : > { %p178_p1 = scmp.eq.s32.totalorder %s177_s9, 0  ;;  %p191_p2 = scmp.eq.s32.totalorder %s10380_s28, 1 }
   0x8   : > { %p196_p3 = scmp.ne.s32.totalorder %s10306_s25, %s10302_s24  ;;  %p197_p4 = scmp.eq.s32.totalorder %s7382_s29, 1 }
   0x9   : > { %s10395_s10 = scalar_select %p178_p1, %s10310_s26, %s180_s8  }
   0xa   : > { %p10397_p5 = por %p191_p2, %p190_p0  ;;  %p10401_p6 = por %p197_p4, %p196_p3 }
   0xb   : > { %p7383_p7 = scmp.ge.s32.totalorder %s10314_s27, 1  ;;  %p204_p8 = scmp.lt.s32.totalorder %s10314_s27, 3 }
   0xc   : > { %p10180_p9 = scmp.eq.s32.totalorder %s10380_s28, 0  ;;  %s215_s15 = sshll.u32 %s15870_s1, 4  ;;  %s216_s15 = int_to_ptr.hbm [resolvable:$true] %s215_s15 }
   0xd   : > { %p205_p10 = pnand %p7383_p7, %p204_p8  ;;  %s10316_s16 = smov [#allocation2]  }
   0xe   : > { %s217_s17 = sshll.u32 %s10316_s16, 4  ;;  %s10317_s18 = smov 256   ;;  %s218_s17 = int_to_ptr.vmem [resolvable:$true] %s217_s17 }
   0xf   : > { %p10172_p11 = pneg %p205_p10  ;;  %s10318_s19 = smov 16  }
  0x10   : > { %256 = sbr.rel (%p205_p10) target bundleno = 2618 (0xa3a), region = 48 }
  0x11   : > { %p10173_p12 = pnand %p10180_p9, %p10172_p11 }
  0x13   : > { %10175 = dma.hbm_to_vmem [thread:$0]  (!%p10173_p12), %s216_s15, 20480, %s218_s17, [#allocation3], %s10317_s18, %s10317_s18, %s10318_s19  }
  0x15   : > { %10293 = dma.done.wait (%p10180_p9), [#allocation3], 20480  }
  0x16   : > { %10295 = vsyncadd (%p10180_p9), [#allocation3], 4294946816  ;;  %v7505_v0 = vld [vmem:[#allocation2 + $0x1e0] sm:$0xf]  ;;  %v9755_v1 = vld [vmem:[#allocation2 + $0x1ec] sm:$0xf0]  ;;  %s7311_s15 = scalar_lea.hbm %s15876_s7, %s10380_s28 }
  0x17   : > { %v9753_v2 = vld [vmem:[#allocation2 + $0x1e4] sm:$0xf]  ;;  %v10417_v3 = vor.u32 %v9755_v1, %v7505_v0  ;;  %v7507_v4 = vld [vmem:[#allocation2 + $0x1f0] sm:$0xf0]  ;;  %v7513_v5 = vld [vmem:[#allocation2 + $0x1e8] sm:$0xf] }
  0x18   : > { %v9756_v6 = vld [vmem:[#allocation2 + $0x1f4] sm:$0xf0]  ;;  %v10419_v7 = vor.u32 %v9753_v2, %v7507_v4  ;;  %v9754_v9 = vld [vmem:[#allocation2 + $0x1ec] sm:$0xf]  ;;  %v7515_v10 = vld [vmem:[#allocation2 + $0x1f8] sm:$0xf0] }
  0x19   : > { %16854 = vst [vmem:[#allocation8_spill] sm:$0xff] %v10417_v3  ;;  %v10421_v8 = vor.u32 %v9756_v6, %v7513_v5  ;;  %v7489_v11 = vld [vmem:[#allocation2 + $0x1c0] sm:$0xf]  ;;  %530 = vmatpush.bf16.msra.mxu0 %v10417_v3  ;;  %v10424_v12 = vor.u32 %v9754_v9, %v7515_v10  ;;  %v9751_v13 = vld [vmem:[#allocation2 + $0x1cc] sm:$0xf0]  ;;  %p288_p13 = scmp.lt.s32.totalorder %s10380_s28, 1 }
  0x1a   : > { %16855 = vst [vmem:[#allocation9_spill] sm:$0xff] %v10419_v7  ;;  %v9749_v14 = vld [vmem:[#allocation2 + $0x1c4] sm:$0xf]  ;;  %v7491_v15 = vld [vmem:[#allocation2 + $0x1d0] sm:$0xf0]  ;;  %544 = vmatpush.bf16.msra.mxu1 %v10419_v7  ;;  %v10428_v16 = vor.u32 %v9751_v13, %v7489_v11  ;;  %vm4037_vm0 = vcmask 1042432  }
  0x1b   : > { %16856 = vst [vmem:[#allocation10_spill] sm:$0xff] %v10421_v8  ;;  %558 = vmatpush.bf16.msra.mxu2 %v10421_v8  ;;  %v10430_v17 = vor.u32 %v9749_v14, %v7491_v15  ;;  %v7497_v18 = vld [vmem:[#allocation2 + $0x1c8] sm:$0xf]  ;;  %v9752_v19 = vld [vmem:[#allocation2 + $0x1d4] sm:$0xf0]  ;;  %572 = vmatpush.bf16.msra.mxu3 %v10424_v12  ;;  %s10480_s20 = scalar_select %p288_p13, %s10380_s28, 1 }
  0x1c   : > { %16857 = vst [vmem:[#allocation11_spill] sm:$0xff] %v10424_v12  ;;  %v9750_v20 = vld [vmem:[#allocation2 + $0x1cc] sm:$0xf]  ;;  %v10433_v21 = vor.u32 %v9752_v19, %v7497_v18  ;;  %v7499_v22 = vld [vmem:[#allocation2 + $0x1d8] sm:$0xf0]  ;;  %vm4140_vm1 = vcmask 1045507  }
  0x1d   : > { %16858 = vst [vmem:[#allocation12_spill] sm:$0xff] %v10428_v16  ;;  %v7473_v23 = vld [vmem:[#allocation2 + $0x1a0] sm:$0xf]  ;;  %v9747_v24 = vld [vmem:[#allocation2 + $0x1ac] sm:$0xf0]  ;;  %v10435_v25 = vor.u32 %v9750_v20, %v7499_v22  ;;  %531 = vmatpush.bf16.msra.mxu0 %v10428_v16  ;;  %s10165_s21 = smul.u32 96, %s10480_s20 }
  0x1e   : > { %16859 = vst [vmem:[#allocation13_spill] sm:$0xff] %v10430_v17  ;;  %v9745_v26 = vld [vmem:[#allocation2 + $0x1a4] sm:$0xf]  ;;  %v7475_v27 = vld [vmem:[#allocation2 + $0x1b0] sm:$0xf0]  ;;  %v10438_v29 = vor.u32 %v9747_v24, %v7473_v23  ;;  %545 = vmatpush.bf16.msra.mxu1 %v10430_v17  ;;  %vm4244_vm2 = vcmask 1047558  }
  0x1f   : > { %16860 = vst [vmem:[#allocation14_spill] sm:$0xff] %v10433_v21  ;;  %v7481_v28 = vld [vmem:[#allocation2 + $0x1a8] sm:$0xf]  ;;  %v9748_v30 = vld [vmem:[#allocation2 + $0x1b4] sm:$0xf0]  ;;  %559 = vmatpush.bf16.msra.mxu2 %v10433_v21  ;;  %v10442_v33 = vor.u32 %v9745_v26, %v7475_v27  ;;  %573 = vmatpush.bf16.msra.mxu3 %v10435_v25  ;;  %s10523_s29 = scalar_lea.vmem %s15869_s0, %s10165_s21  ;;  %vm4246_vm3 = vcmask 1040384  }
  0x20   : > { %16861 = vst [vmem:[#allocation15_spill] sm:$0xff] %v10435_v25  ;;  %v9746_v31 = vld [vmem:[#allocation2 + $0x1ac] sm:$0xf]  ;;  %v7483_v32 = vld [vmem:[#allocation2 + $0x1b8] sm:$0xf0]  ;;  %v10444_v34 = vor.u32 %v9748_v30, %v7481_v28  ;;  %s286_s9 = sand.u32 1, %s10306_s25  }
  0x21   : > { %16862 = vst [vmem:[#allocation16_spill] sm:$0xff] %v10438_v29  ;;  %v7457_v35 = vld [vmem:[#allocation2 + $0x180] sm:$0xf]  ;;  %v9743_v36 = vld [vmem:[#allocation2 + $0x18c] sm:$0xf0]  ;;  %v10447_v38 = vor.u32 %v9746_v31, %v7483_v32  ;;  %532 = vmatpush.bf16.msra.mxu0 %v10438_v29  ;;  %s287_s16 = scalar_lea.vmem [#allocation5], %s286_s9 }
  0x22   : > { %16863 = vst [vmem:[#allocation17_spill] sm:$0xff] %v10442_v33  ;;  %v9741_v37 = vld [vmem:[#allocation2 + $0x184] sm:$0xf]  ;;  %v7459_v39 = vld [vmem:[#allocation2 + $0x190] sm:$0xf0]  ;;  %v10450_v44 = vor.u32 %v9743_v36, %v7457_v35  ;;  %546 = vmatpush.bf16.msra.mxu1 %v10442_v33  ;;  %s7313_s17 = sshll.u32 %s287_s16, 4  ;;  %s7314_s17 = int_to_ptr.vmem [resolvable:$true] %s7313_s17 }
  0x23   : > { %16864 = vst [vmem:[#allocation18_spill] sm:$0xff] %v10444_v34  ;;  %v7465_v40 = vld [vmem:[#allocation2 + $0x188] sm:$0xf]  ;;  %v9744_v41 = vld [vmem:[#allocation2 + $0x194] sm:$0xf0]  ;;  %560 = vmatpush.bf16.msra.mxu2 %v10444_v34  ;;  %v10454_v45 = vor.u32 %v9741_v37, %v7459_v39  ;;  %574 = vmatpush.bf16.msra.mxu3 %v10447_v38  ;;  %s7315_s18 = sshll.u32 %s7311_s15, 4  ;;  %s7316_s18 = int_to_ptr.hbm [resolvable:$true] %s7315_s18 }
  0x24   : > { %16865 = vst [vmem:[#allocation19_spill] sm:$0xff] %v10447_v38  ;;  %v9742_v42 = vld [vmem:[#allocation2 + $0x18c] sm:$0xf]  ;;  %v7467_v43 = vld [vmem:[#allocation2 + $0x198] sm:$0xf0]  ;;  %v10456_v46 = vor.u32 %v9744_v41, %v7465_v40  ;;  %s7303_s19 = scalar_lea.sflag [#allocation4], %s286_s9 }
  0x25   : > { %16866 = vst [vmem:[#allocation20_spill] sm:$0xff] %v10450_v44  ;;  %v7441_v47 = vld [vmem:[#allocation2 + $0x160] sm:$0xf]  ;;  %v9739_v48 = vld [vmem:[#allocation2 + $0x16c] sm:$0xf0]  ;;  %v10459_v50 = vor.u32 %v9742_v42, %v7467_v43  ;;  %533 = vmatpush.bf16.msra.mxu0 %v10450_v44  ;;  %s10268_s28 = scalar_lea.hbm %s15876_s7, 2 }
  0x26   : > { %16867 = vst [vmem:[#allocation21_spill] sm:$0xff] %v10454_v45  ;;  %v9737_v49 = vld [vmem:[#allocation2 + $0x164] sm:$0xf]  ;;  %v7443_v51 = vld [vmem:[#allocation2 + $0x170] sm:$0xf0]  ;;  %v10462_v56 = vor.u32 %v9739_v48, %v7441_v47  ;;  %547 = vmatpush.bf16.msra.mxu1 %v10454_v45 }
  0x27   : > { %16868 = vst [vmem:[#allocation22_spill] sm:$0xff] %v10456_v46  ;;  %v7449_v52 = vld [vmem:[#allocation2 + $0x168] sm:$0xf]  ;;  %v9740_v53 = vld [vmem:[#allocation2 + $0x174] sm:$0xf0]  ;;  %561 = vmatpush.bf16.msra.mxu2 %v10456_v46  ;;  %v10467_v57 = vor.u32 %v9737_v49, %v7443_v51  ;;  %575 = vmatpush.bf16.msra.mxu3 %v10459_v50 }
  0x28   : > { %16869 = vst [vmem:[#allocation23_spill] sm:$0xff] %v10459_v50  ;;  %v9738_v54 = vld [vmem:[#allocation2 + $0x16c] sm:$0xf]  ;;  %v7451_v55 = vld [vmem:[#allocation2 + $0x178] sm:$0xf0]  ;;  %v10469_v58 = vor.u32 %v9740_v53, %v7449_v52 }
  0x29   : > { %16870 = vst [vmem:[#allocation24_spill] sm:$0xff] %v10462_v56  ;;  %v7425_v59 = vld [vmem:[#allocation2 + $0x140] sm:$0xf]  ;;  %v9735_v60 = vld [vmem:[#allocation2 + $0x14c] sm:$0xf0]  ;;  %v10472_v62 = vor.u32 %v9738_v54, %v7451_v55  ;;  %534 = vmatpush.bf16.msra.mxu0 %v10462_v56 }
  0x2a   : > { %16871 = vst [vmem:[#allocation25_spill] sm:$0xff] %v10467_v57  ;;  %v9733_v61 = vld [vmem:[#allocation2 + $0x144] sm:$0xf]  ;;  %v7427_v63 = vld [vmem:[#allocation2 + $0x150] sm:$0xf0]  ;;  %v10475_v5 = vor.u32 %v9735_v60, %v7425_v59  ;;  %548 = vmatpush.bf16.msra.mxu1 %v10467_v57 }
  0x2b   : > { %16872 = vst [vmem:[#allocation26_spill] sm:$0xff] %v10469_v58  ;;  %v7433_v0 = vld [vmem:[#allocation2 + $0x148] sm:$0xf]  ;;  %v9736_v1 = vld [vmem:[#allocation2 + $0x154] sm:$0xf0]  ;;  %562 = vmatpush.bf16.msra.mxu2 %v10469_v58  ;;  %v10484_v6 = vor.u32 %v9733_v61, %v7427_v63  ;;  %576 = vmatpush.bf16.msra.mxu3 %v10472_v62 }
  0x2c   : > { %16873 = vst [vmem:[#allocation27_spill] sm:$0xff] %v10472_v62  ;;  %v9734_v2 = vld [vmem:[#allocation2 + $0x14c] sm:$0xf]  ;;  %v7435_v4 = vld [vmem:[#allocation2 + $0x158] sm:$0xf0]  ;;  %v10486_v9 = vor.u32 %v9736_v1, %v7433_v0 }
  0x2d   : > { %16874 = vst [vmem:[#allocation28_spill] sm:$0xff] %v10475_v5  ;;  %v7409_v10 = vld [vmem:[#allocation2 + $0x120] sm:$0xf]  ;;  %v9731_v11 = vld [vmem:[#allocation2 + $0x12c] sm:$0xf0]  ;;  %v10489_v14 = vor.u32 %v9734_v2, %v7435_v4  ;;  %535 = vmatpush.bf16.msra.mxu0 %v10475_v5 }
  0x2e   : > { %16875 = vst [vmem:[#allocation29_spill] sm:$0xff] %v10484_v6  ;;  %v9729_v13 = vld [vmem:[#allocation2 + $0x124] sm:$0xf]  ;;  %v7411_v15 = vld [vmem:[#allocation2 + $0x130] sm:$0xf0]  ;;  %v10492_v23 = vor.u32 %v9731_v11, %v7409_v10  ;;  %549 = vmatpush.bf16.msra.mxu1 %v10484_v6 }
  0x2f   : > { %16876 = vst [vmem:[#allocation30_spill] sm:$0xff] %v10486_v9  ;;  %v7417_v18 = vld [vmem:[#allocation2 + $0x128] sm:$0xf]  ;;  %v9732_v19 = vld [vmem:[#allocation2 + $0x134] sm:$0xf0]  ;;  %563 = vmatpush.bf16.msra.mxu2 %v10486_v9  ;;  %v10497_v27 = vor.u32 %v9729_v13, %v7411_v15  ;;  %577 = vmatpush.bf16.msra.mxu3 %v10489_v14 }
  0x30   : > { %16877 = vst [vmem:[#allocation31_spill] sm:$0xff] %v10489_v14  ;;  %v9730_v20 = vld [vmem:[#allocation2 + $0x12c] sm:$0xf]  ;;  %v7419_v22 = vld [vmem:[#allocation2 + $0x138] sm:$0xf0]  ;;  %v10499_v28 = vor.u32 %v9732_v19, %v7417_v18  ;;  %v7389_v18 = vld [vmem:[%s10523_s29 + $0x10] sm:$0xff] }
  0x31   : > { %16878 = vst [vmem:[#allocation32_spill] sm:$0xff] %v10492_v23  ;;  %v7393_v24 = vld [vmem:[#allocation2 + $0x100] sm:$0xf]  ;;  %v9727_v26 = vld [vmem:[#allocation2 + $0x10c] sm:$0xf0]  ;;  %v10502_v35 = vor.u32 %v9730_v20, %v7419_v22  ;;  %536 = vmatpush.bf16.msra.mxu0 %v10492_v23 }
  0x32   : > { %16879 = vst [vmem:[#allocation33_spill] sm:$0xff] %v10497_v27  ;;  %v9725_v30 = vld [vmem:[#allocation2 + $0x104] sm:$0xf]  ;;  %v7395_v31 = vld [vmem:[#allocation2 + $0x110] sm:$0xf0]  ;;  %v10505_v43 = vor.u32 %v9727_v26, %v7393_v24  ;;  %550 = vmatpush.bf16.msra.mxu1 %v10497_v27 }
  0x33   : > { %16880 = vst [vmem:[#allocation34_spill] sm:$0xff] %v10499_v28  ;;  %v7401_v32 = vld [vmem:[#allocation2 + $0x108] sm:$0xf]  ;;  %v9728_v36 = vld [vmem:[#allocation2 + $0x114] sm:$0xf0]  ;;  %564 = vmatpush.bf16.msra.mxu2 %v10499_v28  ;;  %v10509_v51 = vor.u32 %v9725_v30, %v7395_v31  ;;  %578 = vmatpush.bf16.msra.mxu3 %v10502_v35 }
  0x34   : > { %16881 = vst [vmem:[#allocation35_spill] sm:$0xff] %v10502_v35  ;;  %v9726_v37 = vld [vmem:[#allocation2 + $0x10c] sm:$0xf]  ;;  %v7403_v39 = vld [vmem:[#allocation2 + $0x118] sm:$0xf0]  ;;  %v10511_v52 = vor.u32 %v9728_v36, %v7401_v32 }
  0x35   : > { %v7633_v40 = vld [vmem:[#allocation2 + $0xe0] sm:$0xf]  ;;  %v9723_v41 = vld [vmem:[#allocation2 + $0xec] sm:$0xf0]  ;;  %v9721_v42 = vld [vmem:[#allocation2 + $0xe4] sm:$0xf]  ;;  %v10514_v55 = vor.u32 %v9726_v37, %v7403_v39  ;;  %537 = vmatpush.bf16.msra.mxu0 %v10505_v43 }
  0x36   : > { %16882 = vst [vmem:[#allocation36_spill] sm:$0xff] %v10505_v43  ;;  %v7635_v47 = vld [vmem:[#allocation2 + $0xf0] sm:$0xf0]  ;;  %v7641_v48 = vld [vmem:[#allocation2 + $0xe8] sm:$0xf]  ;;  %v10516_v59 = vor.u32 %v9723_v41, %v7633_v40  ;;  %551 = vmatpush.bf16.msra.mxu1 %v10509_v51 }
  0x37   : > { %v9724_v49 = vld [vmem:[#allocation2 + $0xf4] sm:$0xf0]  ;;  %16883 = vst [vmem:[#allocation37_spill] sm:$0xff] %v10509_v51  ;;  %v9722_v53 = vld [vmem:[#allocation2 + $0xec] sm:$0xf]  ;;  %v10525_v61 = vor.u32 %v9721_v42, %v7635_v47  ;;  %565 = vmatpush.bf16.msra.mxu2 %v10511_v52  ;;  %579 = vmatpush.bf16.msra.mxu3 %v10514_v55 }
  0x38   : > { %16884 = vst [vmem:[#allocation38_spill] sm:$0xff] %v10511_v52  ;;  %v7643_v54 = vld [vmem:[#allocation2 + $0xf8] sm:$0xf0]  ;;  %v7617_v60 = vld [vmem:[#allocation2 + $0xc0] sm:$0xf]  ;;  %v10527_v63 = vor.u32 %v9724_v49, %v7641_v48 }
  0x39   : > { %16885 = vst [vmem:[#allocation39_spill] sm:$0xff] %v10514_v55  ;;  %v9719_v0 = vld [vmem:[#allocation2 + $0xcc] sm:$0xf0]  ;;  %v9717_v1 = vld [vmem:[#allocation2 + $0xc4] sm:$0xf]  ;;  %v10530_v4 = vor.u32 %v9722_v53, %v7643_v54  ;;  %746 = vmatpush.bf16.msrb.mxu0 %v10516_v59 }
  0x3a   : > { %16886 = vst [vmem:[#allocation40_spill] sm:$0xff] %v10516_v59  ;;  %v7619_v2 = vld [vmem:[#allocation2 + $0xd0] sm:$0xf0]  ;;  %v7625_v10 = vld [vmem:[#allocation2 + $0xc8] sm:$0xf]  ;;  %v10538_v20 = vor.u32 %v9719_v0, %v7617_v60  ;;  %760 = vmatpush.bf16.msrb.mxu1 %v10525_v61 }
  0x3b   : > { %16887 = vst [vmem:[#allocation41_spill] sm:$0xff] %v10525_v61  ;;  %v9720_v11 = vld [vmem:[#allocation2 + $0xd4] sm:$0xf0]  ;;  %v9718_v13 = vld [vmem:[#allocation2 + $0xcc] sm:$0xf]  ;;  %774 = vmatpush.bf16.msrb.mxu2 %v10527_v63  ;;  %v10544_v24 = vor.u32 %v9717_v1, %v7619_v2  ;;  %788 = vmatpush.bf16.msrb.mxu3 %v10530_v4 }
  0x3c   : > { %16888 = vst [vmem:[#allocation42_spill] sm:$0xff] %v10527_v63  ;;  %v7627_v15 = vld [vmem:[#allocation2 + $0xd8] sm:$0xf0]  ;;  %v10546_v26 = vor.u32 %v9720_v11, %v7625_v10  ;;  %v7601_v30 = vld [vmem:[#allocation2 + $0xa0] sm:$0xf] }
  0x3d   : > { %16889 = vst [vmem:[#allocation43_spill] sm:$0xff] %v10530_v4  ;;  %v7390_v19 = vld [vmem:[%s10523_s29 + $0x18] sm:$0x1f]  ;;  %v9715_v31 = vld [vmem:[#allocation2 + $0xac] sm:$0xf0]  ;;  %v10549_v36 = vor.u32 %v9718_v13, %v7627_v15  ;;  %747 = vmatpush.bf16.msrb.mxu0 %v10538_v20 }
  0x3e   : > { %16890 = vst [vmem:[#allocation44_spill] sm:$0xff] %v10538_v20  ;;  %v10540_v22 = vpack.c.bf16 %v7390_v19, %v7389_v18  ;;  %v9713_v32 = vld [vmem:[#allocation2 + $0xa4] sm:$0xf]  ;;  %v7603_v37 = vld [vmem:[#allocation2 + $0xb0] sm:$0xf0]  ;;  %v10555_v47 = vor.u32 %v9715_v31, %v7601_v30  ;;  %761 = vmatpush.bf16.msrb.mxu1 %v10544_v24 }
  0x3f   : > { %16892 = vst [vmem:[#allocation46_spill] sm:$0xff] %v10544_v24  ;;  %v7609_v39 = vld [vmem:[#allocation2 + $0xa8] sm:$0xf]  ;;  %v9716_v40 = vld [vmem:[#allocation2 + $0xb4] sm:$0xf0]  ;;  %775 = vmatpush.bf16.msrb.mxu2 %v10546_v26  ;;  %v10560_v48 = vor.u32 %v9713_v32, %v7603_v37  ;;  %789 = vmatpush.bf16.msrb.mxu3 %v10549_v36 }
  0x40   : > { %16891 = vst [vmem:[#allocation45_spill] sm:$0xff] %v10540_v22  ;;  %538 = vmatmul.bf16.vlgmr.msra.gmra.mxu0 %v10540_v22  ;;  %v9714_v41 = vld [vmem:[#allocation2 + $0xac] sm:$0xf]  ;;  %v7611_v42 = vld [vmem:[#allocation2 + $0xb8] sm:$0xf0]  ;;  %552 = vmatmul.bf16.vlgmr.msra.gmra.mxu1 %v10540_v22  ;;  %v10562_v49 = vor.u32 %v9716_v40, %v7609_v39 }
  0x41   : > { %16893 = vst [vmem:[#allocation47_spill] sm:$0xff] %v10546_v26  ;;  %566 = vmatmul.bf16.vlgmr.msra.gmra.mxu2 %v10540_v22  ;;  %580 = vmatmul.bf16.vlgmr.msra.gmra.mxu3 %v10540_v22  ;;  %v7585_v53 = vld [vmem:[#allocation2 + $0x80] sm:$0xf]  ;;  %v9711_v54 = vld [vmem:[#allocation2 + $0x8c] sm:$0xf0]  ;;  %v10565_v0 = vor.u32 %v9714_v41, %v7611_v42 }
  0x42   : > { %16894 = vst [vmem:[#allocation48_spill] sm:$0xff] %v10549_v36  ;;  %v9709_v60 = vld [vmem:[#allocation2 + $0x84] sm:$0xf]  ;;  %v7587_v1 = vld [vmem:[#allocation2 + $0x90] sm:$0xf0]  ;;  %748 = vmatpush.bf16.msrb.mxu0 %v10555_v47  ;;  %v10568_v15 = vor.u32 %v9711_v54, %v7585_v53  ;;  %762 = vmatpush.bf16.msrb.mxu1 %v10560_v48 }
  0x43   : > { %16895 = vst [vmem:[#allocation49_spill] sm:$0xff] %v10555_v47  ;;  %v7593_v2 = vld [vmem:[#allocation2 + $0x88] sm:$0xf]  ;;  %v9712_v10 = vld [vmem:[#allocation2 + $0x94] sm:$0xf0]  ;;  %776 = vmatpush.bf16.msrb.mxu2 %v10562_v49  ;;  %v10572_v18 = vor.u32 %v9709_v60, %v7587_v1  ;;  %790 = vmatpush.bf16.msrb.mxu3 %v10565_v0 }
  0x44   : > { %16896 = vst [vmem:[#allocation50_spill] sm:$0xff] %v10560_v48  ;;  %v9710_v11 = vld [vmem:[#allocation2 + $0x8c] sm:$0xf]  ;;  %v7595_v13 = vld [vmem:[#allocation2 + $0x98] sm:$0xf0]  ;;  %v10574_v19 = vor.u32 %v9712_v10, %v7593_v2 }
  0x45   : > { %16897 = vst [vmem:[#allocation51_spill] sm:$0xff] %v10562_v49  ;;  %v7569_v30 = vld [vmem:[#allocation2 + $0x60] sm:$0xf]  ;;  %v9707_v31 = vld [vmem:[#allocation2 + $0x6c] sm:$0xf0]  ;;  %v10577_v37 = vor.u32 %v9710_v11, %v7595_v13 }
  0x46   : > { %16898 = vst [vmem:[#allocation52_spill] sm:$0xff] %v10565_v0  ;;  %v9705_v32 = vld [vmem:[#allocation2 + $0x64] sm:$0xf]  ;;  %v7571_v39 = vld [vmem:[#allocation2 + $0x70] sm:$0xf0]  ;;  %749 = vmatpush.bf16.msrb.mxu0 %v10568_v15  ;;  %v10580_v54 = vor.u32 %v9707_v31, %v7569_v30  ;;  %763 = vmatpush.bf16.msrb.mxu1 %v10572_v18 }
  0x47   : > { %16899 = vst [vmem:[#allocation53_spill] sm:$0xff] %v10568_v15  ;;  %v7577_v40 = vld [vmem:[#allocation2 + $0x68] sm:$0xf]  ;;  %v9708_v41 = vld [vmem:[#allocation2 + $0x74] sm:$0xf0]  ;;  %777 = vmatpush.bf16.msrb.mxu2 %v10574_v19  ;;  %v10584_v60 = vor.u32 %v9705_v32, %v7571_v39  ;;  %791 = vmatpush.bf16.msrb.mxu3 %v10577_v37 }
  0x48   : > { %16900 = vst [vmem:[#allocation54_spill] sm:$0xff] %v10572_v18  ;;  %v9706_v42 = vld [vmem:[#allocation2 + $0x6c] sm:$0xf]  ;;  %v7579_v53 = vld [vmem:[#allocation2 + $0x78] sm:$0xf0]  ;;  %v10586_v1 = vor.u32 %v9708_v41, %v7577_v40 }
  0x49   : > { %16901 = vst [vmem:[#allocation55_spill] sm:$0xff] %v10574_v19  ;;  %v7553_v2 = vld [vmem:[#allocation2 + $0x40] sm:$0xf]  ;;  %v9703_v10 = vld [vmem:[#allocation2 + $0x4c] sm:$0xf0]  ;;  %v10589_v13 = vor.u32 %v9706_v42, %v7579_v53 }
  0x4a   : > { %16902 = vst [vmem:[#allocation56_spill] sm:$0xff] %v10577_v37  ;;  %v9701_v11 = vld [vmem:[#allocation2 + $0x44] sm:$0xf]  ;;  %v7555_v22 = vld [vmem:[#allocation2 + $0x50] sm:$0xf0]  ;;  %750 = vmatpush.bf16.msrb.mxu0 %v10580_v54  ;;  %v10592_v18 = vor.u32 %v9703_v10, %v7553_v2  ;;  %764 = vmatpush.bf16.msrb.mxu1 %v10584_v60 }
  0x4b   : > { %16903 = vst [vmem:[#allocation57_spill] sm:$0xff] %v10580_v54  ;;  %v7561_v0 = vld [vmem:[#allocation2 + $0x48] sm:$0xf]  ;;  %v9704_v15 = vld [vmem:[#allocation2 + $0x54] sm:$0xf0]  ;;  %778 = vmatpush.bf16.msrb.mxu2 %v10586_v1  ;;  %v10596_v32 = vor.u32 %v9701_v11, %v7555_v22  ;;  %792 = vmatpush.bf16.msrb.mxu3 %v10589_v13 }
  0x4c   : > { %16904 = vst [vmem:[#allocation58_spill] sm:$0xff] %v10584_v60  ;;  %v9702_v30 = vld [vmem:[#allocation2 + $0x4c] sm:$0xf]  ;;  %v7563_v31 = vld [vmem:[#allocation2 + $0x58] sm:$0xf0]  ;;  %v10598_v39 = vor.u32 %v9704_v15, %v7561_v0 }
  0x4d   : > { %16905 = vst [vmem:[#allocation59_spill] sm:$0xff] %v10586_v1  ;;  %v7537_v40 = vld [vmem:[#allocation2 + $0x20] sm:$0xf]  ;;  %v9699_v41 = vld [vmem:[#allocation2 + $0x2c] sm:$0xf0]  ;;  %v10601_v53 = vor.u32 %v9702_v30, %v7563_v31 }
  0x4e   : > { %16906 = vst [vmem:[#allocation60_spill] sm:$0xff] %v10589_v13  ;;  %v9697_v42 = vld [vmem:[#allocation2 + $0x24] sm:$0xf]  ;;  %v7539_v37 = vld [vmem:[#allocation2 + $0x30] sm:$0xf0]  ;;  %751 = vmatpush.bf16.msrb.mxu0 %v10592_v18  ;;  %v10604_v60 = vor.u32 %v9699_v41, %v7537_v40  ;;  %765 = vmatpush.bf16.msrb.mxu1 %v10596_v32 }
  0x4f   : > { %16907 = vst [vmem:[#allocation61_spill] sm:$0xff] %v10592_v18  ;;  %v7545_v19 = vld [vmem:[#allocation2 + $0x28] sm:$0xf]  ;;  %v9700_v54 = vld [vmem:[#allocation2 + $0x34] sm:$0xf0]  ;;  %779 = vmatpush.bf16.msrb.mxu2 %v10598_v39  ;;  %v10608_v22 = vor.u32 %v9697_v42, %v7539_v37  ;;  %793 = vmatpush.bf16.msrb.mxu3 %v10601_v53  ;;  %v328_v42 = vld [vmem:[%s10523_s29] sm:$0xff] }
  0x50   : > { %16908 = vst [vmem:[#allocation62_spill] sm:$0xff] %v10596_v32  ;;  %v9698_v2 = vld [vmem:[#allocation2 + $0x2c] sm:$0xf]  ;;  %v7547_v10 = vld [vmem:[#allocation2 + $0x38] sm:$0xf0]  ;;  %v10610_v0 = vor.u32 %v9700_v54, %v7545_v19 }
  0x51   : > { %16909 = vst [vmem:[#allocation63_spill] sm:$0xff] %v10598_v39  ;;  %v7521_v15 = vld [vmem:[#allocation2] sm:$0xf]  ;;  %v9695_v11 = vld [vmem:[#allocation2 + $0xc] sm:$0xf0]  ;;  %v10613_v31 = vor.u32 %v9698_v2, %v7547_v10 }
  0x52   : > { %16910 = vst [vmem:[#allocation64_spill] sm:$0xff] %v10601_v53  ;;  %v9693_v30 = vld [vmem:[#allocation2 + $0x4] sm:$0xf]  ;;  %v7523_v18 = vld [vmem:[#allocation2 + $0x10] sm:$0xf0]  ;;  %752 = vmatpush.bf16.msrb.mxu0 %v10604_v60  ;;  %v10616_v37 = vor.u32 %v9695_v11, %v7521_v15  ;;  %766 = vmatpush.bf16.msrb.mxu1 %v10608_v22  ;;  %v16920_v15 = vld [vmem:[#allocation53_spill] sm:$0xff] }
  0x53   : > { %16911 = vst [vmem:[#allocation65_spill] sm:$0xff] %v10604_v60  ;;  %v7529_v40 = vld [vmem:[#allocation2 + $0x8] sm:$0xf]  ;;  %v9696_v41 = vld [vmem:[#allocation2 + $0x14] sm:$0xf0]  ;;  %780 = vmatpush.bf16.msrb.mxu2 %v10610_v0  ;;  %v10620_v19 = vor.u32 %v9693_v30, %v7523_v18  ;;  %794 = vmatpush.bf16.msrb.mxu3 %v10613_v31 }
  0x54   : > { %16912 = vst [vmem:[#allocation66_spill] sm:$0xff] %v10608_v22  ;;  %v9694_v13 = vld [vmem:[#allocation2 + $0xc] sm:$0xf]  ;;  %v7531_v32 = vld [vmem:[#allocation2 + $0x18] sm:$0xf0]  ;;  %v10622_v54 = vor.u32 %v9696_v41, %v7529_v40  ;;  %v368_v18 = vld [vmem:[%s10523_s29 + $0x1] sm:$0xff] }
  0x55   : > { %16913 = vst [vmem:[#allocation67_spill] sm:$0xff] %v10610_v0  ;;  %v329_v2 = vld [vmem:[%s10523_s29 + $0x8] sm:$0x1f]  ;;  %v10627_v10 = vor.u32 %v9694_v13, %v7531_v32  ;;  %v16921_v11 = vld [vmem:[#allocation54_spill] sm:$0xff]  ;;  %v16922_v30 = vld [vmem:[#allocation55_spill] sm:$0xff] }
  0x56   : > { %16914 = vst [vmem:[#allocation68_spill] sm:$0xff] %v10613_v31  ;;  %753 = vmatpush.bf16.msrb.mxu0 %v10616_v37  ;;  %v333_v53 = vpack.c.bf16 %v329_v2, %v328_v42  ;;  %767 = vmatpush.bf16.msrb.mxu1 %v10620_v19  ;;  %v369_v13 = vld [vmem:[%s10523_s29 + $0x9] sm:$0x1f]  ;;  %v16925_v42 = vld [vmem:[#allocation58_spill] sm:$0xff] }
  0x57   : > { %16915 = vst [vmem:[#allocation69_spill] sm:$0xff] %v10616_v37  ;;  %781 = vmatpush.bf16.msrb.mxu2 %v10622_v54  ;;  %795 = vmatpush.bf16.msrb.mxu3 %v10627_v10  ;;  %v10664_v32 = vpack.c.bf16 %v369_v13, %v368_v18  ;;  %v16923_v40 = vld [vmem:[#allocation56_spill] sm:$0xff]  ;;  %v16924_v41 = vld [vmem:[#allocation57_spill] sm:$0xff]  ;;  %v16928_v13 = vld [vmem:[#allocation62_spill] sm:$0xff] }
  0x58   : > { %16916 = vst [vmem:[#allocation70_spill] sm:$0xff] %v10620_v19  ;;  %v16926_v2 = vld [vmem:[#allocation60_spill] sm:$0xff]  ;;  %v16927_v18 = vld [vmem:[#allocation61_spill] sm:$0xff] }
  0x59   : > { %16917 = vst [vmem:[#allocation71_spill] sm:$0xff] %v10622_v54  ;;  %754 = vmatmul.bf16.vlgmr.msrb.gmra.mxu0 %v333_v53  ;;  %768 = vmatmul.bf16.vlgmr.msrb.gmra.mxu1 %v333_v53 }
  0x5a   : > { %16918 = vst [vmem:[#allocation72_spill] sm:$0xff] %v10627_v10  ;;  %803 = vmatpush.bf16.msra.mxu0 %v10417_v3  ;;  %817 = vmatpush.bf16.msra.mxu1 %v10419_v7 }
  0x5b   : > { %831 = vmatpush.bf16.msra.mxu2 %v10421_v8  ;;  %845 = vmatpush.bf16.msra.mxu3 %v10424_v12  ;;  %v7659_v12 = vld [vmem:[#allocation2 + $0x208] sm:$0xf]  ;;  %v7797_v8 = vld [vmem:[#allocation2 + $0x330] sm:$0xf0] }
  0x5c   : > { %782 = vmatmul.bf16.vlgmr.msrb.gmra.mxu2 %v333_v53  ;;  %796 = vmatmul.bf16.vlgmr.msrb.gmra.mxu3 %v333_v53  ;;  %v16919_v53 = vld [vmem:[#allocation52_spill] sm:$0xff] }
  0x5e   : > { %804 = vmatpush.bf16.msra.mxu0 %v10428_v16  ;;  %818 = vmatpush.bf16.msra.mxu1 %v10430_v17  ;;  %v9824_v16 = vld [vmem:[#allocation2 + $0x414] sm:$0xf0] }
  0x5f   : > { %832 = vmatpush.bf16.msra.mxu2 %v10433_v21  ;;  %846 = vmatpush.bf16.msra.mxu3 %v10435_v25  ;;  %v9764_v25 = vld [vmem:[#allocation2 + $0x234] sm:$0xf0]  ;;  %v9798_v21 = vld [vmem:[#allocation2 + $0x34c] sm:$0xf] }
  0x62   : > { %805 = vmatpush.bf16.msra.mxu0 %v10438_v29  ;;  %819 = vmatpush.bf16.msra.mxu1 %v10442_v33  ;;  %v7917_v29 = vld [vmem:[#allocation2 + $0x408] sm:$0xf] }
  0x63   : > { %833 = vmatpush.bf16.msra.mxu2 %v10444_v34  ;;  %847 = vmatpush.bf16.msra.mxu3 %v10447_v38  ;;  %v9760_v34 = vld [vmem:[#allocation2 + $0x214] sm:$0xf0] }
  0x66   : > { %806 = vmatpush.bf16.msra.mxu0 %v10450_v44  ;;  %820 = vmatpush.bf16.msra.mxu1 %v10454_v45  ;;  %v7653_v45 = vld [vmem:[#allocation2 + $0x210] sm:$0xf0] }
  0x67   : > { %834 = vmatpush.bf16.msra.mxu2 %v10456_v46  ;;  %848 = vmatpush.bf16.msra.mxu3 %v10459_v50  ;;  %v7685_v50 = vld [vmem:[#allocation2 + $0x250] sm:$0xf0] }
  0x68   : > { %v7911_v44 = vld [vmem:[#allocation2 + $0x410] sm:$0xf0] }
  0x6a   : > { %807 = vmatpush.bf16.msra.mxu0 %v10462_v56  ;;  %821 = vmatpush.bf16.msra.mxu1 %v10467_v57  ;;  %v7675_v57 = vld [vmem:[#allocation2 + $0x228] sm:$0xf] }
  0x6b   : > { %835 = vmatpush.bf16.msra.mxu2 %v10469_v58  ;;  %849 = vmatpush.bf16.msra.mxu3 %v10472_v62  ;;  %v7707_v62 = vld [vmem:[#allocation2 + $0x268] sm:$0xf]  ;;  %v7669_v58 = vld [vmem:[#allocation2 + $0x230] sm:$0xf0] }
  0x6e   : > { %808 = vmatpush.bf16.msra.mxu0 %v10475_v5  ;;  %822 = vmatpush.bf16.msra.mxu1 %v10484_v6  ;;  %v9768_v6 = vld [vmem:[#allocation2 + $0x254] sm:$0xf0]  ;;  %v7927_v5 = vld [vmem:[#allocation2 + $0x430] sm:$0xf0] }
  0x6f   : > { %836 = vmatpush.bf16.msra.mxu2 %v10486_v9  ;;  %850 = vmatpush.bf16.msra.mxu3 %v10489_v14  ;;  %v9776_v14 = vld [vmem:[#allocation2 + $0x294] sm:$0xf0]  ;;  %v7691_v9 = vld [vmem:[#allocation2 + $0x248] sm:$0xf] }
  0x72   : > { %809 = vmatpush.bf16.msra.mxu0 %v10492_v23  ;;  %823 = vmatpush.bf16.msra.mxu1 %v10497_v27 }
  0x73   : > { %837 = vmatpush.bf16.msra.mxu2 %v10499_v28  ;;  %851 = vmatpush.bf16.msra.mxu3 %v10502_v35  ;;  %v7723_v35 = vld [vmem:[#allocation2 + $0x288] sm:$0xf]  ;;  %v9772_v28 = vld [vmem:[#allocation2 + $0x274] sm:$0xf0] }
  0x76   : > { %810 = vmatpush.bf16.msra.mxu0 %v10505_v43  ;;  %824 = vmatpush.bf16.msra.mxu1 %v10509_v51  ;;  %v7701_v51 = vld [vmem:[#allocation2 + $0x270] sm:$0xf0]  ;;  %v9830_v43 = vld [vmem:[#allocation2 + $0x44c] sm:$0xf] }
  0x77   : > { %838 = vmatpush.bf16.msra.mxu2 %v10511_v52  ;;  %852 = vmatpush.bf16.msra.mxu3 %v10514_v55 }
  0x79   : > { %811 = vmatmul.bf16.vlgmr.msra.gmra.mxu0 %v10664_v32  ;;  %825 = vmatmul.bf16.vlgmr.msra.gmra.mxu1 %v10664_v32 }
  0x7a   : > { %859 = vmatpush.bf16.msrb.mxu0 %v10516_v59  ;;  %873 = vmatpush.bf16.msrb.mxu1 %v10525_v61  ;;  %v9773_v61 = vld [vmem:[#allocation2 + $0x284] sm:$0xf] }
  0x7b   : > { %887 = vmatpush.bf16.msrb.mxu2 %v10527_v63  ;;  %901 = vmatpush.bf16.msrb.mxu3 %v10530_v4  ;;  %v7771_v4 = vld [vmem:[#allocation2 + $0x2e8] sm:$0xf] }
  0x7c   : > { %839 = vmatmul.bf16.vlgmr.msra.gmra.mxu2 %v10664_v32  ;;  %853 = vmatmul.bf16.vlgmr.msra.gmra.mxu3 %v10664_v32  ;;  %v7755_v63 = vld [vmem:[#allocation2 + $0x2c8] sm:$0xf] }
  0x7e   : > { %860 = vmatpush.bf16.msrb.mxu0 %v10538_v20  ;;  %874 = vmatpush.bf16.msrb.mxu1 %v10544_v24  ;;  %v7949_v20 = vld [vmem:[#allocation2 + $0x448] sm:$0xf] }
  0x7f   : > { %888 = vmatpush.bf16.msrb.mxu2 %v10546_v26  ;;  %902 = vmatpush.bf16.msrb.mxu3 %v10549_v36  ;;  %v7763_v36 = vld [vmem:[#allocation2 + $0x2e0] sm:$0xf]  ;;  %v9781_v26 = vld [vmem:[#allocation2 + $0x2c4] sm:$0xf] }
  0x82   : > { %861 = vmatpush.bf16.msrb.mxu0 %v10555_v47  ;;  %875 = vmatpush.bf16.msrb.mxu1 %v10560_v48  ;;  %v9783_v48 = vld [vmem:[#allocation2 + $0x2cc] sm:$0xf0]  ;;  %v7943_v47 = vld [vmem:[#allocation2 + $0x450] sm:$0xf0] }
  0x83   : > { %889 = vmatpush.bf16.msrb.mxu2 %v10562_v49  ;;  %903 = vmatpush.bf16.msrb.mxu3 %v16919_v53  ;;  %v16929_v53 = vld [vmem:[#allocation64_spill] sm:$0xff] }
  0x84   : > { %v7747_v49 = vld [vmem:[#allocation2 + $0x2c0] sm:$0xf] }
  0x86   : > { %862 = vmatpush.bf16.msrb.mxu0 %v16920_v15  ;;  %876 = vmatpush.bf16.msrb.mxu1 %v16921_v11  ;;  %v9785_v11 = vld [vmem:[#allocation2 + $0x2e4] sm:$0xf]  ;;  %v7967_v15 = vld [vmem:[#allocation2 + $0x478] sm:$0xf0] }
  0x87   : > { %890 = vmatpush.bf16.msrb.mxu2 %v16922_v30  ;;  %904 = vmatpush.bf16.msrb.mxu3 %v16923_v40  ;;  %v9787_v30 = vld [vmem:[#allocation2 + $0x2ec] sm:$0xf0]  ;;  %v7765_v40 = vld [vmem:[#allocation2 + $0x2f0] sm:$0xf0] }
  0x8a   : > { %863 = vmatpush.bf16.msrb.mxu0 %v16924_v41  ;;  %877 = vmatpush.bf16.msrb.mxu1 %v16925_v42  ;;  %v9788_v42 = vld [vmem:[#allocation2 + $0x2f4] sm:$0xf0] }
  0x8b   : > { %891 = vmatpush.bf16.msrb.mxu2 %v10586_v1  ;;  %905 = vmatpush.bf16.msrb.mxu3 %v16926_v2  ;;  %v9786_v2 = vld [vmem:[#allocation2 + $0x2ec] sm:$0xf]  ;;  %v7773_v1 = vld [vmem:[#allocation2 + $0x2f8] sm:$0xf0] }
  0x8c   : > { %v10708_v24 = vor.u32 %v9786_v2, %v7773_v1  ;;  %v9777_v2 = vld [vmem:[#allocation2 + $0x2a4] sm:$0xf] }
  0x8e   : > { %864 = vmatpush.bf16.msrb.mxu0 %v16927_v18  ;;  %878 = vmatpush.bf16.msrb.mxu1 %v16928_v13  ;;  %v10701_v13 = vor.u32 %v9787_v30, %v7763_v36  ;;  %16933 = vst [vmem:[#allocation76_spill] sm:$0xff] %v10708_v24  ;;  %v9782_v36 = vld [vmem:[#allocation2 + $0x2cc] sm:$0xf]  ;;  %v7757_v30 = vld [vmem:[#allocation2 + $0x2d8] sm:$0xf0] }
  0x8f   : > { %892 = vmatpush.bf16.msrb.mxu2 %v10598_v39  ;;  %906 = vmatpush.bf16.msrb.mxu3 %v16929_v53  ;;  %v10703_v39 = vor.u32 %v9785_v11, %v7765_v40  ;;  %v10705_v53 = vor.u32 %v9788_v42, %v7771_v4  ;;  %v10714_v4 = vor.u32 %v9783_v48, %v7747_v49  ;;  %v7731_v40 = vld [vmem:[#allocation2 + $0x2a0] sm:$0xf]  ;;  %v9779_v42 = vld [vmem:[#allocation2 + $0x2ac] sm:$0xf0]  ;;  %v7739_v48 = vld [vmem:[#allocation2 + $0x2a8] sm:$0xf] }
  0x90   : > { %16930 = vst [vmem:[#allocation73_spill] sm:$0xff] %v10701_v13  ;;  %v9780_v49 = vld [vmem:[#allocation2 + $0x2b4] sm:$0xf0] }
  0x91   : > { %16931 = vst [vmem:[#allocation74_spill] sm:$0xff] %v10703_v39  ;;  %v9792_v18 = vld [vmem:[#allocation2 + $0x314] sm:$0xf0] }
  0x92   : > { %865 = vmatpush.bf16.msrb.mxu0 %v10604_v60  ;;  %879 = vmatpush.bf16.msrb.mxu1 %v10608_v22  ;;  %16932 = vst [vmem:[#allocation75_spill] sm:$0xff] %v10705_v53  ;;  %v7749_v22 = vld [vmem:[#allocation2 + $0x2d0] sm:$0xf0]  ;;  %v7787_v60 = vld [vmem:[#allocation2 + $0x308] sm:$0xf] }
  0x93   : > { %893 = vmatpush.bf16.msrb.mxu2 %v10610_v0  ;;  %907 = vmatpush.bf16.msrb.mxu3 %v10613_v31  ;;  %v9784_v0 = vld [vmem:[#allocation2 + $0x2d4] sm:$0xf0]  ;;  %16934 = vst [vmem:[#allocation77_spill] sm:$0xff] %v10714_v4  ;;  %v10718_v1 = vor.u32 %v9781_v26, %v7749_v22  ;;  %v16937_v31 = vld [vmem:[#allocation45_spill] sm:$0xff]  ;;  %v7741_v22 = vld [vmem:[#allocation2 + $0x2b8] sm:$0xf0] }
  0x94   : > { %v10720_v11 = vor.u32 %v9784_v0, %v7755_v63  ;;  %v9778_v26 = vld [vmem:[#allocation2 + $0x2ac] sm:$0xf]  ;;  %v10730_v63 = vor.u32 %v9779_v42, %v7731_v40  ;;  %v7725_v42 = vld [vmem:[#allocation2 + $0x298] sm:$0xf0] }
  0x95   : > { %16935 = vst [vmem:[#allocation78_spill] sm:$0xff] %v10718_v1  ;;  %v10739_v55 = vor.u32 %v9778_v26, %v7741_v22  ;;  %v9774_v40 = vld [vmem:[#allocation2 + $0x28c] sm:$0xf]  ;;  %v9769_v26 = vld [vmem:[#allocation2 + $0x264] sm:$0xf] }
  0x96   : > { %866 = vmatpush.bf16.msrb.mxu0 %v10616_v37  ;;  %880 = vmatpush.bf16.msrb.mxu1 %v10620_v19  ;;  %16936 = vst [vmem:[#allocation79_spill] sm:$0xff] %v10720_v11  ;;  %v9775_v19 = vld [vmem:[#allocation2 + $0x28c] sm:$0xf0]  ;;  %v10751_v22 = vor.u32 %v9774_v40, %v7725_v42  ;;  %v9765_v40 = vld [vmem:[#allocation2 + $0x244] sm:$0xf] }
  0x97   : > { %894 = vmatpush.bf16.msrb.mxu2 %v10622_v54  ;;  %908 = vmatpush.bf16.msrb.mxu3 %v10627_v10  ;;  %v10724_v10 = vor.u32 %v9782_v36, %v7757_v30  ;;  %v7733_v54 = vld [vmem:[#allocation2 + $0x2b0] sm:$0xf0]  ;;  %16939 = vst [vmem:[#allocation80_spill] sm:$0xff] %v10730_v63  ;;  %v10736_v36 = vor.u32 %v9780_v49, %v7739_v48  ;;  %v7715_v30 = vld [vmem:[#allocation2 + $0x280] sm:$0xf] }
  0x98   : > { %v10734_v0 = vor.u32 %v9777_v2, %v7733_v54  ;;  %16942 = vst [vmem:[#allocation83_spill] sm:$0xff] %v10739_v55  ;;  %v10742_v52 = vor.u32 %v9775_v19, %v7715_v30  ;;  %v10748_v2 = vor.u32 %v9776_v14, %v7723_v35  ;;  %v7699_v48 = vld [vmem:[#allocation2 + $0x260] sm:$0xf]  ;;  %v9771_v49 = vld [vmem:[#allocation2 + $0x26c] sm:$0xf0]  ;;  %v10758_v14 = vor.u32 %v9769_v26, %v7701_v51 }
  0x99   : > { %867 = vmatmul.bf16.vlgmr.msrb.gmra.mxu0 %v16937_v31  ;;  %16938 = vst [vmem:[#allocation45_spill] sm:$0xff] %v10724_v10  ;;  %881 = vmatmul.bf16.vlgmr.msrb.gmra.mxu1 %v16937_v31  ;;  %v9770_v19 = vld [vmem:[#allocation2 + $0x26c] sm:$0xf]  ;;  %v7709_v30 = vld [vmem:[#allocation2 + $0x278] sm:$0xf0]  ;;  %v10754_v27 = vor.u32 %v9771_v49, %v7699_v48  ;;  %v10760_v35 = vor.u32 %v9772_v28, %v7707_v62 }
  0x9a   : > { %1110 = vmatpush.bf16.msra.mxu0 %v10701_v13  ;;  %1124 = vmatpush.bf16.msra.mxu1 %v10703_v39  ;;  %16940 = vst [vmem:[#allocation81_spill] sm:$0xff] %v10734_v0  ;;  %v10763_v42 = vor.u32 %v9770_v19, %v7709_v30  ;;  %v9766_v48 = vld [vmem:[#allocation2 + $0x24c] sm:$0xf]  ;;  %v7693_v49 = vld [vmem:[#allocation2 + $0x258] sm:$0xf0]  ;;  %v10770_v62 = vor.u32 %v9765_v40, %v7685_v50 }
  0x9b   : > { %1138 = vmatpush.bf16.msra.mxu2 %v10705_v53  ;;  %1152 = vmatpush.bf16.msra.mxu3 %v10708_v24  ;;  %16941 = vst [vmem:[#allocation82_spill] sm:$0xff] %v10736_v36  ;;  %v10772_v28 = vor.u32 %v9768_v6, %v7691_v9  ;;  %v7667_v51 = vld [vmem:[#allocation2 + $0x220] sm:$0xf]  ;;  %v9763_v26 = vld [vmem:[#allocation2 + $0x22c] sm:$0xf0]  ;;  %v10775_v30 = vor.u32 %v9766_v48, %v7693_v49 }
  0x9c   : > { %895 = vmatmul.bf16.vlgmr.msrb.gmra.mxu2 %v16937_v31  ;;  %909 = vmatmul.bf16.vlgmr.msrb.gmra.mxu3 %v16937_v31  ;;  %v7717_v31 = vld [vmem:[#allocation2 + $0x290] sm:$0xf0]  ;;  %16943 = vst [vmem:[#allocation84_spill] sm:$0xff] %v10742_v52  ;;  %v9761_v19 = vld [vmem:[#allocation2 + $0x224] sm:$0xf]  ;;  %v10778_v46 = vor.u32 %v9763_v26, %v7667_v51  ;;  %v10784_v6 = vor.u32 %v9764_v25, %v7675_v57 }
  0x9d   : > { %v10746_v54 = vor.u32 %v9773_v61, %v7717_v31  ;;  %16945 = vst [vmem:[#allocation86_spill] sm:$0xff] %v10748_v2  ;;  %v7683_v61 = vld [vmem:[#allocation2 + $0x240] sm:$0xf]  ;;  %v9767_v31 = vld [vmem:[#allocation2 + $0x24c] sm:$0xf0]  ;;  %v10782_v50 = vor.u32 %v9761_v19, %v7669_v58  ;;  %v10796_v57 = vor.u32 %v9760_v34, %v7659_v12 }
  0x9e   : > { %1111 = vmatpush.bf16.msra.mxu0 %v10714_v4  ;;  %1125 = vmatpush.bf16.msra.mxu1 %v10718_v1  ;;  %16946 = vst [vmem:[#allocation87_spill] sm:$0xff] %v10751_v22  ;;  %v10766_v38 = vor.u32 %v9767_v31, %v7683_v61  ;;  %v9762_v61 = vld [vmem:[#allocation2 + $0x22c] sm:$0xf]  ;;  %v7677_v31 = vld [vmem:[#allocation2 + $0x238] sm:$0xf0] }
  0x9f   : > { %1139 = vmatpush.bf16.msra.mxu2 %v10720_v11  ;;  %1153 = vmatpush.bf16.msra.mxu3 %v10724_v10  ;;  %16944 = vst [vmem:[#allocation85_spill] sm:$0xff] %v10746_v54  ;;  %v7651_v9 = vld [vmem:[#allocation2 + $0x200] sm:$0xf]  ;;  %v9759_v40 = vld [vmem:[#allocation2 + $0x20c] sm:$0xf0]  ;;  %v10787_v49 = vor.u32 %v9762_v61, %v7677_v31 }
  0xa0   : > { %16947 = vst [vmem:[#allocation88_spill] sm:$0xff] %v10754_v27  ;;  %v9757_v48 = vld [vmem:[#allocation2 + $0x204] sm:$0xf]  ;;  %v9758_v51 = vld [vmem:[#allocation2 + $0x20c] sm:$0xf]  ;;  %v10790_v33 = vor.u32 %v9759_v40, %v7651_v9 }
  0xa1   : > { %16948 = vst [vmem:[#allocation89_spill] sm:$0xff] %v10758_v14  ;;  %v7661_v26 = vld [vmem:[#allocation2 + $0x218] sm:$0xf0]  ;;  %v10794_v25 = vor.u32 %v9757_v48, %v7653_v45  ;;  %v7891_v45 = vld [vmem:[#allocation2 + $0x3e0] sm:$0xf] }
  0xa2   : > { %1112 = vmatpush.bf16.msra.mxu0 %v10730_v63  ;;  %1126 = vmatpush.bf16.msra.mxu1 %v10734_v0  ;;  %16949 = vst [vmem:[#allocation90_spill] sm:$0xff] %v10760_v35  ;;  %v10799_v58 = vor.u32 %v9758_v51, %v7661_v26  ;;  %v9817_v19 = vld [vmem:[#allocation2 + $0x3e4] sm:$0xf]  ;;  %v7893_v61 = vld [vmem:[#allocation2 + $0x3f0] sm:$0xf0] }
  0xa3   : > { %1140 = vmatpush.bf16.msra.mxu2 %v10736_v36  ;;  %1154 = vmatpush.bf16.msra.mxu3 %v10739_v55  ;;  %16950 = vst [vmem:[#allocation91_spill] sm:$0xff] %v10763_v42  ;;  %v7899_v31 = vld [vmem:[#allocation2 + $0x3e8] sm:$0xf]  ;;  %v9820_v9 = vld [vmem:[#allocation2 + $0x3f4] sm:$0xf0] }
  0xa4   : > { %16951 = vst [vmem:[#allocation92_spill] sm:$0xff] %v10766_v38  ;;  %v9818_v40 = vld [vmem:[#allocation2 + $0x3ec] sm:$0xf]  ;;  %v7901_v51 = vld [vmem:[#allocation2 + $0x3f8] sm:$0xf0] }
  0xa5   : > { %16952 = vst [vmem:[#allocation93_spill] sm:$0xff] %v10770_v62  ;;  %v7781_v37 = vld [vmem:[#allocation2 + $0x310] sm:$0xf0] }
  0xa6   : > { %1113 = vmatpush.bf16.msra.mxu0 %v10742_v52  ;;  %1127 = vmatpush.bf16.msra.mxu1 %v10746_v54  ;;  %16953 = vst [vmem:[#allocation94_spill] sm:$0xff] %v10772_v28 }
  0xa7   : > { %1141 = vmatpush.bf16.msra.mxu2 %v10748_v2  ;;  %1155 = vmatpush.bf16.msra.mxu3 %v10751_v22  ;;  %16954 = vst [vmem:[#allocation95_spill] sm:$0xff] %v10775_v30 }
  0xa8   : > { %16955 = vst [vmem:[#allocation96_spill] sm:$0xff] %v10778_v46 }
  0xa9   : > { %16956 = vst [vmem:[#allocation97_spill] sm:$0xff] %v10782_v50 }
  0xaa   : > { %1114 = vmatpush.bf16.msra.mxu0 %v10754_v27  ;;  %1128 = vmatpush.bf16.msra.mxu1 %v10758_v14  ;;  %16957 = vst [vmem:[#allocation98_spill] sm:$0xff] %v10784_v6 }
  0xab   : > { %1142 = vmatpush.bf16.msra.mxu2 %v10760_v35  ;;  %1156 = vmatpush.bf16.msra.mxu3 %v10763_v42  ;;  %16958 = vst [vmem:[#allocation99_spill] sm:$0xff] %v10787_v49 }
  0xac   : > { %16959 = vst [vmem:[#allocation100_spill] sm:$0xff] %v10790_v33 }
  0xad   : > { %16960 = vst [vmem:[#allocation101_spill] sm:$0xff] %v10794_v25 }
  0xae   : > { %1115 = vmatpush.bf16.msra.mxu0 %v10766_v38  ;;  %1129 = vmatpush.bf16.msra.mxu1 %v10770_v62  ;;  %16961 = vst [vmem:[#allocation102_spill] sm:$0xff] %v10796_v57 }
  0xaf   : > { %1143 = vmatpush.bf16.msra.mxu2 %v10772_v28  ;;  %1157 = vmatpush.bf16.msra.mxu3 %v10775_v30  ;;  %16962 = vst [vmem:[#allocation103_spill] sm:$0xff] %v10799_v58 }
  0xb2   : > { %1116 = vmatpush.bf16.msra.mxu0 %v10778_v46  ;;  %1130 = vmatpush.bf16.msra.mxu1 %v10782_v50 }
  0xb3   : > { %1144 = vmatpush.bf16.msra.mxu2 %v10784_v6  ;;  %1158 = vmatpush.bf16.msra.mxu3 %v10787_v49 }
  0xb6   : > { %1117 = vmatpush.bf16.msra.mxu0 %v10790_v33  ;;  %1131 = vmatpush.bf16.msra.mxu1 %v10794_v25 }
  0xb7   : > { %1145 = vmatpush.bf16.msra.mxu2 %v10796_v57  ;;  %1159 = vmatpush.bf16.msra.mxu3 %v10799_v58 }
  0xb9   : > { %1118 = vmatmul.bf16.vlgmr.msra.gmra.mxu0 %v10664_v32  ;;  %1132 = vmatmul.bf16.vlgmr.msra.gmra.mxu1 %v10664_v32 }
  0xba   : > { %1175 = vmatpush.bf16.msrb.mxu0 %v10701_v13  ;;  %1189 = vmatpush.bf16.msrb.mxu1 %v10703_v39  ;;  %v7853_v39 = vld [vmem:[#allocation2 + $0x398] sm:$0xf0] }
  0xbb   : > { %1203 = vmatpush.bf16.msrb.mxu2 %v10705_v53  ;;  %1217 = vmatpush.bf16.msrb.mxu3 %v10708_v24  ;;  %v9807_v24 = vld [vmem:[#allocation2 + $0x38c] sm:$0xf0]  ;;  %v9806_v53 = vld [vmem:[#allocation2 + $0x38c] sm:$0xf] }
  0xbc   : > { %1146 = vmatmul.bf16.vlgmr.msra.gmra.mxu2 %v10664_v32  ;;  %1160 = vmatmul.bf16.vlgmr.msra.gmra.mxu3 %v10664_v32  ;;  %v9819_v32 = vld [vmem:[#allocation2 + $0x3ec] sm:$0xf0] }
  0xbd   : > { %v10828_v12 = vpop.f32.mrf.mxu0  ;;  %v10831_v34 = vpop.f32.mrf.mxu1 }
  0xbe   : > { %1176 = vmatpush.bf16.msrb.mxu0 %v10714_v4  ;;  %1190 = vmatpush.bf16.msrb.mxu1 %v10718_v1  ;;  %v7819_v4 = vld [vmem:[#allocation2 + $0x348] sm:$0xf] }
  0xbf   : > { %1204 = vmatpush.bf16.msrb.mxu2 %v10720_v11  ;;  %1218 = vmatpush.bf16.msrb.mxu3 %v10724_v10  ;;  %v9808_v11 = vld [vmem:[#allocation2 + $0x394] sm:$0xf0] }
  0xc2   : > { %1177 = vmatpush.bf16.msrb.mxu0 %v10730_v63  ;;  %1191 = vmatpush.bf16.msrb.mxu1 %v10734_v0  ;;  %v7813_v63 = vld [vmem:[#allocation2 + $0x350] sm:$0xf0] }
  0xc3   : > { %1205 = vmatpush.bf16.msrb.mxu2 %v10736_v36  ;;  %1219 = vmatpush.bf16.msrb.mxu3 %v10739_v55  ;;  %v9805_v36 = vld [vmem:[#allocation2 + $0x384] sm:$0xf] }
  0xc4   : > { %v10838_v48 = vpop.f32.mrf.mxu2  ;;  %v10842_v26 = vpop.f32.mrf.mxu3 }
  0xc5   : > { %v10853_v55 = vpop.f32.mrf.mxu0 }
  0xc6   : > { %1178 = vmatpush.bf16.msrb.mxu0 %v10742_v52  ;;  %1192 = vmatpush.bf16.msrb.mxu1 %v10746_v54  ;;  %v7843_v54 = vld [vmem:[#allocation2 + $0x380] sm:$0xf]  ;;  %v7837_v52 = vld [vmem:[#allocation2 + $0x378] sm:$0xf0] }
  0xc7   : > { %1206 = vmatpush.bf16.msrb.mxu2 %v10748_v2  ;;  %1220 = vmatpush.bf16.msrb.mxu3 %v10751_v22  ;;  %v10847_v22 = vor.u32 %v9819_v32, %v7891_v45  ;;  %v10860_v2 = vpop.f32.mrf.mxu1  ;;  %v7883_v45 = vld [vmem:[#allocation2 + $0x3c8] sm:$0xf]  ;;  %v9816_v32 = vld [vmem:[#allocation2 + $0x3d4] sm:$0xf0] }
  0xc9   : > { %16963 = vst [vmem:[#allocation104_spill] sm:$0xff] %v10847_v22 }
  0xca   : > { %1179 = vmatpush.bf16.msrb.mxu0 %v10754_v27  ;;  %1193 = vmatpush.bf16.msrb.mxu1 %v10758_v14  ;;  %v9815_v14 = vld [vmem:[#allocation2 + $0x3cc] sm:$0xf0]  ;;  %v9802_v27 = vld [vmem:[#allocation2 + $0x36c] sm:$0xf] }
  0xcb   : > { %1207 = vmatpush.bf16.msrb.mxu2 %v10760_v35  ;;  %1221 = vmatpush.bf16.msrb.mxu3 %v10763_v42  ;;  %v7647_v42 = vld [vmem:[%s10523_s29 + $0x11] sm:$0xff]  ;;  %v7875_v35 = vld [vmem:[#allocation2 + $0x3c0] sm:$0xf] }
  0xce   : > { %1180 = vmatpush.bf16.msrb.mxu0 %v10766_v38  ;;  %1194 = vmatpush.bf16.msrb.mxu1 %v10770_v62  ;;  %v10851_v62 = vor.u32 %v9820_v9, %v7899_v31  ;;  %v10866_v31 = vor.u32 %v9815_v14, %v7875_v35  ;;  %v7859_v9 = vld [vmem:[#allocation2 + $0x3a0] sm:$0xf]  ;;  %v7867_v14 = vld [vmem:[#allocation2 + $0x3a8] sm:$0xf]  ;;  %v9812_v35 = vld [vmem:[#allocation2 + $0x3b4] sm:$0xf0] }
  0xcf   : > { %1208 = vmatpush.bf16.msrb.mxu2 %v10772_v28  ;;  %1222 = vmatpush.bf16.msrb.mxu3 %v10775_v30  ;;  %v7648_v30 = vld [vmem:[%s10523_s29 + $0x19] sm:$0x1f]  ;;  %v10849_v28 = vor.u32 %v9817_v19, %v7893_v61  ;;  %v9814_v19 = vld [vmem:[#allocation2 + $0x3cc] sm:$0xf]  ;;  %v9801_v38 = vld [vmem:[#allocation2 + $0x364] sm:$0xf] }
  0xd0   : > { %16965 = vst [vmem:[#allocation106_spill] sm:$0xff] %v10851_v62  ;;  %v10858_v10 = vpack.c.bf16 %v7648_v30, %v7647_v42  ;;  %v7885_v61 = vld [vmem:[#allocation2 + $0x3d8] sm:$0xf0]  ;;  %v10872_v30 = vor.u32 %v9816_v32, %v7883_v45  ;;  %v10884_v32 = vpop.f32.mrf.mxu2 }
  0xd1   : > { %16964 = vst [vmem:[#allocation105_spill] sm:$0xff] %v10849_v28 }
  0xd2   : > { %1181 = vmatpush.bf16.msrb.mxu0 %v10778_v46  ;;  %1195 = vmatpush.bf16.msrb.mxu1 %v10782_v50  ;;  %v9813_v50 = vld [vmem:[#allocation2 + $0x3c4] sm:$0xf]  ;;  %16967 = vst [vmem:[#allocation108_spill] sm:$0xff] %v10866_v31  ;;  %v9803_v46 = vld [vmem:[#allocation2 + $0x36c] sm:$0xf0] }
  0xd3   : > { %1209 = vmatpush.bf16.msrb.mxu2 %v10784_v6  ;;  %1223 = vmatpush.bf16.msrb.mxu3 %v10787_v49  ;;  %v10856_v6 = vor.u32 %v9818_v40, %v7901_v51  ;;  %v7877_v49 = vld [vmem:[#allocation2 + $0x3d0] sm:$0xf0]  ;;  %16969 = vst [vmem:[#allocation110_spill] sm:$0xff] %v10872_v30  ;;  %v9811_v40 = vld [vmem:[#allocation2 + $0x3ac] sm:$0xf0] }
  0xd4   : > { %v10870_v42 = vor.u32 %v9813_v50, %v7877_v49  ;;  %v9809_v51 = vld [vmem:[#allocation2 + $0x3a4] sm:$0xf]  ;;  %v9810_v50 = vld [vmem:[#allocation2 + $0x3ac] sm:$0xf]  ;;  %v7869_v49 = vld [vmem:[#allocation2 + $0x3b8] sm:$0xf0]  ;;  %v10882_v45 = vor.u32 %v9811_v40, %v7859_v9 }
  0xd5   : > { %16966 = vst [vmem:[#allocation107_spill] sm:$0xff] %v10856_v6  ;;  %v10895_v0 = vor.u32 %v9810_v50, %v7869_v49  ;;  %v7845_v9 = vld [vmem:[#allocation2 + $0x390] sm:$0xf0]  ;;  %v7851_v40 = vld [vmem:[#allocation2 + $0x388] sm:$0xf] }
  0xd6   : > { %1182 = vmatpush.bf16.msrb.mxu0 %v10790_v33  ;;  %1196 = vmatpush.bf16.msrb.mxu1 %v10794_v25  ;;  %16968 = vst [vmem:[#allocation109_spill] sm:$0xff] %v10870_v42  ;;  %v10892_v25 = vpop.f32.mrf.mxu3  ;;  %v755_v1 = vpop.f32.mrf.mxu0  ;;  %v10908_v50 = vor.u32 %v9805_v36, %v7845_v9  ;;  %v10910_v49 = vor.u32 %v9808_v11, %v7851_v40  ;;  %v7827_v33 = vld [vmem:[#allocation2 + $0x360] sm:$0xf] }
  0xd7   : > { %1210 = vmatpush.bf16.msrb.mxu2 %v10796_v57  ;;  %1224 = vmatpush.bf16.msrb.mxu3 %v10799_v58  ;;  %v10876_v58 = vor.u32 %v9814_v19, %v7885_v61  ;;  %v7861_v57 = vld [vmem:[#allocation2 + $0x3b0] sm:$0xf0]  ;;  %16971 = vst [vmem:[#allocation112_spill] sm:$0xff] %v10882_v45  ;;  %v10890_v61 = vor.u32 %v9812_v35, %v7867_v14  ;;  %v7811_v9 = vld [vmem:[#allocation2 + $0x340] sm:$0xf] }
  0xd8   : > { %v10888_v19 = vor.u32 %v9809_v51, %v7861_v57  ;;  %16974 = vst [vmem:[#allocation115_spill] sm:$0xff] %v10895_v0  ;;  %v10899_v57 = vadd.f32 %v755_v1, %v10828_v12  ;;  %v769_v51 = vpop.f32.mrf.mxu1  ;;  %v10901_v14 = vor.u32 %v9807_v24, %v7843_v54  ;;  %v10913_v1 = vor.u32 %v9806_v53, %v7853_v39  ;;  %v7829_v24 = vld [vmem:[#allocation2 + $0x370] sm:$0xf0]  ;;  %v7835_v54 = vld [vmem:[#allocation2 + $0x368] sm:$0xf] }
  0xd9   : > { %1183 = vmatmul.bf16.vlgmr.msrb.gmra.mxu0 %v10858_v10  ;;  %16970 = vst [vmem:[#allocation111_spill] sm:$0xff] %v10876_v58  ;;  %1197 = vmatmul.bf16.vlgmr.msrb.gmra.mxu1 %v10858_v10  ;;  %v10906_v35 = vadd.f32 %v769_v51, %v10831_v34  ;;  %v9804_v12 = vld [vmem:[#allocation2 + $0x374] sm:$0xf0]  ;;  %v10916_v34 = vor.u32 %v9803_v46, %v7827_v33  ;;  %v9799_v39 = vld [vmem:[#allocation2 + $0x34c] sm:$0xf0] }
  0xda   : > { %1434 = vmatpush.bf16.msra.mxu0 %v10847_v22  ;;  %1448 = vmatpush.bf16.msra.mxu1 %v10849_v28  ;;  %16972 = vst [vmem:[#allocation113_spill] sm:$0xff] %v10888_v19  ;;  %v10920_v11 = vor.u32 %v9801_v38, %v7829_v24  ;;  %v10922_v36 = vor.u32 %v9804_v12, %v7835_v54  ;;  %v9797_v53 = vld [vmem:[#allocation2 + $0x344] sm:$0xf]  ;;  %v9800_v33 = vld [vmem:[#allocation2 + $0x354] sm:$0xf0] }
  0xdb   : > { %1462 = vmatpush.bf16.msra.mxu2 %v10851_v62  ;;  %1476 = vmatpush.bf16.msra.mxu3 %v10856_v6  ;;  %16973 = vst [vmem:[#allocation114_spill] sm:$0xff] %v10890_v61  ;;  %v10925_v40 = vor.u32 %v9802_v27, %v7837_v52  ;;  %v7821_v38 = vld [vmem:[#allocation2 + $0x358] sm:$0xf0]  ;;  %v10934_v54 = vor.u32 %v9799_v39, %v7811_v9  ;;  %v9795_v12 = vld [vmem:[#allocation2 + $0x32c] sm:$0xf0] }
  0xdc   : > { %1211 = vmatmul.bf16.vlgmr.msrb.gmra.mxu2 %v10858_v10  ;;  %1225 = vmatmul.bf16.vlgmr.msrb.gmra.mxu3 %v10858_v10  ;;  %16975 = vst [vmem:[#allocation116_spill] sm:$0xff] %v10901_v14  ;;  %v10938_v27 = vor.u32 %v9797_v53, %v7813_v63  ;;  %v10940_v52 = vor.u32 %v9800_v33, %v7819_v4  ;;  %v9794_v9 = vld [vmem:[#allocation2 + $0x32c] sm:$0xf]  ;;  %v7805_v39 = vld [vmem:[#allocation2 + $0x338] sm:$0xf0] }
  0xdd   : > { %16976 = vst [vmem:[#allocation117_spill] sm:$0xff] %v10908_v50  ;;  %v10943_v17 = vor.u32 %v9798_v21, %v7821_v38  ;;  %v7779_v53 = vld [vmem:[#allocation2 + $0x300] sm:$0xf]  ;;  %v9791_v21 = vld [vmem:[#allocation2 + $0x30c] sm:$0xf0]  ;;  %v10955_v38 = vor.u32 %v9794_v9, %v7805_v39 }
  0xde   : > { %1435 = vmatpush.bf16.msra.mxu0 %v10866_v31  ;;  %1449 = vmatpush.bf16.msra.mxu1 %v10870_v42  ;;  %16977 = vst [vmem:[#allocation118_spill] sm:$0xff] %v10910_v49  ;;  %v9789_v33 = vld [vmem:[#allocation2 + $0x304] sm:$0xf]  ;;  %v10958_v41 = vor.u32 %v9791_v21, %v7779_v53  ;;  %v8021_v39 = vld [vmem:[#allocation2 + $0x4e0] sm:$0xf] }
  0xdf   : > { %1463 = vmatpush.bf16.msra.mxu2 %v10872_v30  ;;  %1477 = vmatpush.bf16.msra.mxu3 %v10876_v58  ;;  %16978 = vst [vmem:[#allocation119_spill] sm:$0xff] %v10913_v1  ;;  %v783_v51 = vpop.f32.mrf.mxu2  ;;  %v797_v13 = vpop.f32.mrf.mxu3  ;;  %v9851_v53 = vld [vmem:[#allocation2 + $0x4ec] sm:$0xf0]  ;;  %v9849_v21 = vld [vmem:[#allocation2 + $0x4e4] sm:$0xf] }
  0xe0   : > { %16979 = vst [vmem:[#allocation120_spill] sm:$0xff] %v10916_v34  ;;  %v10928_v46 = vadd.f32 %v783_v51, %v10838_v48  ;;  %v10932_v24 = vadd.f32 %v797_v13, %v10842_v26  ;;  %v7795_v48 = vld [vmem:[#allocation2 + $0x320] sm:$0xf]  ;;  %v9793_v51 = vld [vmem:[#allocation2 + $0x324] sm:$0xf] }
  0xe1   : > { %16980 = vst [vmem:[#allocation121_spill] sm:$0xff] %v10920_v11  ;;  %v7803_v13 = vld [vmem:[#allocation2 + $0x328] sm:$0xf]  ;;  %v9796_v26 = vld [vmem:[#allocation2 + $0x334] sm:$0xf0]  ;;  %v10946_v7 = vor.u32 %v9795_v12, %v7795_v48  ;;  %v10950_v4 = vor.u32 %v9793_v51, %v7797_v8  ;;  %v10962_v8 = vor.u32 %v9789_v33, %v7781_v37  ;;  %v10964_v51 = vor.u32 %v9792_v18, %v7787_v60  ;;  %v10986_v60 = vpop.f32.mrf.mxu0  ;;  %v10990_v37 = vpop.f32.mrf.mxu1 }
  0xe2   : > { %1436 = vmatpush.bf16.msra.mxu0 %v10882_v45  ;;  %1450 = vmatpush.bf16.msra.mxu1 %v10888_v19  ;;  %16981 = vst [vmem:[#allocation122_spill] sm:$0xff] %v10922_v36  ;;  %v10952_v63 = vor.u32 %v9796_v26, %v7803_v13  ;;  %v9790_v48 = vld [vmem:[#allocation2 + $0x30c] sm:$0xf]  ;;  %v7789_v12 = vld [vmem:[#allocation2 + $0x318] sm:$0xf0] }
  0xe3   : > { %1464 = vmatpush.bf16.msra.mxu2 %v10890_v61  ;;  %1478 = vmatpush.bf16.msra.mxu3 %v10895_v0  ;;  %16982 = vst [vmem:[#allocation123_spill] sm:$0xff] %v10925_v40  ;;  %v10967_v13 = vor.u32 %v9790_v48, %v7789_v12  ;;  %v8023_v33 = vld [vmem:[#allocation2 + $0x4f0] sm:$0xf0]  ;;  %v8029_v48 = vld [vmem:[#allocation2 + $0x4e8] sm:$0xf] }
  0xe4   : > { %16983 = vst [vmem:[#allocation124_spill] sm:$0xff] %v10934_v54  ;;  %v9852_v12 = vld [vmem:[#allocation2 + $0x4f4] sm:$0xf0] }
  0xe5   : > { %16984 = vst [vmem:[#allocation125_spill] sm:$0xff] %v10938_v27 }
  0xe6   : > { %1437 = vmatpush.bf16.msra.mxu0 %v10901_v14  ;;  %1451 = vmatpush.bf16.msra.mxu1 %v10908_v50  ;;  %16985 = vst [vmem:[#allocation126_spill] sm:$0xff] %v10940_v52 }
  0xe7   : > { %1465 = vmatpush.bf16.msra.mxu2 %v10910_v49  ;;  %1479 = vmatpush.bf16.msra.mxu3 %v10913_v1  ;;  %16986 = vst [vmem:[#allocation127_spill] sm:$0xff] %v10943_v17  ;;  %v11000_v18 = vpop.f32.mrf.mxu3 }
  0xe8   : > { %16987 = vst [vmem:[#allocation128_spill] sm:$0xff] %v10946_v7 }
  0xe9   : > { %16988 = vst [vmem:[#allocation129_spill] sm:$0xff] %v10950_v4 }
  0xea   : > { %1438 = vmatpush.bf16.msra.mxu0 %v10916_v34  ;;  %1452 = vmatpush.bf16.msra.mxu1 %v10920_v11  ;;  %16989 = vst [vmem:[#allocation130_spill] sm:$0xff] %v10952_v63 }
  0xeb   : > { %1466 = vmatpush.bf16.msra.mxu2 %v10922_v36  ;;  %1480 = vmatpush.bf16.msra.mxu3 %v10925_v40  ;;  %16990 = vst [vmem:[#allocation131_spill] sm:$0xff] %v10955_v38 }
  0xec   : > { %16991 = vst [vmem:[#allocation132_spill] sm:$0xff] %v10958_v41 }
  0xed   : > { %16992 = vst [vmem:[#allocation133_spill] sm:$0xff] %v10962_v8 }
  0xee   : > { %1439 = vmatpush.bf16.msra.mxu0 %v10934_v54  ;;  %1453 = vmatpush.bf16.msra.mxu1 %v10938_v27  ;;  %16993 = vst [vmem:[#allocation134_spill] sm:$0xff] %v10964_v51 }
  0xef   : > { %1467 = vmatpush.bf16.msra.mxu2 %v10940_v52  ;;  %1481 = vmatpush.bf16.msra.mxu3 %v10943_v17  ;;  %16994 = vst [vmem:[#allocation135_spill] sm:$0xff] %v10967_v13 }
  0xf2   : > { %1440 = vmatpush.bf16.msra.mxu0 %v10946_v7  ;;  %1454 = vmatpush.bf16.msra.mxu1 %v10950_v4 }
  0xf3   : > { %1468 = vmatpush.bf16.msra.mxu2 %v10952_v63  ;;  %1482 = vmatpush.bf16.msra.mxu3 %v10955_v38 }
  0xf6   : > { %1441 = vmatpush.bf16.msra.mxu0 %v10958_v41  ;;  %1455 = vmatpush.bf16.msra.mxu1 %v10962_v8  ;;  %v11004_v26 = vpop.f32.mrf.mxu0  ;;  %v11007_v9 = vpop.f32.mrf.mxu1 }
  0xf7   : > { %1469 = vmatpush.bf16.msra.mxu2 %v10964_v51  ;;  %1483 = vmatpush.bf16.msra.mxu3 %v10967_v13 }
  0xf9   : > { %1442 = vmatmul.bf16.vlgmr.msra.gmra.mxu0 %v10858_v10  ;;  %1456 = vmatmul.bf16.vlgmr.msra.gmra.mxu1 %v10858_v10 }
  0xfa   : > { %1499 = vmatpush.bf16.msrb.mxu0 %v10847_v22  ;;  %1513 = vmatpush.bf16.msrb.mxu1 %v10849_v28  ;;  %v9834_v22 = vld [vmem:[#allocation2 + $0x46c] sm:$0xf] }
  0xfb   : > { %1527 = vmatpush.bf16.msrb.mxu2 %v10851_v62  ;;  %1541 = vmatpush.bf16.msrb.mxu3 %v10856_v6  ;;  %v9847_v6 = vld [vmem:[#allocation2 + $0x4cc] sm:$0xf0]  ;;  %v9837_v62 = vld [vmem:[#allocation2 + $0x484] sm:$0xf] }
  0xfc   : > { %1470 = vmatmul.bf16.vlgmr.msra.gmra.mxu2 %v10858_v10  ;;  %1484 = vmatmul.bf16.vlgmr.msra.gmra.mxu3 %v10858_v10  ;;  %v10997_v10 = vpop.f32.mrf.mxu2 }
  0xfe   : > { %1500 = vmatpush.bf16.msrb.mxu0 %v10866_v31  ;;  %1514 = vmatpush.bf16.msrb.mxu1 %v10870_v42  ;;  %v9839_v42 = vld [vmem:[#allocation2 + $0x48c] sm:$0xf0]  ;;  %v9833_v31 = vld [vmem:[#allocation2 + $0x464] sm:$0xf] }
  0xff   : > { %1528 = vmatpush.bf16.msrb.mxu2 %v10872_v30  ;;  %1542 = vmatpush.bf16.msrb.mxu3 %v10876_v58  ;;  %v11027_v58 = vor.u32 %v9852_v12, %v8029_v48  ;;  %v9841_v12 = vld [vmem:[#allocation2 + $0x4a4] sm:$0xf]  ;;  %v7973_v30 = vld [vmem:[#allocation2 + $0x480] sm:$0xf] }
 0x101   : > { %16997 = vst [vmem:[#allocation138_spill] sm:$0xff] %v11027_v58 }
 0x102   : > { %1501 = vmatpush.bf16.msrb.mxu0 %v10882_v45  ;;  %1515 = vmatpush.bf16.msrb.mxu1 %v10888_v19  ;;  %v11036_v19 = vpop.f32.mrf.mxu1  ;;  %v9835_v45 = vld [vmem:[#allocation2 + $0x46c] sm:$0xf0] }
 0x103   : > { %1529 = vmatpush.bf16.msrb.mxu2 %v10890_v61  ;;  %1543 = vmatpush.bf16.msrb.mxu3 %v10895_v0  ;;  %v1272_v0 = vld [vmem:[%s10523_s29 + $0x2] sm:$0xff] }
 0x106   : > { %1502 = vmatpush.bf16.msrb.mxu0 %v10901_v14  ;;  %1516 = vmatpush.bf16.msrb.mxu1 %v10908_v50  ;;  %v8005_v50 = vld [vmem:[#allocation2 + $0x4c0] sm:$0xf] }
 0x107   : > { %1530 = vmatpush.bf16.msrb.mxu2 %v10910_v49  ;;  %1544 = vmatpush.bf16.msrb.mxu3 %v10913_v1  ;;  %v11014_v1 = vpop.f32.mrf.mxu2  ;;  %v11029_v49 = vpop.f32.mrf.mxu0  ;;  %v11042_v48 = vor.u32 %v9847_v6, %v8005_v50  ;;  %v7997_v6 = vld [vmem:[#allocation2 + $0x4a8] sm:$0xf]  ;;  %v9844_v50 = vld [vmem:[#allocation2 + $0x4b4] sm:$0xf0]  ;;  %v7957_v14 = vld [vmem:[#allocation2 + $0x460] sm:$0xf] }
 0x109   : > { %16999 = vst [vmem:[#allocation140_spill] sm:$0xff] %v11042_v48 }
 0x10a   : > { %1503 = vmatpush.bf16.msrb.mxu0 %v10916_v34  ;;  %1517 = vmatpush.bf16.msrb.mxu1 %v10920_v11  ;;  %v11025_v11 = vor.u32 %v9849_v21, %v8023_v33  ;;  %v9846_v21 = vld [vmem:[#allocation2 + $0x4cc] sm:$0xf]  ;;  %v8015_v33 = vld [vmem:[#allocation2 + $0x4d8] sm:$0xf0] }
 0x10b   : > { %1531 = vmatpush.bf16.msrb.mxu2 %v10922_v36  ;;  %1545 = vmatpush.bf16.msrb.mxu3 %v10925_v40  ;;  %v9850_v40 = vld [vmem:[#allocation2 + $0x4ec] sm:$0xf]  ;;  %v11023_v36 = vor.u32 %v9851_v53, %v8021_v39  ;;  %v8013_v39 = vld [vmem:[#allocation2 + $0x4c8] sm:$0xf]  ;;  %v9848_v53 = vld [vmem:[#allocation2 + $0x4d4] sm:$0xf0] }
 0x10c   : > { %16996 = vst [vmem:[#allocation137_spill] sm:$0xff] %v11025_v11  ;;  %v7983_v34 = vld [vmem:[#allocation2 + $0x498] sm:$0xf0] }
 0x10d   : > { %16995 = vst [vmem:[#allocation136_spill] sm:$0xff] %v11023_v36 }
 0x10e   : > { %1504 = vmatpush.bf16.msrb.mxu0 %v10934_v54  ;;  %1518 = vmatpush.bf16.msrb.mxu1 %v10938_v27  ;;  %v8031_v27 = vld [vmem:[#allocation2 + $0x4f8] sm:$0xf0]  ;;  %v9838_v54 = vld [vmem:[#allocation2 + $0x48c] sm:$0xf] }
 0x10f   : > { %1532 = vmatpush.bf16.msrb.mxu2 %v10940_v52  ;;  %1546 = vmatpush.bf16.msrb.mxu3 %v10943_v17  ;;  %v11018_v52 = vpop.f32.mrf.mxu3  ;;  %v1273_v17 = vld [vmem:[%s10523_s29 + $0xa] sm:$0x1f] }
 0x110   : > { %v11034_v61 = vpack.c.bf16 %v1273_v17, %v1272_v0  ;;  %v11048_v0 = vor.u32 %v9848_v53, %v8013_v39  ;;  %v11060_v53 = vpop.f32.mrf.mxu2 }
 0x112   : > { %1505 = vmatpush.bf16.msrb.mxu0 %v10946_v7  ;;  %1519 = vmatpush.bf16.msrb.mxu1 %v10950_v4  ;;  %v9845_v4 = vld [vmem:[#allocation2 + $0x4c4] sm:$0xf]  ;;  %17001 = vst [vmem:[#allocation142_spill] sm:$0xff] %v11048_v0 }
 0x113   : > { %1533 = vmatpush.bf16.msrb.mxu2 %v10952_v63  ;;  %1547 = vmatpush.bf16.msrb.mxu3 %v10955_v38  ;;  %v11032_v63 = vor.u32 %v9850_v40, %v8031_v27  ;;  %v8007_v38 = vld [vmem:[#allocation2 + $0x4d0] sm:$0xf0]  ;;  %v7989_v40 = vld [vmem:[#allocation2 + $0x4a0] sm:$0xf]  ;;  %v9843_v27 = vld [vmem:[#allocation2 + $0x4ac] sm:$0xf0] }
 0x114   : > { %v11046_v17 = vor.u32 %v9845_v4, %v8007_v38  ;;  %v9842_v4 = vld [vmem:[#allocation2 + $0x4ac] sm:$0xf]  ;;  %v7999_v38 = vld [vmem:[#allocation2 + $0x4b8] sm:$0xf0]  ;;  %v11058_v39 = vor.u32 %v9843_v27, %v7989_v40  ;;  %v7975_v40 = vld [vmem:[#allocation2 + $0x490] sm:$0xf0] }
 0x115   : > { %16998 = vst [vmem:[#allocation139_spill] sm:$0xff] %v11032_v63  ;;  %v11071_v28 = vor.u32 %v9842_v4, %v7999_v38  ;;  %v7981_v27 = vld [vmem:[#allocation2 + $0x488] sm:$0xf]  ;;  %v11084_v4 = vor.u32 %v9837_v62, %v7975_v40  ;;  %v7941_v40 = vld [vmem:[#allocation2 + $0x440] sm:$0xf] }
 0x116   : > { %1506 = vmatpush.bf16.msrb.mxu0 %v10958_v41  ;;  %1520 = vmatpush.bf16.msrb.mxu1 %v10962_v8  ;;  %17000 = vst [vmem:[#allocation141_spill] sm:$0xff] %v11046_v17  ;;  %v9840_v41 = vld [vmem:[#allocation2 + $0x494] sm:$0xf0]  ;;  %v868_v7 = vpop.f32.mrf.mxu0 }
 0x117   : > { %1534 = vmatpush.bf16.msrb.mxu2 %v10964_v51  ;;  %1548 = vmatpush.bf16.msrb.mxu3 %v10967_v13  ;;  %v11052_v13 = vor.u32 %v9846_v21, %v8015_v33  ;;  %v7991_v51 = vld [vmem:[#allocation2 + $0x4b0] sm:$0xf0]  ;;  %17003 = vst [vmem:[#allocation144_spill] sm:$0xff] %v11058_v39  ;;  %v11066_v33 = vor.u32 %v9844_v50, %v7997_v6  ;;  %v11068_v8 = vpop.f32.mrf.mxu3 }
 0x118   : > { %v11064_v21 = vor.u32 %v9841_v12, %v7991_v51  ;;  %17006 = vst [vmem:[#allocation147_spill] sm:$0xff] %v11071_v28  ;;  %v11075_v51 = vadd.f32 %v868_v7, %v11004_v26  ;;  %v882_v12 = vpop.f32.mrf.mxu1  ;;  %v11077_v6 = vor.u32 %v9839_v42, %v7973_v30  ;;  %v11086_v38 = vor.u32 %v9840_v41, %v7981_v27  ;;  %v7959_v42 = vld [vmem:[#allocation2 + $0x470] sm:$0xf0]  ;;  %v7965_v30 = vld [vmem:[#allocation2 + $0x468] sm:$0xf] }
 0x119   : > { %1507 = vmatmul.bf16.vlgmr.msrb.gmra.mxu0 %v11034_v61  ;;  %17002 = vst [vmem:[#allocation143_spill] sm:$0xff] %v11052_v13  ;;  %1521 = vmatmul.bf16.vlgmr.msrb.gmra.mxu1 %v11034_v61  ;;  %v11082_v50 = vadd.f32 %v882_v12, %v11007_v9  ;;  %v11089_v7 = vor.u32 %v9838_v54, %v7983_v34  ;;  %v9836_v26 = vld [vmem:[#allocation2 + $0x474] sm:$0xf0]  ;;  %v9831_v34 = vld [vmem:[#allocation2 + $0x44c] sm:$0xf0] }
 0x11a   : > { %1758 = vmatpush.bf16.msra.mxu0 %v11023_v36  ;;  %1772 = vmatpush.bf16.msra.mxu1 %v11025_v11  ;;  %17004 = vst [vmem:[#allocation145_spill] sm:$0xff] %v11064_v21  ;;  %v11092_v9 = vor.u32 %v9835_v45, %v7957_v14  ;;  %v11096_v41 = vor.u32 %v9833_v31, %v7959_v42  ;;  %v9829_v54 = vld [vmem:[#allocation2 + $0x444] sm:$0xf]  ;;  %v9832_v45 = vld [vmem:[#allocation2 + $0x454] sm:$0xf0] }
 0x11b   : > { %1786 = vmatpush.bf16.msra.mxu2 %v11027_v58  ;;  %1800 = vmatpush.bf16.msra.mxu3 %v11032_v63  ;;  %17005 = vst [vmem:[#allocation146_spill] sm:$0xff] %v11066_v33  ;;  %v11098_v62 = vor.u32 %v9836_v26, %v7965_v30  ;;  %v11101_v27 = vor.u32 %v9834_v22, %v7967_v15  ;;  %v7951_v31 = vld [vmem:[#allocation2 + $0x458] sm:$0xf0]  ;;  %v9827_v26 = vld [vmem:[#allocation2 + $0x42c] sm:$0xf0] }
 0x11c   : > { %1535 = vmatmul.bf16.vlgmr.msrb.gmra.mxu2 %v11034_v61  ;;  %1549 = vmatmul.bf16.vlgmr.msrb.gmra.mxu3 %v11034_v61  ;;  %17007 = vst [vmem:[#allocation148_spill] sm:$0xff] %v11077_v6  ;;  %v11110_v30 = vor.u32 %v9831_v34, %v7941_v40  ;;  %v11114_v15 = vor.u32 %v9829_v54, %v7943_v47  ;;  %v9826_v40 = vld [vmem:[#allocation2 + $0x42c] sm:$0xf]  ;;  %v7935_v34 = vld [vmem:[#allocation2 + $0x438] sm:$0xf0] }
 0x11d   : > { %17008 = vst [vmem:[#allocation149_spill] sm:$0xff] %v11084_v4  ;;  %v11116_v22 = vor.u32 %v9832_v45, %v7949_v20  ;;  %v11119_v23 = vor.u32 %v9830_v43, %v7951_v31  ;;  %v7909_v54 = vld [vmem:[#allocation2 + $0x400] sm:$0xf]  ;;  %v9823_v43 = vld [vmem:[#allocation2 + $0x40c] sm:$0xf0]  ;;  %v11131_v31 = vor.u32 %v9826_v40, %v7935_v34 }
 0x11e   : > { %1759 = vmatpush.bf16.msra.mxu0 %v11042_v48  ;;  %1773 = vmatpush.bf16.msra.mxu1 %v11046_v17  ;;  %17009 = vst [vmem:[#allocation150_spill] sm:$0xff] %v11086_v38  ;;  %v9821_v45 = vld [vmem:[#allocation2 + $0x404] sm:$0xf]  ;;  %v11134_v3 = vor.u32 %v9823_v43, %v7909_v54 }
 0x11f   : > { %1787 = vmatpush.bf16.msra.mxu2 %v11048_v0  ;;  %1801 = vmatpush.bf16.msra.mxu3 %v11052_v13  ;;  %17010 = vst [vmem:[#allocation151_spill] sm:$0xff] %v11089_v7  ;;  %v896_v12 = vpop.f32.mrf.mxu2  ;;  %v910_v59 = vpop.f32.mrf.mxu3 }
 0x120   : > { %17011 = vst [vmem:[#allocation152_spill] sm:$0xff] %v11092_v9  ;;  %v11104_v14 = vadd.f32 %v896_v12, %v11014_v1  ;;  %v11108_v42 = vadd.f32 %v910_v59, %v11018_v52  ;;  %v7925_v1 = vld [vmem:[#allocation2 + $0x420] sm:$0xf]  ;;  %v9825_v12 = vld [vmem:[#allocation2 + $0x424] sm:$0xf]  ;;  %v11150_v40 = vpop.f32.mrf.mxu1 }
 0x121   : > { %17012 = vst [vmem:[#allocation153_spill] sm:$0xff] %v11096_v41  ;;  %v7933_v59 = vld [vmem:[#allocation2 + $0x428] sm:$0xf]  ;;  %v9828_v52 = vld [vmem:[#allocation2 + $0x434] sm:$0xf0]  ;;  %v11122_v56 = vor.u32 %v9827_v26, %v7925_v1  ;;  %v11126_v20 = vor.u32 %v9825_v12, %v7927_v5  ;;  %v11138_v5 = vor.u32 %v9821_v45, %v7911_v44  ;;  %v11140_v12 = vor.u32 %v9824_v16, %v7917_v29 }
 0x122   : > { %1760 = vmatpush.bf16.msra.mxu0 %v11058_v39  ;;  %1774 = vmatpush.bf16.msra.mxu1 %v11064_v21  ;;  %17013 = vst [vmem:[#allocation154_spill] sm:$0xff] %v11098_v62  ;;  %v11128_v47 = vor.u32 %v9828_v52, %v7933_v59  ;;  %v9822_v1 = vld [vmem:[#allocation2 + $0x40c] sm:$0xf]  ;;  %v7919_v26 = vld [vmem:[#allocation2 + $0x418] sm:$0xf0]  ;;  %v11146_v52 = vpop.f32.mrf.mxu0 }
 0x123   : > { %1788 = vmatpush.bf16.msra.mxu2 %v11066_v33  ;;  %1802 = vmatpush.bf16.msra.mxu3 %v11071_v28  ;;  %17014 = vst [vmem:[#allocation155_spill] sm:$0xff] %v11101_v27  ;;  %v11143_v59 = vor.u32 %v9822_v1, %v7919_v26  ;;  %v7906_v1 = vld [vmem:[%s10523_s29 + $0x1a] sm:$0x1f] }
 0x124   : > { %17015 = vst [vmem:[#allocation156_spill] sm:$0xff] %v11110_v30 }
 0x125   : > { %17016 = vst [vmem:[#allocation157_spill] sm:$0xff] %v11114_v15 }
 0x126   : > { %1761 = vmatpush.bf16.msra.mxu0 %v11077_v6  ;;  %1775 = vmatpush.bf16.msra.mxu1 %v11084_v4  ;;  %17017 = vst [vmem:[#allocation158_spill] sm:$0xff] %v11116_v22 }
 0x127   : > { %1789 = vmatpush.bf16.msra.mxu2 %v11086_v38  ;;  %1803 = vmatpush.bf16.msra.mxu3 %v11089_v7  ;;  %17018 = vst [vmem:[#allocation159_spill] sm:$0xff] %v11119_v23  ;;  %v11164_v16 = vpop.f32.mrf.mxu2  ;;  %v11167_v29 = vpop.f32.mrf.mxu3 }
 0x128   : > { %17019 = vst [vmem:[#allocation160_spill] sm:$0xff] %v11122_v56 }
 0x129   : > { %17020 = vst [vmem:[#allocation161_spill] sm:$0xff] %v11126_v20 }
 0x12a   : > { %1762 = vmatpush.bf16.msra.mxu0 %v11092_v9  ;;  %1776 = vmatpush.bf16.msra.mxu1 %v11096_v41  ;;  %17021 = vst [vmem:[#allocation162_spill] sm:$0xff] %v11128_v47 }
 0x12b   : > { %1790 = vmatpush.bf16.msra.mxu2 %v11098_v62  ;;  %1804 = vmatpush.bf16.msra.mxu3 %v11101_v27  ;;  %17022 = vst [vmem:[#allocation163_spill] sm:$0xff] %v11131_v31 }
 0x12c   : > { %17023 = vst [vmem:[#allocation164_spill] sm:$0xff] %v11134_v3 }
 0x12d   : > { %17024 = vst [vmem:[#allocation165_spill] sm:$0xff] %v11138_v5 }
 0x12e   : > { %1763 = vmatpush.bf16.msra.mxu0 %v11110_v30  ;;  %1777 = vmatpush.bf16.msra.mxu1 %v11114_v15  ;;  %17025 = vst [vmem:[#allocation166_spill] sm:$0xff] %v11140_v12 }
 0x12f   : > { %1791 = vmatpush.bf16.msra.mxu2 %v11116_v22  ;;  %1805 = vmatpush.bf16.msra.mxu3 %v11119_v23  ;;  %17026 = vst [vmem:[#allocation167_spill] sm:$0xff] %v11143_v59 }
 0x132   : > { %1764 = vmatpush.bf16.msra.mxu0 %v11122_v56  ;;  %1778 = vmatpush.bf16.msra.mxu1 %v11126_v20 }
 0x133   : > { %1792 = vmatpush.bf16.msra.mxu2 %v11128_v47  ;;  %1806 = vmatpush.bf16.msra.mxu3 %v11131_v31 }
 0x136   : > { %1765 = vmatpush.bf16.msra.mxu0 %v11134_v3  ;;  %1779 = vmatpush.bf16.msra.mxu1 %v11138_v5  ;;  %v1119_v44 = vpop.f32.mrf.mxu0  ;;  %v1133_v54 = vpop.f32.mrf.mxu1 }
 0x137   : > { %1793 = vmatpush.bf16.msra.mxu2 %v11140_v12  ;;  %1807 = vmatpush.bf16.msra.mxu3 %v11143_v59  ;;  %v11171_v34 = vadd.f32 %v1119_v44, %v10899_v57 }
 0x139   : > { %1766 = vmatmul.bf16.vlgmr.msra.gmra.mxu0 %v11034_v61  ;;  %1780 = vmatmul.bf16.vlgmr.msra.gmra.mxu1 %v11034_v61 }
 0x13a   : > { %1823 = vmatpush.bf16.msrb.mxu0 %v11023_v36  ;;  %1837 = vmatpush.bf16.msrb.mxu1 %v11025_v11 }
 0x13b   : > { %1851 = vmatpush.bf16.msrb.mxu2 %v11027_v58  ;;  %1865 = vmatpush.bf16.msrb.mxu3 %v11032_v63  ;;  %v9931_v58 = vld [vmem:[%s15871_s2 + $0x274] sm:$0xf] }
 0x13c   : > { %1794 = vmatmul.bf16.vlgmr.msra.gmra.mxu2 %v11034_v61  ;;  %1808 = vmatmul.bf16.vlgmr.msra.gmra.mxu3 %v11034_v61  ;;  %v11176_v61 = vadd.f32 %v1133_v54, %v10906_v35 }
 0x13e   : > { %1824 = vmatpush.bf16.msrb.mxu0 %v11042_v48  ;;  %1838 = vmatpush.bf16.msrb.mxu1 %v11046_v17  ;;  %v11204_v26 = vpop.f32.mrf.mxu0  ;;  %v11208_v44 = vpop.f32.mrf.mxu1  ;;  %v9887_v48 = vld [vmem:[%s15871_s2 + $0x110] sm:$0xf0] }
 0x13f   : > { %1852 = vmatpush.bf16.msrb.mxu2 %v11048_v0  ;;  %1866 = vmatpush.bf16.msrb.mxu3 %v11052_v13  ;;  %v1147_v57 = vpop.f32.mrf.mxu2  ;;  %v1161_v45 = vpop.f32.mrf.mxu3 }
 0x140   : > { %v11184_v43 = vadd.f32 %v1147_v57, %v10928_v46  ;;  %v11188_v35 = vadd.f32 %v1161_v45, %v10932_v24  ;;  %v7905_v46 = vld [vmem:[%s10523_s29 + $0x12] sm:$0xff] }
 0x141   : > { %v1822_v24 = vpack.c.bf16 %v7906_v1, %v7905_v46 }
 0x142   : > { %1825 = vmatpush.bf16.msrb.mxu0 %v11058_v39  ;;  %1839 = vmatpush.bf16.msrb.mxu1 %v11064_v21 }
 0x143   : > { %1853 = vmatpush.bf16.msrb.mxu2 %v11066_v33  ;;  %1867 = vmatpush.bf16.msrb.mxu3 %v11071_v28 }
 0x146   : > { %1826 = vmatpush.bf16.msrb.mxu0 %v11077_v6  ;;  %1840 = vmatpush.bf16.msrb.mxu1 %v11084_v4 }
 0x147   : > { %1854 = vmatpush.bf16.msrb.mxu2 %v11086_v38  ;;  %1868 = vmatpush.bf16.msrb.mxu3 %v11089_v7  ;;  %v11211_v54 = vpop.f32.mrf.mxu2  ;;  %v11213_v57 = vpop.f32.mrf.mxu3 }
 0x14a   : > { %1827 = vmatpush.bf16.msrb.mxu0 %v11092_v9  ;;  %1841 = vmatpush.bf16.msrb.mxu1 %v11096_v41 }
 0x14b   : > { %1855 = vmatpush.bf16.msrb.mxu2 %v11098_v62  ;;  %1869 = vmatpush.bf16.msrb.mxu3 %v11101_v27  ;;  %v8175_v62 = vld [vmem:[%s15871_s2 + $0x21c] sm:$0xf0] }
 0x14e   : > { %1828 = vmatpush.bf16.msrb.mxu0 %v11110_v30  ;;  %1842 = vmatpush.bf16.msrb.mxu1 %v11114_v15  ;;  %v9920_v15 = vld [vmem:[%s15871_s2 + $0x218] sm:$0xf0] }
 0x14f   : > { %1856 = vmatpush.bf16.msrb.mxu2 %v11116_v22  ;;  %1870 = vmatpush.bf16.msrb.mxu3 %v11119_v23  ;;  %v8173_v22 = vld [vmem:[%s15871_s2 + $0x210] sm:$0xf] }
 0x152   : > { %1829 = vmatpush.bf16.msrb.mxu0 %v11122_v56  ;;  %1843 = vmatpush.bf16.msrb.mxu1 %v11126_v20 }
 0x153   : > { %1857 = vmatpush.bf16.msrb.mxu2 %v11128_v47  ;;  %1871 = vmatpush.bf16.msrb.mxu3 %v11131_v31 }
 0x156   : > { %1830 = vmatpush.bf16.msrb.mxu0 %v11134_v3  ;;  %1844 = vmatpush.bf16.msrb.mxu1 %v11138_v5  ;;  %v1184_v45 = vpop.f32.mrf.mxu0  ;;  %v1198_v1 = vpop.f32.mrf.mxu1  ;;  %v8473_v3 = vld [vmem:[%s15871_s2 + $0x168] sm:$0xf] }
 0x157   : > { %1858 = vmatpush.bf16.msrb.mxu2 %v11140_v12  ;;  %1872 = vmatpush.bf16.msrb.mxu3 %v11143_v59  ;;  %v11216_v46 = vadd.f32 %v1184_v45, %v11075_v51  ;;  %v11219_v31 = vadd.f32 %v1198_v1, %v11082_v50  ;;  %v8185_v51 = vld [vmem:[%s15871_s2 + $0x228] sm:$0xf]  ;;  %v9923_v50 = vld [vmem:[%s15871_s2 + $0x230] sm:$0xf0]  ;;  %v8187_v1 = vld [vmem:[%s15871_s2 + $0x234] sm:$0xf0] }
 0x158   : > { %v11237_v45 = vor.u32 %v9923_v50, %v8185_v51  ;;  %v9946_v51 = vld [vmem:[%s15871_s2 + $0x2ec] sm:$0xf]  ;;  %v8283_v50 = vld [vmem:[%s15871_s2 + $0x2f4] sm:$0xf0] }
 0x159   : > { %1831 = vmatmul.bf16.vlgmr.msrb.gmra.mxu0 %v1822_v24  ;;  %1845 = vmatmul.bf16.vlgmr.msrb.gmra.mxu1 %v1822_v24 }
 0x15a   : > { %1859 = vmatmul.bf16.vlgmr.msrb.gmra.mxu2 %v1822_v24  ;;  %1873 = vmatmul.bf16.vlgmr.msrb.gmra.mxu3 %v1822_v24  ;;  %17027 = vst [vmem:[#allocation168_spill] sm:$0xff] %v11237_v45 }
 0x15b   : > { %2343 = vmatpush.bf16.msra.mxu0 %v11237_v45 }
 0x15e   : > { %v11227_v24 = vpop.f32.mrf.mxu0  ;;  %v11229_v27 = vpop.f32.mrf.mxu1 }
 0x15f   : > { %v1212_v23 = vpop.f32.mrf.mxu2  ;;  %v1226_v59 = vpop.f32.mrf.mxu3 }
 0x160   : > { %v11222_v12 = vadd.f32 %v1212_v23, %v11104_v14  ;;  %v11225_v5 = vadd.f32 %v1226_v59, %v11108_v42  ;;  %v8281_v23 = vld [vmem:[%s15871_s2 + $0x2e8] sm:$0xf]  ;;  %v9947_v14 = vld [vmem:[%s15871_s2 + $0x2f0] sm:$0xf0]  ;;  %v9922_v42 = vld [vmem:[%s15871_s2 + $0x22c] sm:$0xf] }
 0x161   : > { %v11248_v59 = vor.u32 %v9947_v14, %v8281_v23  ;;  %v11262_v20 = vor.u32 %v9922_v42, %v8187_v1  ;;  %v11264_v23 = vor.u32 %v9946_v51, %v8283_v50  ;;  %v8269_v42 = vld [vmem:[%s15871_s2 + $0x2d0] sm:$0xf]  ;;  %v11284_v51 = vor.u32 %v9920_v15, %v8173_v22  ;;  %v9944_v50 = vld [vmem:[%s15871_s2 + $0x2d8] sm:$0xf0]  ;;  %v8271_v22 = vld [vmem:[%s15871_s2 + $0x2dc] sm:$0xf0] }
 0x162   : > { %v11292_v28 = vor.u32 %v9944_v50, %v8269_v42  ;;  %v8161_v50 = vld [vmem:[%s15871_s2 + $0x1f8] sm:$0xf] }
 0x163   : > { %17028 = vst [vmem:[#allocation169_spill] sm:$0xff] %v11248_v59  ;;  %2357 = vmatpush.bf16.msra.mxu1 %v11248_v59  ;;  %2371 = vmatpush.bf16.msra.mxu2 %v11262_v20  ;;  %v9919_v59 = vld [vmem:[%s15871_s2 + $0x214] sm:$0xf] }
 0x164   : > { %17029 = vst [vmem:[#allocation170_spill] sm:$0xff] %v11262_v20  ;;  %2385 = vmatpush.bf16.msra.mxu3 %v11264_v23  ;;  %2344 = vmatpush.bf16.msra.mxu0 %v11284_v51  ;;  %v11301_v15 = vor.u32 %v9919_v59, %v8175_v62  ;;  %v9917_v20 = vld [vmem:[%s15871_s2 + $0x200] sm:$0xf0]  ;;  %v8257_v62 = vld [vmem:[%s15871_s2 + $0x2b8] sm:$0xf] }
 0x165   : > { %17030 = vst [vmem:[#allocation171_spill] sm:$0xff] %v11264_v23  ;;  %v9943_v23 = vld [vmem:[%s15871_s2 + $0x2d4] sm:$0xf]  ;;  %v11319_v59 = vor.u32 %v9917_v20, %v8161_v50  ;;  %v9940_v20 = vld [vmem:[%s15871_s2 + $0x2bc] sm:$0xf] }
 0x166   : > { %17031 = vst [vmem:[#allocation172_spill] sm:$0xff] %v11284_v51  ;;  %v11307_v42 = vor.u32 %v9943_v23, %v8271_v22  ;;  %v9941_v23 = vld [vmem:[%s15871_s2 + $0x2c0] sm:$0xf0]  ;;  %v9916_v22 = vld [vmem:[%s15871_s2 + $0x1fc] sm:$0xf] }
 0x167   : > { %v11259_v47 = vpop.f32.mrf.mxu2  ;;  %v11266_v14 = vpop.f32.mrf.mxu3  ;;  %17032 = vst [vmem:[#allocation173_spill] sm:$0xff] %v11292_v28  ;;  %2358 = vmatpush.bf16.msra.mxu1 %v11292_v28  ;;  %2372 = vmatpush.bf16.msra.mxu2 %v11301_v15  ;;  %v8163_v28 = vld [vmem:[%s15871_s2 + $0x204] sm:$0xf0]  ;;  %v11331_v41 = vor.u32 %v9941_v23, %v8257_v62  ;;  %v9914_v62 = vld [vmem:[%s15871_s2 + $0x1e8] sm:$0xf0] }
 0x168   : > { %17033 = vst [vmem:[#allocation174_spill] sm:$0xff] %v11301_v15  ;;  %2386 = vmatpush.bf16.msra.mxu3 %v11307_v42  ;;  %v11333_v13 = vor.u32 %v9916_v22, %v8163_v28  ;;  %v8259_v50 = vld [vmem:[%s15871_s2 + $0x2c4] sm:$0xf0]  ;;  %2345 = vmatpush.bf16.msra.mxu0 %v11319_v59  ;;  %v8149_v28 = vld [vmem:[%s15871_s2 + $0x1e0] sm:$0xf] }
 0x169   : > { %17034 = vst [vmem:[#allocation175_spill] sm:$0xff] %v11307_v42  ;;  %v11344_v38 = vor.u32 %v9940_v20, %v8259_v50  ;;  %v8245_v23 = vld [vmem:[%s15871_s2 + $0x2a0] sm:$0xf]  ;;  %v11359_v22 = vor.u32 %v9914_v62, %v8149_v28  ;;  %v9938_v20 = vld [vmem:[%s15871_s2 + $0x2a8] sm:$0xf0] }
 0x16a   : > { %17035 = vst [vmem:[#allocation176_spill] sm:$0xff] %v11319_v59  ;;  %v9913_v50 = vld [vmem:[%s15871_s2 + $0x1e4] sm:$0xf]  ;;  %v8151_v42 = vld [vmem:[%s15871_s2 + $0x1ec] sm:$0xf0]  ;;  %v11373_v63 = vor.u32 %v9938_v20, %v8245_v23 }
 0x16b   : > { %17036 = vst [vmem:[#allocation177_spill] sm:$0xff] %v11331_v41  ;;  %2359 = vmatpush.bf16.msra.mxu1 %v11331_v41  ;;  %2373 = vmatpush.bf16.msra.mxu2 %v11333_v13  ;;  %v11375_v28 = vor.u32 %v9913_v50, %v8151_v42  ;;  %v9937_v62 = vld [vmem:[%s15871_s2 + $0x2a4] sm:$0xf]  ;;  %v8137_v42 = vld [vmem:[%s15871_s2 + $0x1c8] sm:$0xf] }
 0x16c   : > { %17037 = vst [vmem:[#allocation178_spill] sm:$0xff] %v11333_v13  ;;  %2387 = vmatpush.bf16.msra.mxu3 %v11344_v38  ;;  %v8247_v13 = vld [vmem:[%s15871_s2 + $0x2ac] sm:$0xf0]  ;;  %2346 = vmatpush.bf16.msra.mxu0 %v11359_v22  ;;  %v9911_v23 = vld [vmem:[%s15871_s2 + $0x1d0] sm:$0xf0] }
 0x16d   : > { %17038 = vst [vmem:[#allocation179_spill] sm:$0xff] %v11344_v38  ;;  %v11386_v21 = vor.u32 %v9937_v62, %v8247_v13  ;;  %v8233_v20 = vld [vmem:[%s15871_s2 + $0x288] sm:$0xf]  ;;  %v11399_v50 = vor.u32 %v9911_v23, %v8137_v42  ;;  %v9935_v13 = vld [vmem:[%s15871_s2 + $0x290] sm:$0xf0] }
 0x16e   : > { %17039 = vst [vmem:[#allocation180_spill] sm:$0xff] %v11359_v22  ;;  %v9910_v62 = vld [vmem:[%s15871_s2 + $0x1cc] sm:$0xf]  ;;  %v8139_v38 = vld [vmem:[%s15871_s2 + $0x1d4] sm:$0xf0] }
 0x16f   : > { %17040 = vst [vmem:[#allocation181_spill] sm:$0xff] %v11373_v63  ;;  %2360 = vmatpush.bf16.msra.mxu1 %v11373_v63  ;;  %2374 = vmatpush.bf16.msra.mxu2 %v11375_v28  ;;  %v11411_v63 = vor.u32 %v9935_v13, %v8233_v20  ;;  %v11413_v0 = vor.u32 %v9910_v62, %v8139_v38  ;;  %v9934_v42 = vld [vmem:[%s15871_s2 + $0x28c] sm:$0xf]  ;;  %v8235_v23 = vld [vmem:[%s15871_s2 + $0x294] sm:$0xf0] }
 0x170   : > { %17041 = vst [vmem:[#allocation182_spill] sm:$0xff] %v11375_v28  ;;  %2388 = vmatpush.bf16.msra.mxu3 %v11386_v21  ;;  %v8125_v28 = vld [vmem:[%s15871_s2 + $0x1b0] sm:$0xf]  ;;  %2347 = vmatpush.bf16.msra.mxu0 %v11399_v50  ;;  %v11425_v17 = vor.u32 %v9934_v42, %v8235_v23  ;;  %v9908_v38 = vld [vmem:[%s15871_s2 + $0x1b8] sm:$0xf0] }
 0x171   : > { %17042 = vst [vmem:[#allocation183_spill] sm:$0xff] %v11386_v21  ;;  %v8221_v20 = vld [vmem:[%s15871_s2 + $0x270] sm:$0xf]  ;;  %v9932_v13 = vld [vmem:[%s15871_s2 + $0x278] sm:$0xf0]  ;;  %v11437_v62 = vor.u32 %v9908_v38, %v8125_v28 }
 0x172   : > { %17043 = vst [vmem:[#allocation184_spill] sm:$0xff] %v11399_v50  ;;  %v11439_v21 = vor.u32 %v9932_v13, %v8221_v20  ;;  %v9907_v42 = vld [vmem:[%s15871_s2 + $0x1b4] sm:$0xf]  ;;  %v8127_v23 = vld [vmem:[%s15871_s2 + $0x1bc] sm:$0xf0] }
 0x173   : > { %17044 = vst [vmem:[#allocation185_spill] sm:$0xff] %v11411_v63  ;;  %2361 = vmatpush.bf16.msra.mxu1 %v11411_v63  ;;  %2375 = vmatpush.bf16.msra.mxu2 %v11413_v0  ;;  %v11453_v28 = vor.u32 %v9907_v42, %v8127_v23  ;;  %v8223_v38 = vld [vmem:[%s15871_s2 + $0x27c] sm:$0xf0]  ;;  %v8113_v20 = vld [vmem:[%s15871_s2 + $0x198] sm:$0xf] }
 0x174   : > { %17045 = vst [vmem:[#allocation186_spill] sm:$0xff] %v11413_v0  ;;  %v9905_v13 = vld [vmem:[%s15871_s2 + $0x1a0] sm:$0xf0]  ;;  %2389 = vmatpush.bf16.msra.mxu3 %v11425_v17  ;;  %v11469_v42 = vor.u32 %v9931_v58, %v8223_v38  ;;  %v8209_v23 = vld [vmem:[%s15871_s2 + $0x258] sm:$0xf]  ;;  %2348 = vmatpush.bf16.msra.mxu0 %v11437_v62 }
 0x175   : > { %17046 = vst [vmem:[#allocation187_spill] sm:$0xff] %v11425_v17  ;;  %v9929_v0 = vld [vmem:[%s15871_s2 + $0x260] sm:$0xf0]  ;;  %v9904_v22 = vld [vmem:[%s15871_s2 + $0x19c] sm:$0xf]  ;;  %v11483_v51 = vor.u32 %v9905_v13, %v8113_v20 }
 0x176   : > { %v11268_v7 = vpop.f32.mrf.mxu0  ;;  %v11280_v1 = vpop.f32.mrf.mxu1  ;;  %17047 = vst [vmem:[#allocation188_spill] sm:$0xff] %v11437_v62  ;;  %v8115_v58 = vld [vmem:[%s15871_s2 + $0x1a4] sm:$0xf0]  ;;  %v9928_v38 = vld [vmem:[%s15871_s2 + $0x25c] sm:$0xf]  ;;  %v11495_v45 = vor.u32 %v9929_v0, %v8209_v23 }
 0x177   : > { %17048 = vst [vmem:[#allocation189_spill] sm:$0xff] %v11439_v21  ;;  %v8211_v17 = vld [vmem:[%s15871_s2 + $0x264] sm:$0xf0]  ;;  %2362 = vmatpush.bf16.msra.mxu1 %v11439_v21  ;;  %2376 = vmatpush.bf16.msra.mxu2 %v11453_v28  ;;  %v11498_v20 = vor.u32 %v9904_v22, %v8115_v58  ;;  %v8101_v62 = vld [vmem:[%s15871_s2 + $0x180] sm:$0xf] }
 0x178   : > { %17049 = vst [vmem:[#allocation190_spill] sm:$0xff] %v11453_v28  ;;  %2390 = vmatpush.bf16.msra.mxu3 %v11469_v42  ;;  %v11501_v13 = vor.u32 %v9928_v38, %v8211_v17  ;;  %2349 = vmatpush.bf16.msra.mxu0 %v11483_v51  ;;  %v9902_v0 = vld [vmem:[%s15871_s2 + $0x188] sm:$0xf0]  ;;  %v8197_v22 = vld [vmem:[%s15871_s2 + $0x240] sm:$0xf] }
 0x179   : > { %17050 = vst [vmem:[#allocation191_spill] sm:$0xff] %v11469_v42  ;;  %v11517_v17 = vor.u32 %v9902_v0, %v8101_v62  ;;  %v9926_v58 = vld [vmem:[%s15871_s2 + $0x248] sm:$0xf0]  ;;  %v9901_v38 = vld [vmem:[%s15871_s2 + $0x184] sm:$0xf] }
 0x17a   : > { %17051 = vst [vmem:[#allocation192_spill] sm:$0xff] %v11483_v51  ;;  %v8103_v42 = vld [vmem:[%s15871_s2 + $0x18c] sm:$0xf0]  ;;  %v11531_v28 = vor.u32 %v9926_v58, %v8197_v22  ;;  %v9925_v0 = vld [vmem:[%s15871_s2 + $0x244] sm:$0xf] }
 0x17b   : > { %17052 = vst [vmem:[#allocation193_spill] sm:$0xff] %v11495_v45  ;;  %2363 = vmatpush.bf16.msra.mxu1 %v11495_v45  ;;  %2377 = vmatpush.bf16.msra.mxu2 %v11498_v20  ;;  %v11533_v62 = vor.u32 %v9901_v38, %v8103_v42  ;;  %v8193_v21 = vld [vmem:[%s15871_s2 + $0x230] sm:$0xf]  ;;  %v9924_v42 = vld [vmem:[%s15871_s2 + $0x238] sm:$0xf0] }
 0x17c   : > { %17053 = vst [vmem:[#allocation194_spill] sm:$0xff] %v11498_v20  ;;  %2391 = vmatpush.bf16.msra.mxu3 %v11501_v13  ;;  %v8199_v20 = vld [vmem:[%s15871_s2 + $0x24c] sm:$0xf0]  ;;  %2350 = vmatpush.bf16.msra.mxu0 %v11517_v17  ;;  %v9948_v58 = vld [vmem:[%s15871_s2 + $0x2f8] sm:$0xf0] }
 0x17d   : > { %17054 = vst [vmem:[#allocation195_spill] sm:$0xff] %v11501_v13  ;;  %v11545_v51 = vor.u32 %v9925_v0, %v8199_v20  ;;  %v8289_v22 = vld [vmem:[%s15871_s2 + $0x2f0] sm:$0xf]  ;;  %v11559_v13 = vor.u32 %v9924_v42, %v8193_v21  ;;  %v8377_v0 = vld [vmem:[%s15871_s2 + $0xa8] sm:$0xf] }
 0x17e   : > { %v11370_v41 = vpop.f32.mrf.mxu0  ;;  %v11383_v33 = vpop.f32.mrf.mxu1  ;;  %17055 = vst [vmem:[#allocation196_spill] sm:$0xff] %v11517_v17  ;;  %v11561_v20 = vor.u32 %v9948_v58, %v8289_v22  ;;  %v9875_v17 = vld [vmem:[%s15871_s2 + $0xb0] sm:$0xf0]  ;;  %v8181_v22 = vld [vmem:[%s15871_s2 + $0x218] sm:$0xf] }
 0x17f   : > { %v11341_v15 = vpop.f32.mrf.mxu2  ;;  %v11346_v4 = vpop.f32.mrf.mxu3  ;;  %17056 = vst [vmem:[#allocation197_spill] sm:$0xff] %v11531_v28  ;;  %2364 = vmatpush.bf16.msra.mxu1 %v11531_v28  ;;  %2378 = vmatpush.bf16.msra.mxu2 %v11533_v62  ;;  %v11575_v21 = vor.u32 %v9875_v17, %v8377_v0  ;;  %v9899_v42 = vld [vmem:[%s15871_s2 + $0x170] sm:$0xf0]  ;;  %v9921_v58 = vld [vmem:[%s15871_s2 + $0x220] sm:$0xf0] }
 0x180   : > { %17057 = vst [vmem:[#allocation198_spill] sm:$0xff] %v11533_v62  ;;  %2392 = vmatpush.bf16.msra.mxu3 %v11545_v51  ;;  %2399 = vmatpush.bf16.msrb.mxu0 %v11559_v13  ;;  %v11588_v28 = vor.u32 %v9899_v42, %v8473_v3  ;;  %v11590_v17 = vor.u32 %v9921_v58, %v8181_v22  ;;  %v8277_v0 = vld [vmem:[%s15871_s2 + $0x2d8] sm:$0xf]  ;;  %v9945_v62 = vld [vmem:[%s15871_s2 + $0x2e0] sm:$0xf0] }
 0x181   : > { %17058 = vst [vmem:[#allocation199_spill] sm:$0xff] %v11545_v51  ;;  %v11600_v30 = vor.u32 %v9945_v62, %v8277_v0  ;;  %v8365_v3 = vld [vmem:[%s15871_s2 + $0x90] sm:$0xf]  ;;  %v9872_v42 = vld [vmem:[%s15871_s2 + $0x98] sm:$0xf0] }
 0x182   : > { %17059 = vst [vmem:[#allocation200_spill] sm:$0xff] %v11559_v13  ;;  %v11609_v22 = vor.u32 %v9872_v42, %v8365_v3  ;;  %v8461_v58 = vld [vmem:[%s15871_s2 + $0x150] sm:$0xf]  ;;  %v9896_v62 = vld [vmem:[%s15871_s2 + $0x158] sm:$0xf0] }
 0x183   : > { %17060 = vst [vmem:[#allocation201_spill] sm:$0xff] %v11561_v20  ;;  %2413 = vmatpush.bf16.msrb.mxu1 %v11561_v20  ;;  %2683 = vmatpush.bf16.msrb.mxu2 %v11575_v21  ;;  %v11617_v0 = vor.u32 %v9896_v62, %v8461_v58  ;;  %v8169_v51 = vld [vmem:[%s15871_s2 + $0x200] sm:$0xf]  ;;  %v9942_v58 = vld [vmem:[%s15871_s2 + $0x2c8] sm:$0xf0] }
 0x184   : > { %17061 = vst [vmem:[#allocation202_spill] sm:$0xff] %v11575_v21  ;;  %2697 = vmatpush.bf16.msrb.mxu3 %v11588_v28  ;;  %v8265_v3 = vld [vmem:[%s15871_s2 + $0x2c0] sm:$0xf]  ;;  %2400 = vmatpush.bf16.msrb.mxu0 %v11590_v17  ;;  %v8353_v62 = vld [vmem:[%s15871_s2 + $0x78] sm:$0xf] }
 0x185   : > { %17062 = vst [vmem:[#allocation203_spill] sm:$0xff] %v11588_v28  ;;  %v9918_v28 = vld [vmem:[%s15871_s2 + $0x208] sm:$0xf0]  ;;  %v9869_v21 = vld [vmem:[%s15871_s2 + $0x80] sm:$0xf0] }
 0x186   : > { %17063 = vst [vmem:[#allocation204_spill] sm:$0xff] %v11590_v17  ;;  %v11629_v42 = vor.u32 %v9918_v28, %v8169_v51  ;;  %v11644_v51 = vor.u32 %v9942_v58, %v8265_v3  ;;  %v8449_v28 = vld [vmem:[%s15871_s2 + $0x138] sm:$0xf]  ;;  %v9893_v17 = vld [vmem:[%s15871_s2 + $0x140] sm:$0xf0]  ;;  %v11657_v6 = vor.u32 %v9869_v21, %v8353_v62 }
 0x187   : > { %v11450_v11 = vpop.f32.mrf.mxu2  ;;  %v11464_v63 = vpop.f32.mrf.mxu3  ;;  %17064 = vst [vmem:[#allocation205_spill] sm:$0xff] %v11600_v30  ;;  %2414 = vmatpush.bf16.msrb.mxu1 %v11600_v30  ;;  %2684 = vmatpush.bf16.msrb.mxu2 %v11609_v22  ;;  %v11659_v30 = vor.u32 %v9893_v17, %v8449_v28  ;;  %v8157_v58 = vld [vmem:[%s15871_s2 + $0x1e8] sm:$0xf]  ;;  %v9939_v17 = vld [vmem:[%s15871_s2 + $0x2b0] sm:$0xf0] }
 0x188   : > { %17065 = vst [vmem:[#allocation206_spill] sm:$0xff] %v11609_v22  ;;  %2698 = vmatpush.bf16.msrb.mxu3 %v11617_v0  ;;  %v9915_v22 = vld [vmem:[%s15871_s2 + $0x1f0] sm:$0xf0]  ;;  %2401 = vmatpush.bf16.msrb.mxu0 %v11629_v42  ;;  %v8253_v21 = vld [vmem:[%s15871_s2 + $0x2a8] sm:$0xf] }
 0x189   : > { %17066 = vst [vmem:[#allocation207_spill] sm:$0xff] %v11617_v0  ;;  %v11670_v39 = vor.u32 %v9915_v22, %v8157_v58  ;;  %v11680_v62 = vor.u32 %v9939_v17, %v8253_v21  ;;  %v8341_v28 = vld [vmem:[%s15871_s2 + $0x60] sm:$0xf]  ;;  %v9866_v22 = vld [vmem:[%s15871_s2 + $0x68] sm:$0xf0] }
 0x18a   : > { %17067 = vst [vmem:[#allocation208_spill] sm:$0xff] %v11629_v42  ;;  %v11689_v58 = vor.u32 %v9866_v22, %v8341_v28  ;;  %v8437_v0 = vld [vmem:[%s15871_s2 + $0x120] sm:$0xf]  ;;  %v9890_v21 = vld [vmem:[%s15871_s2 + $0x128] sm:$0xf0] }
 0x18b   : > { %17069 = vst [vmem:[#allocation210_spill] sm:$0xff] %v11644_v51  ;;  %2415 = vmatpush.bf16.msrb.mxu1 %v11644_v51  ;;  %2685 = vmatpush.bf16.msrb.mxu2 %v11657_v6  ;;  %v11697_v17 = vor.u32 %v9890_v21, %v8437_v0  ;;  %v8241_v28 = vld [vmem:[%s15871_s2 + $0x290] sm:$0xf]  ;;  %v9936_v0 = vld [vmem:[%s15871_s2 + $0x298] sm:$0xf0] }
 0x18c   : > { %17071 = vst [vmem:[#allocation212_spill] sm:$0xff] %v11657_v6  ;;  %2699 = vmatpush.bf16.msrb.mxu3 %v11659_v30  ;;  %v8145_v6 = vld [vmem:[%s15871_s2 + $0x1d0] sm:$0xf]  ;;  %2402 = vmatpush.bf16.msrb.mxu0 %v11670_v39  ;;  %v8329_v21 = vld [vmem:[%s15871_s2 + $0x48] sm:$0xf] }
 0x18d   : > { %17072 = vst [vmem:[#allocation213_spill] sm:$0xff] %v11659_v30  ;;  %v9912_v30 = vld [vmem:[%s15871_s2 + $0x1d8] sm:$0xf0]  ;;  %v9863_v51 = vld [vmem:[%s15871_s2 + $0x50] sm:$0xf0] }
 0x18e   : > { %17073 = vst [vmem:[#allocation214_spill] sm:$0xff] %v11670_v39  ;;  %v11709_v22 = vor.u32 %v9912_v30, %v8145_v6  ;;  %v11724_v6 = vor.u32 %v9936_v0, %v8241_v28  ;;  %v11726_v30 = vor.u32 %v9863_v51, %v8329_v21  ;;  %v8425_v39 = vld [vmem:[%s15871_s2 + $0x108] sm:$0xf]  ;;  %v11742_v28 = vld [vmem:[%s15873_s4] sm:$0xf] }
 0x18f   : > { %17074 = vst [vmem:[#allocation215_spill] sm:$0xff] %v11680_v62  ;;  %2416 = vmatpush.bf16.msrb.mxu1 %v11680_v62  ;;  %2686 = vmatpush.bf16.msrb.mxu2 %v11689_v58  ;;  %v8133_v51 = vld [vmem:[%s15871_s2 + $0x1b8] sm:$0xf]  ;;  %v9909_v0 = vld [vmem:[%s15871_s2 + $0x1c0] sm:$0xf0] }
 0x190   : > { %17075 = vst [vmem:[#allocation216_spill] sm:$0xff] %v11689_v58  ;;  %2700 = vmatpush.bf16.msrb.mxu3 %v11697_v17  ;;  %2403 = vmatpush.bf16.msrb.mxu0 %v11709_v22 }
 0x191   : > { %17076 = vst [vmem:[#allocation217_spill] sm:$0xff] %v11697_v17  ;;  %v11753_v17 = vor.u32 %v9909_v0, %v8133_v51  ;;  %v8317_v51 = vld [vmem:[%s15871_s2 + $0x30] sm:$0xf]  ;;  %v9860_v0 = vld [vmem:[%s15871_s2 + $0x38] sm:$0xf0] }
 0x192   : > { %17077 = vst [vmem:[#allocation218_spill] sm:$0xff] %v11709_v22  ;;  %v8413_v22 = vld [vmem:[%s15871_s2 + $0xf0] sm:$0xf] }
 0x193   : > { %17078 = vst [vmem:[#allocation219_spill] sm:$0xff] %v11724_v6  ;;  %2417 = vmatpush.bf16.msrb.mxu1 %v11724_v6  ;;  %2687 = vmatpush.bf16.msrb.mxu2 %v11726_v30  ;;  %v11779_v6 = vperm.slane %v11742_v28, 0 }
 0x194   : > { %17079 = vst [vmem:[#allocation220_spill] sm:$0xff] %v11726_v30  ;;  %v9884_v30 = vld [vmem:[%s15871_s2 + $0xf8] sm:$0xf0]  ;;  %2404 = vmatpush.bf16.msrb.mxu0 %v11753_v17 }
 0x195   : > { %17082 = vst [vmem:[#allocation223_spill] sm:$0xff] %v11753_v17 }
 0x196   : > { %v11466_v50 = vpop.f32.mrf.mxu0  ;;  %v11480_v59 = vpop.f32.mrf.mxu1  ;;  %17085 = vst [vmem:[#allocation226_spill] sm:$0xff] %v11779_v6 }
 0x19e   : > { %v11556_v38 = vpop.f32.mrf.mxu0  ;;  %v11572_v56 = vpop.f32.mrf.mxu1 }
 0x19f   : > { %v11514_v23 = vpop.f32.mrf.mxu2  ;;  %v11528_v45 = vpop.f32.mrf.mxu3 }
 0x1a7   : > { %v11640_v20 = vpop.f32.mrf.mxu2  ;;  %v11652_v13 = vpop.f32.mrf.mxu3 }
 0x1a8   : > { %17068 = vst [vmem:[#allocation209_spill] sm:$0xff] %v11640_v20  ;;  %v1490_v20 = vadd.f32 %v11268_v7, %v11171_v34  ;;  %v8121_v7 = vld [vmem:[%s15871_s2 + $0x1a0] sm:$0xf]  ;;  %v9906_v34 = vld [vmem:[%s15871_s2 + $0x1a8] sm:$0xf0] }
 0x1a9   : > { %17070 = vst [vmem:[#allocation211_spill] sm:$0xff] %v11652_v13  ;;  %v11737_v13 = vor.u32 %v9887_v48, %v8425_v39  ;;  %v8229_v48 = vld [vmem:[%s15871_s2 + $0x278] sm:$0xf]  ;;  %v9933_v39 = vld [vmem:[%s15871_s2 + $0x280] sm:$0xf0] }
 0x1aa   : > { %v11765_v62 = vor.u32 %v9933_v39, %v8229_v48  ;;  %v11782_v48 = vperm.slane %v11742_v28, 1  ;;  %v11785_v39 = vor.u32 %v9860_v0, %v8317_v51  ;;  %v8217_v51 = vld [vmem:[%s15871_s2 + $0x260] sm:$0xf]  ;;  %v772_v0 = vadd.f32 %v10990_v37, %v10860_v2  ;;  %v9857_v2 = vld [vmem:[%s15871_s2 + $0x20] sm:$0xf0] }
 0x1ab   : > { %17080 = vst [vmem:[#allocation221_spill] sm:$0xff] %v11737_v13  ;;  %2701 = vmatpush.bf16.msrb.mxu3 %v11737_v13  ;;  %v8305_v13 = vld [vmem:[%s15871_s2 + $0x18] sm:$0xf]  ;;  %v786_v37 = vadd.f32 %v10997_v10, %v10884_v32  ;;  %v8109_v32 = vld [vmem:[%s15871_s2 + $0x188] sm:$0xf]  ;;  %v800_v10 = vadd.f32 %v11000_v18, %v10892_v25  ;;  %v899_v18 = vadd.f32 %v11164_v16, %v11060_v53 }
 0x1ac   : > { %17084 = vst [vmem:[#allocation225_spill] sm:$0xff] %v11765_v62  ;;  %2418 = vmatpush.bf16.msrb.mxu1 %v11765_v62  ;;  %2688 = vmatpush.bf16.msrb.mxu2 %v11785_v39  ;;  %v9927_v25 = vld [vmem:[%s15871_s2 + $0x250] sm:$0xf0] }
 0x1ad   : > { %17086 = vst [vmem:[#allocation227_spill] sm:$0xff] %v11782_v48  ;;  %v17312_v62 = vld [vmem:[#allocation30_spill] sm:$0xff] }
 0x1ae   : > { %17087 = vst [vmem:[#allocation228_spill] sm:$0xff] %v11785_v39 }
 0x1b6   : > { %v11654_v9 = vpop.f32.mrf.mxu0  ;;  %v11661_v3 = vpop.f32.mrf.mxu1 }
 0x1be   : > { %v11750_v21 = vpop.f32.mrf.mxu0  ;;  %v11761_v58 = vpop.f32.mrf.mxu1 }
 0x1bf   : > { %v11720_v42 = vpop.f32.mrf.mxu2  ;;  %v11734_v36 = vpop.f32.mrf.mxu3  ;;  %17081 = vst [vmem:[#allocation222_spill] sm:$0xff] %v11750_v21  ;;  %v11792_v21 = vor.u32 %v9884_v30, %v8413_v22  ;;  %v11809_v22 = vor.u32 %v9906_v34, %v8121_v7  ;;  %v9930_v30 = vld [vmem:[%s15871_s2 + $0x268] sm:$0xf0]  ;;  %v871_v7 = vadd.f32 %v11146_v52, %v11029_v49  ;;  %v885_v49 = vadd.f32 %v11150_v40, %v11036_v19  ;;  %v8389_v19 = vld [vmem:[%s15871_s2 + $0xc0] sm:$0xf] }
 0x1c0   : > { %17083 = vst [vmem:[#allocation224_spill] sm:$0xff] %v11761_v58  ;;  %v758_v58 = vadd.f32 %v10986_v60, %v10853_v55  ;;  %v1491_v55 = vadd.f32 %v11280_v1, %v11176_v61  ;;  %v1814_v60 = vadd.f32 %v11654_v9, %v1490_v20  ;;  %v11824_v9 = vor.u32 %v9930_v30, %v8217_v51  ;;  %v8401_v1 = vld [vmem:[%s15871_s2 + $0xd8] sm:$0xf]  ;;  %v9881_v20 = vld [vmem:[%s15871_s2 + $0xe0] sm:$0xf0] }
 0x1c1   : > { %17088 = vst [vmem:[#allocation229_spill] sm:$0xff] %v11792_v21  ;;  %v11826_v61 = vor.u32 %v9857_v2, %v8305_v13  ;;  %2702 = vmatpush.bf16.msrb.mxu3 %v11792_v21  ;;  %v11843_v34 = vor.u32 %v9881_v20, %v8401_v1  ;;  %v9903_v51 = vld [vmem:[%s15871_s2 + $0x190] sm:$0xf0]  ;;  %v8205_v30 = vld [vmem:[%s15871_s2 + $0x248] sm:$0xf]  ;;  %v913_v52 = vadd.f32 %v11167_v29, %v11068_v8 }
 0x1c2   : > { %17089 = vst [vmem:[#allocation230_spill] sm:$0xff] %v11809_v22  ;;  %v1815_v13 = vadd.f32 %v11661_v3, %v1491_v55  ;;  %v1555_v3 = vadd.f32 %v11466_v50, %v11216_v46  ;;  %v8293_v2 = vld [vmem:[%s15871_s2] sm:$0xf]  ;;  %v9854_v1 = vld [vmem:[%s15871_s2 + $0x8] sm:$0xf0]  ;;  %v1170_v53 = vadd.f32 %v11204_v26, %v758_v58  ;;  %v1556_v8 = vadd.f32 %v11480_v59, %v11219_v31 }
 0x1c3   : > { %17090 = vst [vmem:[#allocation231_spill] sm:$0xff] %v11824_v9  ;;  %v1896_v40 = vadd.f32 %v11779_v6, %v1814_v60  ;;  %2405 = vmatpush.bf16.msrb.mxu0 %v11809_v22  ;;  %v11880_v46 = vor.u32 %v9903_v51, %v8109_v32  ;;  %v9878_v50 = vld [vmem:[%s15871_s2 + $0xc8] sm:$0xf0]  ;;  %2419 = vmatpush.bf16.msrb.mxu1 %v11824_v9 }
 0x1c4   : > { %17091 = vst [vmem:[#allocation232_spill] sm:$0xff] %v11826_v61  ;;  %2689 = vmatpush.bf16.msrb.mxu2 %v11826_v61  ;;  %v11887_v31 = vor.u32 %v9927_v25, %v8205_v30  ;;  %v11889_v26 = vor.u32 %v9854_v1, %v8293_v2  ;;  %v1492_v59 = vadd.f32 %v11341_v15, %v11184_v43  ;;  %v11905_v15 = vperm.slane %v11742_v28, 2  ;;  %v17296_v61 = vld [vmem:[#allocation10_spill] sm:$0xff] }
 0x1c5   : > { %17092 = vst [vmem:[#allocation233_spill] sm:$0xff] %v11843_v34  ;;  %v1897_v58 = vadd.f32 %v11782_v48, %v1815_v13  ;;  %2703 = vmatpush.bf16.msrb.mxu3 %v11843_v34  ;;  %v11895_v32 = vor.u32 %v9878_v50, %v8389_v19  ;;  %v1171_v51 = vadd.f32 %v11208_v44, %v772_v0  ;;  %v1904_v13 = vmax.f32 %v1896_v40, 0.0 }
 0x1c6   : > { %17093 = vst [vmem:[#allocation234_spill] sm:$0xff] %v11880_v46  ;;  %v1493_v30 = vadd.f32 %v11346_v4, %v11188_v35  ;;  %v1173_v2 = vadd.f32 %v11213_v57, %v800_v10  ;;  %v1816_v43 = vadd.f32 %v11720_v42, %v1492_v59  ;;  %v1235_v35 = vadd.f32 %v11227_v24, %v871_v7 }
 0x1c7   : > { %v11862_v55 = vpop.f32.mrf.mxu2  ;;  %v11877_v16 = vpop.f32.mrf.mxu3  ;;  %17094 = vst [vmem:[#allocation235_spill] sm:$0xff] %v11887_v31  ;;  %2406 = vmatpush.bf16.msrb.mxu0 %v11880_v46  ;;  %2420 = vmatpush.bf16.msrb.mxu1 %v11887_v31  ;;  %v1557_v57 = vadd.f32 %v11514_v23, %v11222_v12  ;;  %v1905_v42 = vmax.f32 %v1897_v58, 0.0  ;;  %v1238_v40 = vadd.f32 %v11266_v14, %v913_v52 }
 0x1c8   : > { %17095 = vst [vmem:[#allocation236_spill] sm:$0xff] %v11889_v26  ;;  %v1817_v44 = vadd.f32 %v11734_v36, %v1493_v30  ;;  %2690 = vmatpush.bf16.msrb.mxu2 %v11889_v26  ;;  %v1237_v36 = vadd.f32 %v11259_v47, %v899_v18  ;;  %v1559_v19 = vadd.f32 %v11556_v38, %v1235_v35 }
 0x1c9   : > { %17096 = vst [vmem:[#allocation237_spill] sm:$0xff] %v11895_v32  ;;  %2704 = vmatpush.bf16.msrb.mxu3 %v11895_v32  ;;  %v1898_v24 = vadd.f32 %v11905_v15, %v1816_v43  ;;  %v1495_v50 = vadd.f32 %v11383_v33, %v1171_v51  ;;  %v17101_v43 = vld [vmem:[#allocation209_spill] sm:$0xff]  ;;  %v17102_v51 = vld [vmem:[#allocation211_spill] sm:$0xff] }
 0x1ca   : > { %17097 = vst [vmem:[#allocation238_spill] sm:$0xff] %v11905_v15  ;;  %v9383_v32 = vld [vmem:[%s10523_s29 + $0x21] sm:$0xff] }
 0x1cb   : > { %v1906_v52 = vmax.f32 %v1898_v24, 0.0 }
 0x1d6   : > { %v1832_v29 = vpop.f32.mrf.mxu0  ;;  %v1846_v21 = vpop.f32.mrf.mxu1 }
 0x1d7   : > { %v1879_v20 = vadd.f32 %v1832_v29, %v1555_v3  ;;  %v1880_v60 = vadd.f32 %v1846_v21, %v1556_v8  ;;  %v1172_v3 = vadd.f32 %v11211_v54, %v786_v37  ;;  %v11911_v54 = vperm.slane %v11742_v28, 3 }
 0x1d8   : > { %v1236_v37 = vadd.f32 %v11229_v27, %v885_v49  ;;  %v1558_v28 = vadd.f32 %v11528_v45, %v11225_v5  ;;  %v1494_v5 = vadd.f32 %v11370_v41, %v1170_v53  ;;  %v17100_v41 = vld [vmem:[#allocation224_spill] sm:$0xff] }
 0x1d9   : > { %v1912_v25 = vadd.f32 %v11779_v6, %v1879_v20  ;;  %v1913_v21 = vadd.f32 %v11782_v48, %v1880_v60  ;;  %17098 = vst [vmem:[#allocation239_spill] sm:$0xff] %v11911_v54  ;;  %v1899_v27 = vadd.f32 %v11911_v54, %v1817_v44  ;;  %v1496_v45 = vadd.f32 %v11450_v11, %v1172_v3 }
 0x1da   : > { %v1560_v29 = vadd.f32 %v11572_v56, %v1236_v37  ;;  %v1497_v20 = vadd.f32 %v11464_v63, %v1173_v2  ;;  %v17099_v56 = vld [vmem:[#allocation222_spill] sm:$0xff]  ;;  %v1819_v53 = vadd.f32 %v17100_v41, %v1495_v50  ;;  %v1562_v2 = vadd.f32 %v17102_v51, %v1238_v40  ;;  %v9876_v41 = vld [vmem:[%s15871_s2 + $0xb8] sm:$0xf0] }
 0x1db   : > { %v1920_v4 = vmax.f32 %v1912_v25, 0.0  ;;  %v1921_v0 = vmax.f32 %v1913_v21, 0.0  ;;  %v1818_v58 = vadd.f32 %v17099_v56, %v1494_v5  ;;  %v1820_v60 = vadd.f32 %v11862_v55, %v1496_v45 }
 0x1dc   : > { %v1907_v25 = vmax.f32 %v1899_v27, 0.0  ;;  %v1821_v11 = vadd.f32 %v11877_v16, %v1497_v20  ;;  %v1561_v21 = vadd.f32 %v17101_v43, %v1237_v36  ;;  %v1901_v16 = vadd.f32 %v11782_v48, %v1819_v53  ;;  %v9874_v20 = vld [vmem:[%s15871_s2 + $0xac] sm:$0xf]  ;;  %v8481_v53 = vld [vmem:[%s15871_s2 + $0x170] sm:$0xf] }
 0x1dd   : > { %v1928_v10 = vmax.f32 %v1904_v13, %v1920_v4  ;;  %v1860_v1 = vpop.f32.mrf.mxu2  ;;  %v1929_v7 = vmax.f32 %v1905_v42, %v1921_v0  ;;  %v1874_v12 = vpop.f32.mrf.mxu3  ;;  %v1900_v55 = vadd.f32 %v11779_v6, %v1818_v58  ;;  %v1902_v35 = vadd.f32 %v11905_v15, %v1820_v60  ;;  %v8475_v58 = vld [vmem:[%s15871_s2 + $0x174] sm:$0xf0]  ;;  %v8385_v60 = vld [vmem:[%s15871_s2 + $0xb0] sm:$0xf] }
 0x1de   : > { %v1881_v8 = vadd.f32 %v1860_v1, %v1557_v57  ;;  %v1834_v23 = vpop.f32.mrf.mxu0  ;;  %v1882_v47 = vadd.f32 %v1874_v12, %v1558_v28  ;;  %v1848_v49 = vpop.f32.mrf.mxu1  ;;  %v1903_v37 = vadd.f32 %v11911_v54, %v1821_v11 }
 0x1df   : > { %v1883_v18 = vadd.f32 %v1834_v23, %v1559_v19  ;;  %v1884_v14 = vadd.f32 %v1848_v49, %v1560_v29  ;;  %v1908_v12 = vmax.f32 %v1900_v55, 0.0  ;;  %v1910_v23 = vmax.f32 %v1902_v35, 0.0  ;;  %v8367_v55 = vld [vmem:[%s15871_s2 + $0x9c] sm:$0xf0] }
 0x1e0   : > { %v1914_v38 = vadd.f32 %v11905_v15, %v1881_v8  ;;  %v1915_v59 = vadd.f32 %v11911_v54, %v1882_v47  ;;  %v1909_v29 = vmax.f32 %v1901_v16, 0.0  ;;  %v1911_v27 = vmax.f32 %v1903_v37, 0.0  ;;  %v9895_v16 = vld [vmem:[%s15871_s2 + $0x154] sm:$0xf]  ;;  %v8463_v37 = vld [vmem:[%s15871_s2 + $0x15c] sm:$0xf0] }
 0x1e1   : > { %v1916_v63 = vadd.f32 %v11779_v6, %v1883_v18  ;;  %v1917_v44 = vadd.f32 %v11782_v48, %v1884_v14  ;;  %v9898_v14 = vld [vmem:[%s15871_s2 + $0x16c] sm:$0xf] }
 0x1e2   : > { %v1922_v30 = vmax.f32 %v1914_v38, 0.0  ;;  %v1923_v3 = vmax.f32 %v1915_v59, 0.0  ;;  %v8379_v59 = vld [vmem:[%s15871_s2 + $0xb4] sm:$0xf0] }
 0x1e3   : > { %v1924_v1 = vmax.f32 %v1916_v63, 0.0  ;;  %v1925_v24 = vmax.f32 %v1917_v44, 0.0  ;;  %v11984_v44 = vor.u32 %v9898_v14, %v8475_v58  ;;  %v8343_v14 = vld [vmem:[%s15871_s2 + $0x6c] sm:$0xf0]  ;;  %v9889_v58 = vld [vmem:[%s15871_s2 + $0x124] sm:$0xf] }
 0x1e4   : > { %v1930_v33 = vmax.f32 %v1906_v52, %v1922_v30  ;;  %v1931_v13 = vmax.f32 %v1907_v25, %v1923_v3 }
 0x1e5   : > { %v1862_v4 = vpop.f32.mrf.mxu2  ;;  %v1876_v0 = vpop.f32.mrf.mxu3  ;;  %v1932_v47 = vmax.f32 %v1908_v12, %v1924_v1  ;;  %v1933_v5 = vmax.f32 %v1909_v29, %v1925_v24  ;;  %17104 = vst [vmem:[#allocation224_spill] sm:$0xff] %v11984_v44  ;;  %v9873_v1 = vld [vmem:[%s15871_s2 + $0xa0] sm:$0xf0]  ;;  %v12028_v12 = vor.u32 %v9895_v16, %v8463_v37  ;;  %v9864_v16 = vld [vmem:[%s15871_s2 + $0x58] sm:$0xf0] }
 0x1e6   : > { %v1936_v57 = vmax.f32 %v1928_v10, %v1930_v33  ;;  %v1885_v42 = vadd.f32 %v1862_v4, %v1561_v21  ;;  %v1937_v36 = vmax.f32 %v1929_v7, %v1931_v13  ;;  %v1886_v28 = vadd.f32 %v1876_v0, %v1562_v2  ;;  %v9900_v21 = vld [vmem:[%s15871_s2 + $0x178] sm:$0xf0]  ;;  %v9871_v4 = vld [vmem:[%s15871_s2 + $0x94] sm:$0xf]  ;;  %v9897_v24 = vld [vmem:[%s15871_s2 + $0x160] sm:$0xf0] }
 0x1e7   : > { %v11982_v13 = vor.u32 %v9874_v20, %v8379_v59  ;;  %v11998_v0 = vor.u32 %v9900_v21, %v8481_v53  ;;  %17108 = vst [vmem:[#allocation241_spill] sm:$0xff] %v12028_v12  ;;  %v9865_v59 = vld [vmem:[%s15871_s2 + $0x64] sm:$0xf]  ;;  %v9891_v53 = vld [vmem:[%s15871_s2 + $0x130] sm:$0xf0] }
 0x1e8   : > { %v1918_v19 = vadd.f32 %v11905_v15, %v1885_v42  ;;  %v1919_v8 = vadd.f32 %v11911_v54, %v1886_v28  ;;  %v11996_v42 = vor.u32 %v9876_v41, %v8385_v60  ;;  %v8439_v60 = vld [vmem:[%s15871_s2 + $0x12c] sm:$0xf0]  ;;  %v8445_v41 = vld [vmem:[%s15871_s2 + $0x128] sm:$0xf]  ;;  %v8331_v21 = vld [vmem:[%s15871_s2 + $0x54] sm:$0xf0] }
 0x1e9   : > { %17103 = vst [vmem:[#allocation222_spill] sm:$0xff] %v11982_v13  ;;  %v8433_v37 = vld [vmem:[%s15871_s2 + $0x110] sm:$0xf] }
 0x1ea   : > { %v1926_v40 = vmax.f32 %v1918_v19, 0.0  ;;  %v1927_v10 = vmax.f32 %v1919_v8, 0.0  ;;  %17105 = vst [vmem:[#allocation209_spill] sm:$0xff] %v11996_v42  ;;  %v8469_v19 = vld [vmem:[%s15871_s2 + $0x158] sm:$0xf]  ;;  %v12026_v8 = vor.u32 %v9871_v4, %v8367_v55  ;;  %v10107_v54 = vld [vmem:[%s15872_s3 + $0x70] sm:$0xff] }
 0x1eb   : > { %17106 = vst [vmem:[#allocation211_spill] sm:$0xff] %v11998_v0  ;;  %v8427_v4 = vld [vmem:[%s15871_s2 + $0x114] sm:$0xf0]  ;;  %v8337_v55 = vld [vmem:[%s15871_s2 + $0x50] sm:$0xf] }
 0x1ec   : > { %v1934_v49 = vmax.f32 %v1910_v23, %v1926_v40  ;;  %v1935_v45 = vmax.f32 %v1911_v27, %v1927_v10  ;;  %17107 = vst [vmem:[#allocation240_spill] sm:$0xff] %v12026_v8  ;;  %v9868_v23 = vld [vmem:[%s15871_s2 + $0x7c] sm:$0xf]  ;;  %v8355_v40 = vld [vmem:[%s15871_s2 + $0x84] sm:$0xf0]  ;;  %v12040_v27 = vor.u32 %v9897_v24, %v8469_v19 }
 0x1ed   : > { %v9892_v10 = vld [vmem:[%s15871_s2 + $0x13c] sm:$0xf]  ;;  %v9859_v24 = vld [vmem:[%s15871_s2 + $0x34] sm:$0xf] }
 0x1ee   : > { %v1938_v38 = vmax.f32 %v1932_v47, %v1934_v49  ;;  %v1939_v18 = vmax.f32 %v1933_v5, %v1935_v45  ;;  %17110 = vst [vmem:[#allocation243_spill] sm:$0xff] %v12040_v27  ;;  %v8451_v47 = vld [vmem:[%s15871_s2 + $0x144] sm:$0xf0]  ;;  %v8361_v49 = vld [vmem:[%s15871_s2 + $0x80] sm:$0xf] }
 0x1ef   : > { %v9870_v5 = vld [vmem:[%s15871_s2 + $0x88] sm:$0xf0]  ;;  %v8457_v45 = vld [vmem:[%s15871_s2 + $0x140] sm:$0xf]  ;;  %v12064_v20 = vor.u32 %v9892_v10, %v8451_v47  ;;  %v9883_v47 = vld [vmem:[%s15871_s2 + $0xf4] sm:$0xf] }
 0x1f0   : > { %v11948_v7 = vpack.c.bf16 %v1938_v38, %v1936_v57  ;;  %v11950_v50 = vpack.c.bf16 %v1939_v18, %v1937_v36  ;;  %v8373_v36 = vld [vmem:[%s15871_s2 + $0x98] sm:$0xf]  ;;  %v9894_v38 = vld [vmem:[%s15871_s2 + $0x148] sm:$0xf0]  ;;  %v12062_v18 = vor.u32 %v9868_v23, %v8355_v40  ;;  %v8319_v23 = vld [vmem:[%s15871_s2 + $0x3c] sm:$0xf0]  ;;  %v12146_v40 = vor.u32 %v9864_v16, %v8337_v55 }
 0x1f1   : > { %v12038_v29 = vor.u32 %v9873_v1, %v8373_v36  ;;  %17112 = vst [vmem:[#allocation245_spill] sm:$0xff] %v12064_v20  ;;  %v9888_v36 = vld [vmem:[%s15871_s2 + $0x118] sm:$0xf0] }
 0x1f2   : > { %v2072_v52 = vshrl.u32 %v11948_v7, 16  ;;  %v2074_v56 = vshll.u32 %v11948_v7, 16  ;;  %v2079_v30 = vshrl.u32 %v11950_v50, 16  ;;  %v2081_v25 = vshll.u32 %v11950_v50, 16  ;;  %17111 = vst [vmem:[#allocation244_spill] sm:$0xff] %v12062_v18 }
 0x1f3   : > { %17109 = vst [vmem:[#allocation242_spill] sm:$0xff] %v12038_v29  ;;  %v12148_v10 = vor.u32 %v9888_v36, %v8433_v37  ;;  %v8295_v37 = vld [vmem:[%s15871_s2 + $0xc] sm:$0xf0]  ;;  %v9877_v36 = vld [vmem:[%s15871_s2 + $0xc4] sm:$0xf] }
 0x1f4   : > { %v2076_v11 = vrot.slane %v2074_v56, 1  ;;  %v3249_v3 = vrot.slane %v2072_v52, 1  ;;  %v3250_v43 = vrot.slane %v2074_v56, 2  ;;  %v2083_v33 = vrot.slane %v2081_v25, 1  ;;  %17121 = vst [vmem:[#allocation254_spill] sm:$0xff] %v12146_v40 }
 0x1f5   : > { %v3252_v63 = vrot.slane %v2079_v30, 1  ;;  %v3253_v51 = vrot.slane %v2081_v25, 2  ;;  %v12076_v56 = vor.u32 %v9894_v38, %v8457_v45  ;;  %v9867_v25 = vld [vmem:[%s15871_s2 + $0x70] sm:$0xf0]  ;;  %17122 = vst [vmem:[#allocation255_spill] sm:$0xff] %v12148_v10 }
 0x1f6   : > { %v11980_v2 = vor.u32 %v2076_v11, %v2072_v52  ;;  %v11992_v35 = vor.u32 %v3250_v43, %v3249_v3  ;;  %v11994_v57 = vor.u32 %v2083_v33, %v2079_v30  ;;  %v12074_v52 = vor.u32 %v9870_v5, %v8361_v49  ;;  %v8349_v30 = vld [vmem:[%s15871_s2 + $0x68] sm:$0xf]  ;;  %v9862_v43 = vld [vmem:[%s15871_s2 + $0x4c] sm:$0xf]  ;;  %v8415_v49 = vld [vmem:[%s15871_s2 + $0xfc] sm:$0xf0] }
 0x1f7   : > { %v12009_v28 = vor.u32 %v3253_v51, %v3252_v63  ;;  %17114 = vst [vmem:[#allocation247_spill] sm:$0xff] %v12076_v56  ;;  %v12098_v11 = vor.u32 %v9865_v59, %v8343_v14  ;;  %v12100_v3 = vor.u32 %v9889_v58, %v8439_v60  ;;  %v12110_v33 = vor.u32 %v9867_v25, %v8349_v30  ;;  %v9886_v51 = vld [vmem:[%s15871_s2 + $0x10c] sm:$0xf]  ;;  %v8325_v5 = vld [vmem:[%s15871_s2 + $0x38] sm:$0xf] }
 0x1f8   : > { %2351 = vmatmul.bf16.vlgmr.msra.gmra.mxu0 %v11980_v2  ;;  %2379 = vmatmul.bf16.vlgmr.msra.gmra.mxu2 %v11980_v2  ;;  %17113 = vst [vmem:[#allocation246_spill] sm:$0xff] %v12074_v52  ;;  %v12112_v63 = vor.u32 %v9891_v53, %v8445_v41  ;;  %v12134_v1 = vor.u32 %v9862_v43, %v8331_v21  ;;  %v9861_v45 = vld [vmem:[%s15871_s2 + $0x40] sm:$0xf0]  ;;  %v8421_v38 = vld [vmem:[%s15871_s2 + $0xf8] sm:$0xf] }
 0x1f9   : > { %2365 = vmatmul.bf16.vlgmr.msra.gmra.mxu1 %v11994_v57  ;;  %2393 = vmatmul.bf16.vlgmr.msra.gmra.mxu3 %v11994_v57  ;;  %17115 = vst [vmem:[#allocation248_spill] sm:$0xff] %v12098_v11  ;;  %v12136_v19 = vor.u32 %v9886_v51, %v8427_v4  ;;  %v9885_v59 = vld [vmem:[%s15871_s2 + $0x100] sm:$0xf0]  ;;  %v12176_v14 = vor.u32 %v9883_v47, %v8415_v49  ;;  %v9856_v58 = vld [vmem:[%s15871_s2 + $0x1c] sm:$0xf] }
 0x1fa   : > { %2711 = vmatpush.bf16.msra.mxu0 %v11982_v13  ;;  %2725 = vmatpush.bf16.msra.mxu1 %v11984_v44  ;;  %17116 = vst [vmem:[#allocation249_spill] sm:$0xff] %v12100_v3  ;;  %v8307_v60 = vld [vmem:[%s15871_s2 + $0x24] sm:$0xf0]  ;;  %v12188_v30 = vor.u32 %v9885_v59, %v8421_v38  ;;  %v9880_v25 = vld [vmem:[%s15871_s2 + $0xdc] sm:$0xf]  ;;  %v10099_v13 = vld [vmem:[%s15872_s3 + $0x30] sm:$0xff] }
 0x1fb   : > { %2739 = vmatpush.bf16.msra.mxu2 %v11996_v42  ;;  %2753 = vmatpush.bf16.msra.mxu3 %v11998_v0  ;;  %17117 = vst [vmem:[#allocation250_spill] sm:$0xff] %v12110_v33  ;;  %v8403_v41 = vld [vmem:[%s15871_s2 + $0xe4] sm:$0xf0]  ;;  %v8313_v53 = vld [vmem:[%s15871_s2 + $0x20] sm:$0xf]  ;;  %v12213_v55 = vor.u32 %v9856_v58, %v8307_v60  ;;  %v10100_v0 = vld [vmem:[%s15872_s3 + $0x38] sm:$0xff] }
 0x1fc   : > { %17118 = vst [vmem:[#allocation251_spill] sm:$0xff] %v12112_v63  ;;  %v9858_v43 = vld [vmem:[%s15871_s2 + $0x28] sm:$0xf0]  ;;  %v8409_v21 = vld [vmem:[%s15871_s2 + $0xe0] sm:$0xf]  ;;  %v12215_v16 = vor.u32 %v9880_v25, %v8403_v41 }
 0x1fd   : > { %17119 = vst [vmem:[#allocation252_spill] sm:$0xff] %v12134_v1  ;;  %v9882_v51 = vld [vmem:[%s15871_s2 + $0xe8] sm:$0xf0]  ;;  %v9853_v4 = vld [vmem:[%s15871_s2 + $0x4] sm:$0xf] }
 0x1fe   : > { %2712 = vmatpush.bf16.msra.mxu0 %v12026_v8  ;;  %2726 = vmatpush.bf16.msra.mxu1 %v12028_v12  ;;  %17120 = vst [vmem:[#allocation253_spill] sm:$0xff] %v12136_v19  ;;  %v12230_v47 = vor.u32 %v9882_v51, %v8409_v21  ;;  %v8301_v49 = vld [vmem:[%s15871_s2 + $0x8] sm:$0xf]  ;;  %v9879_v38 = vld [vmem:[%s15871_s2 + $0xd0] sm:$0xf0] }
 0x1ff   : > { %2740 = vmatpush.bf16.msra.mxu2 %v12038_v29  ;;  %2754 = vmatpush.bf16.msra.mxu3 %v12040_v27  ;;  %17124 = vst [vmem:[#allocation257_spill] sm:$0xff] %v12176_v14  ;;  %v8633_v59 = vld [vmem:[%s15871_s2 + $0x3a8] sm:$0xf]  ;;  %v9971_v58 = vld [vmem:[%s15871_s2 + $0x3b0] sm:$0xf0]  ;;  %v9379_v27 = vld [vmem:[%s10523_s29 + $0x20] sm:$0xff] }
 0x200   : > { %17126 = vst [vmem:[#allocation259_spill] sm:$0xff] %v12188_v30  ;;  %v8729_v60 = vld [vmem:[%s15871_s2 + $0x468] sm:$0xf]  ;;  %v9995_v25 = vld [vmem:[%s15871_s2 + $0x470] sm:$0xf0]  ;;  %v10108_v29 = vld [vmem:[%s15872_s3 + $0x78] sm:$0xff] }
 0x201   : > { %17127 = vst [vmem:[#allocation260_spill] sm:$0xff] %v12213_v55  ;;  %v9970_v41 = vld [vmem:[%s15871_s2 + $0x3ac] sm:$0xf]  ;;  %v8635_v21 = vld [vmem:[%s15871_s2 + $0x3b4] sm:$0xf0] }
 0x202   : > { %2713 = vmatpush.bf16.msra.mxu0 %v12062_v18  ;;  %2727 = vmatpush.bf16.msra.mxu1 %v12064_v20  ;;  %17128 = vst [vmem:[#allocation261_spill] sm:$0xff] %v12215_v16  ;;  %v9994_v51 = vld [vmem:[%s15871_s2 + $0x46c] sm:$0xf] }
 0x203   : > { %2741 = vmatpush.bf16.msra.mxu2 %v12074_v52  ;;  %2755 = vmatpush.bf16.msra.mxu3 %v12076_v56  ;;  %17130 = vst [vmem:[#allocation263_spill] sm:$0xff] %v12230_v47  ;;  %v9380_v52 = vld [vmem:[%s10523_s29 + $0x28] sm:$0x1f] }
 0x204   : > { %v13664_v12 = vpack.c.bf16 %v9380_v52, %v9379_v27  ;;  %v17294_v18 = vld [vmem:[#allocation69_spill] sm:$0xff] }
 0x206   : > { %2714 = vmatpush.bf16.msra.mxu0 %v12098_v11  ;;  %2728 = vmatpush.bf16.msra.mxu1 %v12100_v3  ;;  %v17292_v3 = vld [vmem:[#allocation61_spill] sm:$0xff] }
 0x207   : > { %2742 = vmatpush.bf16.msra.mxu2 %v12110_v33  ;;  %2756 = vmatpush.bf16.msra.mxu3 %v12112_v63  ;;  %v17293_v11 = vld [vmem:[#allocation65_spill] sm:$0xff] }
 0x208   : > { %2407 = vmatmul.bf16.vlgmr.msrb.gmra.mxu0 %v11980_v2  ;;  %2691 = vmatmul.bf16.vlgmr.msrb.gmra.mxu2 %v11948_v7  ;;  %v12174_v2 = vor.u32 %v9859_v24, %v8319_v23  ;;  %v8391_v24 = vld [vmem:[%s15871_s2 + $0xcc] sm:$0xf0]  ;;  %v12228_v23 = vor.u32 %v9858_v43, %v8313_v53  ;;  %v12261_v53 = vor.u32 %v9853_v4, %v8295_v37 }
 0x209   : > { %2421 = vmatmul.bf16.vlgmr.msrb.gmra.mxu1 %v11994_v57  ;;  %2705 = vmatmul.bf16.vlgmr.msrb.gmra.mxu3 %v11950_v50  ;;  %v12186_v57 = vor.u32 %v9861_v45, %v8325_v5  ;;  %v9855_v5 = vld [vmem:[%s15871_s2 + $0x10] sm:$0xf0]  ;;  %v8397_v45 = vld [vmem:[%s15871_s2 + $0xc8] sm:$0xf]  ;;  %v12263_v43 = vor.u32 %v9877_v36, %v8391_v24  ;;  %v12280_v36 = vor.u32 %v9971_v58, %v8633_v59  ;;  %v8719_v59 = vld [vmem:[%s15871_s2 + $0x45c] sm:$0xf0] }
 0x20a   : > { %2715 = vmatpush.bf16.msra.mxu0 %v12134_v1  ;;  %2729 = vmatpush.bf16.msra.mxu1 %v12136_v19  ;;  %17123 = vst [vmem:[#allocation256_spill] sm:$0xff] %v12174_v2  ;;  %v12276_v4 = vor.u32 %v9855_v5, %v8301_v49  ;;  %v12278_v37 = vor.u32 %v9879_v38, %v8397_v45  ;;  %v8717_v49 = vld [vmem:[%s15871_s2 + $0x450] sm:$0xf]  ;;  %v9992_v5 = vld [vmem:[%s15871_s2 + $0x458] sm:$0xf0] }
 0x20b   : > { %2743 = vmatpush.bf16.msra.mxu2 %v12146_v40  ;;  %2757 = vmatpush.bf16.msra.mxu3 %v12148_v10  ;;  %17125 = vst [vmem:[#allocation258_spill] sm:$0xff] %v12186_v57  ;;  %v12282_v24 = vor.u32 %v9995_v25, %v8729_v60  ;;  %v9967_v45 = vld [vmem:[%s15871_s2 + $0x394] sm:$0xf]  ;;  %v12320_v60 = vor.u32 %v9992_v5, %v8717_v49  ;;  %v8609_v25 = vld [vmem:[%s15871_s2 + $0x378] sm:$0xf]  ;;  %v17291_v40 = vld [vmem:[#allocation57_spill] sm:$0xff] }
 0x20c   : > { %17129 = vst [vmem:[#allocation262_spill] sm:$0xff] %v12228_v23  ;;  %v9991_v38 = vld [vmem:[%s15871_s2 + $0x454] sm:$0xf]  ;;  %v9964_v49 = vld [vmem:[%s15871_s2 + $0x37c] sm:$0xf] }
 0x20d   : > { %17131 = vst [vmem:[#allocation264_spill] sm:$0xff] %v12261_v53  ;;  %v8611_v5 = vld [vmem:[%s15871_s2 + $0x384] sm:$0xf0]  ;;  %v10044_v10 = vld [vmem:[%s15871_s2 + $0x5f8] sm:$0xf0] }
 0x20e   : > { %2716 = vmatpush.bf16.msra.mxu0 %v12174_v2  ;;  %2730 = vmatpush.bf16.msra.mxu1 %v12176_v14  ;;  %17132 = vst [vmem:[#allocation265_spill] sm:$0xff] %v12263_v43  ;;  %v9968_v14 = vld [vmem:[%s15871_s2 + $0x398] sm:$0xf0] }
 0x20f   : > { %2744 = vmatpush.bf16.msra.mxu2 %v12186_v57  ;;  %2758 = vmatpush.bf16.msra.mxu3 %v12188_v30  ;;  %v8731_v30 = vld [vmem:[%s15871_s2 + $0x474] sm:$0xf0]  ;;  %17133 = vst [vmem:[#allocation266_spill] sm:$0xff] %v12276_v4 }
 0x210   : > { %17134 = vst [vmem:[#allocation267_spill] sm:$0xff] %v12278_v37 }
 0x211   : > { %17135 = vst [vmem:[#allocation268_spill] sm:$0xff] %v12280_v36 }
 0x212   : > { %2717 = vmatpush.bf16.msra.mxu0 %v12213_v55  ;;  %2731 = vmatpush.bf16.msra.mxu1 %v12215_v16  ;;  %17136 = vst [vmem:[#allocation269_spill] sm:$0xff] %v12282_v24  ;;  %v8621_v16 = vld [vmem:[%s15871_s2 + $0x390] sm:$0xf]  ;;  %v12290_v55 = vor.u32 %v9970_v41, %v8635_v21  ;;  %v9965_v41 = vld [vmem:[%s15871_s2 + $0x380] sm:$0xf0] }
 0x213   : > { %2745 = vmatpush.bf16.msra.mxu2 %v12228_v23  ;;  %2759 = vmatpush.bf16.msra.mxu3 %v12230_v47  ;;  %v12292_v23 = vor.u32 %v9994_v51, %v8731_v30  ;;  %v8623_v30 = vld [vmem:[%s15871_s2 + $0x39c] sm:$0xf0]  ;;  %v12318_v58 = vor.u32 %v9968_v14, %v8621_v16  ;;  %17140 = vst [vmem:[#allocation273_spill] sm:$0xff] %v12320_v60  ;;  %v8705_v14 = vld [vmem:[%s15871_s2 + $0x438] sm:$0xf] }
 0x214   : > { %17137 = vst [vmem:[#allocation270_spill] sm:$0xff] %v12290_v55  ;;  %v12330_v21 = vor.u32 %v9967_v45, %v8623_v30  ;;  %v12332_v51 = vor.u32 %v9991_v38, %v8719_v59  ;;  %v9989_v16 = vld [vmem:[%s15871_s2 + $0x440] sm:$0xf0]  ;;  %v9988_v45 = vld [vmem:[%s15871_s2 + $0x43c] sm:$0xf]  ;;  %v12358_v38 = vor.u32 %v9965_v41, %v8609_v25 }
 0x215   : > { %17138 = vst [vmem:[#allocation271_spill] sm:$0xff] %v12292_v23  ;;  %v8707_v30 = vld [vmem:[%s15871_s2 + $0x444] sm:$0xf0]  ;;  %v12360_v59 = vor.u32 %v9989_v16, %v8705_v14  ;;  %v8693_v25 = vld [vmem:[%s15871_s2 + $0x420] sm:$0xf] }
 0x216   : > { %2718 = vmatpush.bf16.msra.mxu0 %v12261_v53  ;;  %2732 = vmatpush.bf16.msra.mxu1 %v12263_v43  ;;  %17139 = vst [vmem:[#allocation272_spill] sm:$0xff] %v12318_v58  ;;  %v9986_v41 = vld [vmem:[%s15871_s2 + $0x428] sm:$0xf0]  ;;  %v9961_v14 = vld [vmem:[%s15871_s2 + $0x364] sm:$0xf] }
 0x217   : > { %2746 = vmatpush.bf16.msra.mxu2 %v12276_v4  ;;  %2760 = vmatpush.bf16.msra.mxu3 %v12278_v37  ;;  %17141 = vst [vmem:[#allocation274_spill] sm:$0xff] %v12330_v21  ;;  %v12370_v37 = vor.u32 %v9964_v49, %v8611_v5  ;;  %v8599_v16 = vld [vmem:[%s15871_s2 + $0x36c] sm:$0xf0]  ;;  %v9985_v49 = vld [vmem:[%s15871_s2 + $0x424] sm:$0xf] }
 0x218   : > { %17142 = vst [vmem:[#allocation275_spill] sm:$0xff] %v12332_v51  ;;  %v8695_v5 = vld [vmem:[%s15871_s2 + $0x42c] sm:$0xf0]  ;;  %v9974_v43 = vld [vmem:[%s15871_s2 + $0x3c8] sm:$0xf0] }
 0x219   : > { %2719 = vmatmul.bf16.vlgmr.msra.gmra.mxu0 %v11948_v7  ;;  %2733 = vmatmul.bf16.vlgmr.msra.gmra.mxu1 %v11950_v50  ;;  %17143 = vst [vmem:[#allocation276_spill] sm:$0xff] %v12358_v38  ;;  %v8985_v47 = vld [vmem:[%s15871_s2 + $0x5e8] sm:$0xf]  ;;  %v10043_v4 = vld [vmem:[%s15871_s2 + $0x5f0] sm:$0xf0] }
 0x21a   : > { %3094 = vmatpush.bf16.msrb.mxu0 %v12280_v36  ;;  %3108 = vmatpush.bf16.msrb.mxu1 %v12282_v24  ;;  %17144 = vst [vmem:[#allocation277_spill] sm:$0xff] %v12360_v59  ;;  %v9962_v24 = vld [vmem:[%s15871_s2 + $0x368] sm:$0xf0]  ;;  %v10019_v36 = vld [vmem:[%s15871_s2 + $0x530] sm:$0xf0] }
 0x21b   : > { %3122 = vmatpush.bf16.msrb.mxu2 %v12290_v55  ;;  %3136 = vmatpush.bf16.msrb.mxu3 %v12292_v23  ;;  %v8597_v23 = vld [vmem:[%s15871_s2 + $0x360] sm:$0xf]  ;;  %17145 = vst [vmem:[#allocation278_spill] sm:$0xff] %v12370_v37 }
 0x21c   : > { %2747 = vmatmul.bf16.vlgmr.msra.gmra.mxu2 %v11948_v7  ;;  %2761 = vmatmul.bf16.vlgmr.msra.gmra.mxu3 %v11950_v50 }
 0x21e   : > { %3095 = vmatpush.bf16.msrb.mxu0 %v12318_v58  ;;  %3109 = vmatpush.bf16.msrb.mxu1 %v12320_v60  ;;  %v12372_v58 = vor.u32 %v9988_v45, %v8707_v30  ;;  %v12394_v45 = vor.u32 %v9962_v24, %v8597_v23  ;;  %v12396_v30 = vor.u32 %v9986_v41, %v8693_v25  ;;  %v9959_v60 = vld [vmem:[%s15871_s2 + $0x350] sm:$0xf0]  ;;  %v8681_v23 = vld [vmem:[%s15871_s2 + $0x408] sm:$0xf]  ;;  %v9958_v25 = vld [vmem:[%s15871_s2 + $0x34c] sm:$0xf] }
 0x21f   : > { %3123 = vmatpush.bf16.msrb.mxu2 %v12330_v21  ;;  %3137 = vmatpush.bf16.msrb.mxu3 %v12332_v51  ;;  %v8585_v51 = vld [vmem:[%s15871_s2 + $0x348] sm:$0xf]  ;;  %v12406_v21 = vor.u32 %v9961_v14, %v8599_v16  ;;  %v9983_v24 = vld [vmem:[%s15871_s2 + $0x410] sm:$0xf0]  ;;  %v8587_v41 = vld [vmem:[%s15871_s2 + $0x354] sm:$0xf0] }
 0x220   : > { %17146 = vst [vmem:[#allocation279_spill] sm:$0xff] %v12372_v58  ;;  %v9982_v14 = vld [vmem:[%s15871_s2 + $0x40c] sm:$0xf]  ;;  %v8683_v16 = vld [vmem:[%s15871_s2 + $0x414] sm:$0xf0] }
 0x221   : > { %17147 = vst [vmem:[#allocation280_spill] sm:$0xff] %v12394_v45 }
 0x222   : > { %3096 = vmatpush.bf16.msrb.mxu0 %v12358_v38  ;;  %3110 = vmatpush.bf16.msrb.mxu1 %v12360_v59  ;;  %17148 = vst [vmem:[#allocation281_spill] sm:$0xff] %v12396_v30  ;;  %v12408_v38 = vor.u32 %v9985_v49, %v8695_v5  ;;  %v12430_v49 = vor.u32 %v9959_v60, %v8585_v51  ;;  %v9956_v59 = vld [vmem:[%s15871_s2 + $0x338] sm:$0xf0]  ;;  %v8669_v60 = vld [vmem:[%s15871_s2 + $0x3f0] sm:$0xf] }
 0x223   : > { %3124 = vmatpush.bf16.msrb.mxu2 %v12370_v37  ;;  %3138 = vmatpush.bf16.msrb.mxu3 %v12372_v58  ;;  %17149 = vst [vmem:[#allocation282_spill] sm:$0xff] %v12406_v21  ;;  %v12432_v5 = vor.u32 %v9983_v24, %v8681_v23  ;;  %v8573_v58 = vld [vmem:[%s15871_s2 + $0x330] sm:$0xf]  ;;  %v12442_v37 = vor.u32 %v9958_v25, %v8587_v41  ;;  %v9980_v51 = vld [vmem:[%s15871_s2 + $0x3f8] sm:$0xf0] }
 0x224   : > { %17150 = vst [vmem:[#allocation283_spill] sm:$0xff] %v12408_v38  ;;  %v9955_v23 = vld [vmem:[%s15871_s2 + $0x334] sm:$0xf]  ;;  %v8575_v24 = vld [vmem:[%s15871_s2 + $0x33c] sm:$0xf0] }
 0x225   : > { %17151 = vst [vmem:[#allocation284_spill] sm:$0xff] %v12430_v49  ;;  %v9979_v25 = vld [vmem:[%s15871_s2 + $0x3f4] sm:$0xf]  ;;  %v8671_v41 = vld [vmem:[%s15871_s2 + $0x3fc] sm:$0xf0] }
 0x226   : > { %3097 = vmatpush.bf16.msrb.mxu0 %v12394_v45  ;;  %3111 = vmatpush.bf16.msrb.mxu1 %v12396_v30  ;;  %17152 = vst [vmem:[#allocation285_spill] sm:$0xff] %v12432_v5  ;;  %v12444_v45 = vor.u32 %v9982_v14, %v8683_v16  ;;  %v12466_v14 = vor.u32 %v9956_v59, %v8573_v58  ;;  %v9953_v30 = vld [vmem:[%s15871_s2 + $0x320] sm:$0xf0]  ;;  %v8657_v58 = vld [vmem:[%s15871_s2 + $0x3d8] sm:$0xf] }
 0x227   : > { %3125 = vmatpush.bf16.msrb.mxu2 %v12406_v21  ;;  %3139 = vmatpush.bf16.msrb.mxu3 %v12408_v38  ;;  %17153 = vst [vmem:[#allocation286_spill] sm:$0xff] %v12442_v37  ;;  %v12468_v16 = vor.u32 %v9980_v51, %v8669_v60  ;;  %v8561_v38 = vld [vmem:[%s15871_s2 + $0x318] sm:$0xf]  ;;  %v12478_v21 = vor.u32 %v9955_v23, %v8575_v24  ;;  %v9977_v59 = vld [vmem:[%s15871_s2 + $0x3e0] sm:$0xf0] }
 0x228   : > { %17154 = vst [vmem:[#allocation287_spill] sm:$0xff] %v12444_v45  ;;  %v9952_v60 = vld [vmem:[%s15871_s2 + $0x31c] sm:$0xf]  ;;  %v8563_v51 = vld [vmem:[%s15871_s2 + $0x324] sm:$0xf0] }
 0x229   : > { %17155 = vst [vmem:[#allocation288_spill] sm:$0xff] %v12466_v14  ;;  %v9976_v23 = vld [vmem:[%s15871_s2 + $0x3dc] sm:$0xf]  ;;  %v8659_v24 = vld [vmem:[%s15871_s2 + $0x3e4] sm:$0xf0] }
 0x22a   : > { %3098 = vmatpush.bf16.msrb.mxu0 %v12430_v49  ;;  %3112 = vmatpush.bf16.msrb.mxu1 %v12432_v5  ;;  %17156 = vst [vmem:[#allocation289_spill] sm:$0xff] %v12468_v16  ;;  %v12480_v49 = vor.u32 %v9979_v25, %v8671_v41  ;;  %v8549_v25 = vld [vmem:[%s15871_s2 + $0x300] sm:$0xf]  ;;  %v12505_v41 = vor.u32 %v9953_v30, %v8561_v38  ;;  %v9950_v5 = vld [vmem:[%s15871_s2 + $0x308] sm:$0xf0] }
 0x22b   : > { %3126 = vmatpush.bf16.msrb.mxu2 %v12442_v37  ;;  %3140 = vmatpush.bf16.msrb.mxu3 %v12444_v45  ;;  %17157 = vst [vmem:[#allocation290_spill] sm:$0xff] %v12478_v21  ;;  %v12507_v45 = vor.u32 %v9977_v59, %v8657_v58  ;;  %v8645_v37 = vld [vmem:[%s15871_s2 + $0x3c0] sm:$0xf]  ;;  %v12520_v38 = vor.u32 %v9952_v60, %v8563_v51  ;;  %v9949_v58 = vld [vmem:[%s15871_s2 + $0x304] sm:$0xf] }
 0x22c   : > { %17158 = vst [vmem:[#allocation291_spill] sm:$0xff] %v12480_v49  ;;  %v12522_v30 = vor.u32 %v9976_v23, %v8659_v24  ;;  %v8551_v59 = vld [vmem:[%s15871_s2 + $0x30c] sm:$0xf0]  ;;  %v9972_v51 = vld [vmem:[%s15871_s2 + $0x3b8] sm:$0xf0]  ;;  %v12555_v55 = vor.u32 %v9974_v43, %v8645_v37 }
 0x22d   : > { %17159 = vst [vmem:[#allocation292_spill] sm:$0xff] %v12505_v41  ;;  %v8641_v60 = vld [vmem:[%s15871_s2 + $0x3b0] sm:$0xf]  ;;  %v9996_v24 = vld [vmem:[%s15871_s2 + $0x478] sm:$0xf0] }
 0x22e   : > { %3099 = vmatpush.bf16.msrb.mxu0 %v12466_v14  ;;  %3113 = vmatpush.bf16.msrb.mxu1 %v12468_v16  ;;  %17160 = vst [vmem:[#allocation293_spill] sm:$0xff] %v12507_v45  ;;  %v9973_v16 = vld [vmem:[%s15871_s2 + $0x3c4] sm:$0xf]  ;;  %v8737_v23 = vld [vmem:[%s15871_s2 + $0x470] sm:$0xf]  ;;  %v12553_v14 = vor.u32 %v9950_v5, %v8549_v25  ;;  %v12568_v5 = vor.u32 %v9949_v58, %v8551_v59  ;;  %v12614_v59 = vrot.slane %v11950_v50, 1 }
 0x22f   : > { %3127 = vmatpush.bf16.msrb.mxu2 %v12478_v21  ;;  %3141 = vmatpush.bf16.msrb.mxu3 %v12480_v49  ;;  %17161 = vst [vmem:[#allocation294_spill] sm:$0xff] %v12520_v38  ;;  %v8647_v49 = vld [vmem:[%s15871_s2 + $0x3cc] sm:$0xf0]  ;;  %v8889_v21 = vld [vmem:[%s15871_s2 + $0x528] sm:$0xf]  ;;  %v12572_v37 = vor.u32 %v9972_v51, %v8641_v60  ;;  %v12574_v25 = vor.u32 %v9996_v24, %v8737_v23 }
 0x230   : > { %17162 = vst [vmem:[#allocation295_spill] sm:$0xff] %v12522_v30  ;;  %v12570_v43 = vor.u32 %v9973_v16, %v8647_v49  ;;  %v12582_v53 = vor.u32 %v10019_v36, %v8889_v21  ;;  %v8725_v49 = vld [vmem:[%s15871_s2 + $0x458] sm:$0xf]  ;;  %v9993_v16 = vld [vmem:[%s15871_s2 + $0x460] sm:$0xf0]  ;;  %v12611_v21 = vrot.slane %v11948_v7, 1 }
 0x231   : > { %17163 = vst [vmem:[#allocation296_spill] sm:$0xff] %v12553_v14  ;;  %v8877_v58 = vld [vmem:[%s15871_s2 + $0x510] sm:$0xf]  ;;  %v10040_v36 = vld [vmem:[%s15871_s2 + $0x5d8] sm:$0xf0]  ;;  %v12618_v51 = vor.u32 %v9993_v16, %v8725_v49 }
 0x232   : > { %3100 = vmatpush.bf16.msrb.mxu0 %v12505_v41  ;;  %3114 = vmatpush.bf16.msrb.mxu1 %v12507_v45  ;;  %17164 = vst [vmem:[#allocation297_spill] sm:$0xff] %v12555_v55  ;;  %v8629_v45 = vld [vmem:[%s15871_s2 + $0x398] sm:$0xf]  ;;  %v9969_v41 = vld [vmem:[%s15871_s2 + $0x3a0] sm:$0xf0] }
 0x233   : > { %3128 = vmatpush.bf16.msrb.mxu2 %v12520_v38  ;;  %3142 = vmatpush.bf16.msrb.mxu3 %v12522_v30  ;;  %17165 = vst [vmem:[#allocation298_spill] sm:$0xff] %v12568_v5  ;;  %v12584_v38 = vor.u32 %v10043_v4, %v8985_v47  ;;  %v10016_v47 = vld [vmem:[%s15871_s2 + $0x518] sm:$0xf0]  ;;  %v8973_v4 = vld [vmem:[%s15871_s2 + $0x5d0] sm:$0xf]  ;;  %v12616_v60 = vor.u32 %v9969_v41, %v8629_v45 }
 0x234   : > { %17166 = vst [vmem:[#allocation299_spill] sm:$0xff] %v12570_v43  ;;  %v8617_v23 = vld [vmem:[%s15871_s2 + $0x380] sm:$0xf]  ;;  %v9966_v24 = vld [vmem:[%s15871_s2 + $0x388] sm:$0xf0] }
 0x235   : > { %17167 = vst [vmem:[#allocation300_spill] sm:$0xff] %v12572_v37  ;;  %v8713_v45 = vld [vmem:[%s15871_s2 + $0x440] sm:$0xf]  ;;  %v9990_v41 = vld [vmem:[%s15871_s2 + $0x448] sm:$0xf0] }
 0x236   : > { %17168 = vst [vmem:[#allocation301_spill] sm:$0xff] %v12574_v25  ;;  %3101 = vmatpush.bf16.msrb.mxu0 %v12553_v14  ;;  %3115 = vmatpush.bf16.msrb.mxu1 %v12555_v55  ;;  %v8865_v49 = vld [vmem:[%s15871_s2 + $0x4f8] sm:$0xf]  ;;  %v10013_v16 = vld [vmem:[%s15871_s2 + $0x500] sm:$0xf0] }
 0x237   : > { %17169 = vst [vmem:[#allocation302_spill] sm:$0xff] %v12582_v53  ;;  %3129 = vmatpush.bf16.msrb.mxu2 %v12568_v5  ;;  %3143 = vmatpush.bf16.msrb.mxu3 %v12570_v43  ;;  %v12630_v43 = vor.u32 %v10040_v36, %v8973_v4  ;;  %v12656_v4 = vor.u32 %v9966_v24, %v8617_v23  ;;  %v9963_v55 = vld [vmem:[%s15871_s2 + $0x370] sm:$0xf0]  ;;  %v8701_v23 = vld [vmem:[%s15871_s2 + $0x428] sm:$0xf] }
 0x238   : > { %17170 = vst [vmem:[#allocation303_spill] sm:$0xff] %v12584_v38  ;;  %v12658_v36 = vor.u32 %v9990_v41, %v8713_v45  ;;  %v9987_v24 = vld [vmem:[%s15871_s2 + $0x430] sm:$0xf0]  ;;  %v8853_v45 = vld [vmem:[%s15871_s2 + $0x4e0] sm:$0xf] }
 0x239   : > { %17171 = vst [vmem:[#allocation304_spill] sm:$0xff] %v12616_v60  ;;  %3102 = vmatmul.bf16.vlgmr.msrb.gmra.mxu0 %v12611_v21  ;;  %3116 = vmatmul.bf16.vlgmr.msrb.gmra.mxu1 %v12614_v59  ;;  %v10010_v41 = vld [vmem:[%s15871_s2 + $0x4e8] sm:$0xf0]  ;;  %v10020_v5 = vld [vmem:[%s15871_s2 + $0x538] sm:$0xf0] }
 0x23a   : > { %3150 = vmatpush.bf16.msra.mxu0 %v12572_v37  ;;  %3164 = vmatpush.bf16.msra.mxu1 %v12574_v25  ;;  %17172 = vst [vmem:[#allocation305_spill] sm:$0xff] %v12618_v51  ;;  %v12628_v25 = vor.u32 %v10016_v47, %v8877_v58  ;;  %v8961_v58 = vld [vmem:[%s15871_s2 + $0x5b8] sm:$0xf]  ;;  %v10037_v47 = vld [vmem:[%s15871_s2 + $0x5c0] sm:$0xf0] }
 0x23b   : > { %3513 = vmatpush.bf16.msra.mxu2 %v12582_v53  ;;  %3527 = vmatpush.bf16.msra.mxu3 %v12584_v38  ;;  %17174 = vst [vmem:[#allocation307_spill] sm:$0xff] %v12630_v43  ;;  %v8605_v38 = vld [vmem:[%s15871_s2 + $0x368] sm:$0xf]  ;;  %v12668_v53 = vor.u32 %v10013_v16, %v8865_v49  ;;  %v8949_v49 = vld [vmem:[%s15871_s2 + $0x5a0] sm:$0xf] }
 0x23c   : > { %17173 = vst [vmem:[#allocation306_spill] sm:$0xff] %v12628_v25  ;;  %3130 = vmatmul.bf16.vlgmr.msrb.gmra.mxu2 %v12611_v21  ;;  %3144 = vmatmul.bf16.vlgmr.msrb.gmra.mxu3 %v12614_v59  ;;  %v10034_v16 = vld [vmem:[%s15871_s2 + $0x5a8] sm:$0xf0]  ;;  %v9975_v37 = vld [vmem:[%s15871_s2 + $0x3d0] sm:$0xf0] }
 0x23d   : > { %17175 = vst [vmem:[#allocation308_spill] sm:$0xff] %v12656_v4  ;;  %v8993_v14 = vld [vmem:[%s15871_s2 + $0x5f0] sm:$0xf] }
 0x23e   : > { %3151 = vmatpush.bf16.msra.mxu0 %v12616_v60  ;;  %3165 = vmatpush.bf16.msra.mxu1 %v12618_v51  ;;  %17176 = vst [vmem:[#allocation309_spill] sm:$0xff] %v12658_v36  ;;  %v12670_v60 = vor.u32 %v10037_v47, %v8961_v58  ;;  %v12692_v58 = vor.u32 %v9963_v55, %v8605_v38  ;;  %v9960_v51 = vld [vmem:[%s15871_s2 + $0x358] sm:$0xf0]  ;;  %v8689_v55 = vld [vmem:[%s15871_s2 + $0x410] sm:$0xf] }
 0x23f   : > { %3514 = vmatpush.bf16.msra.mxu2 %v12628_v25  ;;  %3528 = vmatpush.bf16.msra.mxu3 %v12630_v43  ;;  %17177 = vst [vmem:[#allocation310_spill] sm:$0xff] %v12668_v53  ;;  %v12694_v47 = vor.u32 %v9987_v24, %v8701_v23  ;;  %v8593_v43 = vld [vmem:[%s15871_s2 + $0x350] sm:$0xf]  ;;  %v12704_v25 = vor.u32 %v10010_v41, %v8853_v45  ;;  %v9984_v38 = vld [vmem:[%s15871_s2 + $0x418] sm:$0xf0] }
 0x240   : > { %17178 = vst [vmem:[#allocation311_spill] sm:$0xff] %v12670_v60  ;;  %v8841_v23 = vld [vmem:[%s15871_s2 + $0x4c8] sm:$0xf]  ;;  %v10007_v24 = vld [vmem:[%s15871_s2 + $0x4d0] sm:$0xf0] }
 0x241   : > { %17179 = vst [vmem:[#allocation312_spill] sm:$0xff] %v12692_v58  ;;  %v8937_v45 = vld [vmem:[%s15871_s2 + $0x588] sm:$0xf]  ;;  %v10031_v41 = vld [vmem:[%s15871_s2 + $0x590] sm:$0xf0] }
 0x242   : > { %3152 = vmatpush.bf16.msra.mxu0 %v12656_v4  ;;  %3166 = vmatpush.bf16.msra.mxu1 %v12658_v36  ;;  %17180 = vst [vmem:[#allocation313_spill] sm:$0xff] %v12694_v47  ;;  %v12706_v4 = vor.u32 %v10034_v16, %v8949_v49  ;;  %v12728_v49 = vor.u32 %v9960_v51, %v8593_v43  ;;  %v9957_v36 = vld [vmem:[%s15871_s2 + $0x340] sm:$0xf0]  ;;  %v8677_v43 = vld [vmem:[%s15871_s2 + $0x3f8] sm:$0xf] }
 0x243   : > { %3515 = vmatpush.bf16.msra.mxu2 %v12668_v53  ;;  %3529 = vmatpush.bf16.msra.mxu3 %v12670_v60  ;;  %17181 = vst [vmem:[#allocation314_spill] sm:$0xff] %v12704_v25  ;;  %v12730_v16 = vor.u32 %v9984_v38, %v8689_v55  ;;  %v8581_v60 = vld [vmem:[%s15871_s2 + $0x338] sm:$0xf]  ;;  %v12740_v53 = vor.u32 %v10007_v24, %v8841_v23  ;;  %v9981_v51 = vld [vmem:[%s15871_s2 + $0x400] sm:$0xf0] }
 0x244   : > { %17182 = vst [vmem:[#allocation315_spill] sm:$0xff] %v12706_v4  ;;  %v8829_v55 = vld [vmem:[%s15871_s2 + $0x4b0] sm:$0xf]  ;;  %v10004_v38 = vld [vmem:[%s15871_s2 + $0x4b8] sm:$0xf0] }
 0x245   : > { %17183 = vst [vmem:[#allocation316_spill] sm:$0xff] %v12728_v49  ;;  %v8925_v23 = vld [vmem:[%s15871_s2 + $0x570] sm:$0xf]  ;;  %v10028_v24 = vld [vmem:[%s15871_s2 + $0x578] sm:$0xf0] }
 0x246   : > { %3153 = vmatpush.bf16.msra.mxu0 %v12692_v58  ;;  %3167 = vmatpush.bf16.msra.mxu1 %v12694_v47  ;;  %17184 = vst [vmem:[#allocation317_spill] sm:$0xff] %v12730_v16  ;;  %v12742_v58 = vor.u32 %v10031_v41, %v8937_v45  ;;  %v12764_v45 = vor.u32 %v9957_v36, %v8581_v60  ;;  %v9954_v47 = vld [vmem:[%s15871_s2 + $0x328] sm:$0xf0]  ;;  %v8665_v60 = vld [vmem:[%s15871_s2 + $0x3e0] sm:$0xf] }
 0x247   : > { %3516 = vmatpush.bf16.msra.mxu2 %v12704_v25  ;;  %3530 = vmatpush.bf16.msra.mxu3 %v12706_v4  ;;  %17185 = vst [vmem:[#allocation318_spill] sm:$0xff] %v12740_v53  ;;  %v12766_v41 = vor.u32 %v9981_v51, %v8677_v43  ;;  %v8569_v4 = vld [vmem:[%s15871_s2 + $0x320] sm:$0xf]  ;;  %v12776_v25 = vor.u32 %v10004_v38, %v8829_v55  ;;  %v9978_v36 = vld [vmem:[%s15871_s2 + $0x3e8] sm:$0xf0] }
 0x248   : > { %17186 = vst [vmem:[#allocation319_spill] sm:$0xff] %v12742_v58  ;;  %v8817_v43 = vld [vmem:[%s15871_s2 + $0x498] sm:$0xf]  ;;  %v10001_v51 = vld [vmem:[%s15871_s2 + $0x4a0] sm:$0xf0] }
 0x249   : > { %17187 = vst [vmem:[#allocation320_spill] sm:$0xff] %v12764_v45  ;;  %v8913_v55 = vld [vmem:[%s15871_s2 + $0x558] sm:$0xf]  ;;  %v10025_v38 = vld [vmem:[%s15871_s2 + $0x560] sm:$0xf0] }
 0x24a   : > { %3154 = vmatpush.bf16.msra.mxu0 %v12728_v49  ;;  %3168 = vmatpush.bf16.msra.mxu1 %v12730_v16  ;;  %17188 = vst [vmem:[#allocation321_spill] sm:$0xff] %v12766_v41  ;;  %v12778_v49 = vor.u32 %v10028_v24, %v8925_v23  ;;  %v8557_v23 = vld [vmem:[%s15871_s2 + $0x308] sm:$0xf]  ;;  %v12803_v24 = vor.u32 %v9954_v47, %v8569_v4  ;;  %v9951_v16 = vld [vmem:[%s15871_s2 + $0x310] sm:$0xf0] }
 0x24b   : > { %3517 = vmatpush.bf16.msra.mxu2 %v12740_v53  ;;  %3531 = vmatpush.bf16.msra.mxu3 %v12742_v58  ;;  %17189 = vst [vmem:[#allocation322_spill] sm:$0xff] %v12776_v25  ;;  %v12805_v58 = vor.u32 %v9978_v36, %v8665_v60  ;;  %v8653_v53 = vld [vmem:[%s15871_s2 + $0x3c8] sm:$0xf]  ;;  %v12818_v4 = vor.u32 %v10001_v51, %v8817_v43  ;;  %v8805_v60 = vld [vmem:[%s15871_s2 + $0x480] sm:$0xf] }
 0x24c   : > { %17190 = vst [vmem:[#allocation323_spill] sm:$0xff] %v12778_v49  ;;  %v12820_v47 = vor.u32 %v10025_v38, %v8913_v55  ;;  %v9998_v36 = vld [vmem:[%s15871_s2 + $0x488] sm:$0xf0]  ;;  %v8891_v51 = vld [vmem:[%s15871_s2 + $0x534] sm:$0xf0]  ;;  %v12853_v30 = vor.u32 %v9975_v37, %v8653_v53 }
 0x24d   : > { %17191 = vst [vmem:[#allocation324_spill] sm:$0xff] %v12803_v24  ;;  %v10018_v43 = vld [vmem:[%s15871_s2 + $0x52c] sm:$0xf]  ;;  %v8987_v38 = vld [vmem:[%s15871_s2 + $0x5f4] sm:$0xf0] }
 0x24e   : > { %3155 = vmatpush.bf16.msra.mxu0 %v12764_v45  ;;  %3169 = vmatpush.bf16.msra.mxu1 %v12766_v41  ;;  %17192 = vst [vmem:[#allocation325_spill] sm:$0xff] %v12805_v58  ;;  %v8901_v41 = vld [vmem:[%s15871_s2 + $0x540] sm:$0xf]  ;;  %v10042_v55 = vld [vmem:[%s15871_s2 + $0x5ec] sm:$0xf]  ;;  %v12851_v45 = vor.u32 %v9951_v16, %v8557_v23  ;;  %v12866_v16 = vor.u32 %v9998_v36, %v8805_v60 }
 0x24f   : > { %3518 = vmatpush.bf16.msra.mxu2 %v12776_v25  ;;  %3532 = vmatpush.bf16.msra.mxu3 %v12778_v49  ;;  %17193 = vst [vmem:[#allocation326_spill] sm:$0xff] %v12818_v4  ;;  %v10022_v49 = vld [vmem:[%s15871_s2 + $0x548] sm:$0xf0]  ;;  %v8897_v25 = vld [vmem:[%s15871_s2 + $0x530] sm:$0xf]  ;;  %v12870_v37 = vor.u32 %v10018_v43, %v8891_v51  ;;  %v12872_v23 = vor.u32 %v10042_v55, %v8987_v38 }
 0x250   : > { %17194 = vst [vmem:[#allocation327_spill] sm:$0xff] %v12820_v47  ;;  %v12868_v53 = vor.u32 %v10022_v49, %v8901_v41  ;;  %v12880_v57 = vor.u32 %v10020_v5, %v8897_v25  ;;  %v10039_v49 = vld [vmem:[%s15871_s2 + $0x5d4] sm:$0xf]  ;;  %v8975_v41 = vld [vmem:[%s15871_s2 + $0x5dc] sm:$0xf0] }
 0x251   : > { %17195 = vst [vmem:[#allocation328_spill] sm:$0xff] %v12851_v45  ;;  %v8885_v60 = vld [vmem:[%s15871_s2 + $0x518] sm:$0xf]  ;;  %v10041_v5 = vld [vmem:[%s15871_s2 + $0x5e0] sm:$0xf0]  ;;  %v12910_v36 = vor.u32 %v10039_v49, %v8975_v41 }
 0x252   : > { %3156 = vmatpush.bf16.msra.mxu0 %v12803_v24  ;;  %3170 = vmatpush.bf16.msra.mxu1 %v12805_v58  ;;  %17196 = vst [vmem:[#allocation329_spill] sm:$0xff] %v12853_v30  ;;  %v10015_v58 = vld [vmem:[%s15871_s2 + $0x514] sm:$0xf]  ;;  %v8879_v24 = vld [vmem:[%s15871_s2 + $0x51c] sm:$0xf0] }
 0x253   : > { %3519 = vmatpush.bf16.msra.mxu2 %v12818_v4  ;;  %3533 = vmatpush.bf16.msra.mxu3 %v12820_v47  ;;  %17197 = vst [vmem:[#allocation330_spill] sm:$0xff] %v12866_v16  ;;  %v12882_v4 = vor.u32 %v10044_v10, %v8993_v14  ;;  %v10017_v10 = vld [vmem:[%s15871_s2 + $0x520] sm:$0xf0]  ;;  %v8981_v14 = vld [vmem:[%s15871_s2 + $0x5d8] sm:$0xf]  ;;  %v12908_v25 = vor.u32 %v10015_v58, %v8879_v24 }
 0x254   : > { %17198 = vst [vmem:[#allocation331_spill] sm:$0xff] %v12868_v53  ;;  %v10012_v43 = vld [vmem:[%s15871_s2 + $0x4fc] sm:$0xf]  ;;  %v8867_v51 = vld [vmem:[%s15871_s2 + $0x504] sm:$0xf0]  ;;  %v12920_v55 = vor.u32 %v10017_v10, %v8885_v60  ;;  %v12922_v38 = vor.u32 %v10041_v5, %v8981_v14 }
 0x255   : > { %17199 = vst [vmem:[#allocation332_spill] sm:$0xff] %v12870_v37  ;;  %v10036_v58 = vld [vmem:[%s15871_s2 + $0x5bc] sm:$0xf]  ;;  %v8963_v24 = vld [vmem:[%s15871_s2 + $0x5c4] sm:$0xf0] }
 0x256   : > { %17200 = vst [vmem:[#allocation333_spill] sm:$0xff] %v12872_v23  ;;  %3157 = vmatpush.bf16.msra.mxu0 %v12851_v45  ;;  %3171 = vmatpush.bf16.msra.mxu1 %v12853_v30  ;;  %v8873_v49 = vld [vmem:[%s15871_s2 + $0x500] sm:$0xf]  ;;  %v10014_v41 = vld [vmem:[%s15871_s2 + $0x508] sm:$0xf0] }
 0x257   : > { %17201 = vst [vmem:[#allocation334_spill] sm:$0xff] %v12880_v57  ;;  %3520 = vmatpush.bf16.msra.mxu2 %v12866_v16  ;;  %3534 = vmatpush.bf16.msra.mxu3 %v12868_v53  ;;  %v8969_v60 = vld [vmem:[%s15871_s2 + $0x5c0] sm:$0xf]  ;;  %v10038_v10 = vld [vmem:[%s15871_s2 + $0x5c8] sm:$0xf0] }
 0x258   : > { %17202 = vst [vmem:[#allocation335_spill] sm:$0xff] %v12882_v4  ;;  %v10009_v14 = vld [vmem:[%s15871_s2 + $0x4e4] sm:$0xf]  ;;  %v8855_v5 = vld [vmem:[%s15871_s2 + $0x4ec] sm:$0xf0] }
 0x259   : > { %17203 = vst [vmem:[#allocation336_spill] sm:$0xff] %v12908_v25  ;;  %3158 = vmatmul.bf16.vlgmr.msra.gmra.mxu0 %v12611_v21  ;;  %3172 = vmatmul.bf16.vlgmr.msra.gmra.mxu1 %v12614_v59  ;;  %v12948_v21 = vor.u32 %v10012_v43, %v8867_v51  ;;  %v12950_v59 = vor.u32 %v10036_v58, %v8963_v24  ;;  %v10033_v43 = vld [vmem:[%s15871_s2 + $0x5a4] sm:$0xf]  ;;  %v8951_v51 = vld [vmem:[%s15871_s2 + $0x5ac] sm:$0xf0] }
 0x25a   : > { %3541 = vmatpush.bf16.msrb.mxu0 %v12870_v37  ;;  %3555 = vmatpush.bf16.msrb.mxu1 %v12872_v23  ;;  %17204 = vst [vmem:[#allocation337_spill] sm:$0xff] %v12910_v36  ;;  %v12962_v23 = vor.u32 %v10038_v10, %v8969_v60  ;;  %v8861_v58 = vld [vmem:[%s15871_s2 + $0x4e8] sm:$0xf]  ;;  %v10011_v24 = vld [vmem:[%s15871_s2 + $0x4f0] sm:$0xf0]  ;;  %v12984_v60 = vor.u32 %v10009_v14, %v8855_v5 }
 0x25b   : > { %3569 = vmatpush.bf16.msrb.mxu2 %v12880_v57  ;;  %3583 = vmatpush.bf16.msrb.mxu3 %v12882_v4  ;;  %17205 = vst [vmem:[#allocation338_spill] sm:$0xff] %v12920_v55  ;;  %v12960_v4 = vor.u32 %v10014_v41, %v8873_v49  ;;  %v8957_v49 = vld [vmem:[%s15871_s2 + $0x5a8] sm:$0xf]  ;;  %v10035_v41 = vld [vmem:[%s15871_s2 + $0x5b0] sm:$0xf0]  ;;  %v12986_v10 = vor.u32 %v10033_v43, %v8951_v51 }
 0x25c   : > { %17206 = vst [vmem:[#allocation339_spill] sm:$0xff] %v12922_v38  ;;  %3521 = vmatmul.bf16.vlgmr.msra.gmra.mxu2 %v11992_v35  ;;  %3535 = vmatmul.bf16.vlgmr.msra.gmra.mxu3 %v12009_v28  ;;  %v10030_v14 = vld [vmem:[%s15871_s2 + $0x58c] sm:$0xf]  ;;  %v8939_v5 = vld [vmem:[%s15871_s2 + $0x594] sm:$0xf0] }
 0x25d   : > { %17207 = vst [vmem:[#allocation340_spill] sm:$0xff] %v12948_v21  ;;  %v8849_v43 = vld [vmem:[%s15871_s2 + $0x4d0] sm:$0xf]  ;;  %v10008_v51 = vld [vmem:[%s15871_s2 + $0x4d8] sm:$0xf0] }
 0x25e   : > { %3542 = vmatpush.bf16.msrb.mxu0 %v12908_v25  ;;  %3556 = vmatpush.bf16.msrb.mxu1 %v12910_v36  ;;  %17208 = vst [vmem:[#allocation341_spill] sm:$0xff] %v12950_v59  ;;  %v8843_v36 = vld [vmem:[%s15871_s2 + $0x4d4] sm:$0xf0]  ;;  %v8903_v25 = vld [vmem:[%s15871_s2 + $0x54c] sm:$0xf0] }
 0x25f   : > { %3570 = vmatpush.bf16.msrb.mxu2 %v12920_v55  ;;  %3584 = vmatpush.bf16.msrb.mxu3 %v12922_v38  ;;  %17209 = vst [vmem:[#allocation342_spill] sm:$0xff] %v12960_v4  ;;  %v10006_v38 = vld [vmem:[%s15871_s2 + $0x4cc] sm:$0xf]  ;;  %v12996_v55 = vor.u32 %v10011_v24, %v8861_v58  ;;  %v8945_v58 = vld [vmem:[%s15871_s2 + $0x590] sm:$0xf] }
 0x260   : > { %17210 = vst [vmem:[#allocation343_spill] sm:$0xff] %v12962_v23  ;;  %v10032_v24 = vld [vmem:[%s15871_s2 + $0x598] sm:$0xf0]  ;;  %v9147_v30 = vld [vmem:[%s15871_s2 + $0x6b4] sm:$0xf0] }
 0x261   : > { %17211 = vst [vmem:[#allocation344_spill] sm:$0xff] %v12984_v60  ;;  %v10090_v57 = vld [vmem:[%s15871_s2 + $0x76c] sm:$0xf]  ;;  %v9243_v37 = vld [vmem:[%s15871_s2 + $0x774] sm:$0xf0] }
 0x262   : > { %3543 = vmatpush.bf16.msrb.mxu0 %v12948_v21  ;;  %3557 = vmatpush.bf16.msrb.mxu1 %v12950_v59  ;;  %17212 = vst [vmem:[#allocation345_spill] sm:$0xff] %v12986_v10  ;;  %v12998_v21 = vor.u32 %v10035_v41, %v8957_v49  ;;  %v13020_v49 = vor.u32 %v10006_v38, %v8843_v36  ;;  %v8831_v59 = vld [vmem:[%s15871_s2 + $0x4bc] sm:$0xf0]  ;;  %v10027_v36 = vld [vmem:[%s15871_s2 + $0x574] sm:$0xf] }
 0x263   : > { %3571 = vmatpush.bf16.msrb.mxu2 %v12960_v4  ;;  %3585 = vmatpush.bf16.msrb.mxu3 %v12962_v23  ;;  %17213 = vst [vmem:[#allocation346_spill] sm:$0xff] %v12996_v55  ;;  %v13022_v41 = vor.u32 %v10030_v14, %v8939_v5  ;;  %v10003_v23 = vld [vmem:[%s15871_s2 + $0x4b4] sm:$0xf]  ;;  %v13032_v4 = vor.u32 %v10008_v51, %v8849_v43  ;;  %v8927_v38 = vld [vmem:[%s15871_s2 + $0x57c] sm:$0xf0] }
 0x264   : > { %17214 = vst [vmem:[#allocation347_spill] sm:$0xff] %v12998_v21  ;;  %v8837_v14 = vld [vmem:[%s15871_s2 + $0x4b8] sm:$0xf]  ;;  %v10005_v5 = vld [vmem:[%s15871_s2 + $0x4c0] sm:$0xf0] }
 0x265   : > { %17215 = vst [vmem:[#allocation348_spill] sm:$0xff] %v13020_v49  ;;  %v8933_v43 = vld [vmem:[%s15871_s2 + $0x578] sm:$0xf]  ;;  %v10029_v51 = vld [vmem:[%s15871_s2 + $0x580] sm:$0xf0] }
 0x266   : > { %3544 = vmatpush.bf16.msrb.mxu0 %v12984_v60  ;;  %3558 = vmatpush.bf16.msrb.mxu1 %v12986_v10  ;;  %17216 = vst [vmem:[#allocation349_spill] sm:$0xff] %v13022_v41  ;;  %v13034_v60 = vor.u32 %v10032_v24, %v8945_v58  ;;  %v13056_v58 = vor.u32 %v10003_v23, %v8831_v59  ;;  %v8819_v10 = vld [vmem:[%s15871_s2 + $0x4a4] sm:$0xf0]  ;;  %v10024_v23 = vld [vmem:[%s15871_s2 + $0x55c] sm:$0xf] }
 0x267   : > { %3572 = vmatpush.bf16.msrb.mxu2 %v12996_v55  ;;  %3586 = vmatpush.bf16.msrb.mxu3 %v12998_v21  ;;  %17217 = vst [vmem:[#allocation350_spill] sm:$0xff] %v13032_v4  ;;  %v13058_v24 = vor.u32 %v10027_v36, %v8927_v38  ;;  %v10000_v21 = vld [vmem:[%s15871_s2 + $0x49c] sm:$0xf]  ;;  %v13068_v55 = vor.u32 %v10005_v5, %v8837_v14  ;;  %v8915_v59 = vld [vmem:[%s15871_s2 + $0x564] sm:$0xf0] }
 0x268   : > { %17218 = vst [vmem:[#allocation351_spill] sm:$0xff] %v13034_v60  ;;  %v8825_v36 = vld [vmem:[%s15871_s2 + $0x4a0] sm:$0xf]  ;;  %v10002_v38 = vld [vmem:[%s15871_s2 + $0x4a8] sm:$0xf0] }
 0x269   : > { %17219 = vst [vmem:[#allocation352_spill] sm:$0xff] %v13056_v58  ;;  %v8921_v14 = vld [vmem:[%s15871_s2 + $0x560] sm:$0xf]  ;;  %v10026_v5 = vld [vmem:[%s15871_s2 + $0x568] sm:$0xf0] }
 0x26a   : > { %3545 = vmatpush.bf16.msrb.mxu0 %v13020_v49  ;;  %3559 = vmatpush.bf16.msrb.mxu1 %v13022_v41  ;;  %17220 = vst [vmem:[#allocation353_spill] sm:$0xff] %v13058_v24  ;;  %v13070_v49 = vor.u32 %v10029_v51, %v8933_v43  ;;  %v9997_v43 = vld [vmem:[%s15871_s2 + $0x484] sm:$0xf]  ;;  %v13095_v51 = vor.u32 %v10000_v21, %v8819_v10  ;;  %v8807_v41 = vld [vmem:[%s15871_s2 + $0x48c] sm:$0xf0] }
 0x26b   : > { %3573 = vmatpush.bf16.msrb.mxu2 %v13032_v4  ;;  %3587 = vmatpush.bf16.msrb.mxu3 %v13034_v60  ;;  %17221 = vst [vmem:[#allocation354_spill] sm:$0xff] %v13068_v55  ;;  %v13097_v60 = vor.u32 %v10024_v23, %v8915_v59  ;;  %v10021_v4 = vld [vmem:[%s15871_s2 + $0x544] sm:$0xf]  ;;  %v13110_v21 = vor.u32 %v10002_v38, %v8825_v36  ;;  %v8813_v23 = vld [vmem:[%s15871_s2 + $0x488] sm:$0xf] }
 0x26c   : > { %17222 = vst [vmem:[#allocation355_spill] sm:$0xff] %v13070_v49  ;;  %v13112_v10 = vor.u32 %v10026_v5, %v8921_v14  ;;  %v9999_v59 = vld [vmem:[%s15871_s2 + $0x490] sm:$0xf0]  ;;  %v9145_v36 = vld [vmem:[%s15871_s2 + $0x6a8] sm:$0xf]  ;;  %v13145_v53 = vor.u32 %v10021_v4, %v8903_v25 }
 0x26d   : > { %17223 = vst [vmem:[#allocation356_spill] sm:$0xff] %v13095_v51  ;;  %v10067_v38 = vld [vmem:[%s15871_s2 + $0x6b0] sm:$0xf0]  ;;  %v9241_v14 = vld [vmem:[%s15871_s2 + $0x768] sm:$0xf] }
 0x26e   : > { %3546 = vmatpush.bf16.msrb.mxu0 %v13056_v58  ;;  %3560 = vmatpush.bf16.msrb.mxu1 %v13058_v24  ;;  %17224 = vst [vmem:[#allocation357_spill] sm:$0xff] %v13097_v60  ;;  %v8909_v24 = vld [vmem:[%s15871_s2 + $0x548] sm:$0xf]  ;;  %v10091_v5 = vld [vmem:[%s15871_s2 + $0x770] sm:$0xf0]  ;;  %v13143_v58 = vor.u32 %v9997_v43, %v8807_v41  ;;  %v13158_v41 = vor.u32 %v9999_v59, %v8813_v23 }
 0x26f   : > { %3574 = vmatpush.bf16.msrb.mxu2 %v13068_v55  ;;  %3588 = vmatpush.bf16.msrb.mxu3 %v13070_v49  ;;  %17225 = vst [vmem:[#allocation358_spill] sm:$0xff] %v13110_v21  ;;  %v10023_v49 = vld [vmem:[%s15871_s2 + $0x550] sm:$0xf0]  ;;  %v10066_v55 = vld [vmem:[%s15871_s2 + $0x6ac] sm:$0xf]  ;;  %v13162_v25 = vor.u32 %v10067_v38, %v9145_v36  ;;  %v13164_v43 = vor.u32 %v10091_v5, %v9241_v14 }
 0x270   : > { %17226 = vst [vmem:[#allocation359_spill] sm:$0xff] %v13112_v10  ;;  %v13160_v4 = vor.u32 %v10023_v49, %v8909_v24  ;;  %v13172_v47 = vor.u32 %v10066_v55, %v9147_v30  ;;  %v9229_v49 = vld [vmem:[%s15871_s2 + $0x750] sm:$0xf]  ;;  %v10088_v24 = vld [vmem:[%s15871_s2 + $0x758] sm:$0xf0] }
 0x271   : > { %17227 = vst [vmem:[#allocation360_spill] sm:$0xff] %v13143_v58  ;;  %v10063_v23 = vld [vmem:[%s15871_s2 + $0x694] sm:$0xf]  ;;  %v13202_v59 = vor.u32 %v10088_v24, %v9229_v49  ;;  %v9121_v36 = vld [vmem:[%s15871_s2 + $0x678] sm:$0xf] }
 0x272   : > { %3547 = vmatpush.bf16.msrb.mxu0 %v13095_v51  ;;  %3561 = vmatpush.bf16.msrb.mxu1 %v13097_v60  ;;  %17228 = vst [vmem:[#allocation361_spill] sm:$0xff] %v13145_v53  ;;  %v9133_v60 = vld [vmem:[%s15871_s2 + $0x690] sm:$0xf]  ;;  %v10064_v51 = vld [vmem:[%s15871_s2 + $0x698] sm:$0xf0] }
 0x273   : > { %3575 = vmatpush.bf16.msrb.mxu2 %v13110_v21  ;;  %3589 = vmatpush.bf16.msrb.mxu3 %v13112_v10  ;;  %17229 = vst [vmem:[#allocation362_spill] sm:$0xff] %v13158_v41  ;;  %v13174_v21 = vor.u32 %v10090_v57, %v9243_v37  ;;  %v9135_v57 = vld [vmem:[%s15871_s2 + $0x69c] sm:$0xf0]  ;;  %v10087_v30 = vld [vmem:[%s15871_s2 + $0x754] sm:$0xf]  ;;  %v13200_v55 = vor.u32 %v10064_v51, %v9133_v60 }
 0x274   : > { %17230 = vst [vmem:[#allocation363_spill] sm:$0xff] %v13160_v4  ;;  %v9231_v37 = vld [vmem:[%s15871_s2 + $0x75c] sm:$0xf0]  ;;  %v10061_v38 = vld [vmem:[%s15871_s2 + $0x680] sm:$0xf0]  ;;  %v13212_v14 = vor.u32 %v10063_v23, %v9135_v57 }
 0x275   : > { %17231 = vst [vmem:[#allocation364_spill] sm:$0xff] %v13162_v25  ;;  %v13214_v5 = vor.u32 %v10087_v30, %v9231_v37  ;;  %v9217_v60 = vld [vmem:[%s15871_s2 + $0x738] sm:$0xf]  ;;  %v10085_v51 = vld [vmem:[%s15871_s2 + $0x740] sm:$0xf0]  ;;  %v2352_v30 = vpop.f32.mrf.mxu0  ;;  %v13240_v37 = vor.u32 %v10061_v38, %v9121_v36 }
 0x276   : > { %17232 = vst [vmem:[#allocation365_spill] sm:$0xff] %v13164_v43  ;;  %3548 = vmatpush.bf16.msrb.mxu0 %v13143_v58  ;;  %3562 = vmatpush.bf16.msrb.mxu1 %v13145_v53  ;;  %v10060_v49 = vld [vmem:[%s15871_s2 + $0x67c] sm:$0xf]  ;;  %v9123_v24 = vld [vmem:[%s15871_s2 + $0x684] sm:$0xf0] }
 0x277   : > { %17233 = vst [vmem:[#allocation366_spill] sm:$0xff] %v13172_v47  ;;  %3576 = vmatpush.bf16.msrb.mxu2 %v13158_v41  ;;  %3590 = vmatpush.bf16.msrb.mxu3 %v13160_v4  ;;  %v10084_v23 = vld [vmem:[%s15871_s2 + $0x73c] sm:$0xf]  ;;  %v9219_v57 = vld [vmem:[%s15871_s2 + $0x744] sm:$0xf0] }
 0x278   : > { %17234 = vst [vmem:[#allocation367_spill] sm:$0xff] %v13174_v21  ;;  %v9109_v4 = vld [vmem:[%s15871_s2 + $0x660] sm:$0xf]  ;;  %v10046_v41 = vld [vmem:[%s15871_s2 + $0x608] sm:$0xf0] }
 0x279   : > { %17235 = vst [vmem:[#allocation368_spill] sm:$0xff] %v13200_v55  ;;  %3549 = vmatmul.bf16.vlgmr.msrb.gmra.mxu0 %v11992_v35  ;;  %3563 = vmatmul.bf16.vlgmr.msrb.gmra.mxu1 %v12009_v28  ;;  %v9205_v38 = vld [vmem:[%s15871_s2 + $0x720] sm:$0xf] }
 0x27a   : > { %3928 = vmatpush.bf16.msra.mxu0 %v13162_v25  ;;  %3942 = vmatpush.bf16.msra.mxu1 %v13164_v43  ;;  %17236 = vst [vmem:[#allocation369_spill] sm:$0xff] %v13202_v59  ;;  %v2366_v43 = vpop.f32.mrf.mxu1  ;;  %v9061_v10 = vld [vmem:[%s15871_s2 + $0x600] sm:$0xf] }
 0x27b   : > { %3956 = vmatpush.bf16.msra.mxu2 %v13172_v47  ;;  %3970 = vmatpush.bf16.msra.mxu3 %v13174_v21  ;;  %17237 = vst [vmem:[#allocation370_spill] sm:$0xff] %v13212_v14  ;;  %v13242_v21 = vor.u32 %v10085_v51, %v9217_v60  ;;  %v13256_v36 = vadd.f32 %v2366_v43, %v2352_v30  ;;  %v10082_v60 = vld [vmem:[%s15871_s2 + $0x728] sm:$0xf0]  ;;  %v10057_v51 = vld [vmem:[%s15871_s2 + $0x664] sm:$0xf] }
 0x27c   : > { %17238 = vst [vmem:[#allocation371_spill] sm:$0xff] %v13214_v5  ;;  %3577 = vmatmul.bf16.vlgmr.msrb.gmra.mxu2 %v11992_v35  ;;  %3591 = vmatmul.bf16.vlgmr.msrb.gmra.mxu3 %v12009_v28  ;;  %v10058_v35 = vld [vmem:[%s15871_s2 + $0x668] sm:$0xf0]  ;;  %v13252_v28 = vor.u32 %v10060_v49, %v9123_v24  ;;  %v9111_v49 = vld [vmem:[%s15871_s2 + $0x66c] sm:$0xf0] }
 0x27d   : > { %17239 = vst [vmem:[#allocation372_spill] sm:$0xff] %v13240_v37  ;;  %v10081_v43 = vld [vmem:[%s15871_s2 + $0x724] sm:$0xf]  ;;  %v9207_v24 = vld [vmem:[%s15871_s2 + $0x72c] sm:$0xf0] }
 0x27e   : > { %3929 = vmatpush.bf16.msra.mxu0 %v13200_v55  ;;  %3943 = vmatpush.bf16.msra.mxu1 %v13202_v59  ;;  %17240 = vst [vmem:[#allocation373_spill] sm:$0xff] %v13242_v21  ;;  %v13254_v59 = vor.u32 %v10084_v23, %v9219_v57  ;;  %v13278_v23 = vor.u32 %v10058_v35, %v9109_v4  ;;  %v9097_v30 = vld [vmem:[%s15871_s2 + $0x648] sm:$0xf]  ;;  %v2380_v4 = vpop.f32.mrf.mxu2  ;;  %v9085_v47 = vld [vmem:[%s15871_s2 + $0x630] sm:$0xf] }
 0x27f   : > { %3957 = vmatpush.bf16.msra.mxu2 %v13212_v14  ;;  %3971 = vmatpush.bf16.msra.mxu3 %v13214_v5  ;;  %17241 = vst [vmem:[#allocation374_spill] sm:$0xff] %v13252_v28  ;;  %v13280_v57 = vor.u32 %v10082_v60, %v9205_v38  ;;  %v10055_v5 = vld [vmem:[%s15871_s2 + $0x650] sm:$0xf0]  ;;  %v13290_v14 = vor.u32 %v10057_v51, %v9111_v49  ;;  %v9193_v35 = vld [vmem:[%s15871_s2 + $0x708] sm:$0xf] }
 0x280   : > { %17242 = vst [vmem:[#allocation375_spill] sm:$0xff] %v13254_v59  ;;  %v10079_v38 = vld [vmem:[%s15871_s2 + $0x710] sm:$0xf0]  ;;  %v10054_v60 = vld [vmem:[%s15871_s2 + $0x64c] sm:$0xf] }
 0x281   : > { %17243 = vst [vmem:[#allocation376_spill] sm:$0xff] %v13278_v23  ;;  %v9099_v51 = vld [vmem:[%s15871_s2 + $0x654] sm:$0xf0]  ;;  %v10078_v49 = vld [vmem:[%s15871_s2 + $0x70c] sm:$0xf]  ;;  %v13320_v55 = vor.u32 %v10079_v38, %v9193_v35 }
 0x282   : > { %3930 = vmatpush.bf16.msra.mxu0 %v13240_v37  ;;  %3944 = vmatpush.bf16.msra.mxu1 %v13242_v21  ;;  %17244 = vst [vmem:[#allocation377_spill] sm:$0xff] %v13280_v57  ;;  %v13292_v37 = vor.u32 %v10081_v43, %v9207_v24  ;;  %v2394_v21 = vpop.f32.mrf.mxu3  ;;  %v9195_v43 = vld [vmem:[%s15871_s2 + $0x714] sm:$0xf0]  ;;  %v13322_v53 = vpop.f32.mrf.mxu1  ;;  %v10076_v35 = vld [vmem:[%s15871_s2 + $0x6f8] sm:$0xf0] }
 0x283   : > { %3958 = vmatpush.bf16.msra.mxu2 %v13252_v28  ;;  %3972 = vmatpush.bf16.msra.mxu3 %v13254_v59  ;;  %17245 = vst [vmem:[#allocation378_spill] sm:$0xff] %v13290_v14  ;;  %v13312_v24 = vadd.f32 %v2394_v21, %v2380_v4  ;;  %v13314_v59 = vpop.f32.mrf.mxu0  ;;  %v13318_v28 = vor.u32 %v10055_v5, %v9097_v30  ;;  %v10052_v21 = vld [vmem:[%s15871_s2 + $0x638] sm:$0xf0]  ;;  %v9181_v30 = vld [vmem:[%s15871_s2 + $0x6f0] sm:$0xf] }
 0x284   : > { %17246 = vst [vmem:[#allocation379_spill] sm:$0xff] %v13292_v37  ;;  %v13332_v4 = vor.u32 %v10054_v60, %v9099_v51  ;;  %v13334_v5 = vor.u32 %v10078_v49, %v9195_v43  ;;  %v10051_v38 = vld [vmem:[%s15871_s2 + $0x634] sm:$0xf]  ;;  %v9183_v51 = vld [vmem:[%s15871_s2 + $0x6fc] sm:$0xf0]  ;;  %v13356_v49 = vor.u32 %v10052_v21, %v9085_v47  ;;  %v13358_v43 = vor.u32 %v10076_v35, %v9181_v30 }
 0x285   : > { %17247 = vst [vmem:[#allocation380_spill] sm:$0xff] %v13318_v28  ;;  %v10075_v60 = vld [vmem:[%s15871_s2 + $0x6f4] sm:$0xf]  ;;  %v9169_v21 = vld [vmem:[%s15871_s2 + $0x6d8] sm:$0xf] }
 0x286   : > { %3931 = vmatpush.bf16.msra.mxu0 %v13278_v23  ;;  %3945 = vmatpush.bf16.msra.mxu1 %v13280_v57  ;;  %17248 = vst [vmem:[#allocation381_spill] sm:$0xff] %v13320_v55  ;;  %v9073_v57 = vld [vmem:[%s15871_s2 + $0x618] sm:$0xf]  ;;  %v13372_v47 = vpop.f32.mrf.mxu2  ;;  %v10073_v30 = vld [vmem:[%s15871_s2 + $0x6e0] sm:$0xf0] }
 0x287   : > { %3959 = vmatpush.bf16.msra.mxu2 %v13290_v14  ;;  %3973 = vmatpush.bf16.msra.mxu3 %v13292_v37  ;;  %17249 = vst [vmem:[#allocation382_spill] sm:$0xff] %v13332_v4  ;;  %v9087_v37 = vld [vmem:[%s15871_s2 + $0x63c] sm:$0xf0]  ;;  %v10049_v14 = vld [vmem:[%s15871_s2 + $0x620] sm:$0xf0] }
 0x288   : > { %17250 = vst [vmem:[#allocation383_spill] sm:$0xff] %v13334_v5  ;;  %v13368_v23 = vor.u32 %v10051_v38, %v9087_v37  ;;  %v10048_v35 = vld [vmem:[%s15871_s2 + $0x61c] sm:$0xf]  ;;  %v9075_v37 = vld [vmem:[%s15871_s2 + $0x624] sm:$0xf0] }
 0x289   : > { %17251 = vst [vmem:[#allocation384_spill] sm:$0xff] %v13356_v49  ;;  %v10072_v38 = vld [vmem:[%s15871_s2 + $0x6dc] sm:$0xf]  ;;  %v9157_v58 = vld [vmem:[%s15871_s2 + $0x6c0] sm:$0xf] }
 0x28a   : > { %3932 = vmatpush.bf16.msra.mxu0 %v13318_v28  ;;  %3946 = vmatpush.bf16.msra.mxu1 %v13320_v55  ;;  %17252 = vst [vmem:[#allocation385_spill] sm:$0xff] %v13358_v43  ;;  %v13370_v28 = vor.u32 %v10075_v60, %v9183_v51  ;;  %v13383_v55 = vpop.f32.mrf.mxu3  ;;  %v9171_v60 = vld [vmem:[%s15871_s2 + $0x6e4] sm:$0xf0]  ;;  %v2422_v25 = vpop.f32.mrf.mxu1 }
 0x28b   : > { %3960 = vmatpush.bf16.msra.mxu2 %v13332_v4  ;;  %3974 = vmatpush.bf16.msra.mxu3 %v13334_v5  ;;  %17253 = vst [vmem:[#allocation386_spill] sm:$0xff] %v13368_v23  ;;  %v2408_v51 = vpop.f32.mrf.mxu0  ;;  %v13396_v5 = vor.u32 %v10049_v14, %v9073_v57  ;;  %v13398_v4 = vor.u32 %v10073_v30, %v9169_v21  ;;  %v10070_v30 = vld [vmem:[%s15871_s2 + $0x6c8] sm:$0xf0] }
 0x28c   : > { %17254 = vst [vmem:[#allocation387_spill] sm:$0xff] %v13370_v28  ;;  %v13411_v14 = vor.u32 %v10048_v35, %v9075_v37  ;;  %v13413_v57 = vor.u32 %v10072_v38, %v9171_v60  ;;  %v13415_v21 = vadd.f32 %v2422_v25, %v2408_v51  ;;  %v10069_v35 = vld [vmem:[%s15871_s2 + $0x6c4] sm:$0xf]  ;;  %v9159_v25 = vld [vmem:[%s15871_s2 + $0x6cc] sm:$0xf0] }
 0x28d   : > { %17255 = vst [vmem:[#allocation388_spill] sm:$0xff] %v13396_v5  ;;  %v9153_v37 = vld [vmem:[%s15871_s2 + $0x6b0] sm:$0xf]  ;;  %v10068_v38 = vld [vmem:[%s15871_s2 + $0x6b8] sm:$0xf0]  ;;  %v13454_v45 = vor.u32 %v10069_v35, %v9159_v25  ;;  %v13485_v35 = vrot.slane %v11950_v50, 2 }
 0x28e   : > { %3933 = vmatpush.bf16.msra.mxu0 %v13356_v49  ;;  %3947 = vmatpush.bf16.msra.mxu1 %v13358_v43  ;;  %17256 = vst [vmem:[#allocation389_spill] sm:$0xff] %v13398_v4  ;;  %v10045_v43 = vld [vmem:[%s15871_s2 + $0x604] sm:$0xf]  ;;  %v9249_v60 = vld [vmem:[%s15871_s2 + $0x770] sm:$0xf]  ;;  %v13448_v49 = vor.u32 %v10070_v30, %v9157_v58  ;;  %v2692_v19 = vpop.f32.mrf.mxu2  ;;  %v13456_v2 = vor.u32 %v10068_v38, %v9153_v37 }
 0x28f   : > { %3961 = vmatpush.bf16.msra.mxu2 %v13368_v23  ;;  %3975 = vmatpush.bf16.msra.mxu3 %v13370_v28  ;;  %17257 = vst [vmem:[#allocation390_spill] sm:$0xff] %v13411_v14  ;;  %v9063_v23 = vld [vmem:[%s15871_s2 + $0x60c] sm:$0xf0]  ;;  %v10092_v51 = vld [vmem:[%s15871_s2 + $0x778] sm:$0xf0]  ;;  %v13446_v28 = vor.u32 %v10046_v41, %v9061_v10 }
 0x290   : > { %17258 = vst [vmem:[#allocation391_spill] sm:$0xff] %v13413_v57  ;;  %v13452_v16 = vor.u32 %v10045_v43, %v9063_v23  ;;  %v13458_v63 = vor.u32 %v10092_v51, %v9249_v60  ;;  %v9141_v58 = vld [vmem:[%s15871_s2 + $0x698] sm:$0xf]  ;;  %v10065_v23 = vld [vmem:[%s15871_s2 + $0x6a0] sm:$0xf0] }
 0x291   : > { %17259 = vst [vmem:[#allocation392_spill] sm:$0xff] %v13446_v28  ;;  %v9237_v43 = vld [vmem:[%s15871_s2 + $0x758] sm:$0xf]  ;;  %v10089_v30 = vld [vmem:[%s15871_s2 + $0x760] sm:$0xf0]  ;;  %v13491_v37 = vor.u32 %v10065_v23, %v9141_v58 }
 0x292   : > { %3934 = vmatpush.bf16.msra.mxu0 %v13396_v5  ;;  %3948 = vmatpush.bf16.msra.mxu1 %v13398_v4  ;;  %17260 = vst [vmem:[#allocation393_spill] sm:$0xff] %v13448_v49  ;;  %v2693_v5 = vadd.f32 %v2692_v19, %v13256_v36  ;;  %v2706_v10 = vpop.f32.mrf.mxu3  ;;  %v13482_v36 = vrot.slane %v11948_v7, 2  ;;  %v13487_v25 = vpop.f32.mrf.mxu1  ;;  %v9129_v38 = vld [vmem:[%s15871_s2 + $0x680] sm:$0xf]  ;;  %v10062_v7 = vld [vmem:[%s15871_s2 + $0x688] sm:$0xf0] }
 0x293   : > { %3962 = vmatpush.bf16.msra.mxu2 %v13411_v14  ;;  %3976 = vmatpush.bf16.msra.mxu3 %v13413_v57  ;;  %17261 = vst [vmem:[#allocation394_spill] sm:$0xff] %v13452_v16  ;;  %v13464_v41 = vpop.f32.mrf.mxu0  ;;  %v9225_v50 = vld [vmem:[%s15871_s2 + $0x740] sm:$0xf]  ;;  %v10086_v60 = vld [vmem:[%s15871_s2 + $0x748] sm:$0xf0]  ;;  %v13513_v51 = vor.u32 %v10062_v7, %v9129_v38 }
 0x294   : > { %17262 = vst [vmem:[#allocation395_spill] sm:$0xff] %v13454_v45  ;;  %v13477_v19 = vadd.f32 %v2706_v10, %v2693_v5  ;;  %v13493_v5 = vor.u32 %v10089_v30, %v9237_v43  ;;  %v13515_v58 = vor.u32 %v10086_v60, %v9225_v50  ;;  %v9117_v10 = vld [vmem:[%s15871_s2 + $0x668] sm:$0xf]  ;;  %v10059_v23 = vld [vmem:[%s15871_s2 + $0x670] sm:$0xf0] }
 0x295   : > { %17263 = vst [vmem:[#allocation396_spill] sm:$0xff] %v13456_v2  ;;  %v9213_v43 = vld [vmem:[%s15871_s2 + $0x728] sm:$0xf]  ;;  %v10083_v30 = vld [vmem:[%s15871_s2 + $0x730] sm:$0xf0]  ;;  %v13532_v50 = vor.u32 %v10059_v23, %v9117_v10 }
 0x296   : > { %17264 = vst [vmem:[#allocation397_spill] sm:$0xff] %v13458_v63  ;;  %3935 = vmatpush.bf16.msra.mxu0 %v13446_v28  ;;  %3949 = vmatpush.bf16.msra.mxu1 %v13448_v49  ;;  %v13534_v60 = vor.u32 %v10083_v30, %v9213_v43  ;;  %v9093_v30 = vld [vmem:[%s15871_s2 + $0x638] sm:$0xf]  ;;  %v17288_v49 = vld [vmem:[#allocation44_spill] sm:$0xff] }
 0x297   : > { %3963 = vmatpush.bf16.msra.mxu2 %v13452_v16  ;;  %3977 = vmatpush.bf16.msra.mxu3 %v13454_v45  ;;  %17265 = vst [vmem:[#allocation398_spill] sm:$0xff] %v13491_v37 }
 0x298   : > { %17266 = vst [vmem:[#allocation399_spill] sm:$0xff] %v13493_v5 }
 0x299   : > { %3936 = vmatmul.bf16.vlgmr.msra.gmra.mxu0 %v13482_v36  ;;  %3950 = vmatmul.bf16.vlgmr.msra.gmra.mxu1 %v13485_v35  ;;  %17267 = vst [vmem:[#allocation400_spill] sm:$0xff] %v13513_v51 }
 0x29a   : > { %3984 = vmatpush.bf16.msrb.mxu0 %v13456_v2  ;;  %3998 = vmatpush.bf16.msrb.mxu1 %v13458_v63  ;;  %17268 = vst [vmem:[#allocation401_spill] sm:$0xff] %v13515_v58  ;;  %v2734_v63 = vpop.f32.mrf.mxu1 }
 0x29b   : > { %3964 = vmatmul.bf16.vlgmr.msra.gmra.mxu2 %v13482_v36  ;;  %3978 = vmatmul.bf16.vlgmr.msra.gmra.mxu3 %v13485_v35  ;;  %v2720_v38 = vpop.f32.mrf.mxu0  ;;  %17269 = vst [vmem:[#allocation402_spill] sm:$0xff] %v13532_v50 }
 0x29c   : > { %v2721_v7 = vadd.f32 %v2720_v38, %v13312_v24  ;;  %17270 = vst [vmem:[#allocation403_spill] sm:$0xff] %v13534_v60  ;;  %v10080_v24 = vld [vmem:[%s15871_s2 + $0x718] sm:$0xf0]  ;;  %v10053_v38 = vld [vmem:[%s15871_s2 + $0x640] sm:$0xf0]  ;;  %4126 = vmatpush.bf16.msrb.mxu2 %v10100_v0  ;;  %4230 = vmatpush.bf16.msrb.mxu3 %v10108_v29  ;;  %v10098_v29 = vld [vmem:[%s15872_s3 + $0x28] sm:$0xff] }
 0x29e   : > { %3985 = vmatpush.bf16.msrb.mxu0 %v13491_v37  ;;  %3999 = vmatpush.bf16.msrb.mxu1 %v13493_v5  ;;  %v9105_v5 = vld [vmem:[%s15871_s2 + $0x650] sm:$0xf]  ;;  %v10056_v37 = vld [vmem:[%s15871_s2 + $0x658] sm:$0xf0]  ;;  %v13548_v10 = vadd.f32 %v2734_v63, %v2721_v7  ;;  %v9189_v63 = vld [vmem:[%s15871_s2 + $0x6f8] sm:$0xf] }
 0x29f   : > { %v13552_v23 = vor.u32 %v10056_v37, %v9105_v5  ;;  %v10077_v7 = vld [vmem:[%s15871_s2 + $0x700] sm:$0xf0]  ;;  %v13570_v37 = vor.u32 %v10053_v38, %v9093_v30 }
 0x2a0   : > { %v13572_v5 = vor.u32 %v10077_v7, %v9189_v63  ;;  %v9069_v63 = vld [vmem:[%s15871_s2 + $0x608] sm:$0xf]  ;;  %v10047_v7 = vld [vmem:[%s15871_s2 + $0x610] sm:$0xf0]  ;;  %4127 = vmatpush.bf16.msrb.mxu2 %v10099_v13  ;;  %4231 = vmatpush.bf16.msrb.mxu3 %v10107_v54  ;;  %v10097_v54 = vld [vmem:[%s15872_s3 + $0x20] sm:$0xff] }
 0x2a1   : > { %17271 = vst [vmem:[#allocation404_spill] sm:$0xff] %v13552_v23  ;;  %v10105_v13 = vld [vmem:[%s15872_s3 + $0x60] sm:$0xff] }
 0x2a2   : > { %3986 = vmatpush.bf16.msrb.mxu0 %v13513_v51  ;;  %4000 = vmatpush.bf16.msrb.mxu1 %v13515_v58  ;;  %v9201_v51 = vld [vmem:[%s15871_s2 + $0x710] sm:$0xf]  ;;  %17273 = vst [vmem:[#allocation406_spill] sm:$0xff] %v13570_v37  ;;  %v17287_v58 = vld [vmem:[#allocation40_spill] sm:$0xff]  ;;  %v13639_v57 = vpop.f32.mrf.mxu1 }
 0x2a3   : > { %v13554_v43 = vor.u32 %v10080_v24, %v9201_v51  ;;  %17274 = vst [vmem:[#allocation407_spill] sm:$0xff] %v13572_v5  ;;  %v9081_v51 = vld [vmem:[%s15871_s2 + $0x620] sm:$0xf]  ;;  %v10050_v24 = vld [vmem:[%s15871_s2 + $0x628] sm:$0xf0]  ;;  %v13637_v2 = vpop.f32.mrf.mxu0 }
 0x2a4   : > { %v13588_v30 = vor.u32 %v10050_v24, %v9081_v51  ;;  %v17279_v51 = vld [vmem:[#allocation8_spill] sm:$0xff]  ;;  %4128 = vmatpush.bf16.msrb.mxu2 %v10098_v29 }
 0x2a5   : > { %17272 = vst [vmem:[#allocation405_spill] sm:$0xff] %v13554_v43  ;;  %v17280_v24 = vld [vmem:[#allocation12_spill] sm:$0xff] }
 0x2a6   : > { %3987 = vmatpush.bf16.msrb.mxu0 %v13532_v50  ;;  %4001 = vmatpush.bf16.msrb.mxu1 %v13534_v60  ;;  %v9177_v60 = vld [vmem:[%s15871_s2 + $0x6e0] sm:$0xf]  ;;  %17275 = vst [vmem:[#allocation408_spill] sm:$0xff] %v13588_v30 }
 0x2a8   : > { %4129 = vmatpush.bf16.msrb.mxu2 %v10097_v54  ;;  %v10114_v54 = vld [vmem:[%s15872_s3 + $0xa8] sm:$0xff] }
 0x2aa   : > { %3988 = vmatpush.bf16.msrb.mxu0 %v13552_v23  ;;  %4002 = vmatpush.bf16.msrb.mxu1 %v13554_v43  ;;  %v10074_v43 = vld [vmem:[%s15871_s2 + $0x6e8] sm:$0xf0]  ;;  %v9165_v23 = vld [vmem:[%s15871_s2 + $0x6c8] sm:$0xf] }
 0x2ab   : > { %v13590_v38 = vor.u32 %v10074_v43, %v9177_v60  ;;  %v13606_v60 = vor.u32 %v10047_v7, %v9069_v63  ;;  %v17283_v63 = vld [vmem:[#allocation24_spill] sm:$0xff]  ;;  %v13622_v7 = vpop.f32.mrf.mxu3 }
 0x2ad   : > { %17276 = vst [vmem:[#allocation409_spill] sm:$0xff] %v13590_v38 }
 0x2ae   : > { %3989 = vmatpush.bf16.msrb.mxu0 %v13570_v37  ;;  %4003 = vmatpush.bf16.msrb.mxu1 %v13572_v5  ;;  %v10071_v5 = vld [vmem:[%s15871_s2 + $0x6d0] sm:$0xf0]  ;;  %17277 = vst [vmem:[#allocation410_spill] sm:$0xff] %v13606_v60 }
 0x2af   : > { %v13608_v43 = vor.u32 %v10071_v5, %v9165_v23  ;;  %v17284_v23 = vld [vmem:[#allocation28_spill] sm:$0xff]  ;;  %v13620_v5 = vpop.f32.mrf.mxu2 }
 0x2b1   : > { %17278 = vst [vmem:[#allocation411_spill] sm:$0xff] %v13608_v43 }
 0x2b2   : > { %3990 = vmatpush.bf16.msrb.mxu0 %v13588_v30  ;;  %4004 = vmatpush.bf16.msrb.mxu1 %v13590_v38  ;;  %v17281_v30 = vld [vmem:[#allocation16_spill] sm:$0xff] }
 0x2b3   : > { %v17282_v38 = vld [vmem:[#allocation20_spill] sm:$0xff]  ;;  %v13634_v45 = vpop.f32.mrf.mxu3 }
 0x2b6   : > { %3991 = vmatpush.bf16.msrb.mxu0 %v13606_v60  ;;  %4005 = vmatpush.bf16.msrb.mxu1 %v13608_v43  ;;  %v17285_v43 = vld [vmem:[#allocation32_spill] sm:$0xff]  ;;  %v9381_v60 = vld [vmem:[%s10523_s29 + $0x30] sm:$0xff]  ;;  %v13647_v28 = vpop.f32.mrf.mxu0  ;;  %v13649_v14 = vpop.f32.mrf.mxu1 }
 0x2b7   : > { %v13632_v50 = vpop.f32.mrf.mxu2 }
 0x2b9   : > { %3992 = vmatmul.bf16.vlgmr.msrb.gmra.mxu0 %v13482_v36  ;;  %4006 = vmatmul.bf16.vlgmr.msrb.gmra.mxu1 %v13485_v35  ;;  %v9382_v36 = vld [vmem:[%s10523_s29 + $0x38] sm:$0x1f]  ;;  %v17286_v35 = vld [vmem:[#allocation36_spill] sm:$0xff] }
 0x2ba   : > { %4365 = vmatpush.bf16.msra.mxu1 %v17279_v51  ;;  %v13627_v37 = vpack.c.bf16 %v9382_v36, %v9381_v60  ;;  %v17289_v60 = vld [vmem:[#allocation49_spill] sm:$0xff] }
 0x2bb   : > { %v17290_v36 = vld [vmem:[#allocation53_spill] sm:$0xff]  ;;  %v13645_v4 = vpop.f32.mrf.mxu3 }
 0x2be   : > { %4366 = vmatpush.bf16.msra.mxu1 %v17280_v24  ;;  %v13657_v33 = vpop.f32.mrf.mxu0  ;;  %v13659_v20 = vpop.f32.mrf.mxu1 }
 0x2bf   : > { %v13643_v16 = vpop.f32.mrf.mxu2 }
 0x2c2   : > { %4367 = vmatpush.bf16.msra.mxu1 %v17281_v30 }
 0x2c3   : > { %v13655_v56 = vpop.f32.mrf.mxu3 }
 0x2c6   : > { %4368 = vmatpush.bf16.msra.mxu1 %v17282_v38 }
 0x2c7   : > { %v13653_v1 = vpop.f32.mrf.mxu2 }
 0x2ca   : > { %4369 = vmatpush.bf16.msra.mxu1 %v17283_v63 }
 0x2cb   : > { %v13676_v8 = vpop.f32.mrf.mxu3 }
 0x2ce   : > { %4370 = vmatpush.bf16.msra.mxu1 %v17284_v23 }
 0x2cf   : > { %v13674_v44 = vpop.f32.mrf.mxu2 }
 0x2d2   : > { %4371 = vmatpush.bf16.msra.mxu1 %v17285_v43 }
 0x2d6   : > { %4372 = vmatpush.bf16.msra.mxu1 %v17286_v35  ;;  %v13679_v27 = vpop.f32.mrf.mxu0  ;;  %v13681_v52 = vpop.f32.mrf.mxu1 }
 0x2d9   : > { %4373 = vmatmul.bf16.vlgmr.msra.gmra.mxu1 %v13627_v37 }
 0x2da   : > { %4421 = vmatpush.bf16.msrb.mxu1 %v17287_v58 }
 0x2de   : > { %4422 = vmatpush.bf16.msrb.mxu1 %v17288_v49  ;;  %v13692_v15 = vpop.f32.mrf.mxu0  ;;  %v13694_v0 = vpop.f32.mrf.mxu1 }
 0x2df   : > { %v3536_v42 = vpop.f32.mrf.mxu3 }
 0x2e2   : > { %4423 = vmatpush.bf16.msrb.mxu1 %v17289_v60 }
 0x2e6   : > { %4424 = vmatpush.bf16.msrb.mxu1 %v17290_v36 }
 0x2e7   : > { %v13714_v48 = vpop.f32.mrf.mxu3 }
 0x2ea   : > { %4425 = vmatpush.bf16.msrb.mxu1 %v17291_v40 }
 0x2ee   : > { %4426 = vmatpush.bf16.msrb.mxu1 %v17292_v3 }
 0x2f2   : > { %4427 = vmatpush.bf16.msrb.mxu1 %v17293_v11 }
 0x2f6   : > { %4428 = vmatpush.bf16.msrb.mxu1 %v17294_v18  ;;  %v13719_v29 = vpop.f32.mrf.mxu1 }
 0x2f9   : > { %4429 = vmatmul.bf16.vlgmr.msrb.gmra.mxu1 %v13664_v12 }
 0x2fa   : > { %4478 = vmatpush.bf16.msra.mxu1 %v17279_v51  ;;  %v3522_v51 = vpop.f32.mrf.mxu2 }
 0x2fe   : > { %4479 = vmatpush.bf16.msra.mxu1 %v17280_v24  ;;  %v13755_v31 = vpop.f32.mrf.mxu1 }
 0x2ff   : > { %v13743_v26 = vpop.f32.mrf.mxu3 }
 0x302   : > { %4480 = vmatpush.bf16.msra.mxu1 %v17281_v30  ;;  %v10106_v30 = vld [vmem:[%s15872_s3 + $0x68] sm:$0xff]  ;;  %v13712_v24 = vpop.f32.mrf.mxu2 }
 0x303   : > { %4232 = vmatpush.bf16.msrb.mxu3 %v10106_v30  ;;  %v13717_v30 = vpop.f32.mrf.mxu0 }
 0x306   : > { %4481 = vmatpush.bf16.msra.mxu1 %v17282_v38  ;;  %v10116_v38 = vld [vmem:[%s15872_s3 + $0xb8] sm:$0xff] }
 0x307   : > { %4341 = vmatpush.bf16.msra.mxu0 %v10116_v38  ;;  %4233 = vmatpush.bf16.msrb.mxu3 %v10105_v13  ;;  %v10115_v38 = vld [vmem:[%s15872_s3 + $0xb0] sm:$0xff] }
 0x308   : > { %v10095_v13 = vld [vmem:[%s15872_s3 + $0x10] sm:$0xff] }
 0x30a   : > { %4482 = vmatpush.bf16.msra.mxu1 %v17283_v63  ;;  %v10096_v63 = vld [vmem:[%s15872_s3 + $0x18] sm:$0xff]  ;;  %v13741_v34 = vpop.f32.mrf.mxu2 }
 0x30b   : > { %4342 = vmatpush.bf16.msra.mxu0 %v10115_v38  ;;  %4130 = vmatpush.bf16.msrb.mxu2 %v10096_v63  ;;  %v10103_v38 = vld [vmem:[%s15872_s3 + $0x50] sm:$0xff]  ;;  %v9384_v63 = vld [vmem:[%s10523_s29 + $0x29] sm:$0x1f] }
 0x30e   : > { %4483 = vmatpush.bf16.msra.mxu1 %v17284_v23  ;;  %v10104_v23 = vld [vmem:[%s15872_s3 + $0x58] sm:$0xff] }
 0x30f   : > { %4234 = vmatpush.bf16.msrb.mxu3 %v10104_v23  ;;  %4343 = vmatpush.bf16.msra.mxu0 %v10114_v54  ;;  %v13748_v23 = vpack.c.bf16 %v9384_v63, %v9383_v32  ;;  %v10113_v54 = vld [vmem:[%s15872_s3 + $0xa0] sm:$0xff]  ;;  %v10102_v32 = vld [vmem:[%s15872_s3 + $0x48] sm:$0xff] }
 0x310   : > { %4131 = vmatpush.bf16.msrb.mxu2 %v10095_v13  ;;  %v10112_v13 = vld [vmem:[%s15872_s3 + $0x98] sm:$0xff]  ;;  %v10093_v63 = vld [vmem:[%s15872_s3] sm:$0xff] }
 0x312   : > { %4484 = vmatpush.bf16.msra.mxu1 %v17285_v43  ;;  %v13753_v43 = vpop.f32.mrf.mxu0 }
 0x313   : > { %4235 = vmatpush.bf16.msrb.mxu3 %v10103_v38  ;;  %4344 = vmatpush.bf16.msra.mxu0 %v10113_v54  ;;  %v3118_v38 = vadd.f32 %v13649_v14, %v13647_v28  ;;  %v10101_v54 = vld [vmem:[%s15872_s3 + $0x40] sm:$0xff]  ;;  %v10111_v28 = vld [vmem:[%s15872_s3 + $0x90] sm:$0xff]  ;;  %v2369_v14 = vadd.f32 %v13322_v53, %v13314_v59  ;;  %v3146_v59 = vadd.f32 %v13655_v56, %v13653_v1 }
 0x314   : > { %v2397_v56 = vadd.f32 %v13383_v55, %v13372_v47 }
 0x316   : > { %4485 = vmatpush.bf16.msra.mxu1 %v17286_v35  ;;  %v10094_v35 = vld [vmem:[%s15872_s3 + $0x8] sm:$0xff] }
 0x317   : > { %4132 = vmatpush.bf16.msrb.mxu2 %v10094_v35  ;;  %4236 = vmatpush.bf16.msrb.mxu3 %v10102_v32  ;;  %v13780_v35 = vld [vmem:[%s15874_s5] sm:$0x7]  ;;  %v3178_v32 = vadd.f32 %v3118_v38, %v13477_v19  ;;  %v10110_v19 = vld [vmem:[%s15872_s3 + $0x88] sm:$0xff]  ;;  %v3120_v38 = vadd.f32 %v13659_v20, %v13657_v33  ;;  %v2723_v20 = vadd.f32 %v13637_v2, %v2397_v56 }
 0x318   : > { %4345 = vmatpush.bf16.msra.mxu0 %v10112_v13  ;;  %v13788_v13 = vpop.f32.mrf.mxu2  ;;  %v13796_v53 = vperm.slane %v13780_v35, 0 }
 0x319   : > { %4486 = vmatmul.bf16.vlgmr.msra.gmra.mxu1 %v13748_v23 }
 0x31a   : > { %4534 = vmatpush.bf16.msrb.mxu1 %v17287_v58  ;;  %v3537_v58 = vadd.f32 %v3536_v42, %v3522_v51  ;;  %v13790_v42 = vpop.f32.mrf.mxu3  ;;  %v17295_v51 = vld [vmem:[#allocation9_spill] sm:$0xff] }
 0x31b   : > { %4133 = vmatpush.bf16.msrb.mxu2 %v10093_v63  ;;  %4237 = vmatpush.bf16.msrb.mxu3 %v10101_v54  ;;  %v2695_v63 = vadd.f32 %v13620_v5, %v2369_v14  ;;  %17297 = vst [vmem:[#allocation9_spill] sm:$0xff] %v13796_v53  ;;  %v3539_v5 = vadd.f32 %v13714_v48, %v13712_v24 }
 0x31c   : > { %4346 = vmatpush.bf16.msra.mxu0 %v10111_v28  ;;  %v3597_v9 = vadd.f32 %v3537_v58, %v3178_v32  ;;  %v17298_v28 = vld [vmem:[#allocation13_spill] sm:$0xff]  ;;  %v17299_v58 = vld [vmem:[#allocation14_spill] sm:$0xff]  ;;  %v3148_v48 = vadd.f32 %v13676_v8, %v13674_v44 }
 0x31d   : > { %v2709_v1 = vadd.f32 %v13622_v7, %v2695_v63  ;;  %v17302_v63 = vld [vmem:[#allocation18_spill] sm:$0xff] }
 0x31e   : > { %4535 = vmatpush.bf16.msrb.mxu1 %v17288_v49  ;;  %v3951_v49 = vpop.f32.mrf.mxu1 }
 0x31f   : > { %4379 = vmatpush.bf16.msra.mxu2 %v17295_v51  ;;  %4393 = vmatpush.bf16.msra.mxu3 %v17296_v61  ;;  %v3181_v33 = vadd.f32 %v3120_v38, %v2709_v1 }
 0x320   : > { %4347 = vmatpush.bf16.msra.mxu0 %v10110_v19  ;;  %v3965_v47 = vpop.f32.mrf.mxu2 }
 0x321   : > { %v3600_v2 = vadd.f32 %v3539_v5, %v3181_v33  ;;  %v3567_v5 = vadd.f32 %v13755_v31, %v13753_v43 }
 0x322   : > { %4536 = vmatpush.bf16.msrb.mxu1 %v17289_v60  ;;  %v3937_v60 = vpop.f32.mrf.mxu0  ;;  %v3979_v7 = vpop.f32.mrf.mxu3 }
 0x323   : > { %v3952_v39 = vadd.f32 %v3951_v49, %v3937_v60  ;;  %4380 = vmatpush.bf16.msra.mxu2 %v17298_v28  ;;  %v3565_v49 = vadd.f32 %v13719_v29, %v13717_v30  ;;  %4394 = vmatpush.bf16.msra.mxu3 %v17299_v58  ;;  %v17300_v30 = vld [vmem:[#allocation17_spill] sm:$0xff]  ;;  %v3980_v24 = vadd.f32 %v3979_v7, %v3965_v47  ;;  %v13826_v29 = vperm.slane %v13780_v35, 1  ;;  %v17305_v47 = vld [vmem:[#allocation22_spill] sm:$0xff] }
 0x325   : > { %v4012_v54 = vadd.f32 %v3952_v39, %v3597_v9  ;;  %v3179_v39 = vadd.f32 %v3146_v59, %v13548_v10  ;;  %v10109_v9 = vld [vmem:[%s15872_s3 + $0x80] sm:$0xff]  ;;  %17301 = vst [vmem:[#allocation10_spill] sm:$0xff] %v13826_v29 }
 0x326   : > { %4537 = vmatpush.bf16.msrb.mxu1 %v17290_v36  ;;  %v3953_v32 = vpop.f32.mrf.mxu1  ;;  %4348 = vmatpush.bf16.msra.mxu0 %v10109_v9 }
 0x327   : > { %v4025_v60 = vadd.f32 %v13796_v53, %v4012_v54  ;;  %4381 = vmatpush.bf16.msra.mxu2 %v17300_v30  ;;  %v3598_v10 = vadd.f32 %v3565_v49, %v3179_v39  ;;  %4395 = vmatpush.bf16.msra.mxu3 %v17302_v63  ;;  %v17303_v54 = vld [vmem:[#allocation11_spill] sm:$0xff]  ;;  %v2737_v49 = vadd.f32 %v13639_v57, %v2723_v20 }
 0x328   : > { %v3967_v31 = vpop.f32.mrf.mxu2 }
 0x329   : > { %v4031_v55 = vmax.f32 %v4025_v60, 0.0  ;;  %v4013_v8 = vadd.f32 %v3980_v24, %v3598_v10  ;;  %v17304_v60 = vld [vmem:[#allocation21_spill] sm:$0xff]  ;;  %v3182_v7 = vadd.f32 %v3148_v48, %v2737_v49  ;;  %v17306_v24 = vld [vmem:[#allocation15_spill] sm:$0xff] }
 0x32a   : > { %4538 = vmatpush.bf16.msrb.mxu1 %v17291_v40  ;;  %v3939_v14 = vpop.f32.mrf.mxu0  ;;  %4407 = vmatpush.bf16.msrb.mxu0 %v17303_v54  ;;  %v3981_v43 = vpop.f32.mrf.mxu3  ;;  %v17311_v40 = vld [vmem:[#allocation29_spill] sm:$0xff] }
 0x32b   : > { %v4038_v59 = vsel %vm4037_vm0, %v4031_v55, -inf  ;;  %v4141_v19 = vsel %vm4140_vm1, %v4031_v55, -inf  ;;  %v3954_v38 = vadd.f32 %v3953_v32, %v3939_v14  ;;  %4382 = vmatpush.bf16.msra.mxu2 %v17304_v60  ;;  %v4026_v33 = vadd.f32 %v13826_v29, %v4013_v8  ;;  %4396 = vmatpush.bf16.msra.mxu3 %v17305_v47 }
 0x32c   : > { %v4039_v56 = vrot.slane %v4038_v59, 4  ;;  %v4142_v44 = vrot.slane %v4141_v19, 4 }
 0x32d   : > { %v4015_v1 = vadd.f32 %v3954_v38, %v3600_v2  ;;  %v4032_v20 = vmax.f32 %v4026_v33, 0.0  ;;  %v17307_v2 = vld [vmem:[#allocation25_spill] sm:$0xff]  ;;  %v17308_v38 = vld [vmem:[#allocation26_spill] sm:$0xff] }
 0x32e   : > { %4539 = vmatpush.bf16.msrb.mxu1 %v17292_v3  ;;  %v4040_v39 = vmax.f32 %v4038_v59, %v4039_v56  ;;  %v4143_v9 = vmax.f32 %v4141_v19, %v4142_v44  ;;  %4408 = vmatpush.bf16.msrb.mxu0 %v17306_v24  ;;  %v3601_v59 = vadd.f32 %v3567_v5, %v3182_v7  ;;  %v4245_v56 = vsel %vm4244_vm2, %v4031_v55, -inf  ;;  %v17310_v3 = vld [vmem:[#allocation73_spill] sm:$0xff] }
 0x32f   : > { %v4028_v10 = vadd.f32 %v13796_v53, %v4015_v1  ;;  %4383 = vmatpush.bf16.msra.mxu2 %v17307_v2  ;;  %v4045_v19 = vsel %vm4037_vm0, %v4032_v20, -inf  ;;  %v4148_v48 = vsel %vm4140_vm1, %v4032_v20, -inf  ;;  %4397 = vmatpush.bf16.msra.mxu3 %v17308_v38  ;;  %v17309_v1 = vld [vmem:[#allocation19_spill] sm:$0xff] }
 0x330   : > { %v4041_v14 = vrot.slane %v4040_v39, 2  ;;  %v4144_v57 = vrot.slane %v4143_v9, 2  ;;  %v4046_v44 = vrot.slane %v4045_v19, 4  ;;  %v4149_v8 = vrot.slane %v4148_v48, 4 }
 0x331   : > { %v4034_v32 = vmax.f32 %v4028_v10, 0.0 }
 0x332   : > { %4540 = vmatpush.bf16.msrb.mxu1 %v17293_v11  ;;  %4409 = vmatpush.bf16.msrb.mxu0 %v17309_v1  ;;  %v4042_v33 = vmax.f32 %v4040_v39, %v4041_v14  ;;  %v4145_v10 = vmax.f32 %v4143_v9, %v4144_v57  ;;  %v3982_v11 = vadd.f32 %v3981_v43, %v3967_v31  ;;  %v17313_v9 = vld [vmem:[#allocation23_spill] sm:$0xff] }
 0x333   : > { %v4247_v49 = vsel %vm4246_vm3, %v4034_v32, -inf  ;;  %v4047_v5 = vmax.f32 %v4045_v19, %v4046_v44  ;;  %v4150_v7 = vmax.f32 %v4148_v48, %v4149_v8  ;;  %4384 = vmatpush.bf16.msra.mxu2 %v17311_v40  ;;  %4398 = vmatpush.bf16.msra.mxu3 %v17312_v62  ;;  %v2749_v32 = vadd.f32 %v13632_v50, %v13415_v21 }
 0x334   : > { %v4248_v53 = vmax.f32 %v4245_v56, %v4247_v49  ;;  %v4016_v55 = vadd.f32 %v3982_v11, %v3601_v59  ;;  %v4043_v14 = vrot.slane %v4042_v33, 1  ;;  %v4146_v57 = vrot.slane %v4145_v10, 1  ;;  %v17314_v56 = vld [vmem:[#allocation77_spill] sm:$0xff]  ;;  %v17316_v59 = vld [vmem:[#allocation34_spill] sm:$0xff] }
 0x335   : > { %v4048_v6 = vrot.slane %v4047_v5, 2  ;;  %v4151_v39 = vrot.slane %v4150_v7, 2  ;;  %v17315_v11 = vld [vmem:[#allocation33_spill] sm:$0xff]  ;;  %v3174_v21 = vadd.f32 %v13681_v52, %v13679_v27  ;;  %v2763_v44 = vadd.f32 %v13634_v45, %v2749_v32 }
 0x336   : > { %4541 = vmatpush.bf16.msrb.mxu1 %v17294_v18  ;;  %v4249_v36 = vrot.slane %v4248_v53, 4  ;;  %4410 = vmatpush.bf16.msrb.mxu0 %v17313_v9  ;;  %v4029_v31 = vadd.f32 %v13826_v29, %v4016_v55  ;;  %v3593_v8 = vadd.f32 %v13743_v26, %v13741_v34  ;;  %v17319_v34 = vld [vmem:[#allocation37_spill] sm:$0xff]  ;;  %v17328_v29 = vld [vmem:[#allocation96_spill] sm:$0xff] }
 0x337   : > { %v4049_v43 = vmax.f32 %v4047_v5, %v4048_v6  ;;  %v4152_v19 = vmax.f32 %v4150_v7, %v4151_v39  ;;  %4385 = vmatpush.bf16.msra.mxu2 %v17315_v11  ;;  %4399 = vmatpush.bf16.msra.mxu3 %v17316_v59  ;;  %v17317_v6 = vld [vmem:[#allocation27_spill] sm:$0xff]  ;;  %v4255_v5 = vsel %vm4244_vm2, %v4032_v20, -inf  ;;  %v17318_v39 = vld [vmem:[#allocation80_spill] sm:$0xff]  ;;  %v3180_v26 = vadd.f32 %v3174_v21, %v2763_v44 }
 0x338   : > { %v4250_v48 = vmax.f32 %v4248_v53, %v4249_v36  ;;  %v4035_v50 = vmax.f32 %v4029_v31, 0.0  ;;  %v13867_v36 = vmax.f32 %v4042_v33, %v4043_v14  ;;  %v13869_v53 = vmax.f32 %v4145_v10, %v4146_v57  ;;  %v17320_v31 = vld [vmem:[#allocation38_spill] sm:$0xff]  ;;  %v17321_v14 = vld [vmem:[#allocation31_spill] sm:$0xff]  ;;  %v17329_v18 = vld [vmem:[#allocation100_spill] sm:$0xff] }
 0x339   : > { %4542 = vmatmul.bf16.vlgmr.msrb.gmra.mxu1 %v13627_v37  ;;  %v4050_v49 = vrot.slane %v4049_v43, 1  ;;  %v4153_v55 = vrot.slane %v4152_v19, 1  ;;  %v2425_v57 = vadd.f32 %v13487_v25, %v13464_v41  ;;  %v13888_v44 = vperm.slane %v13780_v35, 2 }
 0x33a   : > { %4592 = vmatpush.bf16.msra.mxu1 %v17310_v3  ;;  %4411 = vmatpush.bf16.msrb.mxu0 %v17317_v6  ;;  %v4256_v27 = vsel %vm4246_vm3, %v4035_v50, -inf  ;;  %v4251_v45 = vrot.slane %v4250_v48, 2  ;;  %v4007_v50 = vpop.f32.mrf.mxu1  ;;  %v3176_v41 = vadd.f32 %v13694_v0, %v13692_v15 }
 0x33b   : > { %v13873_v52 = vmax.f32 %v4049_v43, %v4050_v49  ;;  %v13875_v7 = vmax.f32 %v4152_v19, %v4153_v55  ;;  %v4257_v32 = vmax.f32 %v4255_v5, %v4256_v27  ;;  %4386 = vmatpush.bf16.msra.mxu2 %v17319_v34  ;;  %4400 = vmatpush.bf16.msra.mxu3 %v17320_v31  ;;  %v3993_v19 = vpop.f32.mrf.mxu0  ;;  %v17323_v5 = vld [vmem:[#allocation84_spill] sm:$0xff] }
 0x33c   : > { %v3599_v43 = vadd.f32 %v3593_v8, %v3180_v26  ;;  %v4252_v49 = vmax.f32 %v4250_v48, %v4251_v45  ;;  %v4008_v21 = vadd.f32 %v4007_v50, %v3993_v19  ;;  %17322 = vst [vmem:[#allocation412_spill] sm:$0xff] %v13888_v44  ;;  %v3595_v45 = vadd.f32 %v13790_v42, %v13788_v13  ;;  %v17326_v26 = vld [vmem:[#allocation39_spill] sm:$0xff] }
 0x33d   : > { %v4258_v33 = vrot.slane %v4257_v32, 4  ;;  %v4059_v10 = vmax.f32 %v13867_v36, %v13873_v52  ;;  %v4162_v20 = vmax.f32 %v13869_v53, %v13875_v7  ;;  %v2751_v36 = vadd.f32 %v13643_v16, %v2425_v57  ;;  %v17324_v52 = vld [vmem:[#allocation35_spill] sm:$0xff]  ;;  %v17325_v7 = vld [vmem:[#allocation88_spill] sm:$0xff] }
 0x33e   : > { %4593 = vmatpush.bf16.msra.mxu1 %v17314_v56  ;;  %4412 = vmatpush.bf16.msrb.mxu0 %v17321_v14  ;;  %v4014_v53 = vadd.f32 %v4008_v21, %v3599_v43  ;;  %v4253_v25 = vrot.slane %v4252_v49, 1 }
 0x33f   : > { %v4259_v55 = vmax.f32 %v4257_v32, %v4258_v33  ;;  %v2765_v35 = vadd.f32 %v13645_v4, %v2751_v36 }
 0x340   : > { %v4027_v48 = vadd.f32 %v13888_v44, %v4014_v53  ;;  %v4254_v19 = vmax.f32 %v4252_v49, %v4253_v25 }
 0x341   : > { %v4260_v27 = vrot.slane %v4259_v55, 2  ;;  %v3183_v33 = vadd.f32 %v3176_v41, %v2765_v35 }
 0x342   : > { %4594 = vmatpush.bf16.msra.mxu1 %v17318_v39  ;;  %4413 = vmatpush.bf16.msrb.mxu0 %v17324_v52  ;;  %v4033_v16 = vmax.f32 %v4027_v48, 0.0  ;;  %v4009_v43 = vpop.f32.mrf.mxu1 }
 0x343   : > { %v4261_v8 = vmax.f32 %v4259_v55, %v4260_v27  ;;  %v3995_v57 = vpop.f32.mrf.mxu0  ;;  %v17327_v55 = vld [vmem:[#allocation92_spill] sm:$0xff]  ;;  %v3602_v21 = vadd.f32 %v3595_v45, %v3183_v33 }
 0x344   : > { %v4052_v0 = vsel %vm4037_vm0, %v4033_v16, -inf  ;;  %v4155_v50 = vsel %vm4140_vm1, %v4033_v16, -inf  ;;  %v4010_v27 = vadd.f32 %v4009_v43, %v3995_v57  ;;  %v4264_v33 = vsel %vm4244_vm2, %v4033_v16, -inf }
 0x345   : > { %v4262_v32 = vrot.slane %v4261_v8, 1  ;;  %v4053_v4 = vrot.slane %v4052_v0, 4  ;;  %v4156_v36 = vrot.slane %v4155_v50, 4 }
 0x346   : > { %4595 = vmatpush.bf16.msra.mxu1 %v17323_v5  ;;  %4414 = vmatpush.bf16.msrb.mxu0 %v17326_v26  ;;  %v4017_v48 = vadd.f32 %v4010_v27, %v3602_v21 }
 0x347   : > { %v4263_v15 = vmax.f32 %v4261_v8, %v4262_v32  ;;  %v4054_v42 = vmax.f32 %v4052_v0, %v4053_v4  ;;  %v4157_v53 = vmax.f32 %v4155_v50, %v4156_v36 }
 0x348   : > { %v4030_v49 = vadd.f32 %v13888_v44, %v4017_v48  ;;  %v17331_v48 = vld [vmem:[#allocation42_spill] sm:$0xff]  ;;  %v17357_v44 = vld [vmem:[#allocation120_spill] sm:$0xff] }
 0x349   : > { %v4273_v13 = vmax.f32 %v4254_v19, %v4263_v15  ;;  %v4055_v41 = vrot.slane %v4054_v42, 2  ;;  %v4158_v35 = vrot.slane %v4157_v53, 2 }
 0x34a   : > { %4596 = vmatpush.bf16.msra.mxu1 %v17325_v7  ;;  %v4036_v32 = vmax.f32 %v4030_v49, 0.0  ;;  %v17334_v49 = vld [vmem:[#allocation50_spill] sm:$0xff] }
 0x34b   : > { %v4056_v25 = vmax.f32 %v4054_v42, %v4055_v41  ;;  %v4159_v8 = vmax.f32 %v4157_v53, %v4158_v35  ;;  %v17330_v53 = vld [vmem:[#allocation41_spill] sm:$0xff]  ;;  %v17332_v41 = vld [vmem:[#allocation46_spill] sm:$0xff]  ;;  %v17333_v35 = vld [vmem:[#allocation47_spill] sm:$0xff] }
 0x34c   : > { %v4265_v57 = vsel %vm4246_vm3, %v4036_v32, -inf  ;;  %v17336_v32 = vld [vmem:[#allocation43_spill] sm:$0xff] }
 0x34d   : > { %v4057_v46 = vrot.slane %v4056_v25, 1  ;;  %v4160_v45 = vrot.slane %v4159_v8, 1  ;;  %v4266_v43 = vmax.f32 %v4264_v33, %v4265_v57  ;;  %v17338_v33 = vld [vmem:[#allocation55_spill] sm:$0xff]  ;;  %v17339_v57 = vld [vmem:[#allocation48_spill] sm:$0xff] }
 0x34e   : > { %4597 = vmatpush.bf16.msra.mxu1 %v17327_v55 }
 0x34f   : > { %v4058_v19 = vmax.f32 %v4056_v25, %v4057_v46  ;;  %v4161_v15 = vmax.f32 %v4159_v8, %v4160_v45  ;;  %v4267_v0 = vrot.slane %v4266_v43, 4  ;;  %v17335_v25 = vld [vmem:[#allocation51_spill] sm:$0xff]  ;;  %v17337_v45 = vld [vmem:[#allocation54_spill] sm:$0xff] }
 0x351   : > { %v4060_v50 = vmax.f32 %v4059_v10, %v4058_v19  ;;  %v4163_v21 = vmax.f32 %v4162_v20, %v4161_v15  ;;  %v4268_v4 = vmax.f32 %v4266_v43, %v4267_v0  ;;  %v17341_v43 = vld [vmem:[#allocation59_spill] sm:$0xff]  ;;  %v9385_v19 = vld [vmem:[%s10523_s29 + $0x31] sm:$0xff]  ;;  %v17342_v0 = vld [vmem:[#allocation52_spill] sm:$0xff] }
 0x352   : > { %4598 = vmatpush.bf16.msra.mxu1 %v17328_v29  ;;  %v9386_v15 = vld [vmem:[%s10523_s29 + $0x39] sm:$0x1f] }
 0x353   : > { %v4061_v36 = vpack.c.bf16 %v4060_v50, %v4060_v50  ;;  %v4164_v27 = vpack.c.bf16 %v4163_v21, %v4163_v21  ;;  %v4269_v42 = vrot.slane %v4268_v4, 2  ;;  %v17343_v50 = vld [vmem:[#allocation62_spill] sm:$0xff]  ;;  %v13935_v21 = vpack.c.bf16 %v9386_v15, %v9385_v19  ;;  %v17353_v19 = vld [vmem:[#allocation112_spill] sm:$0xff] }
 0x354   : > { %v17354_v15 = vld [vmem:[#allocation64_spill] sm:$0xff] }
 0x355   : > { %4134 = vmatmul.bf16.vlgmr.msrb.gmra.mxu2 %v4061_v36  ;;  %4238 = vmatmul.bf16.vlgmr.msrb.gmra.mxu3 %v4164_v27  ;;  %v4270_v16 = vmax.f32 %v4268_v4, %v4269_v42  ;;  %v17344_v4 = vld [vmem:[#allocation63_spill] sm:$0xff]  ;;  %v17345_v36 = vld [vmem:[#allocation104_spill] sm:$0xff]  ;;  %v17347_v42 = vld [vmem:[#allocation66_spill] sm:$0xff] }
 0x356   : > { %4599 = vmatpush.bf16.msra.mxu1 %v17329_v18  ;;  %4435 = vmatpush.bf16.msrb.mxu2 %v17330_v53  ;;  %v17346_v27 = vld [vmem:[#allocation56_spill] sm:$0xff] }
 0x357   : > { %4449 = vmatpush.bf16.msrb.mxu3 %v17331_v48  ;;  %v4271_v46 = vrot.slane %v4270_v16, 1 }
 0x359   : > { %4600 = vmatmul.bf16.vlgmr.msra.gmra.mxu1 %v13748_v23  ;;  %v4272_v10 = vmax.f32 %v4270_v16, %v4271_v46  ;;  %v17348_v16 = vld [vmem:[#allocation67_spill] sm:$0xff]  ;;  %v17349_v46 = vld [vmem:[#allocation108_spill] sm:$0xff] }
 0x35a   : > { %4657 = vmatpush.bf16.msrb.mxu1 %v17310_v3  ;;  %4436 = vmatpush.bf16.msrb.mxu2 %v17332_v41 }
 0x35b   : > { %4450 = vmatpush.bf16.msrb.mxu3 %v17333_v35  ;;  %v4274_v20 = vmax.f32 %v4273_v13, %v4272_v10  ;;  %v17340_v13 = vld [vmem:[#allocation58_spill] sm:$0xff]  ;;  %v17350_v10 = vld [vmem:[#allocation60_spill] sm:$0xff] }
 0x35d   : > { %v4275_v8 = vpack.c.bf16 %v4274_v20, %v4274_v20  ;;  %v17351_v20 = vld [vmem:[#allocation70_spill] sm:$0xff] }
 0x35e   : > { %4658 = vmatpush.bf16.msrb.mxu1 %v17314_v56  ;;  %4437 = vmatpush.bf16.msrb.mxu2 %v17334_v49  ;;  %v17361_v56 = vld [vmem:[#allocation132_spill] sm:$0xff] }
 0x35f   : > { %4451 = vmatpush.bf16.msrb.mxu3 %v17335_v25  ;;  %4349 = vmatmul.bf16.vlgmr.msra.gmra.mxu0 %v4275_v8  ;;  %v17352_v8 = vld [vmem:[#allocation71_spill] sm:$0xff] }
 0x360   : > { %4463 = vmatpush.bf16.msra.mxu0 %v17336_v32 }
 0x362   : > { %4659 = vmatpush.bf16.msrb.mxu1 %v17318_v39  ;;  %4438 = vmatpush.bf16.msrb.mxu2 %v17337_v45  ;;  %v4374_v39 = vpop.f32.mrf.mxu1 }
 0x363   : > { %4452 = vmatpush.bf16.msrb.mxu3 %v17338_v33 }
 0x364   : > { %4464 = vmatpush.bf16.msra.mxu0 %v17339_v57 }
 0x365   : > { %4387 = vmatmul.bf16.vlgmr.msra.gmra.mxu2 %v13627_v37  ;;  %4401 = vmatmul.bf16.vlgmr.msra.gmra.mxu3 %v13627_v37 }
 0x366   : > { %4660 = vmatpush.bf16.msrb.mxu1 %v17323_v5  ;;  %4439 = vmatpush.bf16.msrb.mxu2 %v17340_v13  ;;  %v17360_v5 = vld [vmem:[#allocation128_spill] sm:$0xff] }
 0x367   : > { %4453 = vmatpush.bf16.msrb.mxu3 %v17341_v43 }
 0x368   : > { %4465 = vmatpush.bf16.msra.mxu0 %v17342_v0 }
 0x36a   : > { %4661 = vmatpush.bf16.msrb.mxu1 %v17325_v7  ;;  %4440 = vmatpush.bf16.msrb.mxu2 %v17343_v50  ;;  %v17359_v7 = vld [vmem:[#allocation124_spill] sm:$0xff] }
 0x36b   : > { %4454 = vmatpush.bf16.msrb.mxu3 %v17344_v4 }
 0x36c   : > { %4466 = vmatpush.bf16.msra.mxu0 %v17346_v27 }
 0x36e   : > { %4662 = vmatpush.bf16.msrb.mxu1 %v17327_v55  ;;  %4441 = vmatpush.bf16.msrb.mxu2 %v17347_v42  ;;  %v17358_v55 = vld [vmem:[#allocation72_spill] sm:$0xff] }
 0x36f   : > { %4455 = vmatpush.bf16.msrb.mxu3 %v17348_v16  ;;  %4415 = vmatmul.bf16.vlgmr.msrb.gmra.mxu0 %v13627_v37 }
 0x370   : > { %4467 = vmatpush.bf16.msra.mxu0 %v17350_v10 }
 0x372   : > { %4663 = vmatpush.bf16.msrb.mxu1 %v17328_v29  ;;  %4442 = vmatpush.bf16.msrb.mxu2 %v17351_v20  ;;  %v17356_v29 = vld [vmem:[#allocation68_spill] sm:$0xff] }
 0x373   : > { %4456 = vmatpush.bf16.msrb.mxu3 %v17352_v8 }
 0x374   : > { %4468 = vmatpush.bf16.msra.mxu0 %v17354_v15 }
 0x375   : > { %4443 = vmatmul.bf16.vlgmr.msrb.gmra.mxu2 %v13664_v12 }
 0x376   : > { %4664 = vmatpush.bf16.msrb.mxu1 %v17329_v18  ;;  %4492 = vmatpush.bf16.msra.mxu2 %v17295_v51  ;;  %v17355_v18 = vld [vmem:[#allocation116_spill] sm:$0xff] }
 0x377   : > { %4506 = vmatpush.bf16.msra.mxu3 %v17296_v61 }
 0x378   : > { %4457 = vmatmul.bf16.vlgmr.msrb.gmra.mxu3 %v13664_v12  ;;  %4469 = vmatpush.bf16.msra.mxu0 %v17356_v29 }
 0x379   : > { %4665 = vmatmul.bf16.vlgmr.msrb.gmra.mxu1 %v13935_v21 }
 0x37a   : > { %4723 = vmatpush.bf16.msra.mxu1 %v17345_v36  ;;  %4493 = vmatpush.bf16.msra.mxu2 %v17298_v28 }
 0x37b   : > { %4507 = vmatpush.bf16.msra.mxu3 %v17299_v58 }
 0x37c   : > { %4470 = vmatpush.bf16.msra.mxu0 %v17358_v55 }
 0x37e   : > { %4724 = vmatpush.bf16.msra.mxu1 %v17349_v46  ;;  %4494 = vmatpush.bf16.msra.mxu2 %v17300_v30 }
 0x37f   : > { %4508 = vmatpush.bf16.msra.mxu3 %v17302_v63  ;;  %4471 = vmatmul.bf16.vlgmr.msra.gmra.mxu0 %v13664_v12  ;;  %v13984_v12 = vpop.f32.mrf.mxu1 }
 0x380   : > { %4520 = vmatpush.bf16.msrb.mxu0 %v17303_v54 }
 0x382   : > { %4725 = vmatpush.bf16.msra.mxu1 %v17353_v19  ;;  %4495 = vmatpush.bf16.msra.mxu2 %v17304_v60 }
 0x383   : > { %4509 = vmatpush.bf16.msra.mxu3 %v17305_v47 }
 0x384   : > { %4521 = vmatpush.bf16.msrb.mxu0 %v17306_v24 }
 0x386   : > { %4726 = vmatpush.bf16.msra.mxu1 %v17355_v18  ;;  %4496 = vmatpush.bf16.msra.mxu2 %v17307_v2  ;;  %v17456_v2 = vld [vmem:[#allocation167_spill] sm:$0xff] }
 0x387   : > { %4510 = vmatpush.bf16.msra.mxu3 %v17308_v38  ;;  %v17450_v38 = vld [vmem:[#allocation162_spill] sm:$0xff] }
 0x388   : > { %4522 = vmatpush.bf16.msrb.mxu0 %v17309_v1 }
 0x38a   : > { %4727 = vmatpush.bf16.msra.mxu1 %v17357_v44  ;;  %4497 = vmatpush.bf16.msra.mxu2 %v17311_v40  ;;  %v17449_v40 = vld [vmem:[#allocation161_spill] sm:$0xff] }
 0x38b   : > { %4511 = vmatpush.bf16.msra.mxu3 %v17312_v62  ;;  %v17448_v62 = vld [vmem:[#allocation151_spill] sm:$0xff] }
 0x38c   : > { %4523 = vmatpush.bf16.msrb.mxu0 %v17313_v9 }
 0x38e   : > { %4728 = vmatpush.bf16.msra.mxu1 %v17359_v7  ;;  %4498 = vmatpush.bf16.msra.mxu2 %v17315_v11 }
 0x38f   : > { %4512 = vmatpush.bf16.msra.mxu3 %v17316_v59  ;;  %v17447_v59 = vld [vmem:[#allocation158_spill] sm:$0xff] }
 0x390   : > { %4524 = vmatpush.bf16.msrb.mxu0 %v17317_v6  ;;  %v17446_v6 = vld [vmem:[#allocation157_spill] sm:$0xff] }
 0x392   : > { %4729 = vmatpush.bf16.msra.mxu1 %v17360_v5  ;;  %4499 = vmatpush.bf16.msra.mxu2 %v17319_v34  ;;  %v17425_v34 = vld [vmem:[#allocation134_spill] sm:$0xff] }
 0x393   : > { %4513 = vmatpush.bf16.msra.mxu3 %v17320_v31  ;;  %v17424_v31 = vld [vmem:[#allocation204_spill] sm:$0xff] }
 0x394   : > { %4525 = vmatpush.bf16.msrb.mxu0 %v17321_v14 }
 0x395   : > { %4500 = vmatmul.bf16.vlgmr.msra.gmra.mxu2 %v13748_v23 }
 0x396   : > { %4730 = vmatpush.bf16.msra.mxu1 %v17361_v56  ;;  %4548 = vmatpush.bf16.msrb.mxu2 %v17330_v53  ;;  %v17389_v53 = vld [vmem:[#allocation101_spill] sm:$0xff] }
 0x397   : > { %4562 = vmatpush.bf16.msrb.mxu3 %v17331_v48  ;;  %v17388_v48 = vld [vmem:[#allocation91_spill] sm:$0xff] }
 0x398   : > { %4514 = vmatmul.bf16.vlgmr.msra.gmra.mxu3 %v13748_v23  ;;  %4526 = vmatpush.bf16.msrb.mxu0 %v17324_v52 }
 0x399   : > { %4731 = vmatmul.bf16.vlgmr.msra.gmra.mxu1 %v13935_v21 }
 0x39a   : > { %4788 = vmatpush.bf16.msrb.mxu1 %v17345_v36  ;;  %4549 = vmatpush.bf16.msrb.mxu2 %v17332_v41  ;;  %v17375_v36 = vld [vmem:[#allocation86_spill] sm:$0xff] }
 0x39b   : > { %4563 = vmatpush.bf16.msrb.mxu3 %v17333_v35  ;;  %v17386_v35 = vld [vmem:[#allocation97_spill] sm:$0xff]  ;;  %v17387_v41 = vld [vmem:[#allocation98_spill] sm:$0xff] }
 0x39c   : > { %4527 = vmatpush.bf16.msrb.mxu0 %v17326_v26  ;;  %v17390_v26 = vld [vmem:[#allocation102_spill] sm:$0xff] }
 0x39e   : > { %4789 = vmatpush.bf16.msrb.mxu1 %v17349_v46  ;;  %v4430_v46 = vpop.f32.mrf.mxu1  ;;  %4550 = vmatpush.bf16.msrb.mxu2 %v17334_v49  ;;  %v17385_v49 = vld [vmem:[#allocation87_spill] sm:$0xff] }
 0x39f   : > { %4564 = vmatpush.bf16.msrb.mxu3 %v17335_v25  ;;  %4528 = vmatmul.bf16.vlgmr.msrb.gmra.mxu0 %v13748_v23  ;;  %v17382_v25 = vld [vmem:[#allocation93_spill] sm:$0xff] }
 0x3a0   : > { %4576 = vmatpush.bf16.msra.mxu0 %v17336_v32  ;;  %v17381_v32 = vld [vmem:[#allocation83_spill] sm:$0xff] }
 0x3a2   : > { %4790 = vmatpush.bf16.msrb.mxu1 %v17353_v19  ;;  %v13998_v19 = vadd.f32 %v4430_v46, %v4374_v39  ;;  %4551 = vmatpush.bf16.msrb.mxu2 %v17337_v45  ;;  %v9387_v46 = vld [vmem:[%s10523_s29 + $0x22] sm:$0xff]  ;;  %v17379_v45 = vld [vmem:[#allocation90_spill] sm:$0xff] }
 0x3a3   : > { %4565 = vmatpush.bf16.msrb.mxu3 %v17338_v33  ;;  %v17378_v33 = vld [vmem:[#allocation89_spill] sm:$0xff] }
 0x3a4   : > { %4577 = vmatpush.bf16.msra.mxu0 %v17339_v57  ;;  %v17377_v57 = vld [vmem:[#allocation45_spill] sm:$0xff] }
 0x3a6   : > { %4791 = vmatpush.bf16.msrb.mxu1 %v17355_v18  ;;  %v14009_v39 = vpop.f32.mrf.mxu1  ;;  %4552 = vmatpush.bf16.msrb.mxu2 %v17340_v13 }
 0x3a7   : > { %4566 = vmatpush.bf16.msrb.mxu3 %v17341_v43  ;;  %v17374_v43 = vld [vmem:[#allocation85_spill] sm:$0xff] }
 0x3a8   : > { %4578 = vmatpush.bf16.msra.mxu0 %v17342_v0  ;;  %v17363_v0 = vld [vmem:[#allocation140_spill] sm:$0xff] }
 0x3aa   : > { %4792 = vmatpush.bf16.msrb.mxu1 %v17357_v44  ;;  %v9388_v44 = vld [vmem:[%s10523_s29 + $0x2a] sm:$0x1f]  ;;  %4553 = vmatpush.bf16.msrb.mxu2 %v17343_v50 }
 0x3ab   : > { %v14018_v18 = vpack.c.bf16 %v9388_v44, %v9387_v46  ;;  %4567 = vmatpush.bf16.msrb.mxu3 %v17344_v4  ;;  %v17364_v44 = vld [vmem:[#allocation74_spill] sm:$0xff]  ;;  %v17365_v46 = vld [vmem:[#allocation75_spill] sm:$0xff]  ;;  %v17372_v4 = vld [vmem:[#allocation152_spill] sm:$0xff] }
 0x3ac   : > { %4579 = vmatpush.bf16.msra.mxu0 %v17346_v27  ;;  %v17371_v27 = vld [vmem:[#allocation82_spill] sm:$0xff] }
 0x3ae   : > { %4793 = vmatpush.bf16.msrb.mxu1 %v17359_v7  ;;  %v17362_v7 = vld [vmem:[#allocation136_spill] sm:$0xff]  ;;  %4554 = vmatpush.bf16.msrb.mxu2 %v17347_v42  ;;  %v17367_v42 = vld [vmem:[#allocation78_spill] sm:$0xff] }
 0x3af   : > { %4568 = vmatpush.bf16.msrb.mxu3 %v17348_v16 }
 0x3b0   : > { %4580 = vmatpush.bf16.msra.mxu0 %v17350_v10  ;;  %v17368_v10 = vld [vmem:[#allocation79_spill] sm:$0xff] }
 0x3b2   : > { %4794 = vmatpush.bf16.msrb.mxu1 %v17360_v5  ;;  %v4487_v5 = vpop.f32.mrf.mxu1  ;;  %4555 = vmatpush.bf16.msrb.mxu2 %v17351_v20  ;;  %v17369_v20 = vld [vmem:[#allocation148_spill] sm:$0xff] }
 0x3b3   : > { %4569 = vmatpush.bf16.msrb.mxu3 %v17352_v8  ;;  %v17370_v8 = vld [vmem:[#allocation81_spill] sm:$0xff] }
 0x3b4   : > { %4581 = vmatpush.bf16.msra.mxu0 %v17354_v15  ;;  %v17373_v15 = vld [vmem:[#allocation76_spill] sm:$0xff] }
 0x3b5   : > { %4556 = vmatmul.bf16.vlgmr.msrb.gmra.mxu2 %v13627_v37 }
 0x3b6   : > { %4795 = vmatpush.bf16.msrb.mxu1 %v17361_v56  ;;  %4606 = vmatpush.bf16.msra.mxu2 %v17364_v44  ;;  %v17366_v56 = vld [vmem:[#allocation144_spill] sm:$0xff] }
 0x3b7   : > { %4620 = vmatpush.bf16.msra.mxu3 %v17365_v46 }
 0x3b8   : > { %4570 = vmatmul.bf16.vlgmr.msrb.gmra.mxu3 %v13627_v37  ;;  %4582 = vmatpush.bf16.msra.mxu0 %v17356_v29  ;;  %v17376_v29 = vld [vmem:[#allocation156_spill] sm:$0xff] }
 0x3b9   : > { %4796 = vmatmul.bf16.vlgmr.msrb.gmra.mxu1 %v14018_v18 }
 0x3ba   : > { %4854 = vmatpush.bf16.msra.mxu1 %v17362_v7  ;;  %v14037_v16 = vpop.f32.mrf.mxu1  ;;  %4607 = vmatpush.bf16.msra.mxu2 %v17367_v42 }
 0x3bb   : > { %4621 = vmatpush.bf16.msra.mxu3 %v17368_v10 }
 0x3bc   : > { %4583 = vmatpush.bf16.msra.mxu0 %v17358_v55  ;;  %v17380_v55 = vld [vmem:[#allocation160_spill] sm:$0xff] }
 0x3be   : > { %4855 = vmatpush.bf16.msra.mxu1 %v17363_v0  ;;  %4608 = vmatpush.bf16.msra.mxu2 %v17370_v8 }
 0x3bf   : > { %4622 = vmatpush.bf16.msra.mxu3 %v17371_v27  ;;  %4584 = vmatmul.bf16.vlgmr.msra.gmra.mxu0 %v13627_v37  ;;  %v17384_v37 = vld [vmem:[#allocation164_spill] sm:$0xff] }
 0x3c0   : > { %4634 = vmatpush.bf16.msrb.mxu0 %v17373_v15 }
 0x3c2   : > { %4856 = vmatpush.bf16.msra.mxu1 %v17366_v56  ;;  %v4543_v50 = vpop.f32.mrf.mxu1  ;;  %4609 = vmatpush.bf16.msra.mxu2 %v17374_v43 }
 0x3c3   : > { %v14049_v13 = vadd.f32 %v4543_v50, %v4487_v5  ;;  %4623 = vmatpush.bf16.msra.mxu3 %v17375_v36  ;;  %v17383_v5 = vld [vmem:[#allocation94_spill] sm:$0xff] }
 0x3c4   : > { %4635 = vmatpush.bf16.msrb.mxu0 %v17377_v57 }
 0x3c6   : > { %4857 = vmatpush.bf16.msra.mxu1 %v17369_v20  ;;  %4610 = vmatpush.bf16.msra.mxu2 %v17378_v33 }
 0x3c7   : > { %4624 = vmatpush.bf16.msra.mxu3 %v17379_v45 }
 0x3c8   : > { %4636 = vmatpush.bf16.msrb.mxu0 %v17381_v32 }
 0x3ca   : > { %4858 = vmatpush.bf16.msra.mxu1 %v17372_v4  ;;  %4611 = vmatpush.bf16.msra.mxu2 %v17382_v25  ;;  %v14061_v50 = vpop.f32.mrf.mxu1 }
 0x3cb   : > { %4625 = vmatpush.bf16.msra.mxu3 %v17383_v5 }
 0x3cc   : > { %4637 = vmatpush.bf16.msrb.mxu0 %v17385_v49 }
 0x3ce   : > { %4859 = vmatpush.bf16.msra.mxu1 %v17376_v29  ;;  %4612 = vmatpush.bf16.msra.mxu2 %v17386_v35 }
 0x3cf   : > { %4626 = vmatpush.bf16.msra.mxu3 %v17387_v41 }
 0x3d0   : > { %4638 = vmatpush.bf16.msrb.mxu0 %v17388_v48 }
 0x3d2   : > { %4860 = vmatpush.bf16.msra.mxu1 %v17380_v55  ;;  %4613 = vmatpush.bf16.msra.mxu2 %v17389_v53 }
 0x3d3   : > { %4627 = vmatpush.bf16.msra.mxu3 %v17390_v26 }
 0x3d5   : > { %4614 = vmatmul.bf16.vlgmr.msra.gmra.mxu2 %v13748_v23 }
 0x3d6   : > { %4861 = vmatpush.bf16.msra.mxu1 %v17384_v37  ;;  %4671 = vmatpush.bf16.msrb.mxu2 %v17364_v44  ;;  %v4601_v52 = vpop.f32.mrf.mxu1  ;;  %v17392_v44 = vld [vmem:[#allocation99_spill] sm:$0xff] }
 0x3d7   : > { %4685 = vmatpush.bf16.msrb.mxu3 %v17365_v46  ;;  %v17393_v46 = vld [vmem:[#allocation103_spill] sm:$0xff] }
 0x3d8   : > { %4628 = vmatmul.bf16.vlgmr.msra.gmra.mxu3 %v13748_v23 }
 0x3d9   : > { %4862 = vmatmul.bf16.vlgmr.msra.gmra.mxu1 %v14018_v18 }
 0x3da   : > { %4919 = vmatpush.bf16.msrb.mxu1 %v17362_v7  ;;  %v17391_v7 = vld [vmem:[#allocation95_spill] sm:$0xff]  ;;  %4672 = vmatpush.bf16.msrb.mxu2 %v17367_v42  ;;  %v17415_v42 = vld [vmem:[#allocation125_spill] sm:$0xff] }
 0x3db   : > { %4639 = vmatpush.bf16.msrb.mxu0 %v17391_v7  ;;  %4686 = vmatpush.bf16.msrb.mxu3 %v17368_v10  ;;  %v9390_v10 = vld [vmem:[%s10523_s29 + $0x3a] sm:$0x1f] }
 0x3de   : > { %4920 = vmatpush.bf16.msrb.mxu1 %v17363_v0  ;;  %v14080_v0 = vadd.f32 %v4601_v52, %v13998_v19  ;;  %4673 = vmatpush.bf16.msrb.mxu2 %v17370_v8  ;;  %v295_v52 = vld [vmem:[%s15875_s6] sm:$0x1]  ;;  %v4135_v19 = vpop.f32.mrf.mxu2 }
 0x3df   : > { %4640 = vmatpush.bf16.msrb.mxu0 %v17392_v44  ;;  %4687 = vmatpush.bf16.msrb.mxu3 %v17371_v27  ;;  %v4239_v27 = vpop.f32.mrf.mxu3  ;;  %v4139_v8 = vadd.f32 %v4135_v19, %v295_v52  ;;  %v14113_v52 = vpop.f32.mrf.mxu1  ;;  %v17395_v19 = vld [vmem:[#allocation168_spill] sm:$0xff] }
 0x3e2   : > { %4921 = vmatpush.bf16.msrb.mxu1 %v17366_v56  ;;  %4674 = vmatpush.bf16.msrb.mxu2 %v17374_v43  ;;  %v9389_v43 = vld [vmem:[%s10523_s29 + $0x32] sm:$0xff]  ;;  %v17418_v56 = vld [vmem:[#allocation196_spill] sm:$0xff] }
 0x3e3   : > { %4641 = vmatpush.bf16.msrb.mxu0 %v17393_v46  ;;  %4688 = vmatpush.bf16.msrb.mxu3 %v17375_v36 }
 0x3e6   : > { %4922 = vmatpush.bf16.msrb.mxu1 %v17369_v20  ;;  %4642 = vmatmul.bf16.vlgmr.msrb.gmra.mxu0 %v13748_v23  ;;  %v4350_v23 = vpop.f32.mrf.mxu0 }
 0x3e7   : > { %4699 = vmatpush.bf16.msra.mxu0 %v17373_v15  ;;  %4675 = vmatpush.bf16.msrb.mxu2 %v17378_v33  ;;  %v4243_v15 = vadd.f32 %v4239_v27, %v4139_v8  ;;  %v4137_v27 = vpop.f32.mrf.mxu2  ;;  %v4241_v8 = vpop.f32.mrf.mxu3 }
 0x3e8   : > { %4689 = vmatpush.bf16.msrb.mxu3 %v17379_v45 }
 0x3e9   : > { %v14105_v36 = vadd.f32 %v4350_v23, %v4243_v15  ;;  %v17397_v15 = vld [vmem:[#allocation105_spill] sm:$0xff]  ;;  %v17398_v23 = vld [vmem:[#allocation106_spill] sm:$0xff] }
 0x3ea   : > { %4923 = vmatpush.bf16.msrb.mxu1 %v17372_v4  ;;  %v17416_v4 = vld [vmem:[#allocation126_spill] sm:$0xff] }
 0x3eb   : > { %4700 = vmatpush.bf16.msra.mxu0 %v17377_v57  ;;  %17394 = vst [vmem:[#allocation413_spill] sm:$0xff] %v14105_v36  ;;  %4676 = vmatpush.bf16.msrb.mxu2 %v17382_v25  ;;  %v14109_v57 = vpack.c.bf16 %v9390_v10, %v9389_v43  ;;  %v17396_v10 = vld [vmem:[#allocation172_spill] sm:$0xff]  ;;  %v17401_v36 = vld [vmem:[#allocation110_spill] sm:$0xff] }
 0x3ec   : > { %4690 = vmatpush.bf16.msrb.mxu3 %v17383_v5  ;;  %v17406_v5 = vld [vmem:[#allocation184_spill] sm:$0xff] }
 0x3ed   : > { %v17410_v25 = vld [vmem:[#allocation188_spill] sm:$0xff] }
 0x3ee   : > { %4924 = vmatpush.bf16.msrb.mxu1 %v17376_v29  ;;  %v4352_v43 = vpop.f32.mrf.mxu0  ;;  %v17414_v29 = vld [vmem:[#allocation192_spill] sm:$0xff] }
 0x3ef   : > { %4701 = vmatpush.bf16.msra.mxu0 %v17381_v32  ;;  %4677 = vmatpush.bf16.msrb.mxu2 %v17386_v35  ;;  %v4388_v27 = vpop.f32.mrf.mxu2  ;;  %v4402_v8 = vpop.f32.mrf.mxu3  ;;  %v17400_v43 = vld [vmem:[#allocation109_spill] sm:$0xff] }
 0x3f0   : > { %4691 = vmatpush.bf16.msrb.mxu3 %v17387_v41  ;;  %v17404_v41 = vld [vmem:[#allocation114_spill] sm:$0xff]  ;;  %v17411_v32 = vld [vmem:[#allocation121_spill] sm:$0xff] }
 0x3f2   : > { %4925 = vmatpush.bf16.msrb.mxu1 %v17380_v55  ;;  %v17413_v55 = vld [vmem:[#allocation115_spill] sm:$0xff] }
 0x3f3   : > { %4702 = vmatpush.bf16.msra.mxu0 %v17385_v49  ;;  %4678 = vmatpush.bf16.msrb.mxu2 %v17389_v53  ;;  %v17405_v49 = vld [vmem:[#allocation107_spill] sm:$0xff] }
 0x3f4   : > { %4692 = vmatpush.bf16.msrb.mxu3 %v17390_v26 }
 0x3f6   : > { %4926 = vmatpush.bf16.msrb.mxu1 %v17384_v37  ;;  %4679 = vmatmul.bf16.vlgmr.msrb.gmra.mxu2 %v13935_v21  ;;  %v4416_v53 = vpop.f32.mrf.mxu0 }
 0x3f7   : > { %4703 = vmatpush.bf16.msra.mxu0 %v17388_v48  ;;  %4737 = vmatpush.bf16.msra.mxu2 %v17397_v15  ;;  %v17402_v48 = vld [vmem:[#allocation180_spill] sm:$0xff]  ;;  %v14138_v35 = vpop.f32.mrf.mxu2 }
 0x3f8   : > { %4751 = vmatpush.bf16.msra.mxu3 %v17398_v23 }
 0x3f9   : > { %4927 = vmatmul.bf16.vlgmr.msrb.gmra.mxu1 %v14109_v57  ;;  %4693 = vmatmul.bf16.vlgmr.msrb.gmra.mxu3 %v13935_v21 }
 0x3fa   : > { %5045 = vmatpush.bf16.msra.mxu1 %v17395_v19  ;;  %v17399_v19 = vld [vmem:[#allocation176_spill] sm:$0xff] }
 0x3fb   : > { %4704 = vmatpush.bf16.msra.mxu0 %v17391_v7  ;;  %4738 = vmatpush.bf16.msra.mxu2 %v17400_v43  ;;  %v17403_v7 = vld [vmem:[#allocation113_spill] sm:$0xff] }
 0x3fc   : > { %4752 = vmatpush.bf16.msra.mxu3 %v17401_v36 }
 0x3fe   : > { %5046 = vmatpush.bf16.msra.mxu1 %v17396_v10  ;;  %v4666_v10 = vpop.f32.mrf.mxu1 }
 0x3ff   : > { %v14132_v26 = vadd.f32 %v4666_v10, %v14049_v13  ;;  %4705 = vmatpush.bf16.msra.mxu0 %v17392_v44  ;;  %4739 = vmatpush.bf16.msra.mxu2 %v17403_v7  ;;  %v17407_v13 = vld [vmem:[#allocation117_spill] sm:$0xff]  ;;  %v17408_v10 = vld [vmem:[#allocation118_spill] sm:$0xff]  ;;  %v17409_v44 = vld [vmem:[#allocation111_spill] sm:$0xff]  ;;  %v4444_v45 = vpop.f32.mrf.mxu2 }
 0x400   : > { %4753 = vmatpush.bf16.msra.mxu3 %v17404_v41  ;;  %v14154_v33 = vadd.f32 %v4444_v45, %v4388_v27  ;;  %v17419_v45 = vld [vmem:[#allocation129_spill] sm:$0xff]  ;;  %v17420_v27 = vld [vmem:[#allocation200_spill] sm:$0xff] }
 0x402   : > { %5047 = vmatpush.bf16.msra.mxu1 %v17399_v19  ;;  %v14141_v19 = vpop.f32.mrf.mxu3 }
 0x403   : > { %4706 = vmatpush.bf16.msra.mxu0 %v17393_v46  ;;  %4740 = vmatpush.bf16.msra.mxu2 %v17407_v13  ;;  %v17412_v46 = vld [vmem:[#allocation122_spill] sm:$0xff] }
 0x404   : > { %4754 = vmatpush.bf16.msra.mxu3 %v17408_v10 }
 0x406   : > { %5048 = vmatpush.bf16.msra.mxu1 %v17402_v48  ;;  %4707 = vmatmul.bf16.vlgmr.msra.gmra.mxu0 %v13935_v21  ;;  %v14148_v48 = vpop.f32.mrf.mxu0 }
 0x407   : > { %4765 = vmatpush.bf16.msrb.mxu0 %v17405_v49  ;;  %4741 = vmatpush.bf16.msra.mxu2 %v17411_v32 }
 0x408   : > { %4755 = vmatpush.bf16.msra.mxu3 %v17412_v46 }
 0x40a   : > { %5049 = vmatpush.bf16.msra.mxu1 %v17406_v5  ;;  %v4458_v5 = vpop.f32.mrf.mxu3 }
 0x40b   : > { %4766 = vmatpush.bf16.msrb.mxu0 %v17409_v44  ;;  %v14156_v37 = vadd.f32 %v4458_v5, %v4402_v8  ;;  %4742 = vmatpush.bf16.msra.mxu2 %v17415_v42  ;;  %v17421_v5 = vld [vmem:[#allocation130_spill] sm:$0xff]  ;;  %v17422_v8 = vld [vmem:[#allocation123_spill] sm:$0xff] }
 0x40c   : > { %4756 = vmatpush.bf16.msra.mxu3 %v17416_v4 }
 0x40e   : > { %5050 = vmatpush.bf16.msra.mxu1 %v17410_v25  ;;  %v4472_v20 = vpop.f32.mrf.mxu0  ;;  %v17417_v25 = vld [vmem:[#allocation119_spill] sm:$0xff] }
 0x40f   : > { %4767 = vmatpush.bf16.msrb.mxu0 %v17413_v55  ;;  %v14164_v14 = vadd.f32 %v4472_v20, %v4416_v53  ;;  %4743 = vmatpush.bf16.msra.mxu2 %v17419_v45  ;;  %v17426_v53 = vld [vmem:[#allocation127_spill] sm:$0xff]  ;;  %v17427_v20 = vld [vmem:[#allocation208_spill] sm:$0xff] }
 0x410   : > { %4757 = vmatpush.bf16.msra.mxu3 %v17421_v5 }
 0x412   : > { %5051 = vmatpush.bf16.msra.mxu1 %v17414_v29  ;;  %v17423_v29 = vld [vmem:[#allocation133_spill] sm:$0xff] }
 0x413   : > { %4768 = vmatpush.bf16.msrb.mxu0 %v17417_v25  ;;  %4744 = vmatpush.bf16.msra.mxu2 %v17423_v29 }
 0x414   : > { %4758 = vmatpush.bf16.msra.mxu3 %v17425_v34 }
 0x416   : > { %5052 = vmatpush.bf16.msra.mxu1 %v17418_v56  ;;  %4745 = vmatmul.bf16.vlgmr.msra.gmra.mxu2 %v13935_v21  ;;  %v17430_v56 = vld [vmem:[#allocation135_spill] sm:$0xff] }
 0x417   : > { %4769 = vmatpush.bf16.msrb.mxu0 %v17422_v8  ;;  %4802 = vmatpush.bf16.msrb.mxu2 %v17397_v15  ;;  %v17445_v15 = vld [vmem:[#allocation147_spill] sm:$0xff] }
 0x418   : > { %4816 = vmatpush.bf16.msrb.mxu3 %v17398_v23  ;;  %v17431_v23 = vld [vmem:[#allocation218_spill] sm:$0xff] }
 0x419   : > { %4759 = vmatmul.bf16.vlgmr.msra.gmra.mxu3 %v13935_v21 }
 0x41a   : > { %5101 = vmatpush.bf16.msrb.mxu1 %v17420_v27  ;;  %v17428_v27 = vld [vmem:[#allocation131_spill] sm:$0xff] }
 0x41b   : > { %4770 = vmatpush.bf16.msrb.mxu0 %v17426_v53  ;;  %4803 = vmatpush.bf16.msrb.mxu2 %v17400_v43 }
 0x41c   : > { %4817 = vmatpush.bf16.msrb.mxu3 %v17401_v36 }
 0x41e   : > { %5102 = vmatpush.bf16.msrb.mxu1 %v17424_v31  ;;  %v17429_v31 = vld [vmem:[#allocation214_spill] sm:$0xff] }
 0x41f   : > { %4771 = vmatpush.bf16.msrb.mxu0 %v17428_v27  ;;  %4804 = vmatpush.bf16.msrb.mxu2 %v17403_v7 }
 0x420   : > { %4818 = vmatpush.bf16.msrb.mxu3 %v17404_v41  ;;  %v17444_v41 = vld [vmem:[#allocation154_spill] sm:$0xff] }
 0x422   : > { %5103 = vmatpush.bf16.msrb.mxu1 %v17427_v20  ;;  %v14197_v20 = vpop.f32.mrf.mxu3 }
 0x423   : > { %4772 = vmatpush.bf16.msrb.mxu0 %v17430_v56  ;;  %4805 = vmatpush.bf16.msrb.mxu2 %v17407_v13  ;;  %v17443_v13 = vld [vmem:[#allocation153_spill] sm:$0xff] }
 0x424   : > { %4819 = vmatpush.bf16.msrb.mxu3 %v17408_v10  ;;  %v17442_v10 = vld [vmem:[#allocation143_spill] sm:$0xff] }
 0x426   : > { %5104 = vmatpush.bf16.msrb.mxu1 %v17429_v31  ;;  %4773 = vmatmul.bf16.vlgmr.msrb.gmra.mxu0 %v13935_v21  ;;  %v14195_v31 = vpop.f32.mrf.mxu2  ;;  %v14203_v21 = vpop.f32.mrf.mxu0 }
 0x427   : > { %4830 = vmatpush.bf16.msra.mxu0 %v17405_v49  ;;  %4806 = vmatpush.bf16.msrb.mxu2 %v17411_v32  ;;  %v17440_v32 = vld [vmem:[#allocation149_spill] sm:$0xff] }
 0x428   : > { %4820 = vmatpush.bf16.msrb.mxu3 %v17412_v46 }
 0x42a   : > { %5105 = vmatpush.bf16.msrb.mxu1 %v17431_v23  ;;  %v14209_v23 = vpop.f32.mrf.mxu1 }
 0x42b   : > { %4831 = vmatpush.bf16.msra.mxu0 %v17409_v44  ;;  %4807 = vmatpush.bf16.msrb.mxu2 %v17415_v42  ;;  %v17434_v42 = vld [vmem:[#allocation138_spill] sm:$0xff] }
 0x42c   : > { %4821 = vmatpush.bf16.msrb.mxu3 %v17416_v4  ;;  %v17433_v4 = vld [vmem:[#allocation137_spill] sm:$0xff] }
 0x42e   : > { %5106 = vmatpush.bf16.msrb.mxu1 %v11753_v17  ;;  %v17432_v17 = vld [vmem:[#allocation234_spill] sm:$0xff]  ;;  %v4501_v46 = vpop.f32.mrf.mxu2 }
 0x42f   : > { %4832 = vmatpush.bf16.msra.mxu0 %v17413_v55  ;;  %4808 = vmatpush.bf16.msrb.mxu2 %v17419_v45  ;;  %v17436_v45 = vld [vmem:[#allocation142_spill] sm:$0xff]  ;;  %v17439_v55 = vld [vmem:[#allocation139_spill] sm:$0xff] }
 0x430   : > { %4822 = vmatpush.bf16.msrb.mxu3 %v17421_v5  ;;  %v17435_v5 = vld [vmem:[#allocation141_spill] sm:$0xff] }
 0x432   : > { %5107 = vmatpush.bf16.msrb.mxu1 %v11809_v22  ;;  %v4515_v22 = vpop.f32.mrf.mxu3 }
 0x433   : > { %4833 = vmatpush.bf16.msra.mxu0 %v17417_v25  ;;  %4809 = vmatpush.bf16.msrb.mxu2 %v17423_v29  ;;  %v14222_v29 = vpop.f32.mrf.mxu1 }
 0x434   : > { %4823 = vmatpush.bf16.msrb.mxu3 %v17425_v34 }
 0x436   : > { %5108 = vmatpush.bf16.msrb.mxu1 %v17432_v17  ;;  %4810 = vmatmul.bf16.vlgmr.msrb.gmra.mxu2 %v14018_v18  ;;  %v4529_v17 = vpop.f32.mrf.mxu0  ;;  %v14224_v34 = vpop.f32.mrf.mxu2 }
 0x437   : > { %4834 = vmatpush.bf16.msra.mxu0 %v17422_v8  ;;  %4868 = vmatpush.bf16.msra.mxu2 %v17433_v4  ;;  %v17437_v8 = vld [vmem:[#allocation145_spill] sm:$0xff] }
 0x438   : > { %4882 = vmatpush.bf16.msra.mxu3 %v17434_v42 }
 0x439   : > { %4824 = vmatmul.bf16.vlgmr.msrb.gmra.mxu3 %v14018_v18 }
 0x43a   : > { %v14227_v25 = vpop.f32.mrf.mxu3 }
 0x43b   : > { %4835 = vmatpush.bf16.msra.mxu0 %v17426_v53  ;;  %4869 = vmatpush.bf16.msra.mxu2 %v17435_v5  ;;  %v17438_v53 = vld [vmem:[#allocation146_spill] sm:$0xff]  ;;  %v14239_v49 = vpop.f32.mrf.mxu1 }
 0x43c   : > { %4883 = vmatpush.bf16.msra.mxu3 %v17436_v45 }
 0x43e   : > { %v14233_v44 = vpop.f32.mrf.mxu0  ;;  %v4557_v7 = vpop.f32.mrf.mxu2 }
 0x43f   : > { %4836 = vmatpush.bf16.msra.mxu0 %v17428_v27  ;;  %4870 = vmatpush.bf16.msra.mxu2 %v17437_v8  ;;  %v17441_v27 = vld [vmem:[#allocation150_spill] sm:$0xff] }
 0x440   : > { %4884 = vmatpush.bf16.msra.mxu3 %v17438_v53 }
 0x442   : > { %v4571_v36 = vpop.f32.mrf.mxu3 }
 0x443   : > { %4837 = vmatpush.bf16.msra.mxu0 %v17430_v56  ;;  %4871 = vmatpush.bf16.msra.mxu2 %v17440_v32  ;;  %v14242_v56 = vadd.f32 %v4557_v7, %v4501_v46  ;;  %v14244_v43 = vadd.f32 %v4571_v36, %v4515_v22  ;;  %v4797_v1 = vpop.f32.mrf.mxu1  ;;  %v17451_v7 = vld [vmem:[#allocation155_spill] sm:$0xff]  ;;  %v17452_v22 = vld [vmem:[#allocation165_spill] sm:$0xff]  ;;  %v17453_v36 = vld [vmem:[#allocation166_spill] sm:$0xff] }
 0x444   : > { %4885 = vmatpush.bf16.msra.mxu3 %v17441_v27  ;;  %v17454_v46 = vld [vmem:[#allocation159_spill] sm:$0xff] }
 0x446   : > { %4838 = vmatmul.bf16.vlgmr.msra.gmra.mxu0 %v14018_v18  ;;  %v4585_v11 = vpop.f32.mrf.mxu0 }
 0x447   : > { %4896 = vmatpush.bf16.msrb.mxu0 %v17439_v55  ;;  %4872 = vmatpush.bf16.msra.mxu2 %v17443_v13  ;;  %v14249_v9 = vadd.f32 %v4585_v11, %v4529_v17  ;;  %v17455_v11 = vld [vmem:[#allocation163_spill] sm:$0xff] }
 0x448   : > { %4886 = vmatpush.bf16.msra.mxu3 %v17444_v41 }
 0x44b   : > { %4897 = vmatpush.bf16.msrb.mxu0 %v17442_v10  ;;  %4873 = vmatpush.bf16.msra.mxu2 %v17446_v6  ;;  %v14264_v17 = vpop.f32.mrf.mxu1 }
 0x44c   : > { %4887 = vmatpush.bf16.msra.mxu3 %v17447_v59 }
 0x44f   : > { %4898 = vmatpush.bf16.msrb.mxu0 %v17445_v15  ;;  %4874 = vmatpush.bf16.msra.mxu2 %v17449_v40 }
 0x450   : > { %4888 = vmatpush.bf16.msra.mxu3 %v17450_v38 }
 0x453   : > { %4899 = vmatpush.bf16.msrb.mxu0 %v17448_v62  ;;  %4875 = vmatpush.bf16.msra.mxu2 %v17452_v22 }
 0x454   : > { %4889 = vmatpush.bf16.msra.mxu3 %v17453_v36 }
 0x456   : > { %4876 = vmatmul.bf16.vlgmr.msra.gmra.mxu2 %v14018_v18 }
 0x457   : > { %4900 = vmatpush.bf16.msrb.mxu0 %v17451_v7  ;;  %4933 = vmatpush.bf16.msrb.mxu2 %v17433_v4  ;;  %v14269_v4 = vpop.f32.mrf.mxu2 }
 0x458   : > { %4947 = vmatpush.bf16.msrb.mxu3 %v17434_v42  ;;  %v14271_v42 = vpop.f32.mrf.mxu3 }
 0x459   : > { %4890 = vmatmul.bf16.vlgmr.msra.gmra.mxu3 %v14018_v18 }
 0x45b   : > { %4901 = vmatpush.bf16.msrb.mxu0 %v17454_v46  ;;  %4934 = vmatpush.bf16.msrb.mxu2 %v17435_v5 }
 0x45c   : > { %4948 = vmatpush.bf16.msrb.mxu3 %v17436_v45  ;;  %v14278_v45 = vpop.f32.mrf.mxu0 }
 0x45f   : > { %4902 = vmatpush.bf16.msrb.mxu0 %v17455_v11  ;;  %4935 = vmatpush.bf16.msrb.mxu2 %v17437_v8  ;;  %v4863_v8 = vpop.f32.mrf.mxu1 }
 0x460   : > { %4949 = vmatpush.bf16.msrb.mxu3 %v17438_v53  ;;  %v4615_v53 = vpop.f32.mrf.mxu2  ;;  %v4629_v5 = vpop.f32.mrf.mxu3 }
 0x461   : > { %v14284_v3 = vadd.f32 %v4615_v53, %v14154_v33 }
 0x463   : > { %4903 = vmatpush.bf16.msrb.mxu0 %v17456_v2  ;;  %4936 = vmatpush.bf16.msrb.mxu2 %v17440_v32  ;;  %v14287_v32 = vadd.f32 %v4629_v5, %v14156_v37  ;;  %v4779_v37 = vadd.f32 %v14222_v29, %v14080_v0  ;;  %v17457_v5 = vld [vmem:[#allocation169_spill] sm:$0xff]  ;;  %v17461_v29 = vld [vmem:[#allocation226_spill] sm:$0xff] }
 0x464   : > { %4950 = vmatpush.bf16.msrb.mxu3 %v17441_v27 }
 0x465   : > { %v4910_v53 = vadd.f32 %v4863_v8, %v4779_v37  ;;  %v17462_v37 = vld [vmem:[#allocation177_spill] sm:$0xff] }
 0x466   : > { %4904 = vmatmul.bf16.vlgmr.msrb.gmra.mxu0 %v14018_v18  ;;  %v4643_v18 = vpop.f32.mrf.mxu0 }
 0x467   : > { %4961 = vmatpush.bf16.msra.mxu0 %v17439_v55  ;;  %4937 = vmatpush.bf16.msrb.mxu2 %v17443_v13  ;;  %v14298_v33 = vpop.f32.mrf.mxu1  ;;  %v4983_v0 = vadd.f32 %v4910_v53, %v17461_v29  ;;  %v4546_v13 = vadd.f32 %v14061_v50, %v14037_v16 }
 0x468   : > { %4951 = vmatpush.bf16.msrb.mxu3 %v17444_v41  ;;  %v4433_v41 = vadd.f32 %v14009_v39, %v13984_v12  ;;  %v4447_v12 = vadd.f32 %v14195_v31, %v14138_v35  ;;  %v4574_v31 = vadd.f32 %v14271_v42, %v14227_v25  ;;  %v17506_v35 = vld [vmem:[#allocation227_spill] sm:$0xff] }
 0x469   : > { %v4717_v47 = vadd.f32 %v14209_v23, %v4546_v13 }
 0x46a   : > { %v4652_v24 = vadd.f32 %v14113_v52, %v4433_v41  ;;  %v4461_v41 = vadd.f32 %v14197_v20, %v14141_v19  ;;  %v4588_v19 = vadd.f32 %v14278_v45, %v14233_v44  ;;  %v17508_v45 = vld [vmem:[#allocation239_spill] sm:$0xff] }
 0x46b   : > { %4962 = vmatpush.bf16.msra.mxu0 %v17442_v10  ;;  %4938 = vmatpush.bf16.msrb.mxu2 %v17446_v6  ;;  %v14293_v10 = vadd.f32 %v4643_v18, %v14164_v14  ;;  %v17458_v14 = vld [vmem:[#allocation170_spill] sm:$0xff]  ;;  %v4844_v18 = vadd.f32 %v4797_v1, %v14132_v26  ;;  %v14320_v1 = vpop.f32.mrf.mxu3  ;;  %v4848_v16 = vadd.f32 %v14264_v17, %v4717_v47 }
 0x46c   : > { %4952 = vmatpush.bf16.msrb.mxu3 %v17447_v59  ;;  %v4783_v54 = vadd.f32 %v14239_v49, %v4652_v24 }
 0x46e   : > { %v4914_v39 = vadd.f32 %v14298_v33, %v4783_v54 }
 0x46f   : > { %4963 = vmatpush.bf16.msra.mxu0 %v17445_v15  ;;  %4939 = vmatpush.bf16.msrb.mxu2 %v17449_v40 }
 0x470   : > { %4953 = vmatpush.bf16.msrb.mxu3 %v17450_v38  ;;  %v17460_v38 = vld [vmem:[#allocation174_spill] sm:$0xff]  ;;  %v4987_v23 = vadd.f32 %v4914_v39, %v17461_v29 }
 0x473   : > { %4964 = vmatpush.bf16.msra.mxu0 %v17448_v62  ;;  %4940 = vmatpush.bf16.msrb.mxu2 %v17452_v22 }
 0x474   : > { %4954 = vmatpush.bf16.msrb.mxu3 %v17453_v36 }
 0x476   : > { %4941 = vmatmul.bf16.vlgmr.msrb.gmra.mxu2 %v14109_v57  ;;  %v4928_v22 = vpop.f32.mrf.mxu1 }
 0x477   : > { %4965 = vmatpush.bf16.msra.mxu0 %v17451_v7  ;;  %5059 = vmatpush.bf16.msra.mxu2 %v17457_v5  ;;  %v17459_v7 = vld [vmem:[#allocation173_spill] sm:$0xff]  ;;  %v4975_v36 = vadd.f32 %v4928_v22, %v4844_v18  ;;  %v17463_v5 = vld [vmem:[#allocation178_spill] sm:$0xff]  ;;  %v14329_v18 = vpop.f32.mrf.mxu0 }
 0x478   : > { %5073 = vmatpush.bf16.msra.mxu3 %v17458_v14  ;;  %v14317_v14 = vpop.f32.mrf.mxu2  ;;  %v17465_v22 = vld [vmem:[#allocation181_spill] sm:$0xff] }
 0x479   : > { %4955 = vmatmul.bf16.vlgmr.msrb.gmra.mxu3 %v14109_v57  ;;  %v4999_v8 = vadd.f32 %v4975_v36, %v17461_v29  ;;  %v17466_v36 = vld [vmem:[#allocation182_spill] sm:$0xff] }
 0x47b   : > { %4966 = vmatpush.bf16.msra.mxu0 %v17454_v46  ;;  %5060 = vmatpush.bf16.msra.mxu2 %v17459_v7  ;;  %v4991_v46 = vmax.f32 %v4983_v0, 0.0  ;;  %v5007_v26 = vmax.f32 %v4999_v8, 0.0  ;;  %v17468_v0 = vld [vmem:[#allocation185_spill] sm:$0xff]  ;;  %v17469_v8 = vld [vmem:[#allocation186_spill] sm:$0xff] }
 0x47c   : > { %5074 = vmatpush.bf16.msra.mxu3 %v17460_v38  ;;  %v17464_v38 = vld [vmem:[#allocation171_spill] sm:$0xff] }
 0x47d   : > { %v14324_v53 = vmax.f32 %v4991_v46, %v5007_v26  ;;  %v4694_v46 = vpop.f32.mrf.mxu3 }
 0x47e   : > { %v14338_v26 = vadd.f32 %v4694_v46, %v14244_v43  ;;  %v17477_v43 = vld [vmem:[#allocation197_spill] sm:$0xff]  ;;  %v17478_v46 = vld [vmem:[#allocation198_spill] sm:$0xff]  ;;  %v4930_v30 = vpop.f32.mrf.mxu1 }
 0x47f   : > { %4967 = vmatpush.bf16.msra.mxu0 %v17455_v11  ;;  %5061 = vmatpush.bf16.msra.mxu2 %v17462_v37  ;;  %v17467_v37 = vld [vmem:[#allocation175_spill] sm:$0xff]  ;;  %v4979_v47 = vadd.f32 %v4930_v30, %v4848_v16  ;;  %v4653_v30 = vadd.f32 %v14317_v14, %v4447_v12 }
 0x480   : > { %5075 = vmatpush.bf16.msra.mxu3 %v17463_v5  ;;  %v4680_v5 = vpop.f32.mrf.mxu2 }
 0x481   : > { %v14335_v7 = vadd.f32 %v4680_v5, %v14242_v56  ;;  %v17475_v56 = vld [vmem:[#allocation194_spill] sm:$0xff]  ;;  %v17476_v5 = vld [vmem:[#allocation187_spill] sm:$0xff] }
 0x483   : > { %4968 = vmatpush.bf16.msra.mxu0 %v17456_v2  ;;  %5062 = vmatpush.bf16.msra.mxu2 %v17465_v22  ;;  %v17470_v22 = vld [vmem:[#allocation179_spill] sm:$0xff] }
 0x484   : > { %5076 = vmatpush.bf16.msra.mxu3 %v17466_v36  ;;  %v17472_v36 = vld [vmem:[#allocation190_spill] sm:$0xff] }
 0x486   : > { %4969 = vmatmul.bf16.vlgmr.msra.gmra.mxu0 %v14109_v57  ;;  %v17471_v57 = vld [vmem:[#allocation189_spill] sm:$0xff] }
 0x487   : > { %5087 = vmatpush.bf16.msrb.mxu0 %v17464_v38  ;;  %5063 = vmatpush.bf16.msra.mxu2 %v17468_v0  ;;  %v4708_v38 = vpop.f32.mrf.mxu0  ;;  %v17473_v0 = vld [vmem:[#allocation183_spill] sm:$0xff] }
 0x488   : > { %5077 = vmatpush.bf16.msra.mxu3 %v17469_v8  ;;  %v17474_v8 = vld [vmem:[#allocation193_spill] sm:$0xff] }
 0x48b   : > { %5088 = vmatpush.bf16.msrb.mxu0 %v17467_v37  ;;  %5064 = vmatpush.bf16.msra.mxu2 %v17471_v57  ;;  %v14344_v37 = vadd.f32 %v4708_v38, %v14249_v9  ;;  %v17480_v57 = vld [vmem:[#allocation202_spill] sm:$0xff]  ;;  %v17482_v38 = vld [vmem:[#allocation205_spill] sm:$0xff] }
 0x48c   : > { %5078 = vmatpush.bf16.msra.mxu3 %v17472_v36  ;;  %v17481_v36 = vld [vmem:[#allocation191_spill] sm:$0xff]  ;;  %v17483_v9 = vld [vmem:[#allocation206_spill] sm:$0xff] }
 0x48f   : > { %5089 = vmatpush.bf16.msrb.mxu0 %v17470_v22  ;;  %5065 = vmatpush.bf16.msra.mxu2 %v17474_v8  ;;  %v17479_v22 = vld [vmem:[#allocation201_spill] sm:$0xff]  ;;  %v17485_v8 = vld [vmem:[#allocation210_spill] sm:$0xff] }
 0x490   : > { %5079 = vmatpush.bf16.msra.mxu3 %v17475_v56  ;;  %v17486_v56 = vld [vmem:[#allocation212_spill] sm:$0xff] }
 0x493   : > { %5090 = vmatpush.bf16.msrb.mxu0 %v17473_v0  ;;  %5066 = vmatpush.bf16.msra.mxu2 %v17477_v43  ;;  %v17484_v0 = vld [vmem:[#allocation195_spill] sm:$0xff] }
 0x494   : > { %5080 = vmatpush.bf16.msra.mxu3 %v17478_v46  ;;  %v17488_v43 = vld [vmem:[#allocation203_spill] sm:$0xff] }
 0x495   : > { %v17489_v46 = vld [vmem:[#allocation215_spill] sm:$0xff] }
 0x497   : > { %5091 = vmatpush.bf16.msrb.mxu0 %v17476_v5  ;;  %5115 = vmatpush.bf16.msrb.mxu2 %v17479_v22  ;;  %v17487_v5 = vld [vmem:[#allocation199_spill] sm:$0xff]  ;;  %v17490_v22 = vld [vmem:[#allocation216_spill] sm:$0xff] }
 0x498   : > { %5129 = vmatpush.bf16.msrb.mxu3 %v17480_v57  ;;  %v17491_v57 = vld [vmem:[#allocation207_spill] sm:$0xff] }
 0x49b   : > { %5092 = vmatpush.bf16.msrb.mxu0 %v17481_v36  ;;  %5116 = vmatpush.bf16.msrb.mxu2 %v17482_v38  ;;  %v17492_v36 = vld [vmem:[#allocation219_spill] sm:$0xff]  ;;  %v17493_v38 = vld [vmem:[#allocation220_spill] sm:$0xff] }
 0x49c   : > { %5130 = vmatpush.bf16.msrb.mxu3 %v17483_v9  ;;  %v17494_v9 = vld [vmem:[#allocation213_spill] sm:$0xff] }
 0x49f   : > { %5093 = vmatpush.bf16.msrb.mxu0 %v17484_v0  ;;  %5117 = vmatpush.bf16.msrb.mxu2 %v17485_v8  ;;  %v17495_v0 = vld [vmem:[#allocation225_spill] sm:$0xff]  ;;  %v17496_v8 = vld [vmem:[#allocation228_spill] sm:$0xff] }
 0x4a0   : > { %5131 = vmatpush.bf16.msrb.mxu3 %v17486_v56  ;;  %v17497_v56 = vld [vmem:[#allocation217_spill] sm:$0xff] }
 0x4a3   : > { %5094 = vmatpush.bf16.msrb.mxu0 %v17487_v5  ;;  %5118 = vmatpush.bf16.msrb.mxu2 %v17489_v46  ;;  %v17498_v5 = vld [vmem:[#allocation231_spill] sm:$0xff]  ;;  %v17500_v46 = vld [vmem:[#allocation221_spill] sm:$0xff] }
 0x4a4   : > { %5132 = vmatpush.bf16.msrb.mxu3 %v17490_v22  ;;  %v17501_v22 = vld [vmem:[#allocation235_spill] sm:$0xff] }
 0x4a7   : > { %5143 = vmatpush.bf16.msra.mxu0 %v17488_v43  ;;  %5119 = vmatpush.bf16.msrb.mxu2 %v17492_v36  ;;  %v17499_v43 = vld [vmem:[#allocation232_spill] sm:$0xff]  ;;  %v17503_v36 = vld [vmem:[#allocation229_spill] sm:$0xff] }
 0x4a8   : > { %5133 = vmatpush.bf16.msrb.mxu3 %v17493_v38  ;;  %v17504_v38 = vld [vmem:[#allocation233_spill] sm:$0xff] }
 0x4ab   : > { %5144 = vmatpush.bf16.msra.mxu0 %v17491_v57  ;;  %5120 = vmatpush.bf16.msrb.mxu2 %v17495_v0  ;;  %v17502_v57 = vld [vmem:[#allocation236_spill] sm:$0xff]  ;;  %v4682_v0 = vpop.f32.mrf.mxu2 }
 0x4ac   : > { %5134 = vmatpush.bf16.msrb.mxu3 %v17496_v8  ;;  %v14379_v8 = vpop.f32.mrf.mxu3 }
 0x4ad   : > { %v4719_v14 = vadd.f32 %v14379_v8, %v4574_v31 }
 0x4af   : > { %5145 = vmatpush.bf16.msra.mxu0 %v17494_v9  ;;  %5121 = vmatpush.bf16.msrb.mxu2 %v17498_v5  ;;  %v17505_v9 = vld [vmem:[#allocation237_spill] sm:$0xff] }
 0x4b0   : > { %5135 = vmatpush.bf16.msrb.mxu3 %v17499_v43 }
 0x4b3   : > { %5146 = vmatpush.bf16.msra.mxu0 %v17497_v56  ;;  %5122 = vmatpush.bf16.msrb.mxu2 %v17501_v22  ;;  %v14381_v56 = vpop.f32.mrf.mxu0  ;;  %v4746_v5 = vpop.f32.mrf.mxu2 }
 0x4b4   : > { %5136 = vmatpush.bf16.msrb.mxu3 %v17502_v57  ;;  %v4760_v2 = vpop.f32.mrf.mxu3  ;;  %v4780_v60 = vadd.f32 %v4746_v5, %v14284_v3  ;;  %v4475_v3 = vadd.f32 %v14203_v21, %v14148_v48 }
 0x4b5   : > { %v4781_v63 = vadd.f32 %v4760_v2, %v14287_v32 }
 0x4b7   : > { %5147 = vmatpush.bf16.msra.mxu0 %v17500_v46 }
 0x4bb   : > { %5148 = vmatpush.bf16.msra.mxu0 %v17503_v36  ;;  %v4774_v43 = vpop.f32.mrf.mxu0  ;;  %v14383_v11 = vpop.f32.mrf.mxu2 }
 0x4bc   : > { %v4762_v46 = vpop.f32.mrf.mxu3  ;;  %v4782_v24 = vadd.f32 %v4774_v43, %v14293_v10  ;;  %v4784_v5 = vadd.f32 %v14383_v11, %v4653_v30 }
 0x4bf   : > { %5149 = vmatpush.bf16.msra.mxu0 %v17504_v38 }
 0x4c3   : > { %5150 = vmatpush.bf16.msra.mxu0 %v17505_v9  ;;  %v14385_v22 = vpop.f32.mrf.mxu0  ;;  %v4811_v57 = vpop.f32.mrf.mxu2 }
 0x4c4   : > { %v4825_v40 = vpop.f32.mrf.mxu3  ;;  %v4845_v2 = vadd.f32 %v4811_v57, %v14335_v7  ;;  %v4720_v57 = vadd.f32 %v14381_v56, %v4588_v19 }
 0x4c5   : > { %v4846_v54 = vadd.f32 %v4825_v40, %v14338_v26  ;;  %v4655_v40 = vadd.f32 %v14329_v18, %v4475_v3 }
 0x4cb   : > { %v4839_v36 = vpop.f32.mrf.mxu0  ;;  %v4813_v62 = vpop.f32.mrf.mxu2 }
 0x4cc   : > { %v4827_v38 = vpop.f32.mrf.mxu3  ;;  %v4847_v10 = vadd.f32 %v4839_v36, %v14344_v37  ;;  %v4786_v37 = vadd.f32 %v14385_v22, %v4655_v40 }
 0x4cd   : > { %v4850_v36 = vadd.f32 %v4827_v38, %v4719_v14 }
 0x4d3   : > { %v14387_v59 = vpop.f32.mrf.mxu0 }
 0x4d9   : > { %v4877_v9 = vpop.f32.mrf.mxu2 }
 0x4da   : > { %v4911_v58 = vadd.f32 %v4877_v9, %v4780_v60  ;;  %v4560_v60 = vadd.f32 %v14269_v4, %v14224_v34  ;;  %v17507_v34 = vld [vmem:[#allocation238_spill] sm:$0xff] }
 0x4dc   : > { %v4891_v6 = vpop.f32.mrf.mxu3  ;;  %v4984_v49 = vadd.f32 %v4911_v58, %v17506_v35  ;;  %v5003_v58 = vadd.f32 %v4979_v47, %v17461_v29 }
 0x4dd   : > { %v4912_v50 = vadd.f32 %v4891_v6, %v4781_v63  ;;  %v4654_v6 = vadd.f32 %v14320_v1, %v4461_v41 }
 0x4de   : > { %v4992_v44 = vmax.f32 %v4984_v49, 0.0 }
 0x4df   : > { %v4985_v4 = vadd.f32 %v4912_v50, %v17507_v34  ;;  %v4785_v25 = vadd.f32 %v4762_v46, %v4654_v6 }
 0x4e1   : > { %v4879_v27 = vpop.f32.mrf.mxu2  ;;  %v4993_v1 = vmax.f32 %v4985_v4, 0.0 }
 0x4e2   : > { %v4915_v16 = vadd.f32 %v4879_v27, %v4784_v5 }
 0x4e3   : > { %v4905_v15 = vpop.f32.mrf.mxu0 }
 0x4e4   : > { %v4893_v55 = vpop.f32.mrf.mxu3  ;;  %v4913_v32 = vadd.f32 %v4905_v15, %v4782_v24  ;;  %v4718_v15 = vadd.f32 %v4682_v0, %v4560_v60  ;;  %v4851_v24 = vadd.f32 %v14387_v59, %v4720_v57  ;;  %v4995_v60 = vmax.f32 %v4987_v23, 0.0 }
 0x4e5   : > { %v4916_v7 = vadd.f32 %v4893_v55, %v4785_v25  ;;  %v4988_v27 = vadd.f32 %v4915_v16, %v17506_v35  ;;  %v17519_v16 = vld [vmem:[#allocation248_spill] sm:$0xff] }
 0x4e6   : > { %v4986_v21 = vadd.f32 %v4913_v32, %v17508_v45  ;;  %v4849_v0 = vadd.f32 %v4813_v62, %v4718_v15  ;;  %v5011_v62 = vmax.f32 %v5003_v58, 0.0 }
 0x4e7   : > { %v4989_v8 = vadd.f32 %v4916_v7, %v17507_v34 }
 0x4e8   : > { %v4994_v12 = vmax.f32 %v4986_v21, 0.0  ;;  %v5019_v6 = vmax.f32 %v4995_v60, %v5011_v62  ;;  %v17527_v62 = vld [vmem:[#allocation256_spill] sm:$0xff]  ;;  %v17532_v60 = vld [vmem:[#allocation257_spill] sm:$0xff] }
 0x4e9   : > { %v4997_v31 = vmax.f32 %v4989_v8, 0.0  ;;  %v17520_v8 = vld [vmem:[#allocation245_spill] sm:$0xff] }
 0x4eb   : > { %v4907_v28 = vpop.f32.mrf.mxu0 }
 0x4ec   : > { %v4917_v41 = vadd.f32 %v4907_v28, %v4786_v37  ;;  %v17513_v37 = vld [vmem:[#allocation242_spill] sm:$0xff] }
 0x4f9   : > { %v4942_v63 = vpop.f32.mrf.mxu2 }
 0x4fa   : > { %v4976_v48 = vadd.f32 %v4942_v63, %v4845_v2 }
 0x4fc   : > { %v4956_v52 = vpop.f32.mrf.mxu3  ;;  %v5000_v42 = vadd.f32 %v4976_v48, %v17506_v35  ;;  %v4996_v48 = vmax.f32 %v4988_v27, 0.0  ;;  %v17533_v27 = vld [vmem:[#allocation262_spill] sm:$0xff] }
 0x4fd   : > { %v4977_v13 = vadd.f32 %v4956_v52, %v4846_v54  ;;  %v4990_v54 = vadd.f32 %v4917_v41, %v17508_v45  ;;  %v17523_v41 = vld [vmem:[#allocation252_spill] sm:$0xff] }
 0x4fe   : > { %v5008_v17 = vmax.f32 %v5000_v42, 0.0 }
 0x4ff   : > { %v5001_v20 = vadd.f32 %v4977_v13, %v17507_v34  ;;  %v4998_v52 = vmax.f32 %v4990_v54, 0.0  ;;  %v17536_v54 = vld [vmem:[#allocation261_spill] sm:$0xff] }
 0x500   : > { %v5016_v43 = vmax.f32 %v4992_v44, %v5008_v17 }
 0x501   : > { %v5009_v18 = vmax.f32 %v5001_v20, 0.0  ;;  %v4944_v55 = vpop.f32.mrf.mxu2 }
 0x502   : > { %v4980_v39 = vadd.f32 %v4944_v55, %v4849_v0  ;;  %v17511_v0 = vld [vmem:[#allocation240_spill] sm:$0xff]  ;;  %v17517_v55 = vld [vmem:[#allocation246_spill] sm:$0xff] }
 0x503   : > { %v4970_v33 = vpop.f32.mrf.mxu0  ;;  %v5017_v46 = vmax.f32 %v4993_v1, %v5009_v18  ;;  %v17509_v18 = vld [vmem:[#allocation222_spill] sm:$0xff] }
 0x504   : > { %v4978_v26 = vadd.f32 %v4970_v33, %v4847_v10  ;;  %v4958_v50 = vpop.f32.mrf.mxu3  ;;  %v5004_v38 = vadd.f32 %v4980_v39, %v17506_v35  ;;  %v17521_v39 = vld [vmem:[#allocation250_spill] sm:$0xff] }
 0x505   : > { %v5023_v56 = vmax.f32 %v14324_v53, %v5017_v46  ;;  %v4981_v11 = vadd.f32 %v4958_v50, %v4850_v36  ;;  %v17514_v36 = vld [vmem:[#allocation211_spill] sm:$0xff]  ;;  %v17515_v46 = vld [vmem:[#allocation244_spill] sm:$0xff] }
 0x506   : > { %v5002_v9 = vadd.f32 %v4978_v26, %v17508_v45  ;;  %v5012_v49 = vmax.f32 %v5004_v38, 0.0  ;;  %v17510_v26 = vld [vmem:[#allocation209_spill] sm:$0xff]  ;;  %v17522_v50 = vld [vmem:[#allocation247_spill] sm:$0xff] }
 0x507   : > { %v5005_v2 = vadd.f32 %v4981_v11, %v17507_v34  ;;  %v17526_v11 = vld [vmem:[#allocation251_spill] sm:$0xff] }
 0x508   : > { %v5010_v3 = vmax.f32 %v5002_v9, 0.0  ;;  %v5020_v13 = vmax.f32 %v4996_v48, %v5012_v49  ;;  %v17516_v9 = vld [vmem:[#allocation241_spill] sm:$0xff]  ;;  %v17530_v38 = vld [vmem:[#allocation255_spill] sm:$0xff]  ;;  %v17544_v48 = vld [vmem:[#allocation272_spill] sm:$0xff] }
 0x509   : > { %v5013_v63 = vmax.f32 %v5005_v2, 0.0  ;;  %v17531_v2 = vld [vmem:[#allocation260_spill] sm:$0xff]  ;;  %v17541_v49 = vld [vmem:[#allocation265_spill] sm:$0xff] }
 0x50a   : > { %v5018_v22 = vmax.f32 %v4994_v12, %v5010_v3  ;;  %v17518_v12 = vld [vmem:[#allocation243_spill] sm:$0xff]  ;;  %v17525_v3 = vld [vmem:[#allocation254_spill] sm:$0xff] }
 0x50b   : > { %v4972_v47 = vpop.f32.mrf.mxu0  ;;  %v5021_v32 = vmax.f32 %v4997_v31, %v5013_v63  ;;  %v17534_v31 = vld [vmem:[#allocation259_spill] sm:$0xff] }
 0x50c   : > { %v5024_v28 = vmax.f32 %v5016_v43, %v5018_v22  ;;  %v4982_v53 = vadd.f32 %v4972_v47, %v4851_v24  ;;  %v17512_v43 = vld [vmem:[#allocation224_spill] sm:$0xff]  ;;  %v17528_v24 = vld [vmem:[#allocation253_spill] sm:$0xff]  ;;  %v17529_v22 = vld [vmem:[#allocation258_spill] sm:$0xff] }
 0x50d   : > { %v5025_v19 = vmax.f32 %v5019_v6, %v5021_v32  ;;  %v17535_v47 = vld [vmem:[#allocation264_spill] sm:$0xff]  ;;  %v17538_v63 = vld [vmem:[#allocation263_spill] sm:$0xff]  ;;  %v17540_v6 = vld [vmem:[#allocation270_spill] sm:$0xff] }
 0x50e   : > { %v5006_v59 = vadd.f32 %v4982_v53, %v17508_v45  ;;  %v17539_v53 = vld [vmem:[#allocation268_spill] sm:$0xff]  ;;  %v17542_v32 = vld [vmem:[#allocation267_spill] sm:$0xff] }
 0x50f   : > { %v14439_v23 = vpack.c.bf16 %v5025_v19, %v5023_v56  ;;  %v17524_v56 = vld [vmem:[#allocation249_spill] sm:$0xff]  ;;  %v17546_v19 = vld [vmem:[#allocation271_spill] sm:$0xff] }
 0x510   : > { %v5014_v4 = vmax.f32 %v5006_v59, 0.0  ;;  %v17543_v59 = vld [vmem:[#allocation269_spill] sm:$0xff] }
 0x511   : > { %v5030_v25 = vshrl.u32 %v14439_v23, 16  ;;  %v5032_v42 = vshll.u32 %v14439_v23, 16 }
 0x512   : > { %v5022_v30 = vmax.f32 %v4998_v52, %v5014_v4  ;;  %v17545_v52 = vld [vmem:[#allocation274_spill] sm:$0xff]  ;;  %v17547_v4 = vld [vmem:[#allocation273_spill] sm:$0xff] }
 0x513   : > { %v5034_v15 = vrot.slane %v5032_v42, 1  ;;  %v5309_v10 = vrot.slane %v5030_v25, 1  ;;  %v5310_v20 = vrot.slane %v5032_v42, 2  ;;  %v17552_v42 = vld [vmem:[#allocation280_spill] sm:$0xff] }
 0x514   : > { %v5026_v40 = vmax.f32 %v5020_v13, %v5022_v30  ;;  %v17548_v13 = vld [vmem:[#allocation276_spill] sm:$0xff]  ;;  %v17549_v30 = vld [vmem:[#allocation278_spill] sm:$0xff] }
 0x515   : > { %v5035_v44 = vor.u32 %v5034_v15, %v5030_v25  ;;  %v14447_v17 = vor.u32 %v5310_v20, %v5309_v10  ;;  %v17551_v25 = vld [vmem:[#allocation277_spill] sm:$0xff]  ;;  %v17553_v15 = vld [vmem:[#allocation282_spill] sm:$0xff]  ;;  %v17554_v10 = vld [vmem:[#allocation279_spill] sm:$0xff] }
 0x516   : > { %v14443_v58 = vpack.c.bf16 %v5026_v40, %v5024_v28  ;;  %v17537_v28 = vld [vmem:[#allocation266_spill] sm:$0xff]  ;;  %v17550_v40 = vld [vmem:[#allocation275_spill] sm:$0xff]  ;;  %v17555_v20 = vld [vmem:[#allocation281_spill] sm:$0xff] }
 0x517   : > { %5053 = vmatmul.bf16.vlgmr.msra.gmra.mxu1 %v5035_v44  ;;  %5081 = vmatmul.bf16.vlgmr.msra.gmra.mxu3 %v5035_v44 }
 0x518   : > { %v5037_v21 = vshrl.u32 %v14443_v58, 16  ;;  %v5039_v7 = vshll.u32 %v14443_v58, 16  ;;  %5157 = vmatpush.bf16.msra.mxu1 %v17509_v18  ;;  %5185 = vmatpush.bf16.msra.mxu3 %v17510_v26  ;;  %v10125_v26 = vld [vmem:[%s15872_s3 + $0x100] sm:$0xff] }
 0x51a   : > { %v5041_v33 = vrot.slane %v5039_v7, 1  ;;  %v5312_v14 = vrot.slane %v5037_v21, 1  ;;  %v5313_v1 = vrot.slane %v5039_v7, 2  ;;  %v17558_v7 = vld [vmem:[#allocation283_spill] sm:$0xff] }
 0x51c   : > { %v5042_v57 = vor.u32 %v5041_v33, %v5037_v21  ;;  %v14451_v5 = vor.u32 %v5313_v1, %v5312_v14  ;;  %5158 = vmatpush.bf16.msra.mxu1 %v17511_v0  ;;  %5186 = vmatpush.bf16.msra.mxu3 %v17513_v37  ;;  %v17557_v21 = vld [vmem:[#allocation286_spill] sm:$0xff]  ;;  %v17559_v33 = vld [vmem:[#allocation285_spill] sm:$0xff]  ;;  %v17560_v14 = vld [vmem:[#allocation288_spill] sm:$0xff] }
 0x51d   : > { %v17561_v1 = vld [vmem:[#allocation290_spill] sm:$0xff] }
 0x51e   : > { %5067 = vmatmul.bf16.vlgmr.msra.gmra.mxu2 %v5042_v57  ;;  %5095 = vmatmul.bf16.vlgmr.msrb.gmra.mxu0 %v5042_v57  ;;  %v10120_v0 = vld [vmem:[%s15872_s3 + $0xd8] sm:$0xff] }
 0x51f   : > { %5171 = vmatpush.bf16.msra.mxu2 %v17512_v43  ;;  %5199 = vmatpush.bf16.msrb.mxu0 %v17514_v36  ;;  %v10130_v36 = vld [vmem:[%s15872_s3 + $0x128] sm:$0xff]  ;;  %v10121_v43 = vld [vmem:[%s15872_s3 + $0xe0] sm:$0xff] }
 0x520   : > { %5159 = vmatpush.bf16.msra.mxu1 %v17515_v46  ;;  %5187 = vmatpush.bf16.msra.mxu3 %v17517_v55  ;;  %v10129_v55 = vld [vmem:[%s15872_s3 + $0x120] sm:$0xff]  ;;  %v9540_v46 = vld [vmem:[%s10523_s29 + $0x49] sm:$0x1f] }
 0x523   : > { %5172 = vmatpush.bf16.msra.mxu2 %v17516_v9  ;;  %5200 = vmatpush.bf16.msrb.mxu0 %v17518_v12 }
 0x524   : > { %5160 = vmatpush.bf16.msra.mxu1 %v17519_v16  ;;  %5188 = vmatpush.bf16.msra.mxu3 %v17521_v39 }
 0x527   : > { %5173 = vmatpush.bf16.msra.mxu2 %v17520_v8  ;;  %5201 = vmatpush.bf16.msrb.mxu0 %v17522_v50  ;;  %v17700_v8 = vld [vmem:[#allocation69_spill] sm:$0xff] }
 0x528   : > { %5109 = vmatmul.bf16.vlgmr.msrb.gmra.mxu1 %v5035_v44  ;;  %5137 = vmatmul.bf16.vlgmr.msrb.gmra.mxu3 %v14439_v23  ;;  %v17556_v44 = vld [vmem:[#allocation284_spill] sm:$0xff] }
 0x529   : > { %5161 = vmatpush.bf16.msra.mxu1 %v17523_v41  ;;  %5189 = vmatpush.bf16.msra.mxu3 %v17525_v3 }
 0x52b   : > { %5174 = vmatpush.bf16.msra.mxu2 %v17524_v56  ;;  %5202 = vmatpush.bf16.msrb.mxu0 %v17526_v11  ;;  %v9536_v11 = vld [vmem:[%s10523_s29 + $0x48] sm:$0x1f] }
 0x52d   : > { %5162 = vmatpush.bf16.msra.mxu1 %v17527_v62  ;;  %5190 = vmatpush.bf16.msra.mxu3 %v17529_v22 }
 0x52e   : > { %5123 = vmatmul.bf16.vlgmr.msrb.gmra.mxu2 %v5042_v57  ;;  %5151 = vmatmul.bf16.vlgmr.msra.gmra.mxu0 %v14443_v58  ;;  %v17562_v57 = vld [vmem:[#allocation287_spill] sm:$0xff] }
 0x52f   : > { %5175 = vmatpush.bf16.msra.mxu2 %v17528_v24  ;;  %5203 = vmatpush.bf16.msrb.mxu0 %v17530_v38  ;;  %v17698_v24 = vld [vmem:[#allocation61_spill] sm:$0xff] }
 0x531   : > { %5163 = vmatpush.bf16.msra.mxu1 %v17531_v2  ;;  %5191 = vmatpush.bf16.msra.mxu3 %v17533_v27  ;;  %v17699_v27 = vld [vmem:[#allocation65_spill] sm:$0xff]  ;;  %v9535_v2 = vld [vmem:[%s10523_s29 + $0x40] sm:$0xff] }
 0x532   : > { %v14711_v62 = vpack.c.bf16 %v9536_v11, %v9535_v2  ;;  %v10124_v2 = vld [vmem:[%s15872_s3 + $0xf8] sm:$0xff] }
 0x533   : > { %5176 = vmatpush.bf16.msra.mxu2 %v17532_v60  ;;  %5204 = vmatpush.bf16.msrb.mxu0 %v17534_v31  ;;  %v17695_v31 = vld [vmem:[#allocation49_spill] sm:$0xff] }
 0x535   : > { %5164 = vmatpush.bf16.msra.mxu1 %v17535_v47  ;;  %5192 = vmatpush.bf16.msra.mxu3 %v17537_v28  ;;  %v17697_v28 = vld [vmem:[#allocation57_spill] sm:$0xff] }
 0x537   : > { %5177 = vmatpush.bf16.msra.mxu2 %v17536_v54  ;;  %5205 = vmatpush.bf16.msrb.mxu0 %v17538_v63  ;;  %v17693_v63 = vld [vmem:[#allocation40_spill] sm:$0xff] }
 0x538   : > { %5165 = vmatmul.bf16.vlgmr.msra.gmra.mxu1 %v14439_v23  ;;  %5193 = vmatmul.bf16.vlgmr.msra.gmra.mxu3 %v14439_v23  ;;  %v17694_v54 = vld [vmem:[#allocation44_spill] sm:$0xff] }
 0x539   : > { %5219 = vmatpush.bf16.msrb.mxu1 %v17539_v53  ;;  %5247 = vmatpush.bf16.msrb.mxu3 %v17540_v6 }
 0x53b   : > { %5178 = vmatpush.bf16.msra.mxu2 %v17541_v49  ;;  %5206 = vmatpush.bf16.msrb.mxu0 %v17542_v32  ;;  %v17678_v49 = vld [vmem:[#allocation406_spill] sm:$0xff] }
 0x53d   : > { %5220 = vmatpush.bf16.msrb.mxu1 %v17544_v48  ;;  %5248 = vmatpush.bf16.msrb.mxu3 %v17545_v52 }
 0x53e   : > { %5179 = vmatmul.bf16.vlgmr.msra.gmra.mxu2 %v14443_v58  ;;  %5207 = vmatmul.bf16.vlgmr.msrb.gmra.mxu0 %v14443_v58 }
 0x53f   : > { %5233 = vmatpush.bf16.msrb.mxu2 %v17543_v59  ;;  %5261 = vmatpush.bf16.msra.mxu0 %v17546_v19  ;;  %v17663_v19 = vld [vmem:[#allocation392_spill] sm:$0xff] }
 0x541   : > { %5221 = vmatpush.bf16.msrb.mxu1 %v17548_v13  ;;  %5249 = vmatpush.bf16.msrb.mxu3 %v17549_v30  ;;  %v17679_v30 = vld [vmem:[#allocation405_spill] sm:$0xff]  ;;  %v17692_v13 = vld [vmem:[#allocation36_spill] sm:$0xff] }
 0x543   : > { %5234 = vmatpush.bf16.msrb.mxu2 %v17547_v4  ;;  %5262 = vmatpush.bf16.msra.mxu0 %v17550_v40  ;;  %v17564_v40 = vld [vmem:[#allocation292_spill] sm:$0xff]  ;;  %v17585_v4 = vld [vmem:[#allocation314_spill] sm:$0xff] }
 0x545   : > { %5222 = vmatpush.bf16.msrb.mxu1 %v17552_v42  ;;  %5250 = vmatpush.bf16.msrb.mxu3 %v17553_v15  ;;  %v17589_v15 = vld [vmem:[#allocation318_spill] sm:$0xff]  ;;  %v17658_v42 = vld [vmem:[#allocation383_spill] sm:$0xff] }
 0x547   : > { %5235 = vmatpush.bf16.msrb.mxu2 %v17551_v25  ;;  %5263 = vmatpush.bf16.msra.mxu0 %v17554_v10  ;;  %v17563_v25 = vld [vmem:[#allocation289_spill] sm:$0xff]  ;;  %v17565_v10 = vld [vmem:[#allocation294_spill] sm:$0xff] }
 0x549   : > { %5223 = vmatpush.bf16.msrb.mxu1 %v17556_v44  ;;  %5251 = vmatpush.bf16.msrb.mxu3 %v17557_v21  ;;  %v17567_v44 = vld [vmem:[#allocation293_spill] sm:$0xff]  ;;  %v17568_v21 = vld [vmem:[#allocation296_spill] sm:$0xff] }
 0x54b   : > { %5236 = vmatpush.bf16.msrb.mxu2 %v17555_v20  ;;  %5264 = vmatpush.bf16.msra.mxu0 %v17558_v7  ;;  %v17566_v20 = vld [vmem:[#allocation291_spill] sm:$0xff]  ;;  %v17569_v7 = vld [vmem:[#allocation298_spill] sm:$0xff] }
 0x54d   : > { %5224 = vmatpush.bf16.msrb.mxu1 %v17560_v14  ;;  %5252 = vmatpush.bf16.msrb.mxu3 %v17561_v1  ;;  %v17571_v14 = vld [vmem:[#allocation300_spill] sm:$0xff]  ;;  %v17572_v1 = vld [vmem:[#allocation302_spill] sm:$0xff] }
 0x54f   : > { %5237 = vmatpush.bf16.msrb.mxu2 %v17559_v33  ;;  %5265 = vmatpush.bf16.msra.mxu0 %v17562_v57  ;;  %v17570_v33 = vld [vmem:[#allocation295_spill] sm:$0xff]  ;;  %v5215_v57 = vrot.slane %v14439_v23, 1 }
 0x551   : > { %5225 = vmatpush.bf16.msrb.mxu1 %v17564_v40  ;;  %5253 = vmatpush.bf16.msrb.mxu3 %v17565_v10  ;;  %v17574_v10 = vld [vmem:[#allocation299_spill] sm:$0xff]  ;;  %v17581_v40 = vld [vmem:[#allocation310_spill] sm:$0xff] }
 0x553   : > { %5238 = vmatpush.bf16.msrb.mxu2 %v17563_v25  ;;  %5266 = vmatpush.bf16.msra.mxu0 %v17566_v20  ;;  %v17573_v25 = vld [vmem:[#allocation297_spill] sm:$0xff]  ;;  %v17575_v20 = vld [vmem:[#allocation304_spill] sm:$0xff] }
 0x555   : > { %5226 = vmatpush.bf16.msrb.mxu1 %v17568_v21  ;;  %5254 = vmatpush.bf16.msrb.mxu3 %v17569_v7  ;;  %v17576_v21 = vld [vmem:[#allocation301_spill] sm:$0xff]  ;;  %v17577_v7 = vld [vmem:[#allocation306_spill] sm:$0xff] }
 0x557   : > { %5239 = vmatpush.bf16.msrb.mxu2 %v17567_v44  ;;  %5267 = vmatpush.bf16.msra.mxu0 %v17570_v33  ;;  %v5216_v44 = vrot.slane %v14443_v58, 1  ;;  %v17578_v33 = vld [vmem:[#allocation303_spill] sm:$0xff] }
 0x558   : > { %5227 = vmatmul.bf16.vlgmr.msrb.gmra.mxu1 %v5215_v57  ;;  %5255 = vmatmul.bf16.vlgmr.msrb.gmra.mxu3 %v5215_v57 }
 0x559   : > { %5275 = vmatpush.bf16.msra.mxu1 %v17571_v14  ;;  %5317 = vmatpush.bf16.msra.mxu3 %v17572_v1  ;;  %v17579_v14 = vld [vmem:[#allocation308_spill] sm:$0xff]  ;;  %v17580_v1 = vld [vmem:[#allocation305_spill] sm:$0xff] }
 0x55b   : > { %5240 = vmatpush.bf16.msrb.mxu2 %v17573_v25  ;;  %5268 = vmatpush.bf16.msra.mxu0 %v17574_v10  ;;  %v17582_v25 = vld [vmem:[#allocation307_spill] sm:$0xff]  ;;  %v17583_v10 = vld [vmem:[#allocation312_spill] sm:$0xff] }
 0x55d   : > { %5276 = vmatpush.bf16.msra.mxu1 %v17575_v20  ;;  %5318 = vmatpush.bf16.msra.mxu3 %v17577_v7  ;;  %v17584_v20 = vld [vmem:[#allocation309_spill] sm:$0xff]  ;;  %v17587_v7 = vld [vmem:[#allocation316_spill] sm:$0xff] }
 0x55e   : > { %5241 = vmatmul.bf16.vlgmr.msrb.gmra.mxu2 %v5216_v44  ;;  %5269 = vmatmul.bf16.vlgmr.msra.gmra.mxu0 %v5216_v44 }
 0x55f   : > { %5289 = vmatpush.bf16.msra.mxu2 %v17576_v21  ;;  %5331 = vmatpush.bf16.msrb.mxu0 %v17578_v33  ;;  %v17586_v21 = vld [vmem:[#allocation311_spill] sm:$0xff]  ;;  %v17588_v33 = vld [vmem:[#allocation313_spill] sm:$0xff] }
 0x561   : > { %5277 = vmatpush.bf16.msra.mxu1 %v17579_v14  ;;  %5319 = vmatpush.bf16.msra.mxu3 %v17581_v40  ;;  %v17590_v14 = vld [vmem:[#allocation315_spill] sm:$0xff]  ;;  %v17592_v40 = vld [vmem:[#allocation317_spill] sm:$0xff] }
 0x563   : > { %5290 = vmatpush.bf16.msra.mxu2 %v17580_v1  ;;  %5332 = vmatpush.bf16.msrb.mxu0 %v17582_v25  ;;  %v17591_v1 = vld [vmem:[#allocation320_spill] sm:$0xff]  ;;  %v17593_v25 = vld [vmem:[#allocation322_spill] sm:$0xff] }
 0x565   : > { %5278 = vmatpush.bf16.msra.mxu1 %v17583_v10  ;;  %5320 = vmatpush.bf16.msra.mxu3 %v17585_v4  ;;  %v17594_v10 = vld [vmem:[#allocation319_spill] sm:$0xff]  ;;  %v17596_v4 = vld [vmem:[#allocation321_spill] sm:$0xff] }
 0x567   : > { %5291 = vmatpush.bf16.msra.mxu2 %v17584_v20  ;;  %5333 = vmatpush.bf16.msrb.mxu0 %v17586_v21  ;;  %v17595_v20 = vld [vmem:[#allocation324_spill] sm:$0xff]  ;;  %v17597_v21 = vld [vmem:[#allocation326_spill] sm:$0xff] }
 0x569   : > { %5279 = vmatpush.bf16.msra.mxu1 %v17587_v7  ;;  %5321 = vmatpush.bf16.msra.mxu3 %v17589_v15  ;;  %v17598_v7 = vld [vmem:[#allocation323_spill] sm:$0xff]  ;;  %v17600_v15 = vld [vmem:[#allocation325_spill] sm:$0xff] }
 0x56b   : > { %5292 = vmatpush.bf16.msra.mxu2 %v17588_v33  ;;  %5334 = vmatpush.bf16.msrb.mxu0 %v17590_v14  ;;  %v17599_v33 = vld [vmem:[#allocation328_spill] sm:$0xff]  ;;  %v17601_v14 = vld [vmem:[#allocation330_spill] sm:$0xff] }
 0x56d   : > { %5280 = vmatpush.bf16.msra.mxu1 %v17591_v1  ;;  %5322 = vmatpush.bf16.msra.mxu3 %v17593_v25  ;;  %v17602_v1 = vld [vmem:[#allocation327_spill] sm:$0xff]  ;;  %v17604_v25 = vld [vmem:[#allocation334_spill] sm:$0xff] }
 0x56f   : > { %5293 = vmatpush.bf16.msra.mxu2 %v17592_v40  ;;  %5335 = vmatpush.bf16.msrb.mxu0 %v17594_v10  ;;  %v17603_v40 = vld [vmem:[#allocation332_spill] sm:$0xff]  ;;  %v17606_v10 = vld [vmem:[#allocation331_spill] sm:$0xff] }
 0x571   : > { %5281 = vmatpush.bf16.msra.mxu1 %v17595_v20  ;;  %5323 = vmatpush.bf16.msra.mxu3 %v17597_v21  ;;  %v17651_v21 = vld [vmem:[#allocation380_spill] sm:$0xff]  ;;  %v17653_v20 = vld [vmem:[#allocation382_spill] sm:$0xff] }
 0x573   : > { %5294 = vmatpush.bf16.msra.mxu2 %v17596_v4  ;;  %5336 = vmatpush.bf16.msrb.mxu0 %v17598_v7  ;;  %v17605_v4 = vld [vmem:[#allocation329_spill] sm:$0xff]  ;;  %v17607_v7 = vld [vmem:[#allocation336_spill] sm:$0xff] }
 0x575   : > { %5282 = vmatpush.bf16.msra.mxu1 %v17599_v33  ;;  %5324 = vmatpush.bf16.msra.mxu3 %v17601_v14  ;;  %v17608_v33 = vld [vmem:[#allocation333_spill] sm:$0xff]  ;;  %v17610_v14 = vld [vmem:[#allocation335_spill] sm:$0xff] }
 0x577   : > { %5295 = vmatpush.bf16.msra.mxu2 %v17600_v15  ;;  %5337 = vmatpush.bf16.msrb.mxu0 %v17602_v1  ;;  %v17609_v15 = vld [vmem:[#allocation338_spill] sm:$0xff]  ;;  %v17611_v1 = vld [vmem:[#allocation340_spill] sm:$0xff] }
 0x578   : > { %5283 = vmatmul.bf16.vlgmr.msra.gmra.mxu1 %v5215_v57  ;;  %5325 = vmatmul.bf16.vlgmr.msra.gmra.mxu3 %v14447_v17  ;;  %v17612_v57 = vld [vmem:[#allocation337_spill] sm:$0xff] }
 0x579   : > { %5345 = vmatpush.bf16.msrb.mxu1 %v17603_v40  ;;  %5373 = vmatpush.bf16.msrb.mxu3 %v17604_v25  ;;  %v17613_v25 = vld [vmem:[#allocation342_spill] sm:$0xff] }
 0x57a   : > { %v17621_v40 = vld [vmem:[#allocation350_spill] sm:$0xff] }
 0x57b   : > { %5296 = vmatpush.bf16.msra.mxu2 %v17605_v4  ;;  %5338 = vmatpush.bf16.msrb.mxu0 %v17606_v10  ;;  %v17614_v4 = vld [vmem:[#allocation339_spill] sm:$0xff]  ;;  %v17615_v10 = vld [vmem:[#allocation344_spill] sm:$0xff] }
 0x57d   : > { %5346 = vmatpush.bf16.msrb.mxu1 %v17607_v7  ;;  %5374 = vmatpush.bf16.msrb.mxu3 %v17609_v15  ;;  %v17616_v7 = vld [vmem:[#allocation341_spill] sm:$0xff]  ;;  %v17618_v15 = vld [vmem:[#allocation343_spill] sm:$0xff] }
 0x57e   : > { %5297 = vmatmul.bf16.vlgmr.msra.gmra.mxu2 %v5216_v44  ;;  %5339 = vmatmul.bf16.vlgmr.msrb.gmra.mxu0 %v14451_v5  ;;  %v17620_v44 = vld [vmem:[#allocation345_spill] sm:$0xff] }
 0x57f   : > { %5359 = vmatpush.bf16.msrb.mxu2 %v17608_v33  ;;  %5387 = vmatpush.bf16.msra.mxu0 %v17610_v14  ;;  %v17617_v33 = vld [vmem:[#allocation346_spill] sm:$0xff]  ;;  %v17619_v14 = vld [vmem:[#allocation348_spill] sm:$0xff] }
 0x581   : > { %5347 = vmatpush.bf16.msrb.mxu1 %v17611_v1  ;;  %5375 = vmatpush.bf16.msrb.mxu3 %v17613_v25  ;;  %v17622_v1 = vld [vmem:[#allocation347_spill] sm:$0xff]  ;;  %v17624_v25 = vld [vmem:[#allocation349_spill] sm:$0xff] }
 0x583   : > { %5360 = vmatpush.bf16.msrb.mxu2 %v17612_v57  ;;  %5388 = vmatpush.bf16.msra.mxu0 %v17614_v4  ;;  %v17623_v57 = vld [vmem:[#allocation352_spill] sm:$0xff]  ;;  %v17625_v4 = vld [vmem:[#allocation354_spill] sm:$0xff] }
 0x585   : > { %5348 = vmatpush.bf16.msrb.mxu1 %v17615_v10  ;;  %5376 = vmatpush.bf16.msrb.mxu3 %v17617_v33  ;;  %v17626_v10 = vld [vmem:[#allocation351_spill] sm:$0xff]  ;;  %v17628_v33 = vld [vmem:[#allocation353_spill] sm:$0xff] }
 0x587   : > { %5361 = vmatpush.bf16.msrb.mxu2 %v17616_v7  ;;  %5389 = vmatpush.bf16.msra.mxu0 %v17618_v15  ;;  %v17627_v7 = vld [vmem:[#allocation356_spill] sm:$0xff]  ;;  %v17629_v15 = vld [vmem:[#allocation358_spill] sm:$0xff] }
 0x589   : > { %5349 = vmatpush.bf16.msrb.mxu1 %v17619_v14  ;;  %5377 = vmatpush.bf16.msrb.mxu3 %v17621_v40  ;;  %v17630_v14 = vld [vmem:[#allocation355_spill] sm:$0xff]  ;;  %v17632_v40 = vld [vmem:[#allocation357_spill] sm:$0xff] }
 0x58b   : > { %5362 = vmatpush.bf16.msrb.mxu2 %v17620_v44  ;;  %5390 = vmatpush.bf16.msra.mxu0 %v17622_v1  ;;  %v17631_v44 = vld [vmem:[#allocation360_spill] sm:$0xff]  ;;  %v17633_v1 = vld [vmem:[#allocation362_spill] sm:$0xff] }
 0x58d   : > { %5350 = vmatpush.bf16.msrb.mxu1 %v17623_v57  ;;  %5378 = vmatpush.bf16.msrb.mxu3 %v17625_v4  ;;  %v17634_v57 = vld [vmem:[#allocation359_spill] sm:$0xff]  ;;  %v17636_v4 = vld [vmem:[#allocation366_spill] sm:$0xff] }
 0x58f   : > { %5363 = vmatpush.bf16.msrb.mxu2 %v17624_v25  ;;  %5391 = vmatpush.bf16.msra.mxu0 %v17626_v10  ;;  %v17635_v25 = vld [vmem:[#allocation364_spill] sm:$0xff]  ;;  %v17638_v10 = vld [vmem:[#allocation363_spill] sm:$0xff] }
 0x591   : > { %5351 = vmatpush.bf16.msrb.mxu1 %v17627_v7  ;;  %5379 = vmatpush.bf16.msrb.mxu3 %v17629_v15  ;;  %v17648_v15 = vld [vmem:[#allocation373_spill] sm:$0xff] }
 0x593   : > { %5364 = vmatpush.bf16.msrb.mxu2 %v17628_v33  ;;  %5392 = vmatpush.bf16.msra.mxu0 %v17630_v14  ;;  %v17637_v33 = vld [vmem:[#allocation361_spill] sm:$0xff]  ;;  %v17639_v14 = vld [vmem:[#allocation368_spill] sm:$0xff] }
 0x595   : > { %5352 = vmatpush.bf16.msrb.mxu1 %v17631_v44  ;;  %5380 = vmatpush.bf16.msrb.mxu3 %v17633_v1  ;;  %v17640_v44 = vld [vmem:[#allocation365_spill] sm:$0xff]  ;;  %v5054_v1 = vpop.f32.mrf.mxu1 }
 0x597   : > { %5365 = vmatpush.bf16.msrb.mxu2 %v17632_v40  ;;  %5393 = vmatpush.bf16.msra.mxu0 %v17634_v57  ;;  %v17641_v40 = vld [vmem:[#allocation370_spill] sm:$0xff]  ;;  %v17642_v57 = vld [vmem:[#allocation367_spill] sm:$0xff] }
 0x598   : > { %5353 = vmatmul.bf16.vlgmr.msrb.gmra.mxu1 %v14447_v17  ;;  %5381 = vmatmul.bf16.vlgmr.msrb.gmra.mxu3 %v14447_v17  ;;  %v17644_v17 = vld [vmem:[#allocation369_spill] sm:$0xff] }
 0x599   : > { %5411 = vmatpush.bf16.msra.mxu1 %v17635_v25  ;;  %5439 = vmatpush.bf16.msra.mxu3 %v17636_v4  ;;  %v17643_v4 = vld [vmem:[#allocation372_spill] sm:$0xff]  ;;  %v17646_v25 = vld [vmem:[#allocation371_spill] sm:$0xff] }
 0x59b   : > { %5366 = vmatpush.bf16.msrb.mxu2 %v17637_v33  ;;  %5394 = vmatpush.bf16.msra.mxu0 %v17638_v10  ;;  %v17645_v33 = vld [vmem:[#allocation374_spill] sm:$0xff]  ;;  %v5096_v10 = vpop.f32.mrf.mxu0 }
 0x59d   : > { %5412 = vmatpush.bf16.msra.mxu1 %v17639_v14  ;;  %5440 = vmatpush.bf16.msra.mxu3 %v17641_v40  ;;  %v5082_v14 = vpop.f32.mrf.mxu3  ;;  %v14606_v7 = vpop.f32.mrf.mxu1 }
 0x59e   : > { %5367 = vmatmul.bf16.vlgmr.msrb.gmra.mxu2 %v14451_v5  ;;  %5395 = vmatmul.bf16.vlgmr.msra.gmra.mxu0 %v14451_v5  ;;  %v5097_v40 = vadd.f32 %v5096_v10, %v5082_v14  ;;  %v17650_v5 = vld [vmem:[#allocation375_spill] sm:$0xff]  ;;  %v17655_v14 = vld [vmem:[#allocation384_spill] sm:$0xff] }
 0x59f   : > { %5425 = vmatpush.bf16.msra.mxu2 %v17640_v44  ;;  %5453 = vmatpush.bf16.msrb.mxu0 %v17642_v57  ;;  %v17647_v44 = vld [vmem:[#allocation376_spill] sm:$0xff]  ;;  %v17649_v57 = vld [vmem:[#allocation378_spill] sm:$0xff] }
 0x5a1   : > { %5413 = vmatpush.bf16.msra.mxu1 %v17643_v4  ;;  %5441 = vmatpush.bf16.msra.mxu3 %v17645_v33  ;;  %v5068_v4 = vpop.f32.mrf.mxu2  ;;  %v17652_v33 = vld [vmem:[#allocation377_spill] sm:$0xff] }
 0x5a3   : > { %5426 = vmatpush.bf16.msra.mxu2 %v17644_v17  ;;  %5454 = vmatpush.bf16.msrb.mxu0 %v17646_v25  ;;  %v5069_v17 = vadd.f32 %v5068_v4, %v5054_v1  ;;  %v17654_v25 = vld [vmem:[#allocation379_spill] sm:$0xff]  ;;  %v17659_v1 = vld [vmem:[#allocation388_spill] sm:$0xff] }
 0x5a5   : > { %5414 = vmatpush.bf16.msra.mxu1 %v17647_v44  ;;  %5442 = vmatpush.bf16.msra.mxu3 %v17649_v57  ;;  %v14613_v44 = vpop.f32.mrf.mxu0  ;;  %v14615_v10 = vpop.f32.mrf.mxu3  ;;  %v17657_v57 = vld [vmem:[#allocation386_spill] sm:$0xff] }
 0x5a7   : > { %5427 = vmatpush.bf16.msra.mxu2 %v17648_v15  ;;  %5455 = vmatpush.bf16.msrb.mxu0 %v17650_v5  ;;  %v17656_v15 = vld [vmem:[#allocation381_spill] sm:$0xff]  ;;  %v5110_v5 = vpop.f32.mrf.mxu1 }
 0x5a9   : > { %5415 = vmatpush.bf16.msra.mxu1 %v17651_v21  ;;  %5443 = vmatpush.bf16.msra.mxu3 %v17653_v20  ;;  %v14621_v4 = vpop.f32.mrf.mxu2  ;;  %v17662_v20 = vld [vmem:[#allocation387_spill] sm:$0xff] }
 0x5ab   : > { %5428 = vmatpush.bf16.msra.mxu2 %v17652_v33  ;;  %5456 = vmatpush.bf16.msrb.mxu0 %v17654_v25  ;;  %v17660_v33 = vld [vmem:[#allocation385_spill] sm:$0xff]  ;;  %v17661_v25 = vld [vmem:[#allocation390_spill] sm:$0xff] }
 0x5ad   : > { %5416 = vmatpush.bf16.msra.mxu1 %v17655_v14  ;;  %5444 = vmatpush.bf16.msra.mxu3 %v17657_v57  ;;  %v5138_v21 = vpop.f32.mrf.mxu3  ;;  %v17665_v57 = vld [vmem:[#allocation394_spill] sm:$0xff]  ;;  %v5152_v59 = vpop.f32.mrf.mxu0 }
 0x5ae   : > { %v5139_v14 = vadd.f32 %v5138_v21, %v5069_v17  ;;  %v17668_v21 = vld [vmem:[#allocation393_spill] sm:$0xff]  ;;  %v17669_v17 = vld [vmem:[#allocation395_spill] sm:$0xff] }
 0x5af   : > { %5429 = vmatpush.bf16.msra.mxu2 %v17656_v15  ;;  %5457 = vmatpush.bf16.msrb.mxu0 %v17658_v42  ;;  %v17664_v15 = vld [vmem:[#allocation389_spill] sm:$0xff]  ;;  %v5407_v42 = vrot.slane %v14439_v23, 2  ;;  %v14631_v32 = vpop.f32.mrf.mxu1  ;;  %v5408_v23 = vrot.slane %v14443_v58, 2 }
 0x5b1   : > { %5417 = vmatpush.bf16.msra.mxu1 %v17659_v1  ;;  %5445 = vmatpush.bf16.msra.mxu3 %v17661_v25  ;;  %v17666_v1 = vld [vmem:[#allocation391_spill] sm:$0xff]  ;;  %v14635_v25 = vadd.f32 %v5152_v59, %v5139_v14  ;;  %v17672_v59 = vld [vmem:[#allocation400_spill] sm:$0xff] }
 0x5b3   : > { %5430 = vmatpush.bf16.msra.mxu2 %v17660_v33  ;;  %5458 = vmatpush.bf16.msrb.mxu0 %v17662_v20  ;;  %v17667_v33 = vld [vmem:[#allocation396_spill] sm:$0xff]  ;;  %v5124_v20 = vpop.f32.mrf.mxu2 }
 0x5b5   : > { %5418 = vmatpush.bf16.msra.mxu1 %v17663_v19  ;;  %5446 = vmatpush.bf16.msra.mxu3 %v17665_v57  ;;  %v14637_v19 = vadd.f32 %v5124_v20, %v5110_v5  ;;  %v17671_v57 = vld [vmem:[#allocation397_spill] sm:$0xff]  ;;  %v17674_v5 = vld [vmem:[#allocation402_spill] sm:$0xff] }
 0x5b7   : > { %5431 = vmatpush.bf16.msra.mxu2 %v17664_v15  ;;  %5459 = vmatpush.bf16.msrb.mxu0 %v17666_v1  ;;  %v17670_v15 = vld [vmem:[#allocation398_spill] sm:$0xff]  ;;  %v5166_v1 = vpop.f32.mrf.mxu1 }
 0x5b8   : > { %5419 = vmatmul.bf16.vlgmr.msra.gmra.mxu1 %v5407_v42  ;;  %5447 = vmatmul.bf16.vlgmr.msra.gmra.mxu3 %v5407_v42  ;;  %v5167_v14 = vadd.f32 %v5166_v1, %v5097_v40  ;;  %v17680_v40 = vld [vmem:[#allocation408_spill] sm:$0xff]  ;;  %v17681_v1 = vld [vmem:[#allocation407_spill] sm:$0xff] }
 0x5b9   : > { %5467 = vmatpush.bf16.msrb.mxu1 %v17667_v33  ;;  %v17673_v33 = vld [vmem:[#allocation399_spill] sm:$0xff]  ;;  %5602 = vmatpush.bf16.msrb.mxu3 %v10124_v2 }
 0x5bb   : > { %5432 = vmatpush.bf16.msra.mxu2 %v17668_v21  ;;  %5460 = vmatpush.bf16.msrb.mxu0 %v17669_v17  ;;  %v14646_v20 = vpop.f32.mrf.mxu2  ;;  %v17675_v21 = vld [vmem:[#allocation401_spill] sm:$0xff]  ;;  %v17676_v17 = vld [vmem:[#allocation404_spill] sm:$0xff] }
 0x5bd   : > { %5468 = vmatpush.bf16.msrb.mxu1 %v17670_v15  ;;  %v17677_v15 = vld [vmem:[#allocation403_spill] sm:$0xff] }
 0x5be   : > { %5433 = vmatmul.bf16.vlgmr.msra.gmra.mxu2 %v5408_v23  ;;  %5461 = vmatmul.bf16.vlgmr.msrb.gmra.mxu0 %v5408_v23 }
 0x5bf   : > { %5481 = vmatpush.bf16.msrb.mxu2 %v17671_v57  ;;  %v14689_v60 = vpop.f32.mrf.mxu1 }
 0x5c1   : > { %5469 = vmatpush.bf16.msrb.mxu1 %v17672_v59 }
 0x5c3   : > { %5482 = vmatpush.bf16.msrb.mxu2 %v17673_v33  ;;  %v5180_v58 = vpop.f32.mrf.mxu2  ;;  %v17682_v33 = vld [vmem:[#allocation410_spill] sm:$0xff] }
 0x5c4   : > { %v14652_v57 = vadd.f32 %v5180_v58, %v5167_v14  ;;  %v17686_v14 = vld [vmem:[#allocation12_spill] sm:$0xff] }
 0x5c5   : > { %5470 = vmatpush.bf16.msrb.mxu1 %v17674_v5  ;;  %v17687_v58 = vld [vmem:[#allocation16_spill] sm:$0xff] }
 0x5c7   : > { %5483 = vmatpush.bf16.msrb.mxu2 %v17675_v21  ;;  %v17683_v21 = vld [vmem:[#allocation409_spill] sm:$0xff] }
 0x5c9   : > { %5471 = vmatpush.bf16.msrb.mxu1 %v17676_v17  ;;  %v17684_v17 = vld [vmem:[#allocation411_spill] sm:$0xff] }
 0x5cb   : > { %5484 = vmatpush.bf16.msrb.mxu2 %v17677_v15  ;;  %v17685_v15 = vld [vmem:[#allocation8_spill] sm:$0xff] }
 0x5cd   : > { %5472 = vmatpush.bf16.msrb.mxu1 %v17678_v49  ;;  %v14668_v49 = vpop.f32.mrf.mxu3 }
 0x5cf   : > { %5485 = vmatpush.bf16.msrb.mxu2 %v17679_v30  ;;  %v17688_v30 = vld [vmem:[#allocation20_spill] sm:$0xff] }
 0x5d1   : > { %5473 = vmatpush.bf16.msrb.mxu1 %v17680_v40  ;;  %v14665_v40 = vpop.f32.mrf.mxu0 }
 0x5d3   : > { %5486 = vmatpush.bf16.msrb.mxu2 %v17681_v1  ;;  %v17689_v1 = vld [vmem:[#allocation24_spill] sm:$0xff] }
 0x5d5   : > { %5474 = vmatpush.bf16.msrb.mxu1 %v17682_v33  ;;  %v17690_v33 = vld [vmem:[#allocation28_spill] sm:$0xff]  ;;  %v14699_v47 = vpop.f32.mrf.mxu1 }
 0x5d7   : > { %5487 = vmatpush.bf16.msrb.mxu2 %v17683_v21  ;;  %v9538_v21 = vld [vmem:[%s10523_s29 + $0x58] sm:$0x1f] }
 0x5d8   : > { %5475 = vmatmul.bf16.vlgmr.msrb.gmra.mxu1 %v5407_v42  ;;  %v17691_v42 = vld [vmem:[#allocation32_spill] sm:$0xff] }
 0x5d9   : > { %v14674_v5 = vpop.f32.mrf.mxu0 }
 0x5db   : > { %5488 = vmatpush.bf16.msrb.mxu2 %v17684_v17  ;;  %v9537_v17 = vld [vmem:[%s10523_s29 + $0x50] sm:$0xff] }
 0x5dc   : > { %v14678_v59 = vpack.c.bf16 %v9538_v21, %v9537_v17  ;;  %v14691_v21 = vpop.f32.mrf.mxu2  ;;  %v17696_v17 = vld [vmem:[#allocation53_spill] sm:$0xff] }
 0x5dd   : > { %v14713_v50 = vpop.f32.mrf.mxu1 }
 0x5de   : > { %5489 = vmatmul.bf16.vlgmr.msrb.gmra.mxu2 %v5408_v23  ;;  %v14676_v23 = vpop.f32.mrf.mxu3 }
 0x5df   : > { %5838 = vmatpush.bf16.msra.mxu2 %v17685_v15 }
 0x5e1   : > { %v14684_v52 = vpop.f32.mrf.mxu0 }
 0x5e3   : > { %5839 = vmatpush.bf16.msra.mxu2 %v17686_v14 }
 0x5e4   : > { %v14701_v38 = vpop.f32.mrf.mxu2 }
 0x5e6   : > { %v14686_v48 = vpop.f32.mrf.mxu3 }
 0x5e7   : > { %5840 = vmatpush.bf16.msra.mxu2 %v17687_v58 }
 0x5e9   : > { %v14694_v6 = vpop.f32.mrf.mxu0 }
 0x5eb   : > { %5841 = vmatpush.bf16.msra.mxu2 %v17688_v30 }
 0x5ec   : > { %v14717_v3 = vpop.f32.mrf.mxu2 }
 0x5ee   : > { %v14696_v53 = vpop.f32.mrf.mxu3 }
 0x5ef   : > { %5842 = vmatpush.bf16.msra.mxu2 %v17689_v1 }
 0x5f1   : > { %v14707_v56 = vpop.f32.mrf.mxu0 }
 0x5f3   : > { %5843 = vmatpush.bf16.msra.mxu2 %v17690_v33 }
 0x5f5   : > { %v14725_v9 = vpop.f32.mrf.mxu1 }
 0x5f6   : > { %v14709_v22 = vpop.f32.mrf.mxu3 }
 0x5f7   : > { %5844 = vmatpush.bf16.msra.mxu2 %v17691_v42 }
 0x5fb   : > { %5845 = vmatpush.bf16.msra.mxu2 %v17692_v13  ;;  %v14720_v41 = vpop.f32.mrf.mxu0 }
 0x5fd   : > { %v14748_v2 = vpop.f32.mrf.mxu1 }
 0x5fe   : > { %5846 = vmatmul.bf16.vlgmr.msra.gmra.mxu2 %v14678_v59  ;;  %v14723_v12 = vpop.f32.mrf.mxu3 }
 0x5ff   : > { %5894 = vmatpush.bf16.msrb.mxu2 %v17693_v63 }
 0x601   : > { %v14728_v11 = vpop.f32.mrf.mxu2 }
 0x603   : > { %5895 = vmatpush.bf16.msrb.mxu2 %v17694_v54  ;;  %v14743_v39 = vpop.f32.mrf.mxu0 }
 0x606   : > { %v14745_v16 = vpop.f32.mrf.mxu3 }
 0x607   : > { %5896 = vmatpush.bf16.msrb.mxu2 %v17695_v31 }
 0x60b   : > { %5897 = vmatpush.bf16.msrb.mxu2 %v17696_v17 }
 0x60f   : > { %5898 = vmatpush.bf16.msrb.mxu2 %v17697_v28 }
 0x613   : > { %5899 = vmatpush.bf16.msrb.mxu2 %v17698_v24 }
 0x617   : > { %5900 = vmatpush.bf16.msrb.mxu2 %v17699_v27 }
 0x61b   : > { %5901 = vmatpush.bf16.msrb.mxu2 %v17700_v8 }
 0x61e   : > { %5902 = vmatmul.bf16.vlgmr.msrb.gmra.mxu2 %v14711_v62 }
 0x61f   : > { %5951 = vmatpush.bf16.msra.mxu2 %v17685_v15  ;;  %v10132_v15 = vld [vmem:[%s15872_s3 + $0x138] sm:$0xff] }
 0x620   : > { %5705 = vmatpush.bf16.msra.mxu0 %v10132_v15  ;;  %v14750_v15 = vpop.f32.mrf.mxu2 }
 0x623   : > { %5952 = vmatpush.bf16.msra.mxu2 %v17686_v14  ;;  %v10123_v14 = vld [vmem:[%s15872_s3 + $0xf0] sm:$0xff] }
 0x624   : > { %5603 = vmatpush.bf16.msrb.mxu3 %v10123_v14  ;;  %v14762_v14 = vpop.f32.mrf.mxu0 }
 0x627   : > { %5953 = vmatpush.bf16.msra.mxu2 %v17687_v58  ;;  %v10131_v58 = vld [vmem:[%s15872_s3 + $0x130] sm:$0xff] }
 0x628   : > { %5706 = vmatpush.bf16.msra.mxu0 %v10131_v58  ;;  %v14764_v58 = vpop.f32.mrf.mxu3 }
 0x62b   : > { %5954 = vmatpush.bf16.msra.mxu2 %v17688_v30  ;;  %v10122_v30 = vld [vmem:[%s15872_s3 + $0xe8] sm:$0xff] }
 0x62c   : > { %5604 = vmatpush.bf16.msrb.mxu3 %v10122_v30  ;;  %5707 = vmatpush.bf16.msra.mxu0 %v10130_v36  ;;  %v5354_v36 = vpop.f32.mrf.mxu1  ;;  %v9539_v30 = vld [vmem:[%s10523_s29 + $0x41] sm:$0xff] }
 0x62d   : > { %v14778_v37 = vpack.c.bf16 %v9540_v46, %v9539_v30  ;;  %v10119_v46 = vld [vmem:[%s15872_s3 + $0xd0] sm:$0xff]  ;;  %v10118_v30 = vld [vmem:[%s15872_s3 + $0xc8] sm:$0xff] }
 0x62f   : > { %5955 = vmatpush.bf16.msra.mxu2 %v17689_v1  ;;  %v10140_v1 = vld [vmem:[%s15872_s3 + $0x178] sm:$0xff] }
 0x630   : > { %5814 = vmatpush.bf16.msra.mxu1 %v10140_v1  ;;  %5605 = vmatpush.bf16.msrb.mxu3 %v10121_v43  ;;  %v5368_v1 = vpop.f32.mrf.mxu2  ;;  %v10138_v43 = vld [vmem:[%s15872_s3 + $0x168] sm:$0xff] }
 0x631   : > { %5708 = vmatpush.bf16.msra.mxu0 %v10129_v55  ;;  %v10127_v55 = vld [vmem:[%s15872_s3 + $0x110] sm:$0xff] }
 0x633   : > { %5956 = vmatpush.bf16.msra.mxu2 %v17690_v33  ;;  %v10139_v33 = vld [vmem:[%s15872_s3 + $0x170] sm:$0xff] }
 0x634   : > { %5815 = vmatpush.bf16.msra.mxu1 %v10139_v33  ;;  %5606 = vmatpush.bf16.msrb.mxu3 %v10120_v0  ;;  %v10137_v0 = vld [vmem:[%s15872_s3 + $0x160] sm:$0xff]  ;;  %v5356_v33 = vpop.f32.mrf.mxu1 }
 0x637   : > { %5957 = vmatpush.bf16.msra.mxu2 %v17691_v42  ;;  %v10128_v42 = vld [vmem:[%s15872_s3 + $0x118] sm:$0xff] }
 0x638   : > { %5709 = vmatpush.bf16.msra.mxu0 %v10128_v42  ;;  %5816 = vmatpush.bf16.msra.mxu1 %v10138_v43  ;;  %v10126_v42 = vld [vmem:[%s15872_s3 + $0x108] sm:$0xff]  ;;  %v5271_v43 = vadd.f32 %v14694_v6, %v14696_v53 }
 0x639   : > { %5607 = vmatpush.bf16.msrb.mxu3 %v10119_v46  ;;  %v10136_v46 = vld [vmem:[%s15872_s3 + $0x158] sm:$0xff] }
 0x63a   : > { %v5304_v53 = vadd.f32 %v5271_v43, %v14652_v57 }
 0x63b   : > { %5958 = vmatpush.bf16.msra.mxu2 %v17692_v13  ;;  %v14798_v13 = vpop.f32.mrf.mxu0 }
 0x63c   : > { %5710 = vmatpush.bf16.msra.mxu0 %v10127_v55  ;;  %5817 = vmatpush.bf16.msra.mxu1 %v10137_v0  ;;  %v5369_v55 = vadd.f32 %v5368_v1, %v5354_v36  ;;  %v10117_v0 = vld [vmem:[%s15872_s3 + $0xc0] sm:$0xff]  ;;  %v10135_v36 = vld [vmem:[%s15872_s3 + $0x150] sm:$0xff]  ;;  %v5341_v1 = vadd.f32 %v14720_v41, %v14723_v12  ;;  %v5420_v57 = vpop.f32.mrf.mxu1 }
 0x63d   : > { %5608 = vmatpush.bf16.msrb.mxu3 %v10118_v30 }
 0x63e   : > { %5959 = vmatmul.bf16.vlgmr.msra.gmra.mxu2 %v14778_v37 }
 0x63f   : > { %6007 = vmatpush.bf16.msrb.mxu2 %v17693_v63  ;;  %v14800_v63 = vpop.f32.mrf.mxu3 }
 0x640   : > { %5711 = vmatpush.bf16.msra.mxu0 %v10126_v42  ;;  %5818 = vmatpush.bf16.msra.mxu1 %v10136_v46  ;;  %v5402_v42 = vadd.f32 %v5369_v55, %v5304_v53 }
 0x641   : > { %5609 = vmatpush.bf16.msrb.mxu3 %v10117_v0 }
 0x643   : > { %6008 = vmatpush.bf16.msrb.mxu2 %v17694_v54  ;;  %v5370_v54 = vpop.f32.mrf.mxu2  ;;  %v5462_v6 = vpop.f32.mrf.mxu0 }
 0x644   : > { %5712 = vmatpush.bf16.msra.mxu0 %v10125_v26  ;;  %5819 = vmatpush.bf16.msra.mxu1 %v10135_v36  ;;  %v5273_v26 = vadd.f32 %v14707_v56, %v14709_v22  ;;  %v5371_v53 = vadd.f32 %v5370_v54, %v5356_v33  ;;  %v5245_v56 = vadd.f32 %v14717_v3, %v14713_v50  ;;  %v10133_v36 = vld [vmem:[%s15872_s3 + $0x140] sm:$0xff]  ;;  %v17704_v50 = vld [vmem:[#allocation9_spill] sm:$0xff] }
 0x645   : > { %5852 = vmatpush.bf16.msra.mxu3 %v17295_v51 }
 0x647   : > { %6009 = vmatpush.bf16.msrb.mxu2 %v17695_v31  ;;  %v5243_v31 = vadd.f32 %v14701_v38, %v14699_v47  ;;  %v5448_v30 = vpop.f32.mrf.mxu3  ;;  %v5099_v38 = vadd.f32 %v14613_v44, %v14615_v10  ;;  %v5071_v47 = vadd.f32 %v14621_v4, %v14606_v7  ;;  %v10134_v7 = vld [vmem:[%s15872_s3 + $0x148] sm:$0xff]  ;;  %v17701_v4 = vld [vmem:[#allocation10_spill] sm:$0xff] }
 0x648   : > { %v5463_v46 = vadd.f32 %v5462_v6, %v5448_v30  ;;  %5866 = vmatpush.bf16.msrb.mxu0 %v17296_v61  ;;  %5820 = vmatpush.bf16.msra.mxu1 %v10134_v7 }
 0x649   : > { %v5141_v12 = vadd.f32 %v14668_v49, %v5071_v47  ;;  %v5169_v41 = vadd.f32 %v14689_v60, %v5099_v38  ;;  %v17703_v60 = vld [vmem:[#allocation14_spill] sm:$0xff] }
 0x64a   : > { %v5496_v43 = vadd.f32 %v5463_v46, %v5402_v42  ;;  %v17705_v42 = vld [vmem:[#allocation17_spill] sm:$0xff]  ;;  %v17706_v47 = vld [vmem:[#allocation18_spill] sm:$0xff] }
 0x64b   : > { %6010 = vmatpush.bf16.msrb.mxu2 %v17696_v17  ;;  %v5303_v17 = vadd.f32 %v5243_v31, %v14635_v25  ;;  %v5434_v44 = vpop.f32.mrf.mxu2  ;;  %v17702_v25 = vld [vmem:[#allocation13_spill] sm:$0xff]  ;;  %v5183_v49 = vadd.f32 %v14691_v21, %v5169_v41  ;;  %v5155_v31 = vadd.f32 %v14665_v40, %v5141_v12  ;;  %v5343_v21 = vadd.f32 %v14743_v39, %v14745_v16  ;;  %v5422_v12 = vpop.f32.mrf.mxu1 }
 0x64c   : > { %v5502_v55 = vadd.f32 %v5496_v43, %v17701_v4  ;;  %v5435_v0 = vadd.f32 %v5434_v44, %v5420_v57  ;;  %5853 = vmatpush.bf16.msra.mxu3 %v17702_v25  ;;  %5867 = vmatpush.bf16.msrb.mxu0 %v17703_v60  ;;  %v17707_v43 = vld [vmem:[#allocation11_spill] sm:$0xff] }
 0x64d   : > { %v5401_v10 = vadd.f32 %v5341_v1, %v5303_v17  ;;  %v5307_v6 = vadd.f32 %v5273_v26, %v5183_v49  ;;  %v5464_v1 = vpop.f32.mrf.mxu0  ;;  %5821 = vmatpush.bf16.msra.mxu1 %v10133_v36  ;;  %v5306_v57 = vadd.f32 %v5245_v56, %v5155_v31  ;;  %v17709_v31 = vld [vmem:[#allocation22_spill] sm:$0xff]  ;;  %v17710_v36 = vld [vmem:[#allocation15_spill] sm:$0xff] }
 0x64e   : > { %v5508_v22 = vmax.f32 %v5502_v55, 0.0 }
 0x64f   : > { %6011 = vmatpush.bf16.msrb.mxu2 %v17697_v28  ;;  %v5495_v28 = vadd.f32 %v5435_v0, %v5401_v10  ;;  %v5450_v30 = vpop.f32.mrf.mxu3  ;;  %v5405_v40 = vadd.f32 %v5371_v53, %v5307_v6  ;;  %v5404_v44 = vadd.f32 %v5343_v21, %v5306_v57  ;;  %v17708_v0 = vld [vmem:[#allocation21_spill] sm:$0xff]  ;;  %v17713_v57 = vld [vmem:[#allocation26_spill] sm:$0xff] }
 0x650   : > { %v5520_v33 = vsel %vm4037_vm0, %v5508_v22, -inf  ;;  %v5623_v54 = vsel %vm4140_vm1, %v5508_v22, -inf  ;;  %5854 = vmatpush.bf16.msra.mxu3 %v17705_v42  ;;  %v5465_v38 = vadd.f32 %v5464_v1, %v5450_v30  ;;  %5868 = vmatpush.bf16.msrb.mxu0 %v17706_v47 }
 0x651   : > { %v5501_v3 = vadd.f32 %v5495_v28, %v17704_v50  ;;  %v5521_v46 = vrot.slane %v5520_v33, 4  ;;  %5880 = vmatpush.bf16.msrb.mxu1 %v17707_v43 }
 0x652   : > { %v5499_v41 = vadd.f32 %v5465_v38, %v5405_v40  ;;  %v17711_v40 = vld [vmem:[#allocation73_spill] sm:$0xff] }
 0x653   : > { %6012 = vmatpush.bf16.msrb.mxu2 %v17698_v24  ;;  %v5624_v24 = vrot.slane %v5623_v54, 4  ;;  %v5507_v17 = vmax.f32 %v5501_v3, 0.0  ;;  %v5522_v16 = vmax.f32 %v5520_v33, %v5521_v46  ;;  %v5436_v26 = vpop.f32.mrf.mxu2  ;;  %v17712_v46 = vld [vmem:[#allocation25_spill] sm:$0xff] }
 0x654   : > { %v5437_v55 = vadd.f32 %v5436_v26, %v5422_v12  ;;  %5855 = vmatpush.bf16.msra.mxu3 %v17708_v0  ;;  %5869 = vmatpush.bf16.msrb.mxu0 %v17709_v31  ;;  %v5505_v6 = vadd.f32 %v5499_v41, %v17701_v4  ;;  %v5728_v26 = vsel %vm4244_vm2, %v5508_v22, -inf  ;;  %v17718_v22 = vld [vmem:[#allocation23_spill] sm:$0xff] }
 0x655   : > { %v5625_v39 = vmax.f32 %v5623_v54, %v5624_v24  ;;  %v5513_v7 = vsel %vm4037_vm0, %v5507_v17, -inf  ;;  %v5616_v10 = vsel %vm4140_vm1, %v5507_v17, -inf  ;;  %v5523_v49 = vrot.slane %v5522_v16, 2  ;;  %5881 = vmatpush.bf16.msrb.mxu1 %v17710_v36  ;;  %v5476_v4 = vpop.f32.mrf.mxu1 }
 0x656   : > { %v5514_v56 = vrot.slane %v5513_v7, 4  ;;  %v5617_v28 = vrot.slane %v5616_v10, 4  ;;  %v5498_v30 = vadd.f32 %v5437_v55, %v5404_v44  ;;  %v5511_v3 = vmax.f32 %v5505_v6, 0.0 }
 0x657   : > { %6013 = vmatpush.bf16.msrb.mxu2 %v17699_v27  ;;  %v5626_v53 = vrot.slane %v5625_v39, 2  ;;  %v5524_v27 = vmax.f32 %v5522_v16, %v5523_v49 }
 0x658   : > { %v5515_v33 = vmax.f32 %v5513_v7, %v5514_v56  ;;  %v5618_v54 = vmax.f32 %v5616_v10, %v5617_v28  ;;  %v5504_v1 = vadd.f32 %v5498_v30, %v17704_v50  ;;  %5856 = vmatpush.bf16.msra.mxu3 %v17712_v46  ;;  %5870 = vmatpush.bf16.msrb.mxu0 %v17713_v57  ;;  %v5729_v41 = vsel %vm4246_vm3, %v5511_v3, -inf  ;;  %v17716_v56 = vld [vmem:[#allocation29_spill] sm:$0xff]  ;;  %v17717_v3 = vld [vmem:[#allocation30_spill] sm:$0xff] }
 0x659   : > { %v5627_v21 = vmax.f32 %v5625_v39, %v5626_v53  ;;  %v5525_v12 = vrot.slane %v5524_v27, 1  ;;  %v17714_v39 = vld [vmem:[#allocation19_spill] sm:$0xff]  ;;  %v5719_v10 = vsel %vm4244_vm2, %v5507_v17, -inf  ;;  %v5730_v55 = vmax.f32 %v5728_v26, %v5729_v41  ;;  %v17715_v53 = vld [vmem:[#allocation77_spill] sm:$0xff]  ;;  %v17719_v41 = vld [vmem:[#allocation80_spill] sm:$0xff] }
 0x65a   : > { %v5516_v24 = vrot.slane %v5515_v33, 2  ;;  %v5619_v38 = vrot.slane %v5618_v54, 2  ;;  %v5510_v16 = vmax.f32 %v5504_v1, 0.0  ;;  %5882 = vmatpush.bf16.msrb.mxu1 %v17714_v39 }
 0x65b   : > { %6014 = vmatpush.bf16.msrb.mxu2 %v17700_v8  ;;  %v5628_v8 = vrot.slane %v5627_v21, 1  ;;  %v14888_v1 = vmax.f32 %v5524_v27, %v5525_v12  ;;  %v5731_v50 = vrot.slane %v5730_v55, 4  ;;  %v5195_v12 = vadd.f32 %v14676_v23, %v14637_v19 }
 0x65c   : > { %v5517_v44 = vmax.f32 %v5515_v33, %v5516_v24  ;;  %v5620_v7 = vmax.f32 %v5618_v54, %v5619_v38  ;;  %v5720_v49 = vsel %vm4246_vm3, %v5510_v16, -inf  ;;  %5857 = vmatpush.bf16.msra.mxu3 %v17716_v56  ;;  %5871 = vmatpush.bf16.msrb.mxu0 %v17717_v3  ;;  %v17720_v16 = vld [vmem:[#allocation33_spill] sm:$0xff]  ;;  %v5397_v19 = vadd.f32 %v14762_v14, %v14764_v58  ;;  %v17728_v58 = vld [vmem:[#allocation35_spill] sm:$0xff] }
 0x65d   : > { %v5721_v30 = vmax.f32 %v5719_v10, %v5720_v49  ;;  %v14891_v33 = vmax.f32 %v5627_v21, %v5628_v8  ;;  %v5732_v38 = vmax.f32 %v5730_v55, %v5731_v50  ;;  %v17721_v10 = vld [vmem:[#allocation34_spill] sm:$0xff]  ;;  %v17723_v49 = vld [vmem:[#allocation84_spill] sm:$0xff]  ;;  %v17726_v21 = vld [vmem:[#allocation31_spill] sm:$0xff] }
 0x65e   : > { %6015 = vmatmul.bf16.vlgmr.msrb.gmra.mxu2 %v14678_v59  ;;  %v5518_v28 = vrot.slane %v5517_v44, 1  ;;  %v5621_v6 = vrot.slane %v5620_v7, 1  ;;  %5883 = vmatpush.bf16.msrb.mxu1 %v17718_v22 }
 0x65f   : > { %6065 = vmatpush.bf16.msra.mxu2 %v17711_v40  ;;  %v5722_v24 = vrot.slane %v5721_v30, 4  ;;  %v5733_v8 = vrot.slane %v5732_v38, 2 }
 0x660   : > { %v14893_v17 = vmax.f32 %v5517_v44, %v5518_v28  ;;  %v14895_v54 = vmax.f32 %v5620_v7, %v5621_v6  ;;  %5858 = vmatpush.bf16.msra.mxu3 %v17720_v16  ;;  %5872 = vmatpush.bf16.msrb.mxu0 %v17721_v10  ;;  %v17722_v44 = vld [vmem:[#allocation27_spill] sm:$0xff]  ;;  %v5299_v7 = vadd.f32 %v14728_v11, %v14725_v9  ;;  %v17724_v28 = vld [vmem:[#allocation37_spill] sm:$0xff] }
 0x661   : > { %v5723_v26 = vmax.f32 %v5721_v30, %v5722_v24  ;;  %v5734_v55 = vmax.f32 %v5732_v38, %v5733_v8  ;;  %v17725_v30 = vld [vmem:[#allocation38_spill] sm:$0xff]  ;;  %v5209_v24 = vadd.f32 %v14674_v5, %v5195_v12  ;;  %v5127_v9 = vadd.f32 %v14646_v20, %v14631_v32  ;;  %v17727_v38 = vld [vmem:[#allocation88_spill] sm:$0xff] }
 0x662   : > { %5884 = vmatpush.bf16.msrb.mxu1 %v17722_v44  ;;  %v5301_v32 = vadd.f32 %v14750_v15, %v14748_v2 }
 0x663   : > { %6066 = vmatpush.bf16.msra.mxu2 %v17715_v53  ;;  %v5724_v50 = vrot.slane %v5723_v26, 2  ;;  %v5735_v23 = vrot.slane %v5734_v55, 1  ;;  %v5305_v11 = vadd.f32 %v5299_v7, %v5209_v24  ;;  %v5197_v5 = vadd.f32 %v14686_v48, %v5127_v9  ;;  %v17729_v7 = vld [vmem:[#allocation92_spill] sm:$0xff]  ;;  %v17731_v24 = vld [vmem:[#allocation39_spill] sm:$0xff]  ;;  %v5478_v9 = vpop.f32.mrf.mxu1 }
 0x664   : > { %5859 = vmatpush.bf16.msra.mxu3 %v17724_v28  ;;  %5873 = vmatpush.bf16.msrb.mxu0 %v17725_v30 }
 0x665   : > { %v5725_v6 = vmax.f32 %v5723_v26, %v5724_v50  ;;  %v14919_v8 = vmax.f32 %v5734_v55, %v5735_v23  ;;  %v5490_v50 = vpop.f32.mrf.mxu2  ;;  %v5403_v12 = vadd.f32 %v5397_v19, %v5305_v11  ;;  %v5211_v55 = vadd.f32 %v14684_v52, %v5197_v5  ;;  %v17732_v23 = vld [vmem:[#allocation96_spill] sm:$0xff] }
 0x666   : > { %5885 = vmatpush.bf16.msrb.mxu1 %v17726_v21  ;;  %v5491_v14 = vadd.f32 %v5490_v50, %v5476_v4 }
 0x667   : > { %6067 = vmatpush.bf16.msra.mxu2 %v17719_v41  ;;  %v5726_v27 = vrot.slane %v5725_v6, 1  ;;  %v5308_v4 = vadd.f32 %v5301_v32, %v5211_v55 }
 0x668   : > { %v5497_v20 = vadd.f32 %v5491_v14, %v5403_v12 }
 0x669   : > { %v14921_v26 = vmax.f32 %v5725_v6, %v5726_v27  ;;  %v5399_v27 = vadd.f32 %v14798_v13, %v14800_v63  ;;  %v17730_v6 = vld [vmem:[#allocation412_spill] sm:$0xff] }
 0x66a   : > { %5886 = vmatpush.bf16.msrb.mxu1 %v17728_v58  ;;  %v5503_v48 = vadd.f32 %v5497_v20, %v17730_v6  ;;  %v17733_v13 = vld [vmem:[#allocation100_spill] sm:$0xff] }
 0x66b   : > { %6068 = vmatpush.bf16.msra.mxu2 %v17723_v49  ;;  %v5746_v18 = vmax.f32 %v14921_v26, %v14919_v8  ;;  %v5406_v8 = vadd.f32 %v5399_v27, %v5308_v4 }
 0x66c   : > { %v5509_v19 = vmax.f32 %v5503_v48, 0.0 }
 0x66d   : > { %v5492_v11 = vpop.f32.mrf.mxu2 }
 0x66e   : > { %5887 = vmatpush.bf16.msrb.mxu1 %v17731_v24  ;;  %v5527_v2 = vsel %vm4037_vm0, %v5509_v19, -inf  ;;  %v5630_v15 = vsel %vm4140_vm1, %v5509_v19, -inf  ;;  %v5493_v26 = vadd.f32 %v5492_v11, %v5478_v9  ;;  %v5737_v4 = vsel %vm4244_vm2, %v5509_v19, -inf }
 0x66f   : > { %6069 = vmatpush.bf16.msra.mxu2 %v17727_v38  ;;  %v5528_v52 = vrot.slane %v5527_v2, 4  ;;  %v5631_v50 = vrot.slane %v5630_v15, 4 }
 0x670   : > { %v5500_v5 = vadd.f32 %v5493_v26, %v5406_v8 }
 0x671   : > { %v5529_v63 = vmax.f32 %v5527_v2, %v5528_v52  ;;  %v5632_v12 = vmax.f32 %v5630_v15, %v5631_v50  ;;  %v17734_v50 = vmax.f32 %v14893_v17, %v14888_v1 }
 0x672   : > { %v5506_v14 = vadd.f32 %v5500_v5, %v17730_v6 }
 0x673   : > { %6070 = vmatpush.bf16.msra.mxu2 %v17729_v7  ;;  %v5530_v32 = vrot.slane %v5529_v63, 2  ;;  %v5633_v20 = vrot.slane %v5632_v12, 2 }
 0x674   : > { %v5512_v55 = vmax.f32 %v5506_v14, 0.0 }
 0x675   : > { %v5531_v27 = vmax.f32 %v5529_v63, %v5530_v32  ;;  %v5634_v48 = vmax.f32 %v5632_v12, %v5633_v20  ;;  %v17737_v20 = vld [vmem:[#allocation42_spill] sm:$0xff] }
 0x676   : > { %v5738_v9 = vsel %vm4246_vm3, %v5512_v55, -inf }
 0x677   : > { %6071 = vmatpush.bf16.msra.mxu2 %v17732_v23  ;;  %v5532_v11 = vrot.slane %v5531_v27, 1  ;;  %v5635_v8 = vrot.slane %v5634_v48, 1  ;;  %v5739_v2 = vmax.f32 %v5737_v4, %v5738_v9  ;;  %v17742_v4 = vld [vmem:[#allocation43_spill] sm:$0xff]  ;;  %v9541_v9 = vld [vmem:[%s10523_s29 + $0x51] sm:$0xff] }
 0x679   : > { %v5740_v15 = vrot.slane %v5739_v2, 4  ;;  %v5636_v26 = vmax.f32 %v5634_v48, %v5635_v8  ;;  %v17741_v48 = vld [vmem:[#allocation51_spill] sm:$0xff] }
 0x67a   : > { %v17744_v8 = vld [vmem:[#allocation55_spill] sm:$0xff] }
 0x67b   : > { %6072 = vmatpush.bf16.msra.mxu2 %v17733_v13  ;;  %v5741_v52 = vmax.f32 %v5739_v2, %v5740_v15  ;;  %v17746_v2 = vld [vmem:[#allocation104_spill] sm:$0xff]  ;;  %v17748_v15 = vld [vmem:[#allocation59_spill] sm:$0xff] }
 0x67d   : > { %v5742_v19 = vrot.slane %v5741_v52, 2 }
 0x67e   : > { %6073 = vmatmul.bf16.vlgmr.msra.gmra.mxu2 %v14778_v37 }
 0x67f   : > { %6130 = vmatpush.bf16.msrb.mxu2 %v17711_v40  ;;  %v5533_v40 = vmax.f32 %v5531_v27, %v5532_v11  ;;  %v5743_v32 = vmax.f32 %v5741_v52, %v5742_v19  ;;  %v17740_v27 = vld [vmem:[#allocation50_spill] sm:$0xff]  ;;  %v17752_v52 = vld [vmem:[#allocation63_spill] sm:$0xff]  ;;  %v17757_v19 = vld [vmem:[#allocation60_spill] sm:$0xff] }
 0x680   : > { %v17743_v11 = vld [vmem:[#allocation54_spill] sm:$0xff] }
 0x681   : > { %v5535_v5 = vmax.f32 %v17734_v50, %v5533_v40  ;;  %v5744_v1 = vrot.slane %v5743_v32, 1  ;;  %v17749_v40 = vld [vmem:[#allocation52_spill] sm:$0xff] }
 0x682   : > { %v17753_v50 = vld [vmem:[#allocation56_spill] sm:$0xff] }
 0x683   : > { %6131 = vmatpush.bf16.msrb.mxu2 %v17715_v53  ;;  %v17735_v53 = vmax.f32 %v14895_v54, %v14891_v33  ;;  %v5536_v12 = vpack.c.bf16 %v5535_v5, %v5535_v5  ;;  %v5745_v17 = vmax.f32 %v5743_v32, %v5744_v1  ;;  %v17738_v33 = vld [vmem:[#allocation46_spill] sm:$0xff]  ;;  %v17739_v54 = vld [vmem:[#allocation47_spill] sm:$0xff]  ;;  %v17754_v5 = vld [vmem:[#allocation112_spill] sm:$0xff] }
 0x684   : > { %v17760_v32 = vld [vmem:[#allocation71_spill] sm:$0xff]  ;;  %v17761_v1 = vld [vmem:[#allocation64_spill] sm:$0xff] }
 0x685   : > { %v5638_v63 = vmax.f32 %v17735_v53, %v5636_v26  ;;  %5610 = vmatmul.bf16.vlgmr.msrb.gmra.mxu3 %v5536_v12  ;;  %v17750_v26 = vld [vmem:[#allocation108_spill] sm:$0xff]  ;;  %v17755_v53 = vld [vmem:[#allocation66_spill] sm:$0xff] }
 0x686   : > { %v17758_v12 = vld [vmem:[#allocation116_spill] sm:$0xff] }
 0x687   : > { %6132 = vmatpush.bf16.msrb.mxu2 %v17719_v41  ;;  %v5639_v14 = vpack.c.bf16 %v5638_v63, %v5638_v63  ;;  %v17736_v41 = vld [vmem:[#allocation41_spill] sm:$0xff]  ;;  %v17756_v63 = vld [vmem:[#allocation67_spill] sm:$0xff] }
 0x688   : > { %5908 = vmatpush.bf16.msrb.mxu3 %v17736_v41 }
 0x689   : > { %5713 = vmatmul.bf16.vlgmr.msra.gmra.mxu0 %v5639_v14  ;;  %v17759_v14 = vld [vmem:[#allocation70_spill] sm:$0xff] }
 0x68a   : > { %5922 = vmatpush.bf16.msra.mxu0 %v17737_v20 }
 0x68b   : > { %6133 = vmatpush.bf16.msrb.mxu2 %v17723_v49  ;;  %v5747_v49 = vmax.f32 %v5746_v18, %v5745_v17  ;;  %v17745_v18 = vld [vmem:[#allocation48_spill] sm:$0xff] }
 0x68c   : > { %5909 = vmatpush.bf16.msrb.mxu3 %v17738_v33  ;;  %v17762_v17 = vld [vmem:[#allocation120_spill] sm:$0xff] }
 0x68d   : > { %v5748_v55 = vpack.c.bf16 %v5747_v49, %v5747_v49  ;;  %v17763_v49 = vld [vmem:[#allocation68_spill] sm:$0xff] }
 0x68e   : > { %5923 = vmatpush.bf16.msra.mxu0 %v17739_v54 }
 0x68f   : > { %6134 = vmatpush.bf16.msrb.mxu2 %v17727_v38  ;;  %5822 = vmatmul.bf16.vlgmr.msra.gmra.mxu1 %v5748_v55  ;;  %v9542_v38 = vld [vmem:[%s10523_s29 + $0x59] sm:$0x1f]  ;;  %v17764_v55 = vld [vmem:[#allocation124_spill] sm:$0xff] }
 0x690   : > { %5910 = vmatpush.bf16.msrb.mxu3 %v17740_v27  ;;  %5936 = vmatpush.bf16.msra.mxu1 %v17742_v4 }
 0x692   : > { %5924 = vmatpush.bf16.msra.mxu0 %v17741_v48 }
 0x693   : > { %6135 = vmatpush.bf16.msrb.mxu2 %v17729_v7  ;;  %v14968_v7 = vpack.c.bf16 %v9542_v38, %v9541_v9  ;;  %v17785_v9 = vld [vmem:[#allocation45_spill] sm:$0xff] }
 0x694   : > { %5911 = vmatpush.bf16.msrb.mxu3 %v17743_v11  ;;  %5937 = vmatpush.bf16.msra.mxu1 %v17745_v18  ;;  %v17786_v38 = vld [vmem:[#allocation89_spill] sm:$0xff] }
 0x695   : > { %5860 = vmatmul.bf16.vlgmr.msra.gmra.mxu3 %v14678_v59 }
 0x696   : > { %5925 = vmatpush.bf16.msra.mxu0 %v17744_v8 }
 0x697   : > { %6136 = vmatpush.bf16.msrb.mxu2 %v17732_v23  ;;  %v17747_v23 = vld [vmem:[#allocation58_spill] sm:$0xff] }
 0x698   : > { %5912 = vmatpush.bf16.msrb.mxu3 %v17747_v23  ;;  %5938 = vmatpush.bf16.msra.mxu1 %v17749_v40 }
 0x699   : > { %5874 = vmatmul.bf16.vlgmr.msrb.gmra.mxu0 %v14678_v59 }
 0x69a   : > { %5926 = vmatpush.bf16.msra.mxu0 %v17748_v15 }
 0x69b   : > { %6137 = vmatpush.bf16.msrb.mxu2 %v17733_v13  ;;  %v17751_v13 = vld [vmem:[#allocation62_spill] sm:$0xff] }
 0x69c   : > { %5913 = vmatpush.bf16.msrb.mxu3 %v17751_v13  ;;  %5939 = vmatpush.bf16.msra.mxu1 %v17753_v50 }
 0x69e   : > { %6138 = vmatmul.bf16.vlgmr.msrb.gmra.mxu2 %v14968_v7  ;;  %5927 = vmatpush.bf16.msra.mxu0 %v17752_v52 }
 0x69f   : > { %6196 = vmatpush.bf16.msra.mxu2 %v17746_v2  ;;  %5888 = vmatmul.bf16.vlgmr.msrb.gmra.mxu1 %v14678_v59 }
 0x6a0   : > { %5914 = vmatpush.bf16.msrb.mxu3 %v17755_v53  ;;  %5940 = vmatpush.bf16.msra.mxu1 %v17757_v19 }
 0x6a2   : > { %5928 = vmatpush.bf16.msra.mxu0 %v17756_v63 }
 0x6a3   : > { %6197 = vmatpush.bf16.msra.mxu2 %v17750_v26 }
 0x6a4   : > { %5915 = vmatpush.bf16.msrb.mxu3 %v17759_v14  ;;  %5941 = vmatpush.bf16.msra.mxu1 %v17761_v1 }
 0x6a6   : > { %5929 = vmatpush.bf16.msra.mxu0 %v17760_v32 }
 0x6a7   : > { %6198 = vmatpush.bf16.msra.mxu2 %v17754_v5  ;;  %5916 = vmatmul.bf16.vlgmr.msrb.gmra.mxu3 %v14711_v62 }
 0x6a8   : > { %5965 = vmatpush.bf16.msra.mxu3 %v17295_v51  ;;  %5942 = vmatpush.bf16.msra.mxu1 %v17763_v49  ;;  %v17766_v51 = vld [vmem:[#allocation128_spill] sm:$0xff] }
 0x6a9   : > { %5930 = vmatmul.bf16.vlgmr.msra.gmra.mxu0 %v14711_v62 }
 0x6aa   : > { %5979 = vmatpush.bf16.msrb.mxu0 %v17296_v61  ;;  %v17765_v61 = vld [vmem:[#allocation72_spill] sm:$0xff] }
 0x6ab   : > { %6199 = vmatpush.bf16.msra.mxu2 %v17758_v12 }
 0x6ac   : > { %5966 = vmatpush.bf16.msra.mxu3 %v17702_v25  ;;  %5943 = vmatpush.bf16.msra.mxu1 %v17765_v61  ;;  %v17767_v25 = vld [vmem:[#allocation132_spill] sm:$0xff] }
 0x6ae   : > { %5980 = vmatpush.bf16.msrb.mxu0 %v17703_v60  ;;  %v5847_v60 = vpop.f32.mrf.mxu2 }
 0x6af   : > { %6200 = vmatpush.bf16.msra.mxu2 %v17762_v17  ;;  %5944 = vmatmul.bf16.vlgmr.msra.gmra.mxu1 %v14711_v62 }
 0x6b0   : > { %5967 = vmatpush.bf16.msra.mxu3 %v17705_v42  ;;  %5993 = vmatpush.bf16.msrb.mxu1 %v17707_v43  ;;  %v9543_v43 = vld [vmem:[%s10523_s29 + $0x42] sm:$0xff] }
 0x6b2   : > { %5981 = vmatpush.bf16.msrb.mxu0 %v17706_v47 }
 0x6b3   : > { %6201 = vmatpush.bf16.msra.mxu2 %v17764_v55 }
 0x6b4   : > { %5968 = vmatpush.bf16.msra.mxu3 %v17708_v0  ;;  %5994 = vmatpush.bf16.msrb.mxu1 %v17710_v36  ;;  %v9544_v0 = vld [vmem:[%s10523_s29 + $0x4a] sm:$0x1f]  ;;  %v17768_v36 = vld [vmem:[#allocation136_spill] sm:$0xff] }
 0x6b6   : > { %5982 = vmatpush.bf16.msrb.mxu0 %v17709_v31  ;;  %v15024_v62 = vpop.f32.mrf.mxu2  ;;  %v15051_v31 = vpack.c.bf16 %v9544_v0, %v9543_v43  ;;  %v17804_v0 = vld [vmem:[#allocation176_spill] sm:$0xff] }
 0x6b7   : > { %6202 = vmatpush.bf16.msra.mxu2 %v17766_v51 }
 0x6b8   : > { %5969 = vmatpush.bf16.msra.mxu3 %v17712_v46  ;;  %5995 = vmatpush.bf16.msrb.mxu1 %v17714_v39  ;;  %v17770_v39 = vld [vmem:[#allocation144_spill] sm:$0xff] }
 0x6ba   : > { %5983 = vmatpush.bf16.msrb.mxu0 %v17713_v57  ;;  %v17769_v57 = vld [vmem:[#allocation140_spill] sm:$0xff] }
 0x6bb   : > { %6203 = vmatpush.bf16.msra.mxu2 %v17767_v25 }
 0x6bc   : > { %5970 = vmatpush.bf16.msra.mxu3 %v17716_v56  ;;  %5996 = vmatpush.bf16.msrb.mxu1 %v17718_v22  ;;  %v17772_v22 = vld [vmem:[#allocation74_spill] sm:$0xff] }
 0x6be   : > { %6204 = vmatmul.bf16.vlgmr.msra.gmra.mxu2 %v14968_v7  ;;  %5984 = vmatpush.bf16.msrb.mxu0 %v17717_v3  ;;  %v5903_v42 = vpop.f32.mrf.mxu2  ;;  %v17771_v3 = vld [vmem:[#allocation148_spill] sm:$0xff] }
 0x6bf   : > { %6261 = vmatpush.bf16.msrb.mxu2 %v17746_v2  ;;  %v15038_v47 = vadd.f32 %v5903_v42, %v5847_v60  ;;  %v17803_v42 = vld [vmem:[#allocation172_spill] sm:$0xff] }
 0x6c0   : > { %5971 = vmatpush.bf16.msra.mxu3 %v17720_v16  ;;  %5997 = vmatpush.bf16.msrb.mxu1 %v17722_v44  ;;  %v17773_v16 = vld [vmem:[#allocation75_spill] sm:$0xff]  ;;  %v17775_v44 = vld [vmem:[#allocation78_spill] sm:$0xff] }
 0x6c2   : > { %5985 = vmatpush.bf16.msrb.mxu0 %v17721_v10  ;;  %v17774_v10 = vld [vmem:[#allocation152_spill] sm:$0xff] }
 0x6c3   : > { %6262 = vmatpush.bf16.msrb.mxu2 %v17750_v26  ;;  %v17794_v26 = vld [vmem:[#allocation91_spill] sm:$0xff] }
 0x6c4   : > { %5972 = vmatpush.bf16.msra.mxu3 %v17724_v28  ;;  %5998 = vmatpush.bf16.msrb.mxu1 %v17726_v21  ;;  %v17776_v28 = vld [vmem:[#allocation79_spill] sm:$0xff] }
 0x6c6   : > { %5986 = vmatpush.bf16.msrb.mxu0 %v17725_v30  ;;  %v15055_v46 = vpop.f32.mrf.mxu2  ;;  %v17777_v30 = vld [vmem:[#allocation156_spill] sm:$0xff] }
 0x6c7   : > { %6263 = vmatpush.bf16.msrb.mxu2 %v17754_v5  ;;  %5973 = vmatmul.bf16.vlgmr.msra.gmra.mxu3 %v14778_v37 }
 0x6c8   : > { %6021 = vmatpush.bf16.msrb.mxu3 %v17736_v41  ;;  %5999 = vmatpush.bf16.msrb.mxu1 %v17728_v58  ;;  %v17778_v58 = vld [vmem:[#allocation81_spill] sm:$0xff]  ;;  %v17780_v41 = vld [vmem:[#allocation160_spill] sm:$0xff] }
 0x6c9   : > { %5987 = vmatmul.bf16.vlgmr.msrb.gmra.mxu0 %v14778_v37 }
 0x6ca   : > { %6035 = vmatpush.bf16.msra.mxu0 %v17737_v20  ;;  %v17781_v20 = vld [vmem:[#allocation76_spill] sm:$0xff] }
 0x6cb   : > { %6264 = vmatpush.bf16.msrb.mxu2 %v17758_v12  ;;  %v17799_v12 = vld [vmem:[#allocation103_spill] sm:$0xff] }
 0x6cc   : > { %6022 = vmatpush.bf16.msrb.mxu3 %v17738_v33  ;;  %6000 = vmatpush.bf16.msrb.mxu1 %v17731_v24  ;;  %v17779_v24 = vld [vmem:[#allocation82_spill] sm:$0xff] }
 0x6ce   : > { %6036 = vmatpush.bf16.msra.mxu0 %v17739_v54  ;;  %v5960_v56 = vpop.f32.mrf.mxu2 }
 0x6cf   : > { %6265 = vmatpush.bf16.msrb.mxu2 %v17762_v17  ;;  %6001 = vmatmul.bf16.vlgmr.msrb.gmra.mxu1 %v14778_v37 }
 0x6d0   : > { %6023 = vmatpush.bf16.msrb.mxu3 %v17740_v27  ;;  %6049 = vmatpush.bf16.msra.mxu1 %v17742_v4  ;;  %v17782_v27 = vld [vmem:[#allocation85_spill] sm:$0xff]  ;;  %v17784_v4 = vld [vmem:[#allocation164_spill] sm:$0xff] }
 0x6d2   : > { %6037 = vmatpush.bf16.msra.mxu0 %v17741_v48  ;;  %v17783_v48 = vld [vmem:[#allocation86_spill] sm:$0xff] }
 0x6d3   : > { %6266 = vmatpush.bf16.msrb.mxu2 %v17764_v55 }
 0x6d4   : > { %6024 = vmatpush.bf16.msrb.mxu3 %v17743_v11  ;;  %6050 = vmatpush.bf16.msra.mxu1 %v17745_v18  ;;  %v17787_v11 = vld [vmem:[#allocation90_spill] sm:$0xff] }
 0x6d5   : > { %v17790_v18 = vld [vmem:[#allocation94_spill] sm:$0xff] }
 0x6d6   : > { %6038 = vmatpush.bf16.msra.mxu0 %v17744_v8  ;;  %v15078_v21 = vpop.f32.mrf.mxu2  ;;  %v17788_v8 = vld [vmem:[#allocation83_spill] sm:$0xff] }
 0x6d7   : > { %6267 = vmatpush.bf16.msrb.mxu2 %v17766_v51 }
 0x6d8   : > { %6025 = vmatpush.bf16.msrb.mxu3 %v17747_v23  ;;  %6051 = vmatpush.bf16.msra.mxu1 %v17749_v40  ;;  %v17791_v23 = vld [vmem:[#allocation87_spill] sm:$0xff]  ;;  %v17793_v40 = vld [vmem:[#allocation98_spill] sm:$0xff] }
 0x6da   : > { %6039 = vmatpush.bf16.msra.mxu0 %v17748_v15  ;;  %v17792_v15 = vld [vmem:[#allocation97_spill] sm:$0xff] }
 0x6db   : > { %6268 = vmatpush.bf16.msrb.mxu2 %v17767_v25 }
 0x6dc   : > { %6026 = vmatpush.bf16.msrb.mxu3 %v17751_v13  ;;  %6052 = vmatpush.bf16.msra.mxu1 %v17753_v50  ;;  %v17795_v13 = vld [vmem:[#allocation101_spill] sm:$0xff]  ;;  %v17797_v50 = vld [vmem:[#allocation95_spill] sm:$0xff] }
 0x6de   : > { %6269 = vmatmul.bf16.vlgmr.msrb.gmra.mxu2 %v15051_v31  ;;  %6040 = vmatpush.bf16.msra.mxu0 %v17752_v52  ;;  %v17796_v52 = vld [vmem:[#allocation102_spill] sm:$0xff] }
 0x6df   : > { %6327 = vmatpush.bf16.msra.mxu2 %v17768_v36 }
 0x6e0   : > { %6027 = vmatpush.bf16.msrb.mxu3 %v17755_v53  ;;  %6053 = vmatpush.bf16.msra.mxu1 %v17757_v19 }
 0x6e1   : > { %v6016_v33 = vpop.f32.mrf.mxu2 }
 0x6e2   : > { %6041 = vmatpush.bf16.msra.mxu0 %v17756_v63  ;;  %v15089_v54 = vadd.f32 %v6016_v33, %v5960_v56  ;;  %v17798_v63 = vld [vmem:[#allocation99_spill] sm:$0xff]  ;;  %v17806_v56 = vld [vmem:[#allocation105_spill] sm:$0xff]  ;;  %v17813_v33 = vld [vmem:[#allocation114_spill] sm:$0xff] }
 0x6e3   : > { %6328 = vmatpush.bf16.msra.mxu2 %v17769_v57 }
 0x6e4   : > { %6028 = vmatpush.bf16.msrb.mxu3 %v17759_v14  ;;  %6054 = vmatpush.bf16.msra.mxu1 %v17761_v1  ;;  %v9545_v14 = vld [vmem:[%s10523_s29 + $0x52] sm:$0xff] }
 0x6e6   : > { %6042 = vmatpush.bf16.msra.mxu0 %v17760_v32  ;;  %v9546_v32 = vld [vmem:[%s10523_s29 + $0x5a] sm:$0x1f]  ;;  %s10262_s29 = sshra.s32 %s7316_s18, 4  ;;  %s10263_s29 = int_to_ptr.hbm [resolvable:$true] %s10262_s29 }
 0x6e7   : > { %6329 = vmatpush.bf16.msra.mxu2 %v17770_v39  ;;  %6029 = vmatmul.bf16.vlgmr.msrb.gmra.mxu3 %v14678_v59  ;;  %v15137_v1 = vpack.c.bf16 %v9546_v32, %v9545_v14  ;;  %v17828_v32 = vld [vmem:[#allocation208_spill] sm:$0xff]  ;;  %s10264_s20 = scalar_lea.hbm %s10263_s29, 1  ;;  %p10269_p3 = scmp.lt.s32.totalorder %s10263_s29, %s15876_s7 }
 0x6e8   : > { %6079 = vmatpush.bf16.msra.mxu3 %v17772_v22  ;;  %6055 = vmatpush.bf16.msra.mxu1 %v17763_v49  ;;  %v17800_v49 = vld [vmem:[#allocation413_spill] sm:$0xff]  ;;  %p10265_p0 = scmp.ne.s32.totalorder %s10263_s29, %s10264_s20  ;;  %p10270_p4 = scmp.lt.s32.totalorder %s10268_s28, %s10264_s20 }
 0x6e9   : > { %6043 = vmatmul.bf16.vlgmr.msra.gmra.mxu0 %v14678_v59  ;;  %v15104_v2 = vpop.f32.mrf.mxu2 }
 0x6ea   : > { %6093 = vmatpush.bf16.msrb.mxu0 %v17773_v16  ;;  %p10266_p1 = pnand %p10265_p0, %p10397_p5  ;;  %p10271_p7 = por %p10270_p4, %p10269_p3 }
 0x6eb   : > { %6330 = vmatpush.bf16.msra.mxu2 %v17771_v3 }
 0x6ec   : > { %6080 = vmatpush.bf16.msra.mxu3 %v17775_v44  ;;  %6056 = vmatpush.bf16.msra.mxu1 %v17765_v61  ;;  %v17801_v61 = vld [vmem:[#allocation168_spill] sm:$0xff]  ;;  %p10267_p2 = pneg %p10266_p1 }
 0x6ee   : > { %6094 = vmatpush.bf16.msrb.mxu0 %v17776_v28  ;;  %p10272_p8 = pnand %p10271_p7, %p10267_p2 }
 0x6ef   : > { %6331 = vmatpush.bf16.msra.mxu2 %v17774_v10  ;;  %6057 = vmatmul.bf16.vlgmr.msra.gmra.mxu1 %v14678_v59  ;;  %v17789_v59 = vld [vmem:[#allocation93_spill] sm:$0xff] }
 0x6f0   : > { %6081 = vmatpush.bf16.msra.mxu3 %v17778_v58  ;;  %6107 = vmatpush.bf16.msrb.mxu1 %v17781_v20 }
 0x6f2   : > { %6095 = vmatpush.bf16.msrb.mxu0 %v17779_v24 }
 0x6f3   : > { %6332 = vmatpush.bf16.msra.mxu2 %v17777_v30 }
 0x6f4   : > { %6082 = vmatpush.bf16.msra.mxu3 %v17782_v27  ;;  %6108 = vmatpush.bf16.msrb.mxu1 %v17785_v9 }
 0x6f6   : > { %6096 = vmatpush.bf16.msrb.mxu0 %v17783_v48 }
 0x6f7   : > { %6333 = vmatpush.bf16.msra.mxu2 %v17780_v41 }
 0x6f8   : > { %6083 = vmatpush.bf16.msra.mxu3 %v17786_v38  ;;  %6109 = vmatpush.bf16.msrb.mxu1 %v17788_v8 }
 0x6fa   : > { %6097 = vmatpush.bf16.msrb.mxu0 %v17787_v11 }
 0x6fb   : > { %6334 = vmatpush.bf16.msra.mxu2 %v17784_v4 }
 0x6fc   : > { %6084 = vmatpush.bf16.msra.mxu3 %v17789_v59  ;;  %6110 = vmatpush.bf16.msrb.mxu1 %v17791_v23 }
 0x6fe   : > { %6335 = vmatmul.bf16.vlgmr.msra.gmra.mxu2 %v15051_v31  ;;  %6098 = vmatpush.bf16.msrb.mxu0 %v17790_v18 }
 0x6ff   : > { %6392 = vmatpush.bf16.msrb.mxu2 %v17768_v36 }
 0x700   : > { %6085 = vmatpush.bf16.msra.mxu3 %v17792_v15  ;;  %6111 = vmatpush.bf16.msrb.mxu1 %v17794_v26 }
 0x701   : > { %v6074_v5 = vpop.f32.mrf.mxu2 }
 0x702   : > { %6099 = vmatpush.bf16.msrb.mxu0 %v17793_v40  ;;  %v15121_v53 = vadd.f32 %v6074_v5, %v15038_v47  ;;  %v17825_v5 = vld [vmem:[#allocation125_spill] sm:$0xff] }
 0x703   : > { %6393 = vmatpush.bf16.msrb.mxu2 %v17769_v57 }
 0x704   : > { %6086 = vmatpush.bf16.msra.mxu3 %v17795_v13  ;;  %6112 = vmatpush.bf16.msrb.mxu1 %v17797_v50 }
 0x706   : > { %6100 = vmatpush.bf16.msrb.mxu0 %v17796_v52  ;;  %v5714_v19 = vpop.f32.mrf.mxu0 }
 0x707   : > { %6394 = vmatpush.bf16.msrb.mxu2 %v17770_v39  ;;  %6087 = vmatmul.bf16.vlgmr.msra.gmra.mxu3 %v14778_v37  ;;  %v17805_v39 = vld [vmem:[#allocation180_spill] sm:$0xff] }
 0x708   : > { %6144 = vmatpush.bf16.msrb.mxu3 %v17772_v22  ;;  %6113 = vmatpush.bf16.msrb.mxu1 %v17798_v63  ;;  %v5611_v17 = vpop.f32.mrf.mxu3 }
 0x709   : > { %6101 = vmatmul.bf16.vlgmr.msrb.gmra.mxu0 %v14778_v37  ;;  %v5615_v55 = vadd.f32 %v5611_v17, %v17800_v49  ;;  %v15153_v43 = vpop.f32.mrf.mxu2  ;;  %v17829_v17 = vld [vmem:[#allocation129_spill] sm:$0xff]  ;;  %v17830_v49 = vld [vmem:[#allocation130_spill] sm:$0xff] }
 0x70a   : > { %6158 = vmatpush.bf16.msra.mxu0 %v17773_v16  ;;  %v17808_v16 = vld [vmem:[#allocation184_spill] sm:$0xff] }
 0x70b   : > { %6395 = vmatpush.bf16.msrb.mxu2 %v17771_v3  ;;  %v17807_v3 = vld [vmem:[#allocation106_spill] sm:$0xff] }
 0x70c   : > { %6145 = vmatpush.bf16.msrb.mxu3 %v17775_v44  ;;  %6114 = vmatpush.bf16.msrb.mxu1 %v17799_v12  ;;  %v5823_v25 = vpop.f32.mrf.mxu1 }
 0x70e   : > { %6159 = vmatpush.bf16.msra.mxu0 %v17776_v28  ;;  %v5716_v51 = vpop.f32.mrf.mxu0  ;;  %v17809_v28 = vld [vmem:[#allocation109_spill] sm:$0xff] }
 0x70f   : > { %6396 = vmatpush.bf16.msrb.mxu2 %v17774_v10  ;;  %6115 = vmatmul.bf16.vlgmr.msrb.gmra.mxu1 %v14778_v37  ;;  %v5718_v37 = vadd.f32 %v5714_v19, %v5615_v55  ;;  %v17831_v55 = vld [vmem:[#allocation123_spill] sm:$0xff]  ;;  %v17833_v51 = vld [vmem:[#allocation133_spill] sm:$0xff] }
 0x710   : > { %6146 = vmatpush.bf16.msrb.mxu3 %v17778_v58  ;;  %6172 = vmatpush.bf16.msra.mxu1 %v17781_v20  ;;  %v5613_v47 = vpop.f32.mrf.mxu3  ;;  %v17810_v58 = vld [vmem:[#allocation110_spill] sm:$0xff]  ;;  %v17812_v20 = vld [vmem:[#allocation113_spill] sm:$0xff] }
 0x711   : > { %v15147_v60 = vadd.f32 %v5823_v25, %v5718_v37  ;;  %v17834_v37 = vld [vmem:[#allocation134_spill] sm:$0xff]  ;;  %v17835_v25 = vld [vmem:[#allocation127_spill] sm:$0xff] }
 0x712   : > { %6160 = vmatpush.bf16.msra.mxu0 %v17779_v24  ;;  %v17837_v47 = vld [vmem:[#allocation131_spill] sm:$0xff] }
 0x713   : > { %6397 = vmatpush.bf16.msrb.mxu2 %v17777_v30  ;;  %17802 = vst [vmem:[#allocation226_spill] sm:$0xff] %v15147_v60 }
 0x714   : > { %6147 = vmatpush.bf16.msrb.mxu3 %v17782_v27  ;;  %6173 = vmatpush.bf16.msra.mxu1 %v17785_v9  ;;  %v5825_v57 = vpop.f32.mrf.mxu1 }
 0x715   : > { %v17840_v57 = vld [vmem:[#allocation230_spill] sm:$0xff] }
 0x716   : > { %6161 = vmatpush.bf16.msra.mxu0 %v17783_v48  ;;  %v5875_v36 = vpop.f32.mrf.mxu0  ;;  %v17814_v48 = vld [vmem:[#allocation107_spill] sm:$0xff] }
 0x717   : > { %6398 = vmatpush.bf16.msrb.mxu2 %v17780_v41  ;;  %v17811_v41 = vld [vmem:[#allocation188_spill] sm:$0xff] }
 0x718   : > { %6148 = vmatpush.bf16.msrb.mxu3 %v17786_v38  ;;  %6174 = vmatpush.bf16.msra.mxu1 %v17788_v8  ;;  %v5861_v22 = vpop.f32.mrf.mxu3  ;;  %v17816_v38 = vld [vmem:[#allocation117_spill] sm:$0xff] }
 0x71a   : > { %6162 = vmatpush.bf16.msra.mxu0 %v17787_v11  ;;  %v17817_v11 = vld [vmem:[#allocation118_spill] sm:$0xff] }
 0x71b   : > { %6399 = vmatpush.bf16.msrb.mxu2 %v17784_v4  ;;  %v17815_v4 = vld [vmem:[#allocation192_spill] sm:$0xff] }
 0x71c   : > { %6149 = vmatpush.bf16.msrb.mxu3 %v17789_v59  ;;  %6175 = vmatpush.bf16.msra.mxu1 %v17791_v23  ;;  %v5889_v24 = vpop.f32.mrf.mxu1  ;;  %v17818_v59 = vld [vmem:[#allocation111_spill] sm:$0xff]  ;;  %v17820_v23 = vld [vmem:[#allocation200_spill] sm:$0xff] }
 0x71e   : > { %6400 = vmatmul.bf16.vlgmr.msrb.gmra.mxu2 %v15137_v1  ;;  %6163 = vmatpush.bf16.msra.mxu0 %v17790_v18  ;;  %v15168_v10 = vpop.f32.mrf.mxu0  ;;  %v17819_v18 = vld [vmem:[#allocation196_spill] sm:$0xff] }
 0x71f   : > { %6518 = vmatpush.bf16.msra.mxu2 %v17801_v61  ;;  %v17832_v61 = vld [vmem:[#allocation214_spill] sm:$0xff] }
 0x720   : > { %6150 = vmatpush.bf16.msrb.mxu3 %v17792_v15  ;;  %6176 = vmatpush.bf16.msra.mxu1 %v17794_v26  ;;  %v15180_v27 = vpop.f32.mrf.mxu3  ;;  %v17821_v15 = vld [vmem:[#allocation121_spill] sm:$0xff] }
 0x721   : > { %v6139_v44 = vpop.f32.mrf.mxu2 }
 0x722   : > { %6164 = vmatpush.bf16.msra.mxu0 %v17793_v40  ;;  %v15172_v30 = vadd.f32 %v6139_v44, %v15089_v54  ;;  %v17822_v40 = vld [vmem:[#allocation122_spill] sm:$0xff] }
 0x723   : > { %6519 = vmatpush.bf16.msra.mxu2 %v17803_v42  ;;  %v17836_v42 = vld [vmem:[#allocation218_spill] sm:$0xff] }
 0x724   : > { %6151 = vmatpush.bf16.msrb.mxu3 %v17795_v13  ;;  %6177 = vmatpush.bf16.msra.mxu1 %v17797_v50  ;;  %v15189_v8 = vpop.f32.mrf.mxu1  ;;  %v17824_v50 = vld [vmem:[#allocation204_spill] sm:$0xff] }
 0x726   : > { %6165 = vmatpush.bf16.msra.mxu0 %v17796_v52  ;;  %v5931_v54 = vpop.f32.mrf.mxu0  ;;  %v17823_v52 = vld [vmem:[#allocation115_spill] sm:$0xff] }
 0x727   : > { %6520 = vmatpush.bf16.msra.mxu2 %v17804_v0  ;;  %6152 = vmatmul.bf16.vlgmr.msrb.gmra.mxu3 %v14968_v7  ;;  %v15184_v9 = vadd.f32 %v5931_v54, %v5875_v36  ;;  %v17838_v0 = vld [vmem:[#allocation223_spill] sm:$0xff]  ;;  %v17846_v54 = vld [vmem:[#allocation145_spill] sm:$0xff] }
 0x728   : > { %6210 = vmatpush.bf16.msra.mxu3 %v17806_v56  ;;  %6178 = vmatpush.bf16.msra.mxu1 %v17798_v63  ;;  %v17826_v63 = vld [vmem:[#allocation126_spill] sm:$0xff]  ;;  %v17839_v36 = vld [vmem:[#allocation135_spill] sm:$0xff] }
 0x729   : > { %6166 = vmatmul.bf16.vlgmr.msra.gmra.mxu0 %v14968_v7 }
 0x72a   : > { %6224 = vmatpush.bf16.msrb.mxu0 %v17807_v3  ;;  %v5917_v26 = vpop.f32.mrf.mxu3 }
 0x72b   : > { %6521 = vmatpush.bf16.msra.mxu2 %v17805_v39  ;;  %v15196_v13 = vadd.f32 %v5917_v26, %v5861_v22  ;;  %v17851_v26 = vld [vmem:[#allocation143_spill] sm:$0xff] }
 0x72c   : > { %6211 = vmatpush.bf16.msra.mxu3 %v17809_v28  ;;  %6179 = vmatpush.bf16.msra.mxu1 %v17799_v12  ;;  %v5945_v19 = vpop.f32.mrf.mxu1  ;;  %v17827_v12 = vld [vmem:[#allocation119_spill] sm:$0xff] }
 0x72d   : > { %v15203_v14 = vadd.f32 %v5945_v19, %v5889_v24 }
 0x72e   : > { %6225 = vmatpush.bf16.msrb.mxu0 %v17810_v58  ;;  %v15227_v39 = vpop.f32.mrf.mxu0 }
 0x72f   : > { %6522 = vmatpush.bf16.msra.mxu2 %v17808_v16  ;;  %6180 = vmatmul.bf16.vlgmr.msra.gmra.mxu1 %v14968_v7  ;;  %v15244_v16 = vpop.f32.mrf.mxu2 }
 0x730   : > { %6212 = vmatpush.bf16.msra.mxu3 %v17812_v20  ;;  %6238 = vmatpush.bf16.msrb.mxu1 %v17814_v48 }
 0x732   : > { %6226 = vmatpush.bf16.msrb.mxu0 %v17813_v33 }
 0x733   : > { %6523 = vmatpush.bf16.msra.mxu2 %v17811_v41 }
 0x734   : > { %6213 = vmatpush.bf16.msra.mxu3 %v17816_v38  ;;  %6239 = vmatpush.bf16.msrb.mxu1 %v17818_v59 }
 0x736   : > { %6227 = vmatpush.bf16.msrb.mxu0 %v17817_v11 }
 0x737   : > { %6524 = vmatpush.bf16.msra.mxu2 %v17815_v4 }
 0x738   : > { %6214 = vmatpush.bf16.msra.mxu3 %v17821_v15  ;;  %6240 = vmatpush.bf16.msrb.mxu1 %v17823_v52 }
 0x73a   : > { %6228 = vmatpush.bf16.msrb.mxu0 %v17822_v40 }
 0x73b   : > { %6525 = vmatpush.bf16.msra.mxu2 %v17819_v18 }
 0x73c   : > { %6215 = vmatpush.bf16.msra.mxu3 %v17825_v5  ;;  %6241 = vmatpush.bf16.msrb.mxu1 %v17827_v12 }
 0x73e   : > { %6229 = vmatpush.bf16.msrb.mxu0 %v17826_v63 }
 0x73f   : > { %6574 = vmatpush.bf16.msrb.mxu2 %v17820_v23 }
 0x740   : > { %6216 = vmatpush.bf16.msra.mxu3 %v17829_v17  ;;  %6242 = vmatpush.bf16.msrb.mxu1 %v17831_v55 }
 0x742   : > { %6230 = vmatpush.bf16.msrb.mxu0 %v17830_v49 }
 0x743   : > { %6575 = vmatpush.bf16.msrb.mxu2 %v17824_v50  ;;  %v17852_v50 = vld [vmem:[#allocation153_spill] sm:$0xff] }
 0x744   : > { %6217 = vmatpush.bf16.msra.mxu3 %v17833_v51  ;;  %6243 = vmatpush.bf16.msrb.mxu1 %v17835_v25 }
 0x746   : > { %6231 = vmatpush.bf16.msrb.mxu0 %v17834_v37  ;;  %v5988_v22 = vpop.f32.mrf.mxu0 }
 0x747   : > { %6576 = vmatpush.bf16.msrb.mxu2 %v17828_v32  ;;  %6218 = vmatmul.bf16.vlgmr.msra.gmra.mxu3 %v14968_v7  ;;  %v17855_v32 = vld [vmem:[#allocation157_spill] sm:$0xff] }
 0x748   : > { %6275 = vmatpush.bf16.msrb.mxu3 %v17806_v56  ;;  %6244 = vmatpush.bf16.msrb.mxu1 %v17837_v47  ;;  %v17841_v56 = vld [vmem:[#allocation234_spill] sm:$0xff] }
 0x749   : > { %6232 = vmatmul.bf16.vlgmr.msrb.gmra.mxu0 %v14968_v7 }
 0x74a   : > { %6289 = vmatpush.bf16.msra.mxu0 %v17807_v3  ;;  %v15236_v3 = vpop.f32.mrf.mxu3 }
 0x74b   : > { %6577 = vmatpush.bf16.msrb.mxu2 %v17832_v61  ;;  %v17857_v61 = vld [vmem:[#allocation151_spill] sm:$0xff] }
 0x74c   : > { %6276 = vmatpush.bf16.msrb.mxu3 %v17809_v28  ;;  %6245 = vmatpush.bf16.msrb.mxu1 %v17839_v36  ;;  %v17842_v28 = vld [vmem:[#allocation137_spill] sm:$0xff] }
 0x74e   : > { %6290 = vmatpush.bf16.msra.mxu0 %v17810_v58  ;;  %v17843_v58 = vld [vmem:[#allocation138_spill] sm:$0xff]  ;;  %v15254_v24 = vpop.f32.mrf.mxu0 }
 0x74f   : > { %6578 = vmatpush.bf16.msrb.mxu2 %v17836_v42  ;;  %6246 = vmatmul.bf16.vlgmr.msrb.gmra.mxu1 %v14968_v7  ;;  %v15241_v7 = vpop.f32.mrf.mxu1  ;;  %v17860_v42 = vld [vmem:[#allocation155_spill] sm:$0xff] }
 0x750   : > { %6277 = vmatpush.bf16.msrb.mxu3 %v17812_v20  ;;  %6303 = vmatpush.bf16.msra.mxu1 %v17814_v48  ;;  %v17844_v20 = vld [vmem:[#allocation141_spill] sm:$0xff]  ;;  %v17845_v48 = vld [vmem:[#allocation142_spill] sm:$0xff] }
 0x752   : > { %6291 = vmatpush.bf16.msra.mxu0 %v17813_v33  ;;  %v5974_v44 = vpop.f32.mrf.mxu3  ;;  %v15259_v33 = vpop.f32.mrf.mxu2 }
 0x753   : > { %6579 = vmatpush.bf16.msrb.mxu2 %v17838_v0  ;;  %v17862_v0 = vld [vmem:[#allocation166_spill] sm:$0xff] }
 0x754   : > { %6278 = vmatpush.bf16.msrb.mxu3 %v17816_v38  ;;  %6304 = vmatpush.bf16.msra.mxu1 %v17818_v59  ;;  %v17847_v38 = vld [vmem:[#allocation146_spill] sm:$0xff] }
 0x756   : > { %6292 = vmatpush.bf16.msra.mxu0 %v17817_v11  ;;  %v17848_v11 = vld [vmem:[#allocation139_spill] sm:$0xff] }
 0x757   : > { %6580 = vmatpush.bf16.msrb.mxu2 %v17840_v57  ;;  %v6002_v41 = vpop.f32.mrf.mxu1 }
 0x758   : > { %6279 = vmatpush.bf16.msrb.mxu3 %v17821_v15  ;;  %6305 = vmatpush.bf16.msra.mxu1 %v17823_v52  ;;  %v17849_v15 = vld [vmem:[#allocation149_spill] sm:$0xff] }
 0x75a   : > { %6293 = vmatpush.bf16.msra.mxu0 %v17822_v40  ;;  %v15263_v4 = vpop.f32.mrf.mxu3  ;;  %v17850_v40 = vld [vmem:[#allocation150_spill] sm:$0xff]  ;;  %v15277_v52 = vpop.f32.mrf.mxu2 }
 0x75b   : > { %6581 = vmatpush.bf16.msrb.mxu2 %v17841_v56 }
 0x75c   : > { %6280 = vmatpush.bf16.msrb.mxu3 %v17825_v5  ;;  %6306 = vmatpush.bf16.msra.mxu1 %v17827_v12  ;;  %v17853_v5 = vld [vmem:[#allocation154_spill] sm:$0xff]  ;;  %v17854_v12 = vld [vmem:[#allocation147_spill] sm:$0xff] }
 0x75e   : > { %6294 = vmatpush.bf16.msra.mxu0 %v17826_v63 }
 0x75f   : > { %v15269_v18 = vpop.f32.mrf.mxu1 }
 0x760   : > { %6281 = vmatpush.bf16.msrb.mxu3 %v17829_v17  ;;  %6307 = vmatpush.bf16.msra.mxu1 %v17831_v55  ;;  %v17856_v17 = vld [vmem:[#allocation158_spill] sm:$0xff] }
 0x762   : > { %6295 = vmatpush.bf16.msra.mxu0 %v17830_v49 }
 0x764   : > { %6282 = vmatpush.bf16.msrb.mxu3 %v17833_v51  ;;  %6308 = vmatpush.bf16.msra.mxu1 %v17835_v25  ;;  %v6270_v51 = vpop.f32.mrf.mxu2  ;;  %v17859_v25 = vld [vmem:[#allocation162_spill] sm:$0xff] }
 0x766   : > { %6296 = vmatpush.bf16.msra.mxu0 %v17834_v37  ;;  %v6044_v59 = vpop.f32.mrf.mxu0  ;;  %v17858_v37 = vld [vmem:[#allocation161_spill] sm:$0xff] }
 0x767   : > { %6283 = vmatmul.bf16.vlgmr.msrb.gmra.mxu3 %v15051_v31  ;;  %v15271_v23 = vadd.f32 %v6044_v59, %v5988_v22  ;;  %v17864_v22 = vld [vmem:[#allocation163_spill] sm:$0xff] }
 0x768   : > { %6341 = vmatpush.bf16.msra.mxu3 %v17842_v28  ;;  %6309 = vmatpush.bf16.msra.mxu1 %v17837_v47  ;;  %v17861_v47 = vld [vmem:[#allocation165_spill] sm:$0xff] }
 0x769   : > { %6297 = vmatmul.bf16.vlgmr.msra.gmra.mxu0 %v15051_v31 }
 0x76a   : > { %6355 = vmatpush.bf16.msrb.mxu0 %v17843_v58  ;;  %v6030_v63 = vpop.f32.mrf.mxu3 }
 0x76b   : > { %v15281_v19 = vadd.f32 %v6030_v63, %v5974_v44  ;;  %v17869_v63 = vld [vmem:[#allocation174_spill] sm:$0xff] }
 0x76c   : > { %6342 = vmatpush.bf16.msra.mxu3 %v17844_v20  ;;  %6310 = vmatpush.bf16.msra.mxu1 %v17839_v36  ;;  %v6058_v49 = vpop.f32.mrf.mxu1  ;;  %v17863_v36 = vld [vmem:[#allocation159_spill] sm:$0xff]  ;;  %v15301_v56 = vpop.f32.mrf.mxu2 }
 0x76d   : > { %v15286_v55 = vadd.f32 %v6058_v49, %v6002_v41 }
 0x76e   : > { %6356 = vmatpush.bf16.msrb.mxu0 %v17845_v48  ;;  %v15299_v57 = vpop.f32.mrf.mxu0 }
 0x76f   : > { %6311 = vmatmul.bf16.vlgmr.msra.gmra.mxu1 %v15051_v31 }
 0x770   : > { %6343 = vmatpush.bf16.msra.mxu3 %v17846_v54  ;;  %6369 = vmatpush.bf16.msrb.mxu1 %v17848_v11 }
 0x772   : > { %6357 = vmatpush.bf16.msrb.mxu0 %v17847_v38  ;;  %v15307_v44 = vpop.f32.mrf.mxu3 }
 0x774   : > { %6344 = vmatpush.bf16.msra.mxu3 %v17849_v15  ;;  %6370 = vmatpush.bf16.msrb.mxu1 %v17851_v26  ;;  %v15314_v41 = vpop.f32.mrf.mxu1 }
 0x776   : > { %6358 = vmatpush.bf16.msrb.mxu0 %v17850_v40 }
 0x778   : > { %6345 = vmatpush.bf16.msra.mxu3 %v17852_v50  ;;  %6371 = vmatpush.bf16.msrb.mxu1 %v17854_v12 }
 0x77a   : > { %6359 = vmatpush.bf16.msrb.mxu0 %v17853_v5 }
 0x77c   : > { %6346 = vmatpush.bf16.msra.mxu3 %v17855_v32  ;;  %6372 = vmatpush.bf16.msrb.mxu1 %v17857_v61 }
 0x77e   : > { %6360 = vmatpush.bf16.msrb.mxu0 %v17856_v17 }
 0x780   : > { %6347 = vmatpush.bf16.msra.mxu3 %v17858_v37  ;;  %6373 = vmatpush.bf16.msrb.mxu1 %v17860_v42 }
 0x782   : > { %6361 = vmatpush.bf16.msrb.mxu0 %v17859_v25 }
 0x784   : > { %6348 = vmatpush.bf16.msra.mxu3 %v17861_v47  ;;  %6374 = vmatpush.bf16.msrb.mxu1 %v17863_v36 }
 0x786   : > { %6362 = vmatpush.bf16.msrb.mxu0 %v17862_v0 }
 0x787   : > { %6349 = vmatmul.bf16.vlgmr.msra.gmra.mxu3 %v15051_v31 }
 0x788   : > { %6406 = vmatpush.bf16.msrb.mxu3 %v17842_v28  ;;  %6375 = vmatpush.bf16.msrb.mxu1 %v17864_v22  ;;  %v17865_v28 = vld [vmem:[#allocation167_spill] sm:$0xff] }
 0x789   : > { %6363 = vmatmul.bf16.vlgmr.msrb.gmra.mxu0 %v15051_v31 }
 0x78a   : > { %6420 = vmatpush.bf16.msra.mxu0 %v17843_v58  ;;  %v6102_v58 = vpop.f32.mrf.mxu0 }
 0x78c   : > { %6407 = vmatpush.bf16.msrb.mxu3 %v17844_v20  ;;  %6376 = vmatpush.bf16.msrb.mxu1 %v17865_v28  ;;  %v15317_v20 = vadd.f32 %v6102_v58, %v15184_v9 }
 0x78e   : > { %6421 = vmatpush.bf16.msra.mxu0 %v17845_v48  ;;  %v6336_v48 = vpop.f32.mrf.mxu2 }
 0x78f   : > { %6377 = vmatmul.bf16.vlgmr.msrb.gmra.mxu1 %v15051_v31  ;;  %v6116_v31 = vpop.f32.mrf.mxu1 }
 0x790   : > { %6408 = vmatpush.bf16.msrb.mxu3 %v17846_v54  ;;  %6434 = vmatpush.bf16.msra.mxu1 %v17848_v11  ;;  %v6088_v54 = vpop.f32.mrf.mxu3  ;;  %v15330_v9 = vadd.f32 %v6116_v31, %v15203_v14  ;;  %v17866_v14 = vld [vmem:[#allocation169_spill] sm:$0xff] }
 0x791   : > { %v17879_v31 = vld [vmem:[#allocation189_spill] sm:$0xff] }
 0x792   : > { %6422 = vmatpush.bf16.msra.mxu0 %v17847_v38  ;;  %v15324_v38 = vadd.f32 %v6088_v54, %v15196_v13  ;;  %v6252_v13 = vadd.f32 %v15259_v33, %v15121_v53  ;;  %v15349_v33 = vpop.f32.mrf.mxu0 }
 0x794   : > { %6409 = vmatpush.bf16.msrb.mxu3 %v17849_v15  ;;  %6435 = vmatpush.bf16.msra.mxu1 %v17851_v26  ;;  %v6383_v59 = vadd.f32 %v6336_v48, %v6252_v13  ;;  %v17867_v15 = vld [vmem:[#allocation170_spill] sm:$0xff] }
 0x795   : > { %v17877_v48 = vld [vmem:[#allocation186_spill] sm:$0xff] }
 0x796   : > { %6423 = vmatpush.bf16.msra.mxu0 %v17850_v40  ;;  %v15333_v11 = vpop.f32.mrf.mxu2  ;;  %v6317_v40 = vadd.f32 %v6270_v51, %v15172_v30  ;;  %v6456_v53 = vadd.f32 %v6383_v59, %v17461_v29  ;;  %v17880_v59 = vld [vmem:[#allocation190_spill] sm:$0xff] }
 0x798   : > { %6410 = vmatpush.bf16.msrb.mxu3 %v17852_v50  ;;  %6436 = vmatpush.bf16.msra.mxu1 %v17854_v12  ;;  %v15356_v49 = vpop.f32.mrf.mxu3 }
 0x79a   : > { %6424 = vmatpush.bf16.msra.mxu0 %v17853_v5  ;;  %v17868_v5 = vld [vmem:[#allocation173_spill] sm:$0xff] }
 0x79c   : > { %6411 = vmatpush.bf16.msrb.mxu3 %v17855_v32  ;;  %6437 = vmatpush.bf16.msra.mxu1 %v17857_v61  ;;  %v6464_v32 = vmax.f32 %v6456_v53, 0.0  ;;  %v17871_v61 = vld [vmem:[#allocation178_spill] sm:$0xff] }
 0x79d   : > { %v17886_v53 = vld [vmem:[#allocation198_spill] sm:$0xff] }
 0x79e   : > { %6425 = vmatpush.bf16.msra.mxu0 %v17856_v17  ;;  %v17870_v17 = vld [vmem:[#allocation177_spill] sm:$0xff] }
 0x7a0   : > { %6412 = vmatpush.bf16.msrb.mxu3 %v17858_v37  ;;  %6438 = vmatpush.bf16.msra.mxu1 %v17860_v42  ;;  %v17872_v37 = vld [vmem:[#allocation171_spill] sm:$0xff]  ;;  %v17873_v42 = vld [vmem:[#allocation181_spill] sm:$0xff] }
 0x7a1   : > { %v6401_v26 = vpop.f32.mrf.mxu2 }
 0x7a2   : > { %6426 = vmatpush.bf16.msra.mxu0 %v17859_v25  ;;  %v6448_v50 = vadd.f32 %v6401_v26, %v6317_v40  ;;  %v17883_v40 = vld [vmem:[#allocation194_spill] sm:$0xff]  ;;  %v17884_v26 = vld [vmem:[#allocation187_spill] sm:$0xff] }
 0x7a4   : > { %6413 = vmatpush.bf16.msrb.mxu3 %v17861_v47  ;;  %6439 = vmatpush.bf16.msra.mxu1 %v17863_v36  ;;  %v6472_v12 = vadd.f32 %v6448_v50, %v17461_v29  ;;  %v15365_v47 = vpop.f32.mrf.mxu1  ;;  %v17874_v36 = vld [vmem:[#allocation182_spill] sm:$0xff]  ;;  %v17887_v50 = vld [vmem:[#allocation201_spill] sm:$0xff] }
 0x7a6   : > { %6427 = vmatpush.bf16.msra.mxu0 %v17862_v0  ;;  %v6480_v30 = vmax.f32 %v6472_v12, 0.0  ;;  %v6167_v25 = vpop.f32.mrf.mxu0  ;;  %v17891_v12 = vld [vmem:[#allocation206_spill] sm:$0xff] }
 0x7a7   : > { %6414 = vmatmul.bf16.vlgmr.msrb.gmra.mxu3 %v15137_v1  ;;  %v15368_v0 = vadd.f32 %v6167_v25, %v15271_v23  ;;  %v17897_v25 = vld [vmem:[#allocation215_spill] sm:$0xff] }
 0x7a8   : > { %6532 = vmatpush.bf16.msra.mxu3 %v17866_v14  ;;  %6440 = vmatpush.bf16.msra.mxu1 %v17864_v22  ;;  %v15360_v51 = vmax.f32 %v6464_v32, %v6480_v30  ;;  %v17875_v22 = vld [vmem:[#allocation175_spill] sm:$0xff]  ;;  %v17893_v30 = vld [vmem:[#allocation210_spill] sm:$0xff] }
 0x7a9   : > { %6428 = vmatmul.bf16.vlgmr.msra.gmra.mxu0 %v15137_v1  ;;  %v17881_v14 = vld [vmem:[#allocation183_spill] sm:$0xff] }
 0x7aa   : > { %6546 = vmatpush.bf16.msrb.mxu0 %v17867_v15  ;;  %v6153_v58 = vpop.f32.mrf.mxu3  ;;  %v17882_v15 = vld [vmem:[#allocation193_spill] sm:$0xff]  ;;  %v17892_v32 = vld [vmem:[#allocation195_spill] sm:$0xff] }
 0x7ab   : > { %v15375_v54 = vadd.f32 %v6153_v58, %v15281_v19  ;;  %v17885_v19 = vld [vmem:[#allocation197_spill] sm:$0xff] }
 0x7ac   : > { %6533 = vmatpush.bf16.msra.mxu3 %v17868_v5  ;;  %6441 = vmatpush.bf16.msra.mxu1 %v17865_v28  ;;  %v17876_v28 = vld [vmem:[#allocation185_spill] sm:$0xff]  ;;  %v6181_v13 = vpop.f32.mrf.mxu1  ;;  %v17888_v5 = vld [vmem:[#allocation202_spill] sm:$0xff] }
 0x7ad   : > { %v15381_v23 = vadd.f32 %v6181_v13, %v15286_v55  ;;  %v17890_v55 = vld [vmem:[#allocation205_spill] sm:$0xff]  ;;  %v17906_v13 = vld [vmem:[#allocation231_spill] sm:$0xff] }
 0x7ae   : > { %6547 = vmatpush.bf16.msrb.mxu0 %v17869_v63  ;;  %v17889_v63 = vld [vmem:[#allocation191_spill] sm:$0xff]  ;;  %v17902_v58 = vld [vmem:[#allocation213_spill] sm:$0xff] }
 0x7af   : > { %6442 = vmatmul.bf16.vlgmr.msra.gmra.mxu1 %v15137_v1  ;;  %v17878_v1 = vld [vmem:[#allocation179_spill] sm:$0xff] }
 0x7b0   : > { %6534 = vmatpush.bf16.msra.mxu3 %v17870_v17  ;;  %6560 = vmatpush.bf16.msrb.mxu1 %v17872_v37  ;;  %v17894_v17 = vld [vmem:[#allocation212_spill] sm:$0xff]  ;;  %v17896_v37 = vld [vmem:[#allocation203_spill] sm:$0xff] }
 0x7b2   : > { %6548 = vmatpush.bf16.msrb.mxu0 %v17871_v61  ;;  %v17895_v61 = vld [vmem:[#allocation199_spill] sm:$0xff] }
 0x7b4   : > { %6535 = vmatpush.bf16.msra.mxu3 %v17873_v42  ;;  %6561 = vmatpush.bf16.msrb.mxu1 %v17875_v22  ;;  %v17898_v42 = vld [vmem:[#allocation216_spill] sm:$0xff]  ;;  %v17900_v22 = vld [vmem:[#allocation219_spill] sm:$0xff] }
 0x7b6   : > { %6549 = vmatpush.bf16.msrb.mxu0 %v17874_v36  ;;  %v17899_v36 = vld [vmem:[#allocation207_spill] sm:$0xff] }
 0x7b8   : > { %6536 = vmatpush.bf16.msra.mxu3 %v17876_v28  ;;  %6562 = vmatpush.bf16.msrb.mxu1 %v17878_v1  ;;  %v17901_v28 = vld [vmem:[#allocation220_spill] sm:$0xff] }
 0x7b9   : > { %v17904_v1 = vld [vmem:[#allocation228_spill] sm:$0xff] }
 0x7ba   : > { %6550 = vmatpush.bf16.msrb.mxu0 %v17877_v48  ;;  %v17903_v48 = vld [vmem:[#allocation225_spill] sm:$0xff] }
 0x7bc   : > { %6537 = vmatpush.bf16.msra.mxu3 %v17879_v31  ;;  %6563 = vmatpush.bf16.msrb.mxu1 %v17881_v14  ;;  %v17905_v31 = vld [vmem:[#allocation217_spill] sm:$0xff] }
 0x7bd   : > { %v17908_v14 = vld [vmem:[#allocation221_spill] sm:$0xff] }
 0x7be   : > { %6551 = vmatpush.bf16.msrb.mxu0 %v17880_v59  ;;  %v17907_v59 = vld [vmem:[#allocation232_spill] sm:$0xff] }
 0x7c0   : > { %6538 = vmatpush.bf16.msra.mxu3 %v17882_v15  ;;  %6564 = vmatpush.bf16.msrb.mxu1 %v17884_v26  ;;  %v17909_v15 = vld [vmem:[#allocation235_spill] sm:$0xff]  ;;  %v17911_v26 = vld [vmem:[#allocation229_spill] sm:$0xff] }
 0x7c2   : > { %6552 = vmatpush.bf16.msrb.mxu0 %v17883_v40  ;;  %v17910_v40 = vld [vmem:[#allocation236_spill] sm:$0xff] }
 0x7c4   : > { %6539 = vmatpush.bf16.msra.mxu3 %v17885_v19  ;;  %6565 = vmatpush.bf16.msrb.mxu1 %v17889_v63  ;;  %v17912_v19 = vld [vmem:[#allocation233_spill] sm:$0xff] }
 0x7c6   : > { %6553 = vmatpush.bf16.msrb.mxu0 %v17886_v53  ;;  %v6169_v53 = vpop.f32.mrf.mxu0 }
 0x7c8   : > { %6588 = vmatpush.bf16.msrb.mxu3 %v17887_v50  ;;  %6566 = vmatpush.bf16.msrb.mxu1 %v17892_v32  ;;  %v17913_v50 = vld [vmem:[#allocation237_spill] sm:$0xff] }
 0x7ca   : > { %6602 = vmatpush.bf16.msra.mxu0 %v17888_v5  ;;  %v15416_v5 = vpop.f32.mrf.mxu3 }
 0x7cc   : > { %6589 = vmatpush.bf16.msrb.mxu3 %v17890_v55  ;;  %6567 = vmatpush.bf16.msrb.mxu1 %v17895_v61  ;;  %v15418_v55 = vpop.f32.mrf.mxu1 }
 0x7ce   : > { %6603 = vmatpush.bf16.msra.mxu0 %v17891_v12  ;;  %v6233_v63 = vpop.f32.mrf.mxu0 }
 0x7d0   : > { %6590 = vmatpush.bf16.msrb.mxu3 %v17893_v30  ;;  %6616 = vmatpush.bf16.msra.mxu1 %v17896_v37 }
 0x7d2   : > { %6604 = vmatpush.bf16.msra.mxu0 %v17894_v17  ;;  %v6219_v12 = vpop.f32.mrf.mxu3 }
 0x7d4   : > { %6591 = vmatpush.bf16.msrb.mxu3 %v17897_v25  ;;  %6617 = vmatpush.bf16.msra.mxu1 %v17899_v36  ;;  %v6247_v32 = vpop.f32.mrf.mxu1 }
 0x7d6   : > { %6605 = vmatpush.bf16.msra.mxu0 %v17898_v42  ;;  %v6235_v30 = vpop.f32.mrf.mxu0 }
 0x7d8   : > { %6592 = vmatpush.bf16.msrb.mxu3 %v17900_v22  ;;  %6618 = vmatpush.bf16.msra.mxu1 %v17902_v58 }
 0x7da   : > { %6606 = vmatpush.bf16.msra.mxu0 %v17901_v28  ;;  %v15420_v17 = vpop.f32.mrf.mxu3 }
 0x7dc   : > { %6593 = vmatpush.bf16.msrb.mxu3 %v17903_v48  ;;  %6619 = vmatpush.bf16.msra.mxu1 %v17905_v31  ;;  %v15422_v37 = vpop.f32.mrf.mxu1 }
 0x7de   : > { %6607 = vmatpush.bf16.msra.mxu0 %v17904_v1 }
 0x7e0   : > { %6594 = vmatpush.bf16.msrb.mxu3 %v17906_v13  ;;  %6620 = vmatpush.bf16.msra.mxu1 %v17908_v14  ;;  %v6019_v13 = vadd.f32 %v15104_v2, %v15078_v21  ;;  %v6254_v14 = vadd.f32 %v6233_v63, %v15317_v20  ;;  %v6403_v21 = vpop.f32.mrf.mxu2  ;;  %v6253_v2 = vadd.f32 %v6219_v12, %v15324_v38 }
 0x7e2   : > { %6608 = vmatpush.bf16.msra.mxu0 %v17907_v59  ;;  %v5906_v59 = vadd.f32 %v15055_v46, %v15024_v62 }
 0x7e4   : > { %6595 = vmatpush.bf16.msrb.mxu3 %v17909_v15  ;;  %6621 = vmatpush.bf16.msra.mxu1 %v17911_v26  ;;  %v6190_v15 = vadd.f32 %v15244_v16, %v6019_v13 }
 0x7e6   : > { %6609 = vmatpush.bf16.msra.mxu0 %v17910_v40  ;;  %v6298_v61 = vpop.f32.mrf.mxu0  ;;  %v6321_v46 = vadd.f32 %v15301_v56, %v6190_v15  ;;  %v5920_v56 = vadd.f32 %v15236_v3, %v15180_v27 }
 0x7e7   : > { %v6319_v60 = vadd.f32 %v6298_v61, %v15368_v0  ;;  %v6255_v61 = vadd.f32 %v6247_v32, %v15330_v9  ;;  %v6061_v9 = vadd.f32 %v15314_v41, %v15269_v18 }
 0x7e8   : > { %6622 = vmatpush.bf16.msra.mxu1 %v17912_v19  ;;  %v6125_v19 = vadd.f32 %v15153_v43, %v5906_v59  ;;  %v6047_v43 = vadd.f32 %v15299_v57, %v15254_v24  ;;  %v6452_v0 = vadd.f32 %v6403_v21, %v6321_v46 }
 0x7e9   : > { %v6193_v21 = vadd.f32 %v15418_v55, %v6061_v9 }
 0x7ea   : > { %v6284_v25 = vpop.f32.mrf.mxu3  ;;  %v6256_v6 = vadd.f32 %v15277_v52, %v6125_v19  ;;  %v6192_v12 = vadd.f32 %v6169_v53, %v6047_v43  ;;  %v6126_v53 = vadd.f32 %v15356_v49, %v5920_v56 }
 0x7ec   : > { %6623 = vmatpush.bf16.msra.mxu1 %v17913_v50  ;;  %v6312_v42 = vpop.f32.mrf.mxu1  ;;  %v5934_v50 = vadd.f32 %v15227_v39, %v15168_v10  ;;  %v6387_v10 = vadd.f32 %v15333_v11, %v6256_v6 }
 0x7ee   : > { %v6300_v36 = vpop.f32.mrf.mxu0  ;;  %v6127_v16 = vadd.f32 %v15349_v33, %v5934_v50  ;;  %v5948_v33 = vadd.f32 %v15241_v7, %v15189_v8  ;;  %v6460_v3 = vadd.f32 %v6387_v10, %v17461_v29  ;;  %v6476_v8 = vadd.f32 %v6452_v0, %v17461_v29 }
 0x7ef   : > { %v6323_v7 = vadd.f32 %v6300_v36, %v6192_v12 }
 0x7f0   : > { %v6258_v52 = vadd.f32 %v6235_v30, %v6127_v16  ;;  %v6033_v30 = vadd.f32 %v15307_v44, %v15263_v4  ;;  %v6468_v15 = vmax.f32 %v6460_v3, 0.0  ;;  %v17915_v3 = vld [vmem:[#allocation209_spill] sm:$0xff] }
 0x7f2   : > { %v15424_v22 = vpop.f32.mrf.mxu3  ;;  %v6191_v29 = vadd.f32 %v15416_v5, %v6033_v30 }
 0x7f4   : > { %v15426_v58 = vpop.f32.mrf.mxu1  ;;  %v6322_v19 = vadd.f32 %v15424_v22, %v6191_v29  ;;  %v17922_v29 = vld [vmem:[#allocation248_spill] sm:$0xff] }
 0x806   : > { %v6364_v28 = vpop.f32.mrf.mxu0 }
 0x807   : > { %v6385_v40 = vadd.f32 %v6364_v28, %v6254_v14 }
 0x809   : > { %v6458_v20 = vadd.f32 %v6385_v40, %v17507_v34 }
 0x80a   : > { %v6350_v48 = vpop.f32.mrf.mxu3 }
 0x80b   : > { %v6384_v39 = vadd.f32 %v6350_v48, %v6253_v2  ;;  %v6466_v13 = vmax.f32 %v6458_v20, 0.0  ;;  %v6320_v48 = vadd.f32 %v6312_v42, %v15381_v23  ;;  %v6257_v23 = vadd.f32 %v15420_v17, %v6126_v53  ;;  %v17917_v53 = vld [vmem:[#allocation242_spill] sm:$0xff] }
 0x80c   : > { %v6378_v1 = vpop.f32.mrf.mxu1 }
 0x80d   : > { %v6386_v57 = vadd.f32 %v6378_v1, %v6255_v61  ;;  %v6457_v32 = vadd.f32 %v6384_v39, %v17506_v35 }
 0x80e   : > { %v6366_v31 = vpop.f32.mrf.mxu0 }
 0x80f   : > { %v6389_v24 = vadd.f32 %v6366_v31, %v6258_v52  ;;  %v6459_v41 = vadd.f32 %v6386_v57, %v17508_v45  ;;  %v6465_v36 = vmax.f32 %v6457_v32, 0.0 }
 0x811   : > { %v6462_v18 = vadd.f32 %v6389_v24, %v17507_v34  ;;  %v6467_v5 = vmax.f32 %v6459_v41, 0.0  ;;  %v17918_v41 = vld [vmem:[#allocation244_spill] sm:$0xff] }
 0x812   : > { %v15434_v26 = vpop.f32.mrf.mxu3 }
 0x813   : > { %v6470_v2 = vmax.f32 %v6462_v18, 0.0  ;;  %v6388_v16 = vadd.f32 %v15434_v26, %v6257_v23  ;;  %v17928_v23 = vld [vmem:[#allocation245_spill] sm:$0xff] }
 0x814   : > { %v6380_v63 = vpop.f32.mrf.mxu1 }
 0x815   : > { %v6461_v55 = vadd.f32 %v6388_v16, %v17506_v35  ;;  %v17939_v16 = vld [vmem:[#allocation266_spill] sm:$0xff] }
 0x817   : > { %v6469_v12 = vmax.f32 %v6461_v55, 0.0  ;;  %v17950_v55 = vld [vmem:[#allocation265_spill] sm:$0xff] }
 0x826   : > { %v6429_v62 = vpop.f32.mrf.mxu0 }
 0x827   : > { %v6450_v28 = vadd.f32 %v6429_v62, %v6319_v60  ;;  %v6318_v60 = vadd.f32 %v6284_v25, %v15375_v54  ;;  %v6128_v25 = vadd.f32 %v15365_v47, %v5948_v33  ;;  %v6484_v47 = vmax.f32 %v6476_v8, 0.0 }
 0x829   : > { %v6474_v38 = vadd.f32 %v6450_v28, %v17507_v34  ;;  %v6259_v40 = vadd.f32 %v15422_v37, %v6128_v25  ;;  %v6492_v43 = vmax.f32 %v6468_v15, %v6484_v47  ;;  %v6324_v37 = vadd.f32 %v15426_v58, %v6193_v21  ;;  %v17926_v15 = vld [vmem:[#allocation252_spill] sm:$0xff]  ;;  %v17927_v47 = vld [vmem:[#allocation254_spill] sm:$0xff] }
 0x82a   : > { %v6415_v11 = vpop.f32.mrf.mxu3  ;;  %v17934_v21 = vld [vmem:[#allocation260_spill] sm:$0xff] }
 0x82b   : > { %v6482_v6 = vmax.f32 %v6474_v38, 0.0  ;;  %v6449_v27 = vadd.f32 %v6415_v11, %v6318_v60  ;;  %v6390_v20 = vadd.f32 %v6380_v63, %v6259_v40  ;;  %v17930_v40 = vld [vmem:[#allocation256_spill] sm:$0xff] }
 0x82c   : > { %v6443_v59 = vpop.f32.mrf.mxu1 }
 0x82d   : > { %v6490_v54 = vmax.f32 %v6466_v13, %v6482_v6  ;;  %v6473_v4 = vadd.f32 %v6449_v27, %v17506_v35  ;;  %v6451_v49 = vadd.f32 %v6443_v59, %v6320_v48  ;;  %v6463_v52 = vadd.f32 %v6390_v20, %v17508_v45  ;;  %v17921_v59 = vld [vmem:[#allocation211_spill] sm:$0xff]  ;;  %v17940_v20 = vld [vmem:[#allocation268_spill] sm:$0xff] }
 0x82e   : > { %v6431_v44 = vpop.f32.mrf.mxu0 }
 0x82f   : > { %v6496_v1 = vmax.f32 %v15360_v51, %v6490_v54  ;;  %v6454_v31 = vadd.f32 %v6431_v44, %v6323_v7  ;;  %v6481_v14 = vmax.f32 %v6473_v4, 0.0  ;;  %v6475_v51 = vadd.f32 %v6451_v49, %v17508_v45  ;;  %v17916_v54 = vld [vmem:[#allocation240_spill] sm:$0xff]  ;;  %v17925_v49 = vld [vmem:[#allocation243_spill] sm:$0xff] }
 0x830   : > { %v6471_v60 = vmax.f32 %v6463_v52, 0.0  ;;  %v17951_v52 = vld [vmem:[#allocation267_spill] sm:$0xff] }
 0x831   : > { %v6478_v42 = vadd.f32 %v6454_v31, %v17507_v34  ;;  %v6489_v50 = vmax.f32 %v6465_v36, %v6481_v14  ;;  %v6483_v28 = vmax.f32 %v6475_v51, 0.0  ;;  %v17920_v31 = vld [vmem:[#allocation224_spill] sm:$0xff]  ;;  %v17923_v36 = vld [vmem:[#allocation250_spill] sm:$0xff]  ;;  %v17924_v14 = vld [vmem:[#allocation241_spill] sm:$0xff] }
 0x832   : > { %v6417_v46 = vpop.f32.mrf.mxu3  ;;  %v17933_v51 = vld [vmem:[#allocation251_spill] sm:$0xff] }
 0x833   : > { %v6486_v62 = vmax.f32 %v6478_v42, 0.0  ;;  %v6453_v17 = vadd.f32 %v6417_v46, %v6322_v19  ;;  %v6491_v10 = vmax.f32 %v6467_v5, %v6483_v28  ;;  %v17929_v42 = vld [vmem:[#allocation247_spill] sm:$0xff]  ;;  %v17931_v19 = vld [vmem:[#allocation258_spill] sm:$0xff]  ;;  %v17936_v5 = vld [vmem:[#allocation253_spill] sm:$0xff] }
 0x834   : > { %v6445_v0 = vpop.f32.mrf.mxu1  ;;  %v17938_v46 = vld [vmem:[#allocation264_spill] sm:$0xff]  ;;  %v17941_v28 = vld [vmem:[#allocation270_spill] sm:$0xff] }
 0x835   : > { %v6494_v34 = vmax.f32 %v6470_v2, %v6486_v62  ;;  %v6477_v22 = vadd.f32 %v6453_v17, %v17506_v35  ;;  %v6497_v61 = vmax.f32 %v6489_v50, %v6491_v10  ;;  %v6455_v38 = vadd.f32 %v6445_v0, %v6324_v37  ;;  %v17932_v50 = vld [vmem:[#allocation249_spill] sm:$0xff]  ;;  %v17935_v2 = vld [vmem:[#allocation262_spill] sm:$0xff]  ;;  %v17937_v62 = vld [vmem:[#allocation255_spill] sm:$0xff] }
 0x836   : > { %v17942_v17 = vld [vmem:[#allocation257_spill] sm:$0xff]  ;;  %v17945_v37 = vld [vmem:[#allocation274_spill] sm:$0xff] }
 0x837   : > { %v6498_v39 = vmax.f32 %v6492_v43, %v6494_v34  ;;  %v6485_v26 = vmax.f32 %v6477_v22, 0.0  ;;  %v6479_v63 = vadd.f32 %v6455_v38, %v17508_v45  ;;  %v17914_v45 = vld [vmem:[#allocation222_spill] sm:$0xff]  ;;  %v17943_v43 = vld [vmem:[#allocation259_spill] sm:$0xff]  ;;  %v17944_v34 = vld [vmem:[#allocation272_spill] sm:$0xff] }
 0x838   : > { %v17946_v10 = vld [vmem:[#allocation261_spill] sm:$0xff]  ;;  %v17947_v22 = vld [vmem:[#allocation263_spill] sm:$0xff]  ;;  %v17949_v0 = vld [vmem:[#allocation278_spill] sm:$0xff] }
 0x839   : > { %v15481_v56 = vpack.c.bf16 %v6498_v39, %v6496_v1  ;;  %v6487_v13 = vmax.f32 %v6479_v63, 0.0  ;;  %v6493_v35 = vmax.f32 %v6469_v12, %v6485_v26  ;;  %v17919_v1 = vld [vmem:[#allocation246_spill] sm:$0xff]  ;;  %v17948_v39 = vld [vmem:[#allocation276_spill] sm:$0xff]  ;;  %v17953_v38 = vld [vmem:[#allocation271_spill] sm:$0xff] }
 0x83a   : > { %v17954_v26 = vld [vmem:[#allocation280_spill] sm:$0xff]  ;;  %v17955_v63 = vld [vmem:[#allocation282_spill] sm:$0xff] }
 0x83b   : > { %v6503_v33 = vshrl.u32 %v15481_v56, 16  ;;  %v6505_v58 = vshll.u32 %v15481_v56, 16  ;;  %v6495_v11 = vmax.f32 %v6471_v60, %v6487_v13  ;;  %v17958_v12 = vld [vmem:[#allocation284_spill] sm:$0xff]  ;;  %v17959_v60 = vld [vmem:[#allocation286_spill] sm:$0xff]  ;;  %v17960_v13 = vld [vmem:[#allocation277_spill] sm:$0xff] }
 0x83d   : > { %v6507_v24 = vrot.slane %v6505_v58, 1  ;;  %v6782_v57 = vrot.slane %v6503_v33, 1  ;;  %v6783_v6 = vrot.slane %v6505_v58, 2  ;;  %v6499_v32 = vmax.f32 %v6493_v35, %v6495_v11  ;;  %v17957_v58 = vld [vmem:[#allocation275_spill] sm:$0xff]  ;;  %v17964_v35 = vld [vmem:[#allocation281_spill] sm:$0xff] }
 0x83e   : > { %v17965_v11 = vld [vmem:[#allocation283_spill] sm:$0xff] }
 0x83f   : > { %v6508_v30 = vor.u32 %v6507_v24, %v6503_v33  ;;  %v15486_v9 = vor.u32 %v6783_v6, %v6782_v57  ;;  %v15488_v27 = vpack.c.bf16 %v6499_v32, %v6497_v61  ;;  %v17952_v61 = vld [vmem:[#allocation269_spill] sm:$0xff]  ;;  %v17961_v24 = vld [vmem:[#allocation279_spill] sm:$0xff]  ;;  %v17962_v57 = vld [vmem:[#allocation288_spill] sm:$0xff] }
 0x840   : > { %v17956_v33 = vld [vmem:[#allocation273_spill] sm:$0xff]  ;;  %v17963_v6 = vld [vmem:[#allocation290_spill] sm:$0xff] }
 0x841   : > { %6526 = vmatmul.bf16.vlgmr.msra.gmra.mxu2 %v6508_v30  ;;  %6554 = vmatmul.bf16.vlgmr.msrb.gmra.mxu0 %v6508_v30  ;;  %v6510_v8 = vshrl.u32 %v15488_v27, 16  ;;  %v6512_v7 = vshll.u32 %v15488_v27, 16  ;;  %v17967_v32 = vld [vmem:[#allocation294_spill] sm:$0xff] }
 0x842   : > { %6630 = vmatpush.bf16.msra.mxu2 %v17914_v45  ;;  %6658 = vmatpush.bf16.msrb.mxu0 %v17915_v3  ;;  %v17968_v45 = vld [vmem:[#allocation285_spill] sm:$0xff]  ;;  %v17969_v3 = vld [vmem:[#allocation287_spill] sm:$0xff] }
 0x843   : > { %v6514_v25 = vrot.slane %v6512_v7, 1  ;;  %v6785_v48 = vrot.slane %v6510_v8, 1  ;;  %v6786_v4 = vrot.slane %v6512_v7, 2  ;;  %v17971_v7 = vld [vmem:[#allocation298_spill] sm:$0xff] }
 0x845   : > { %v6515_v44 = vor.u32 %v6514_v25, %v6510_v8  ;;  %v15496_v18 = vor.u32 %v6786_v4, %v6785_v48  ;;  %v17970_v8 = vld [vmem:[#allocation296_spill] sm:$0xff]  ;;  %v6688_v25 = vrot.slane %v15481_v56, 1  ;;  %v17974_v48 = vld [vmem:[#allocation289_spill] sm:$0xff]  ;;  %v17975_v4 = vld [vmem:[#allocation291_spill] sm:$0xff] }
 0x846   : > { %6631 = vmatpush.bf16.msra.mxu2 %v17916_v54  ;;  %6659 = vmatpush.bf16.msrb.mxu0 %v17917_v53  ;;  %v17972_v54 = vld [vmem:[#allocation300_spill] sm:$0xff]  ;;  %v17973_v53 = vld [vmem:[#allocation302_spill] sm:$0xff] }
 0x847   : > { %6540 = vmatmul.bf16.vlgmr.msra.gmra.mxu3 %v6515_v44  ;;  %6568 = vmatmul.bf16.vlgmr.msrb.gmra.mxu1 %v6515_v44 }
 0x848   : > { %6644 = vmatpush.bf16.msra.mxu3 %v17920_v31  ;;  %6672 = vmatpush.bf16.msrb.mxu1 %v17921_v59  ;;  %v17979_v31 = vld [vmem:[#allocation295_spill] sm:$0xff]  ;;  %v17980_v59 = vld [vmem:[#allocation308_spill] sm:$0xff] }
 0x84a   : > { %6632 = vmatpush.bf16.msra.mxu2 %v17918_v41  ;;  %6660 = vmatpush.bf16.msrb.mxu0 %v17919_v1  ;;  %v17977_v41 = vld [vmem:[#allocation306_spill] sm:$0xff]  ;;  %v17978_v1 = vld [vmem:[#allocation293_spill] sm:$0xff] }
 0x84c   : > { %6645 = vmatpush.bf16.msra.mxu3 %v17924_v14  ;;  %6673 = vmatpush.bf16.msrb.mxu1 %v17925_v49  ;;  %v17983_v14 = vld [vmem:[#allocation299_spill] sm:$0xff]  ;;  %v17984_v49 = vld [vmem:[#allocation301_spill] sm:$0xff] }
 0x84e   : > { %6633 = vmatpush.bf16.msra.mxu2 %v17922_v29  ;;  %6661 = vmatpush.bf16.msrb.mxu0 %v17923_v36  ;;  %v17981_v29 = vld [vmem:[#allocation310_spill] sm:$0xff]  ;;  %v17982_v36 = vld [vmem:[#allocation297_spill] sm:$0xff] }
 0x850   : > { %6646 = vmatpush.bf16.msra.mxu3 %v17928_v23  ;;  %6674 = vmatpush.bf16.msrb.mxu1 %v17929_v42  ;;  %v17986_v23 = vld [vmem:[#allocation312_spill] sm:$0xff]  ;;  %v17987_v42 = vld [vmem:[#allocation314_spill] sm:$0xff] }
 0x851   : > { %6582 = vmatmul.bf16.vlgmr.msrb.gmra.mxu2 %v6508_v30  ;;  %6610 = vmatmul.bf16.vlgmr.msra.gmra.mxu0 %v15481_v56  ;;  %v17966_v30 = vld [vmem:[#allocation292_spill] sm:$0xff] }
 0x852   : > { %6634 = vmatpush.bf16.msra.mxu2 %v17926_v15  ;;  %6662 = vmatpush.bf16.msrb.mxu0 %v17927_v47  ;;  %v17985_v15 = vld [vmem:[#allocation303_spill] sm:$0xff]  ;;  %v6689_v47 = vrot.slane %v15488_v27, 1 }
 0x854   : > { %6647 = vmatpush.bf16.msra.mxu3 %v17932_v50  ;;  %6675 = vmatpush.bf16.msrb.mxu1 %v17933_v51  ;;  %v17990_v50 = vld [vmem:[#allocation316_spill] sm:$0xff]  ;;  %v17991_v51 = vld [vmem:[#allocation318_spill] sm:$0xff] }
 0x856   : > { %6635 = vmatpush.bf16.msra.mxu2 %v17930_v40  ;;  %6663 = vmatpush.bf16.msrb.mxu0 %v17931_v19  ;;  %v17988_v40 = vld [vmem:[#allocation305_spill] sm:$0xff]  ;;  %v17989_v19 = vld [vmem:[#allocation307_spill] sm:$0xff] }
 0x857   : > { %6596 = vmatmul.bf16.vlgmr.msrb.gmra.mxu3 %v6515_v44  ;;  %6624 = vmatmul.bf16.vlgmr.msra.gmra.mxu1 %v15488_v27  ;;  %v17976_v44 = vld [vmem:[#allocation304_spill] sm:$0xff] }
 0x858   : > { %6648 = vmatpush.bf16.msra.mxu3 %v17936_v5  ;;  %6676 = vmatpush.bf16.msrb.mxu1 %v17937_v62  ;;  %v17994_v5 = vld [vmem:[#allocation320_spill] sm:$0xff]  ;;  %v17995_v62 = vld [vmem:[#allocation322_spill] sm:$0xff] }
 0x85a   : > { %6636 = vmatpush.bf16.msra.mxu2 %v17934_v21  ;;  %6664 = vmatpush.bf16.msrb.mxu0 %v17935_v2  ;;  %v17992_v21 = vld [vmem:[#allocation309_spill] sm:$0xff]  ;;  %v17993_v2 = vld [vmem:[#allocation311_spill] sm:$0xff] }
 0x85c   : > { %6649 = vmatpush.bf16.msra.mxu3 %v17942_v17  ;;  %6677 = vmatpush.bf16.msrb.mxu1 %v17943_v43  ;;  %v18000_v17 = vld [vmem:[#allocation317_spill] sm:$0xff]  ;;  %v18001_v43 = vld [vmem:[#allocation319_spill] sm:$0xff] }
 0x85e   : > { %6637 = vmatpush.bf16.msra.mxu2 %v17938_v46  ;;  %6665 = vmatpush.bf16.msrb.mxu0 %v17939_v16  ;;  %v17996_v46 = vld [vmem:[#allocation313_spill] sm:$0xff]  ;;  %v17997_v16 = vld [vmem:[#allocation315_spill] sm:$0xff] }
 0x860   : > { %6650 = vmatpush.bf16.msra.mxu3 %v17946_v10  ;;  %6678 = vmatpush.bf16.msrb.mxu1 %v17947_v22  ;;  %v18004_v10 = vld [vmem:[#allocation332_spill] sm:$0xff]  ;;  %v18005_v22 = vld [vmem:[#allocation334_spill] sm:$0xff] }
 0x861   : > { %6638 = vmatmul.bf16.vlgmr.msra.gmra.mxu2 %v15481_v56  ;;  %6666 = vmatmul.bf16.vlgmr.msrb.gmra.mxu0 %v15481_v56 }
 0x862   : > { %6692 = vmatpush.bf16.msrb.mxu2 %v17940_v20  ;;  %6720 = vmatpush.bf16.msra.mxu0 %v17941_v28  ;;  %v17998_v20 = vld [vmem:[#allocation324_spill] sm:$0xff]  ;;  %v17999_v28 = vld [vmem:[#allocation326_spill] sm:$0xff] }
 0x864   : > { %6651 = vmatpush.bf16.msra.mxu3 %v17950_v55  ;;  %6679 = vmatpush.bf16.msrb.mxu1 %v17951_v52  ;;  %v18008_v55 = vld [vmem:[#allocation336_spill] sm:$0xff]  ;;  %v18009_v52 = vld [vmem:[#allocation338_spill] sm:$0xff] }
 0x866   : > { %6693 = vmatpush.bf16.msrb.mxu2 %v17944_v34  ;;  %6721 = vmatpush.bf16.msra.mxu0 %v17945_v37  ;;  %v18002_v34 = vld [vmem:[#allocation328_spill] sm:$0xff]  ;;  %v18003_v37 = vld [vmem:[#allocation330_spill] sm:$0xff] }
 0x867   : > { %6652 = vmatmul.bf16.vlgmr.msra.gmra.mxu3 %v15488_v27  ;;  %6680 = vmatmul.bf16.vlgmr.msrb.gmra.mxu1 %v15488_v27 }
 0x868   : > { %6706 = vmatpush.bf16.msrb.mxu3 %v17952_v61  ;;  %6734 = vmatpush.bf16.msra.mxu1 %v17953_v38  ;;  %v18010_v61 = vld [vmem:[#allocation325_spill] sm:$0xff]  ;;  %v18011_v38 = vld [vmem:[#allocation327_spill] sm:$0xff] }
 0x86a   : > { %6694 = vmatpush.bf16.msrb.mxu2 %v17948_v39  ;;  %6722 = vmatpush.bf16.msra.mxu0 %v17949_v0  ;;  %v18006_v39 = vld [vmem:[#allocation321_spill] sm:$0xff]  ;;  %v18007_v0 = vld [vmem:[#allocation323_spill] sm:$0xff] }
 0x86c   : > { %6707 = vmatpush.bf16.msrb.mxu3 %v17956_v33  ;;  %6735 = vmatpush.bf16.msra.mxu1 %v17957_v58  ;;  %v18014_v33 = vld [vmem:[#allocation329_spill] sm:$0xff]  ;;  %v18015_v58 = vld [vmem:[#allocation331_spill] sm:$0xff] }
 0x86e   : > { %6695 = vmatpush.bf16.msrb.mxu2 %v17954_v26  ;;  %6723 = vmatpush.bf16.msra.mxu0 %v17955_v63  ;;  %v18012_v26 = vld [vmem:[#allocation340_spill] sm:$0xff]  ;;  %v18013_v63 = vld [vmem:[#allocation342_spill] sm:$0xff] }
 0x870   : > { %6708 = vmatpush.bf16.msrb.mxu3 %v17960_v13  ;;  %6736 = vmatpush.bf16.msra.mxu1 %v17961_v24  ;;  %v18018_v13 = vld [vmem:[#allocation344_spill] sm:$0xff]  ;;  %v18019_v24 = vld [vmem:[#allocation346_spill] sm:$0xff] }
 0x872   : > { %6696 = vmatpush.bf16.msrb.mxu2 %v17958_v12  ;;  %6724 = vmatpush.bf16.msra.mxu0 %v17959_v60  ;;  %v18016_v12 = vld [vmem:[#allocation333_spill] sm:$0xff]  ;;  %v18017_v60 = vld [vmem:[#allocation335_spill] sm:$0xff] }
 0x874   : > { %6709 = vmatpush.bf16.msrb.mxu3 %v17964_v35  ;;  %6737 = vmatpush.bf16.msra.mxu1 %v17965_v11  ;;  %v18022_v35 = vld [vmem:[#allocation348_spill] sm:$0xff]  ;;  %v18023_v11 = vld [vmem:[#allocation350_spill] sm:$0xff] }
 0x876   : > { %6697 = vmatpush.bf16.msrb.mxu2 %v17962_v57  ;;  %6725 = vmatpush.bf16.msra.mxu0 %v17963_v6  ;;  %v18020_v57 = vld [vmem:[#allocation337_spill] sm:$0xff]  ;;  %v18021_v6 = vld [vmem:[#allocation339_spill] sm:$0xff] }
 0x878   : > { %6710 = vmatpush.bf16.msrb.mxu3 %v17968_v45  ;;  %6738 = vmatpush.bf16.msra.mxu1 %v17969_v3  ;;  %v18026_v45 = vld [vmem:[#allocation352_spill] sm:$0xff]  ;;  %v18027_v3 = vld [vmem:[#allocation354_spill] sm:$0xff] }
 0x87a   : > { %6698 = vmatpush.bf16.msrb.mxu2 %v17966_v30  ;;  %6726 = vmatpush.bf16.msra.mxu0 %v17967_v32  ;;  %v18024_v30 = vld [vmem:[#allocation341_spill] sm:$0xff]  ;;  %v18025_v32 = vld [vmem:[#allocation343_spill] sm:$0xff] }
 0x87c   : > { %6711 = vmatpush.bf16.msrb.mxu3 %v17974_v48  ;;  %6739 = vmatpush.bf16.msra.mxu1 %v17975_v4  ;;  %v18033_v48 = vld [vmem:[#allocation351_spill] sm:$0xff]  ;;  %v18034_v4 = vld [vmem:[#allocation360_spill] sm:$0xff] }
 0x87e   : > { %6699 = vmatpush.bf16.msrb.mxu2 %v17970_v8  ;;  %6727 = vmatpush.bf16.msra.mxu0 %v17971_v7  ;;  %v18028_v8 = vld [vmem:[#allocation345_spill] sm:$0xff]  ;;  %v18029_v7 = vld [vmem:[#allocation347_spill] sm:$0xff] }
 0x880   : > { %6712 = vmatpush.bf16.msrb.mxu3 %v17978_v1  ;;  %6740 = vmatpush.bf16.msra.mxu1 %v17979_v31  ;;  %v18037_v1 = vld [vmem:[#allocation366_spill] sm:$0xff]  ;;  %v18038_v31 = vld [vmem:[#allocation353_spill] sm:$0xff] }
 0x881   : > { %6700 = vmatmul.bf16.vlgmr.msrb.gmra.mxu2 %v6688_v25  ;;  %6728 = vmatmul.bf16.vlgmr.msra.gmra.mxu0 %v6688_v25 }
 0x882   : > { %6748 = vmatpush.bf16.msra.mxu2 %v17972_v54  ;;  %6790 = vmatpush.bf16.msrb.mxu0 %v17973_v53  ;;  %v18030_v54 = vld [vmem:[#allocation356_spill] sm:$0xff]  ;;  %v18031_v53 = vld [vmem:[#allocation358_spill] sm:$0xff] }
 0x884   : > { %6713 = vmatpush.bf16.msrb.mxu3 %v17982_v36  ;;  %6741 = vmatpush.bf16.msra.mxu1 %v17983_v14  ;;  %v18041_v36 = vld [vmem:[#allocation370_spill] sm:$0xff]  ;;  %v18042_v14 = vld [vmem:[#allocation357_spill] sm:$0xff] }
 0x886   : > { %6749 = vmatpush.bf16.msra.mxu2 %v17976_v44  ;;  %6791 = vmatpush.bf16.msrb.mxu0 %v17977_v41  ;;  %v18035_v44 = vld [vmem:[#allocation362_spill] sm:$0xff]  ;;  %v18036_v41 = vld [vmem:[#allocation364_spill] sm:$0xff] }
 0x887   : > { %6714 = vmatmul.bf16.vlgmr.msrb.gmra.mxu3 %v6689_v47  ;;  %6742 = vmatmul.bf16.vlgmr.msra.gmra.mxu1 %v6689_v47 }
 0x888   : > { %6762 = vmatpush.bf16.msra.mxu3 %v17984_v49  ;;  %6804 = vmatpush.bf16.msrb.mxu1 %v17985_v15  ;;  %v18043_v49 = vld [vmem:[#allocation359_spill] sm:$0xff] }
 0x88a   : > { %6750 = vmatpush.bf16.msra.mxu2 %v17980_v59  ;;  %6792 = vmatpush.bf16.msrb.mxu0 %v17981_v29  ;;  %v18039_v59 = vld [vmem:[#allocation355_spill] sm:$0xff]  ;;  %v18040_v29 = vld [vmem:[#allocation368_spill] sm:$0xff] }
 0x88c   : > { %6763 = vmatpush.bf16.msra.mxu3 %v17988_v40  ;;  %6805 = vmatpush.bf16.msrb.mxu1 %v17989_v19  ;;  %v18047_v40 = vld [vmem:[#allocation363_spill] sm:$0xff]  ;;  %v18048_v19 = vld [vmem:[#allocation365_spill] sm:$0xff] }
 0x88e   : > { %6751 = vmatpush.bf16.msra.mxu2 %v17986_v23  ;;  %6793 = vmatpush.bf16.msrb.mxu0 %v17987_v42  ;;  %v18045_v23 = vld [vmem:[#allocation374_spill] sm:$0xff]  ;;  %v18046_v42 = vld [vmem:[#allocation361_spill] sm:$0xff] }
 0x890   : > { %6764 = vmatpush.bf16.msra.mxu3 %v17992_v21  ;;  %6806 = vmatpush.bf16.msrb.mxu1 %v17993_v2  ;;  %v18051_v21 = vld [vmem:[#allocation378_spill] sm:$0xff]  ;;  %v18052_v2 = vld [vmem:[#allocation369_spill] sm:$0xff] }
 0x892   : > { %6752 = vmatpush.bf16.msra.mxu2 %v17990_v50  ;;  %6794 = vmatpush.bf16.msrb.mxu0 %v17991_v51  ;;  %v18050_v51 = vld [vmem:[#allocation376_spill] sm:$0xff] }
 0x894   : > { %6765 = vmatpush.bf16.msra.mxu3 %v17996_v46  ;;  %6807 = vmatpush.bf16.msrb.mxu1 %v17997_v16  ;;  %v18054_v16 = vld [vmem:[#allocation380_spill] sm:$0xff] }
 0x896   : > { %6753 = vmatpush.bf16.msra.mxu2 %v17994_v5  ;;  %6795 = vmatpush.bf16.msrb.mxu0 %v17995_v62  ;;  %v18053_v5 = vld [vmem:[#allocation371_spill] sm:$0xff] }
 0x898   : > { %6766 = vmatpush.bf16.msra.mxu3 %v18000_v17  ;;  %6808 = vmatpush.bf16.msrb.mxu1 %v18001_v43  ;;  %v18056_v17 = vld [vmem:[#allocation373_spill] sm:$0xff]  ;;  %v18057_v43 = vld [vmem:[#allocation375_spill] sm:$0xff] }
 0x89a   : > { %6754 = vmatpush.bf16.msra.mxu2 %v17998_v20  ;;  %6796 = vmatpush.bf16.msrb.mxu0 %v17999_v28  ;;  %v18055_v20 = vld [vmem:[#allocation382_spill] sm:$0xff] }
 0x89c   : > { %6767 = vmatpush.bf16.msra.mxu3 %v18006_v39  ;;  %6809 = vmatpush.bf16.msrb.mxu1 %v18007_v0 }
 0x89e   : > { %6755 = vmatpush.bf16.msra.mxu2 %v18002_v34  ;;  %6797 = vmatpush.bf16.msrb.mxu0 %v18003_v37  ;;  %v18058_v34 = vld [vmem:[#allocation384_spill] sm:$0xff]  ;;  %v18059_v37 = vld [vmem:[#allocation386_spill] sm:$0xff] }
 0x8a0   : > { %6768 = vmatpush.bf16.msra.mxu3 %v18010_v61  ;;  %6810 = vmatpush.bf16.msrb.mxu1 %v18011_v38  ;;  %v18062_v61 = vld [vmem:[#allocation388_spill] sm:$0xff]  ;;  %v18063_v38 = vld [vmem:[#allocation390_spill] sm:$0xff] }
 0x8a1   : > { %6756 = vmatmul.bf16.vlgmr.msra.gmra.mxu2 %v6688_v25  ;;  %6798 = vmatmul.bf16.vlgmr.msrb.gmra.mxu0 %v15486_v9  ;;  %v18032_v25 = vld [vmem:[#allocation349_spill] sm:$0xff] }
 0x8a2   : > { %6818 = vmatpush.bf16.msrb.mxu2 %v18004_v10  ;;  %6846 = vmatpush.bf16.msra.mxu0 %v18005_v22  ;;  %v18060_v10 = vld [vmem:[#allocation377_spill] sm:$0xff]  ;;  %v18061_v22 = vld [vmem:[#allocation379_spill] sm:$0xff] }
 0x8a4   : > { %6769 = vmatpush.bf16.msra.mxu3 %v18014_v33  ;;  %6811 = vmatpush.bf16.msrb.mxu1 %v18015_v58  ;;  %v18064_v33 = vld [vmem:[#allocation381_spill] sm:$0xff]  ;;  %v18065_v58 = vld [vmem:[#allocation383_spill] sm:$0xff] }
 0x8a6   : > { %6819 = vmatpush.bf16.msrb.mxu2 %v18008_v55  ;;  %6847 = vmatpush.bf16.msra.mxu0 %v18009_v52 }
 0x8a7   : > { %6770 = vmatmul.bf16.vlgmr.msra.gmra.mxu3 %v6689_v47  ;;  %6812 = vmatmul.bf16.vlgmr.msrb.gmra.mxu1 %v15496_v18  ;;  %v18044_v47 = vld [vmem:[#allocation372_spill] sm:$0xff] }
 0x8a8   : > { %6832 = vmatpush.bf16.msrb.mxu3 %v18016_v12  ;;  %6860 = vmatpush.bf16.msra.mxu1 %v18017_v60  ;;  %v18066_v60 = vld [vmem:[#allocation392_spill] sm:$0xff] }
 0x8aa   : > { %6820 = vmatpush.bf16.msrb.mxu2 %v18012_v26  ;;  %6848 = vmatpush.bf16.msra.mxu0 %v18013_v63 }
 0x8ac   : > { %6833 = vmatpush.bf16.msrb.mxu3 %v18020_v57  ;;  %6861 = vmatpush.bf16.msra.mxu1 %v18021_v6  ;;  %v18069_v57 = vld [vmem:[#allocation385_spill] sm:$0xff]  ;;  %v6880_v6 = vrot.slane %v15481_v56, 2 }
 0x8ad   : > { %v18075_v56 = vld [vmem:[#allocation393_spill] sm:$0xff] }
 0x8ae   : > { %6821 = vmatpush.bf16.msrb.mxu2 %v18018_v13  ;;  %6849 = vmatpush.bf16.msra.mxu0 %v18019_v24  ;;  %v18067_v13 = vld [vmem:[#allocation394_spill] sm:$0xff]  ;;  %v18068_v24 = vld [vmem:[#allocation396_spill] sm:$0xff] }
 0x8b0   : > { %6834 = vmatpush.bf16.msrb.mxu3 %v18024_v30  ;;  %6862 = vmatpush.bf16.msra.mxu1 %v18025_v32 }
 0x8b2   : > { %6822 = vmatpush.bf16.msrb.mxu2 %v18022_v35  ;;  %6850 = vmatpush.bf16.msra.mxu0 %v18023_v11  ;;  %v18070_v11 = vld [vmem:[#allocation387_spill] sm:$0xff] }
 0x8b4   : > { %6835 = vmatpush.bf16.msrb.mxu3 %v18028_v8  ;;  %6863 = vmatpush.bf16.msra.mxu1 %v18029_v7  ;;  %v18071_v7 = vld [vmem:[#allocation398_spill] sm:$0xff] }
 0x8b6   : > { %6823 = vmatpush.bf16.msrb.mxu2 %v18026_v45  ;;  %6851 = vmatpush.bf16.msra.mxu0 %v18027_v3 }
 0x8b8   : > { %6836 = vmatpush.bf16.msrb.mxu3 %v18032_v25  ;;  %6864 = vmatpush.bf16.msra.mxu1 %v18033_v48  ;;  %v18074_v48 = vld [vmem:[#allocation400_spill] sm:$0xff] }
 0x8ba   : > { %6824 = vmatpush.bf16.msrb.mxu2 %v18030_v54  ;;  %6852 = vmatpush.bf16.msra.mxu0 %v18031_v53  ;;  %v18072_v54 = vld [vmem:[#allocation389_spill] sm:$0xff]  ;;  %v18073_v53 = vld [vmem:[#allocation391_spill] sm:$0xff] }
 0x8bc   : > { %6837 = vmatpush.bf16.msrb.mxu3 %v18038_v31  ;;  %6865 = vmatpush.bf16.msra.mxu1 %v18039_v59  ;;  %v6881_v31 = vrot.slane %v15488_v27, 2  ;;  %v18083_v27 = vld [vmem:[#allocation403_spill] sm:$0xff] }
 0x8be   : > { %6825 = vmatpush.bf16.msrb.mxu2 %v18034_v4  ;;  %6853 = vmatpush.bf16.msra.mxu0 %v18035_v44  ;;  %v6555_v15 = vpop.f32.mrf.mxu0  ;;  %v18076_v44 = vld [vmem:[#allocation395_spill] sm:$0xff] }
 0x8c0   : > { %6838 = vmatpush.bf16.msrb.mxu3 %v18042_v14  ;;  %6866 = vmatpush.bf16.msra.mxu1 %v18043_v49  ;;  %v18079_v14 = vld [vmem:[#allocation399_spill] sm:$0xff] }
 0x8c1   : > { %6826 = vmatmul.bf16.vlgmr.msrb.gmra.mxu2 %v15486_v9  ;;  %6854 = vmatmul.bf16.vlgmr.msra.gmra.mxu0 %v15486_v9  ;;  %v18049_v9 = vld [vmem:[#allocation367_spill] sm:$0xff] }
 0x8c2   : > { %6884 = vmatpush.bf16.msra.mxu2 %v18036_v41  ;;  %6912 = vmatpush.bf16.msrb.mxu0 %v18037_v1  ;;  %v18077_v41 = vld [vmem:[#allocation397_spill] sm:$0xff] }
 0x8c4   : > { %6839 = vmatpush.bf16.msrb.mxu3 %v18046_v42  ;;  %6867 = vmatpush.bf16.msra.mxu1 %v18047_v40  ;;  %v6527_v50 = vpop.f32.mrf.mxu2  ;;  %v6569_v46 = vpop.f32.mrf.mxu1  ;;  %v18081_v42 = vld [vmem:[#allocation401_spill] sm:$0xff] }
 0x8c5   : > { %v6570_v28 = vadd.f32 %v6569_v46, %v6555_v15  ;;  %v18087_v46 = vld [vmem:[#allocation407_spill] sm:$0xff] }
 0x8c6   : > { %6885 = vmatpush.bf16.msra.mxu2 %v18040_v29  ;;  %6913 = vmatpush.bf16.msrb.mxu0 %v18041_v36  ;;  %v6557_v62 = vpop.f32.mrf.mxu0  ;;  %v18078_v36 = vld [vmem:[#allocation402_spill] sm:$0xff] }
 0x8c7   : > { %6840 = vmatmul.bf16.vlgmr.msrb.gmra.mxu3 %v15496_v18  ;;  %6868 = vmatmul.bf16.vlgmr.msra.gmra.mxu1 %v15496_v18 }
 0x8c8   : > { %6898 = vmatpush.bf16.msra.mxu3 %v18048_v19  ;;  %6926 = vmatpush.bf16.msrb.mxu1 %v18049_v9  ;;  %v18082_v19 = vld [vmem:[#allocation406_spill] sm:$0xff] }
 0x8ca   : > { %6886 = vmatpush.bf16.msra.mxu2 %v18044_v47  ;;  %6914 = vmatpush.bf16.msrb.mxu0 %v18045_v23  ;;  %v6541_v39 = vpop.f32.mrf.mxu3  ;;  %v18080_v47 = vld [vmem:[#allocation404_spill] sm:$0xff] }
 0x8cb   : > { %v6542_v55 = vadd.f32 %v6541_v39, %v6527_v50 }
 0x8cc   : > { %6899 = vmatpush.bf16.msra.mxu3 %v18052_v2  ;;  %6927 = vmatpush.bf16.msrb.mxu1 %v18053_v5  ;;  %v6529_v18 = vpop.f32.mrf.mxu2  ;;  %v6571_v52 = vpop.f32.mrf.mxu1 }
 0x8cd   : > { %v6572_v63 = vadd.f32 %v6571_v52, %v6557_v62  ;;  %v18086_v62 = vld [vmem:[#allocation410_spill] sm:$0xff] }
 0x8ce   : > { %6887 = vmatpush.bf16.msra.mxu2 %v18050_v51  ;;  %6915 = vmatpush.bf16.msrb.mxu0 %v18051_v21  ;;  %v6611_v0 = vpop.f32.mrf.mxu0  ;;  %v18084_v51 = vld [vmem:[#allocation408_spill] sm:$0xff]  ;;  %v18085_v21 = vld [vmem:[#allocation405_spill] sm:$0xff] }
 0x8cf   : > { %v6612_v26 = vadd.f32 %v6611_v0, %v6542_v55 }
 0x8d0   : > { %6900 = vmatpush.bf16.msra.mxu3 %v18056_v17  ;;  %6928 = vmatpush.bf16.msrb.mxu1 %v18057_v43  ;;  %v18089_v17 = vld [vmem:[#allocation411_spill] sm:$0xff] }
 0x8d2   : > { %6888 = vmatpush.bf16.msra.mxu2 %v18054_v16  ;;  %6916 = vmatpush.bf16.msrb.mxu0 %v18055_v20  ;;  %v6543_v35 = vpop.f32.mrf.mxu3  ;;  %v18088_v16 = vld [vmem:[#allocation409_spill] sm:$0xff] }
 0x8d3   : > { %v6544_v30 = vadd.f32 %v6543_v35, %v6529_v18 }
 0x8d4   : > { %6901 = vmatpush.bf16.msra.mxu3 %v18060_v10  ;;  %6929 = vmatpush.bf16.msrb.mxu1 %v18061_v22  ;;  %v6583_v12 = vpop.f32.mrf.mxu2  ;;  %v6625_v45 = vpop.f32.mrf.mxu1 }
 0x8d5   : > { %v15666_v8 = vadd.f32 %v6625_v45, %v6612_v26 }
 0x8d6   : > { %6889 = vmatpush.bf16.msra.mxu2 %v18058_v34  ;;  %6917 = vmatpush.bf16.msrb.mxu0 %v18059_v37  ;;  %v6613_v32 = vpop.f32.mrf.mxu0 }
 0x8d7   : > { %v6614_v3 = vadd.f32 %v6613_v32, %v6544_v30 }
 0x8d8   : > { %6902 = vmatpush.bf16.msra.mxu3 %v18064_v33  ;;  %6930 = vmatpush.bf16.msrb.mxu1 %v18065_v58 }
 0x8da   : > { %6890 = vmatpush.bf16.msra.mxu2 %v18062_v61  ;;  %6918 = vmatpush.bf16.msrb.mxu0 %v18063_v38  ;;  %v6597_v4 = vpop.f32.mrf.mxu3 }
 0x8db   : > { %v15675_v1 = vadd.f32 %v6597_v4, %v6583_v12 }
 0x8dc   : > { %6903 = vmatpush.bf16.msra.mxu3 %v18069_v57  ;;  %6931 = vmatpush.bf16.msrb.mxu1 %v18070_v11  ;;  %v6585_v25 = vpop.f32.mrf.mxu2  ;;  %v6627_v59 = vpop.f32.mrf.mxu1 }
 0x8dd   : > { %v15678_v29 = vadd.f32 %v6627_v59, %v6614_v3  ;;  %v10147_v59 = vld [vmem:[%s15872_s3 + $0x1b0] sm:$0xff] }
 0x8de   : > { %6891 = vmatpush.bf16.msra.mxu2 %v18066_v60  ;;  %6919 = vmatpush.bf16.msrb.mxu0 %v18067_v13  ;;  %v15694_v43 = vpop.f32.mrf.mxu0 }
 0x8e0   : > { %6904 = vmatpush.bf16.msra.mxu3 %v18072_v54  ;;  %6932 = vmatpush.bf16.msrb.mxu1 %v18073_v53  ;;  %v10148_v53 = vld [vmem:[%s15872_s3 + $0x1b8] sm:$0xff] }
 0x8e1   : > { %6892 = vmatmul.bf16.vlgmr.msra.gmra.mxu2 %v6880_v6  ;;  %6920 = vmatmul.bf16.vlgmr.msrb.gmra.mxu0 %v6880_v6 }
 0x8e2   : > { %6940 = vmatpush.bf16.msrb.mxu2 %v18068_v24  ;;  %v6599_v23 = vpop.f32.mrf.mxu3  ;;  %7075 = vmatpush.bf16.msra.mxu0 %v10148_v53 }
 0x8e3   : > { %v15684_v40 = vadd.f32 %v6599_v23, %v6585_v25  ;;  %v10156_v25 = vld [vmem:[%s15872_s3 + $0x1f8] sm:$0xff] }
 0x8e4   : > { %6905 = vmatpush.bf16.msra.mxu3 %v18075_v56  ;;  %6933 = vmatpush.bf16.msrb.mxu1 %v18076_v44  ;;  %v6639_v49 = vpop.f32.mrf.mxu2  ;;  %v15696_v18 = vpop.f32.mrf.mxu1 }
 0x8e5   : > { %v6640_v15 = vadd.f32 %v6639_v49, %v6570_v28 }
 0x8e6   : > { %6941 = vmatpush.bf16.msrb.mxu2 %v18071_v7  ;;  %v15698_v34 = vpop.f32.mrf.mxu0  ;;  %7076 = vmatpush.bf16.msra.mxu0 %v10147_v59 }
 0x8e7   : > { %6906 = vmatmul.bf16.vlgmr.msra.gmra.mxu3 %v6881_v31  ;;  %6934 = vmatmul.bf16.vlgmr.msrb.gmra.mxu1 %v6881_v31 }
 0x8e8   : > { %6954 = vmatpush.bf16.msrb.mxu3 %v18077_v41  ;;  %7178 = vmatpush.bf16.msra.mxu1 %v10156_v25  ;;  %v10144_v25 = vld [vmem:[%s15872_s3 + $0x198] sm:$0xff] }
 0x8ea   : > { %6942 = vmatpush.bf16.msrb.mxu2 %v18074_v48  ;;  %v6653_v2 = vpop.f32.mrf.mxu3 }
 0x8eb   : > { %v6654_v5 = vadd.f32 %v6653_v2, %v6640_v15 }
 0x8ec   : > { %6955 = vmatpush.bf16.msrb.mxu3 %v18079_v14  ;;  %v6641_v9 = vpop.f32.mrf.mxu2  ;;  %v15700_v37 = vpop.f32.mrf.mxu1 }
 0x8ed   : > { %v6642_v50 = vadd.f32 %v6641_v9, %v6572_v63 }
 0x8ee   : > { %6943 = vmatpush.bf16.msrb.mxu2 %v18078_v36  ;;  %v10155_v36 = vld [vmem:[%s15872_s3 + $0x1f0] sm:$0xff] }
 0x8ef   : > { %7179 = vmatpush.bf16.msra.mxu1 %v10155_v36 }
 0x8f0   : > { %6956 = vmatpush.bf16.msrb.mxu3 %v18081_v42 }
 0x8f2   : > { %6944 = vmatpush.bf16.msrb.mxu2 %v18080_v47  ;;  %v6655_v20 = vpop.f32.mrf.mxu3 }
 0x8f3   : > { %v6656_v28 = vadd.f32 %v6655_v20, %v6642_v50  ;;  %v10146_v50 = vld [vmem:[%s15872_s3 + $0x1a8] sm:$0xff] }
 0x8f4   : > { %6957 = vmatpush.bf16.msrb.mxu3 %v18083_v27  ;;  %7077 = vmatpush.bf16.msra.mxu0 %v10146_v50  ;;  %v10143_v50 = vld [vmem:[%s15872_s3 + $0x190] sm:$0xff] }
 0x8f6   : > { %6945 = vmatpush.bf16.msrb.mxu2 %v18082_v19  ;;  %v18090_v19 = vld [vmem:[#allocation10_spill] sm:$0xff] }
 0x8f8   : > { %6958 = vmatpush.bf16.msrb.mxu3 %v18085_v21 }
 0x8fa   : > { %6946 = vmatpush.bf16.msrb.mxu2 %v18084_v51  ;;  %v10154_v51 = vld [vmem:[%s15872_s3 + $0x1e8] sm:$0xff] }
 0x8fb   : > { %7180 = vmatpush.bf16.msra.mxu1 %v10154_v51  ;;  %v10151_v51 = vld [vmem:[%s15872_s3 + $0x1d0] sm:$0xff] }
 0x8fc   : > { %6959 = vmatpush.bf16.msrb.mxu3 %v18087_v46 }
 0x8fe   : > { %6947 = vmatpush.bf16.msrb.mxu2 %v18086_v62  ;;  %v6729_v10 = vpop.f32.mrf.mxu0 }
 0x900   : > { %6960 = vmatpush.bf16.msrb.mxu3 %v18088_v16 }
 0x901   : > { %6948 = vmatmul.bf16.vlgmr.msrb.gmra.mxu2 %v6880_v6 }
 0x904   : > { %6961 = vmatpush.bf16.msrb.mxu3 %v18089_v17  ;;  %v6743_v22 = vpop.f32.mrf.mxu1  ;;  %v6701_v39 = vpop.f32.mrf.mxu2 }
 0x905   : > { %v6744_v45 = vadd.f32 %v6743_v22, %v6729_v10 }
 0x906   : > { %v6731_v55 = vpop.f32.mrf.mxu0 }
 0x907   : > { %6962 = vmatmul.bf16.vlgmr.msrb.gmra.mxu3 %v6881_v31  ;;  %v6777_v56 = vadd.f32 %v6744_v45, %v6654_v5 }
 0x90a   : > { %v6715_v0 = vpop.f32.mrf.mxu3 }
 0x90b   : > { %v6716_v4 = vadd.f32 %v6715_v0, %v6701_v39 }
 0x90c   : > { %v6745_v52 = vpop.f32.mrf.mxu1  ;;  %v6703_v61 = vpop.f32.mrf.mxu2 }
 0x90d   : > { %v6746_v49 = vadd.f32 %v6745_v52, %v6731_v55  ;;  %v6776_v47 = vadd.f32 %v6716_v4, %v15666_v8  ;;  %v10164_v8 = vld [vmem:[%s15872_s3 + $0x238] sm:$0xff]  ;;  %v10153_v52 = vld [vmem:[%s15872_s3 + $0x1e0] sm:$0xff] }
 0x90e   : > { %7287 = vmatpush.bf16.msra.mxu2 %v10164_v8  ;;  %7181 = vmatpush.bf16.msra.mxu1 %v10153_v52 }
 0x90f   : > { %v6780_v5 = vadd.f32 %v6746_v49, %v6656_v28  ;;  %v10145_v28 = vld [vmem:[%s15872_s3 + $0x1a0] sm:$0xff]  ;;  %v10162_v49 = vld [vmem:[%s15872_s3 + $0x228] sm:$0xff] }
 0x910   : > { %7078 = vmatpush.bf16.msra.mxu0 %v10145_v28 }
 0x912   : > { %v6717_v38 = vpop.f32.mrf.mxu3 }
 0x913   : > { %v6718_v62 = vadd.f32 %v6717_v38, %v6703_v61 }
 0x914   : > { %7079 = vmatpush.bf16.msra.mxu0 %v10144_v25 }
 0x918   : > { %7080 = vmatpush.bf16.msra.mxu0 %v10143_v50 }
 0x91e   : > { %v6799_v26 = vpop.f32.mrf.mxu0 }
 0x924   : > { %v6813_v63 = vpop.f32.mrf.mxu1  ;;  %v15702_v33 = vpop.f32.mrf.mxu2 }
 0x925   : > { %v6814_v14 = vadd.f32 %v6813_v63, %v6799_v26  ;;  %v18091_v26 = vld [vmem:[#allocation9_spill] sm:$0xff] }
 0x926   : > { %v6801_v12 = vpop.f32.mrf.mxu0 }
 0x927   : > { %v6874_v21 = vadd.f32 %v6814_v14, %v6776_v47 }
 0x92a   : > { %v15704_v58 = vpop.f32.mrf.mxu3 }
 0x92c   : > { %v6815_v60 = vpop.f32.mrf.mxu1  ;;  %v15706_v13 = vpop.f32.mrf.mxu2 }
 0x92d   : > { %v6816_v16 = vadd.f32 %v6815_v60, %v6801_v12  ;;  %v6779_v12 = vadd.f32 %v6718_v62, %v15678_v29  ;;  %v10152_v29 = vld [vmem:[%s15872_s3 + $0x1d8] sm:$0xff] }
 0x92e   : > { %7182 = vmatpush.bf16.msra.mxu1 %v10152_v29 }
 0x932   : > { %v15708_v24 = vpop.f32.mrf.mxu3  ;;  %7183 = vmatpush.bf16.msra.mxu1 %v10151_v51  ;;  %v18092_v51 = vld [vmem:[#allocation412_spill] sm:$0xff] }
 0x93e   : > { %v15710_v57 = vpop.f32.mrf.mxu0 }
 0x944   : > { %v15712_v6 = vpop.f32.mrf.mxu1  ;;  %v6827_v35 = vpop.f32.mrf.mxu2 }
 0x946   : > { %v15714_v30 = vpop.f32.mrf.mxu0 }
 0x94a   : > { %v6841_v11 = vpop.f32.mrf.mxu3 }
 0x94b   : > { %v6842_v7 = vadd.f32 %v6841_v11, %v6827_v35  ;;  %v10163_v35 = vld [vmem:[%s15872_s3 + $0x230] sm:$0xff] }
 0x94c   : > { %v15716_v32 = vpop.f32.mrf.mxu1  ;;  %v6829_v3 = vpop.f32.mrf.mxu2  ;;  %7288 = vmatpush.bf16.msra.mxu2 %v10163_v35 }
 0x94d   : > { %v6875_v41 = vadd.f32 %v6842_v7, %v6777_v56  ;;  %v6877_v7 = vadd.f32 %v6816_v16, %v6779_v12  ;;  %v6872_v50 = vadd.f32 %v15716_v32, %v15714_v30 }
 0x950   : > { %7289 = vmatpush.bf16.msra.mxu2 %v10162_v49 }
 0x952   : > { %v6843_v54 = vpop.f32.mrf.mxu3 }
 0x953   : > { %v6844_v42 = vadd.f32 %v6843_v54, %v6829_v3 }
 0x955   : > { %v6878_v22 = vadd.f32 %v6844_v42, %v6780_v5 }
 0x95e   : > { %v6921_v48 = vpop.f32.mrf.mxu0 }
 0x964   : > { %v6935_v44 = vpop.f32.mrf.mxu1  ;;  %v6893_v23 = vpop.f32.mrf.mxu2 }
 0x965   : > { %v6936_v31 = vadd.f32 %v6935_v44, %v6921_v48 }
 0x966   : > { %v6923_v20 = vpop.f32.mrf.mxu0 }
 0x967   : > { %v6969_v15 = vadd.f32 %v6936_v31, %v6875_v41 }
 0x969   : > { %v6975_v27 = vadd.f32 %v6969_v15, %v18090_v19 }
 0x96a   : > { %v6907_v9 = vpop.f32.mrf.mxu3 }
 0x96b   : > { %v6908_v2 = vadd.f32 %v6907_v9, %v6893_v23  ;;  %v6981_v46 = vmax.f32 %v6975_v27, 0.0 }
 0x96c   : > { %v6937_v10 = vpop.f32.mrf.mxu1  ;;  %v6895_v4 = vpop.f32.mrf.mxu2 }
 0x96d   : > { %v6968_v17 = vadd.f32 %v6908_v2, %v6874_v21  ;;  %v6993_v39 = vsel %vm4037_vm0, %v6981_v46, -inf  ;;  %v7096_v0 = vsel %vm4140_vm1, %v6981_v46, -inf  ;;  %v6938_v55 = vadd.f32 %v6937_v10, %v6923_v20 }
 0x96e   : > { %v6994_v61 = vrot.slane %v6993_v39, 4  ;;  %v7097_v38 = vrot.slane %v7096_v0, 4  ;;  %v7201_v23 = vsel %vm4244_vm2, %v6981_v46, -inf  ;;  %v10161_v46 = vld [vmem:[%s15872_s3 + $0x220] sm:$0xff] }
 0x96f   : > { %v6974_v63 = vadd.f32 %v6968_v17, %v18091_v26  ;;  %v6972_v60 = vadd.f32 %v6938_v55, %v6878_v22  ;;  %7290 = vmatpush.bf16.msra.mxu2 %v10161_v46 }
 0x970   : > { %v6995_v11 = vmax.f32 %v6993_v39, %v6994_v61  ;;  %v7098_v45 = vmax.f32 %v7096_v0, %v7097_v38  ;;  %v10142_v39 = vld [vmem:[%s15872_s3 + $0x188] sm:$0xff] }
 0x971   : > { %v6980_v3 = vmax.f32 %v6974_v63, 0.0  ;;  %v6978_v54 = vadd.f32 %v6972_v60, %v18090_v19  ;;  %v10150_v0 = vld [vmem:[%s15872_s3 + $0x1c8] sm:$0xff]  ;;  %7081 = vmatpush.bf16.msra.mxu0 %v10142_v39 }
 0x972   : > { %v6909_v53 = vpop.f32.mrf.mxu3  ;;  %v6996_v48 = vrot.slane %v6995_v11, 2  ;;  %v7099_v56 = vrot.slane %v7098_v45, 2  ;;  %7184 = vmatpush.bf16.msra.mxu1 %v10150_v0 }
 0x973   : > { %v6986_v44 = vsel %vm4037_vm0, %v6980_v3, -inf  ;;  %v7089_v41 = vsel %vm4140_vm1, %v6980_v3, -inf  ;;  %v6984_v36 = vmax.f32 %v6978_v54, 0.0  ;;  %v6910_v14 = vadd.f32 %v6909_v53, %v6895_v4  ;;  %v10159_v53 = vld [vmem:[%s15872_s3 + $0x210] sm:$0xff] }
 0x974   : > { %v6987_v31 = vrot.slane %v6986_v44, 4  ;;  %v7090_v59 = vrot.slane %v7089_v41, 4  ;;  %v6997_v15 = vmax.f32 %v6995_v11, %v6996_v48  ;;  %v7100_v47 = vmax.f32 %v7098_v45, %v7099_v56 }
 0x975   : > { %v7202_v27 = vsel %vm4246_vm3, %v6984_v36, -inf  ;;  %v6971_v9 = vadd.f32 %v6910_v14, %v6877_v7  ;;  %v7192_v61 = vsel %vm4244_vm2, %v6980_v3, -inf  ;;  %v10141_v3 = vld [vmem:[%s15872_s3 + $0x180] sm:$0xff]  ;;  %v6668_v4 = vadd.f32 %v15694_v43, %v15675_v1  ;;  %v10158_v36 = vld [vmem:[%s15872_s3 + $0x208] sm:$0xff] }
 0x976   : > { %v6988_v42 = vmax.f32 %v6986_v44, %v6987_v31  ;;  %v7091_v19 = vmax.f32 %v7089_v41, %v7090_v59  ;;  %v7203_v21 = vmax.f32 %v7201_v23, %v7202_v27  ;;  %v6998_v8 = vrot.slane %v6997_v15, 1  ;;  %v10149_v7 = vld [vmem:[%s15872_s3 + $0x1c0] sm:$0xff]  ;;  %7082 = vmatpush.bf16.msra.mxu0 %v10141_v3 }
 0x977   : > { %v6977_v62 = vadd.f32 %v6971_v9, %v18091_v26  ;;  %v7101_v20 = vrot.slane %v7100_v47, 1  ;;  %v10160_v26 = vld [vmem:[%s15872_s3 + $0x218] sm:$0xff]  ;;  %7185 = vmatpush.bf16.msra.mxu1 %v10149_v7  ;;  %v6772_v44 = vadd.f32 %v15704_v58, %v15702_v33  ;;  %v6682_v31 = vadd.f32 %v15696_v18, %v6668_v4  ;;  %v10157_v1 = vld [vmem:[%s15872_s3 + $0x200] sm:$0xff] }
 0x978   : > { %v6989_v2 = vrot.slane %v6988_v42, 2  ;;  %v7092_v5 = vrot.slane %v7091_v19, 2  ;;  %v7204_v16 = vrot.slane %v7203_v21, 4  ;;  %v15789_v60 = vmax.f32 %v6997_v15, %v6998_v8  ;;  %7291 = vmatpush.bf16.msra.mxu2 %v10160_v26 }
 0x979   : > { %v6983_v22 = vmax.f32 %v6977_v62, 0.0  ;;  %v15791_v35 = vmax.f32 %v7100_v47, %v7101_v20  ;;  %v6870_v59 = vadd.f32 %v15712_v6, %v15710_v57  ;;  %v6778_v47 = vadd.f32 %v6772_v44, %v6682_v31 }
 0x97a   : > { %v6990_v17 = vmax.f32 %v6988_v42, %v6989_v2  ;;  %v7093_v10 = vmax.f32 %v7091_v19, %v7092_v5  ;;  %v7205_v55 = vmax.f32 %v7203_v21, %v7204_v16  ;;  %v6670_v57 = vadd.f32 %v15698_v34, %v15684_v40 }
 0x97b   : > { %v7193_v38 = vsel %vm4246_vm3, %v6983_v22, -inf  ;;  %v6876_v58 = vadd.f32 %v6870_v59, %v6778_v47  ;;  %v6774_v6 = vadd.f32 %v15708_v24, %v15706_v13 }
 0x97c   : > { %v6991_v28 = vrot.slane %v6990_v17, 1  ;;  %v7094_v52 = vrot.slane %v7093_v10, 1  ;;  %v7206_v63 = vrot.slane %v7205_v55, 2  ;;  %v7194_v12 = vmax.f32 %v7192_v61, %v7193_v38  ;;  %7292 = vmatpush.bf16.msra.mxu2 %v10159_v53 }
 0x97d   : > { %v6684_v9 = vadd.f32 %v15700_v37, %v6670_v57 }
 0x97e   : > { %v15793_v11 = vmax.f32 %v6990_v17, %v6991_v28  ;;  %v15795_v45 = vmax.f32 %v7093_v10, %v7094_v52  ;;  %v7195_v54 = vrot.slane %v7194_v12, 4  ;;  %v7207_v48 = vmax.f32 %v7205_v55, %v7206_v63 }
 0x97f   : > { %v6781_v2 = vadd.f32 %v6774_v6, %v6684_v9 }
 0x980   : > { %v7007_v25 = vmax.f32 %v15793_v11, %v15789_v60  ;;  %v7110_v29 = vmax.f32 %v15795_v45, %v15791_v35  ;;  %v7196_v56 = vmax.f32 %v7194_v12, %v7195_v54  ;;  %v7208_v14 = vrot.slane %v7207_v48, 1  ;;  %7293 = vmatpush.bf16.msra.mxu2 %v10158_v36 }
 0x981   : > { %v6879_v8 = vadd.f32 %v6872_v50, %v6781_v2 }
 0x982   : > { %v7197_v41 = vrot.slane %v7196_v56, 2  ;;  %v7209_v23 = vmax.f32 %v7207_v48, %v7208_v14 }
 0x984   : > { %v7198_v49 = vmax.f32 %v7196_v56, %v7197_v41  ;;  %v6949_v15 = vpop.f32.mrf.mxu2  ;;  %7294 = vmatpush.bf16.msra.mxu2 %v10157_v1 }
 0x986   : > { %v7199_v43 = vrot.slane %v7198_v49, 1 }
 0x988   : > { %v7200_v42 = vmax.f32 %v7198_v49, %v7199_v43 }
 0x98a   : > { %v6963_v33 = vpop.f32.mrf.mxu3  ;;  %v7219_v27 = vmax.f32 %v7200_v42, %v7209_v23 }
 0x98b   : > { %v6964_v18 = vadd.f32 %v6963_v33, %v6949_v15 }
 0x98c   : > { %v6951_v62 = vpop.f32.mrf.mxu2 }
 0x98d   : > { %v6970_v19 = vadd.f32 %v6964_v18, %v6876_v58 }
 0x98f   : > { %v6976_v21 = vadd.f32 %v6970_v19, %v18092_v51 }
 0x991   : > { %v6982_v5 = vmax.f32 %v6976_v21, 0.0 }
 0x992   : > { %v6965_v46 = vpop.f32.mrf.mxu3 }
 0x993   : > { %v7000_v40 = vsel %vm4037_vm0, %v6982_v5, -inf  ;;  %v7103_v34 = vsel %vm4140_vm1, %v6982_v5, -inf  ;;  %v6966_v13 = vadd.f32 %v6965_v46, %v6951_v62  ;;  %v7210_v55 = vsel %vm4244_vm2, %v6982_v5, -inf }
 0x994   : > { %v7001_v24 = vrot.slane %v7000_v40, 4  ;;  %v7104_v16 = vrot.slane %v7103_v34, 4 }
 0x995   : > { %v6973_v20 = vadd.f32 %v6966_v13, %v6879_v8 }
 0x996   : > { %v7002_v17 = vmax.f32 %v7000_v40, %v7001_v24  ;;  %v7105_v37 = vmax.f32 %v7103_v34, %v7104_v16 }
 0x997   : > { %v6979_v10 = vadd.f32 %v6973_v20, %v18092_v51 }
 0x998   : > { %v7003_v30 = vrot.slane %v7002_v17, 2  ;;  %v7106_v32 = vrot.slane %v7105_v37, 2 }
 0x999   : > { %v6985_v22 = vmax.f32 %v6979_v10, 0.0 }
 0x99a   : > { %v7004_v39 = vmax.f32 %v7002_v17, %v7003_v30  ;;  %v7107_v0 = vmax.f32 %v7105_v37, %v7106_v32 }
 0x99b   : > { %v7211_v28 = vsel %vm4246_vm3, %v6985_v22, -inf }
 0x99c   : > { %v7005_v52 = vrot.slane %v7004_v39, 1  ;;  %v7108_v61 = vrot.slane %v7107_v0, 1  ;;  %v7212_v38 = vmax.f32 %v7210_v55, %v7211_v28 }
 0x99e   : > { %v7213_v26 = vrot.slane %v7212_v38, 4  ;;  %v7006_v63 = vmax.f32 %v7004_v39, %v7005_v52  ;;  %v7109_v12 = vmax.f32 %v7107_v0, %v7108_v61 }
 0x9a0   : > { %v7214_v60 = vmax.f32 %v7212_v38, %v7213_v26  ;;  %v7008_v35 = vmax.f32 %v7007_v25, %v7006_v63  ;;  %v7111_v11 = vmax.f32 %v7110_v29, %v7109_v12  ;;  %v18093_v25 = vld [vmem:[#allocation226_spill] sm:$0xff] }
 0x9a2   : > { %v7215_v45 = vrot.slane %v7214_v60, 2  ;;  %v7009_v3 = vpack.c.bf16 %v7008_v35, %v7008_v35  ;;  %v7112_v7 = vpack.c.bf16 %v7111_v11, %v7111_v11 }
 0x9a4   : > { %v7216_v54 = vmax.f32 %v7214_v60, %v7215_v45  ;;  %7083 = vmatmul.bf16.vlgmr.msra.gmra.mxu0 %v7009_v3  ;;  %7186 = vmatmul.bf16.vlgmr.msra.gmra.mxu1 %v7112_v7 }
 0x9a6   : > { %v7217_v53 = vrot.slane %v7216_v54, 1 }
 0x9a8   : > { %v7218_v48 = vmax.f32 %v7216_v54, %v7217_v53 }
 0x9aa   : > { %v7220_v56 = vmax.f32 %v7219_v27, %v7218_v48 }
 0x9ac   : > { %v7221_v4 = vpack.c.bf16 %v7220_v56, %v7220_v56 }
 0x9ae   : > { %7295 = vmatmul.bf16.vlgmr.msra.gmra.mxu2 %v7221_v4 }
 0xa21   : > { %v7084_v44 = vpop.f32.mrf.mxu0  ;;  %v7187_v41 = vpop.f32.mrf.mxu1 }
 0xa22   : > { %v7088_v29 = vadd.f32 %v7084_v44, %v18093_v25 }
 0xa24   : > { %v7191_v36 = vadd.f32 %v7187_v41, %v7088_v29 }
 0xa29   : > { %v7086_v31 = vpop.f32.mrf.mxu0  ;;  %v7189_v59 = vpop.f32.mrf.mxu1 }
 0xa31   : > { %v7296_v14 = vpop.f32.mrf.mxu2 }
 0xa32   : > { %v7300_v49 = vadd.f32 %v7296_v14, %v7191_v36 }
 0xa34   : > { %7301 = vst [vmem:[%s287_s16] sm:$0x1] %v7300_v49 }
 0xa35   : > { %10275 = shalt.err (!%p10272_p8)
}
 0xa36   : > { %10170 = dma.vmem_to_hbm [thread:$0]  (%p10397_p5), %s7314_s17, 16, %s7316_s18, %s7303_s19  }
 0xa39   : > { %v7298_v15 = vpop.f32.mrf.mxu2 }
 0xa3a PF: > { %p10182_p9 = scmp.ge.s32.totalorder %s10314_s27, 2  ;;  %s7327_s9 = sand.u32 1, %s10302_s24  }
 0xa3b   : > { %s7328_s13 = scalar_lea.sflag [#allocation4], %s7327_s9 }
 0xa3c   : > { %p10177_p10 = pnand %p10182_p9, %p10401_p6 }
 0xa3e   : > { %p10178_p11 = pneg %p10177_p10 }
 0xa40   : > { %10297 = dma.done.wait (%p10178_p11), %s7328_s13, 16  }
 0xa41   : > { %10299 = vsyncadd (%p10178_p11), %s7328_s13, 4294967280  ;;  %p18_p12 = scmp.ge.s32.totalorder %s10384_s30, 4   ;;  %s18094_s24 = smov %s10306_s25 }
 0xa42   : > { %s18095_s25 = smov %s10310_s26  ;;  %s18096_s26 = smov %s10395_s10 }
 0xa43   : > { %s18097_s27 = smov %s10384_s30  ;;  %20 = sbr.rel (!%p18_p12) target bundleno = 4 (0x4), region = 109 }
 0xa48   :  { %7333 = vsyncpa [#allocation3], 1 }
 0xa49   :  { %7335 = vsyncpa [#allocation3 + $0x1], 1 }
 0xa4a   :  { %7336 = vsyncpa [#allocation4], 1 }
 0xa4b   :  { %7338 = vsyncpa [#allocation4 + $0x1], 1 }

</bundles_post_ra>
